<compile_context>
chip_gen: v5e
topology: v5e:2x2
jax: 0.10.0
libtpu: 0.0.40
codegen_flags: <defaults>
</compile_context>

<pallas_src>
import jax
import jax.numpy as jnp
import numpy as np
from jax.experimental import pallas as pl
from jax.experimental.pallas import tpu as pltpu

BATCH = 2
ENC_IN = 4
SEQ_LEN = 1035            # enc_in * seq_len = 4140
KERNEL_SIZE = 2
NUM_FILTERS = 2
LABEL_LEN = 8
DENSE_IN = 4130           # hard-coded in the reference module: nn.Linear(4130, 128)

NUM_STAGES = 5
FLAT_LEN = ENC_IN * SEQ_LEN                 # 4140
NUM_STREAMS0 = 1 << NUM_STAGES              # 32 depth-5 input streams
STREAM0_WIDTH = -(-FLAT_LEN // NUM_STREAMS0)  # 130 (padded stream length)


# --------------------------- static bookkeeping -------------------------------
def _stream_len(n, nstreams, r):
    """#{ i in [0, n) : i % nstreams == r }"""
    if r >= n:
        return 0
    return (n - 1 - r) // nstreams + 1


def _conv_plan(flat_len=FLAT_LEN, num_stages=NUM_STAGES):
    """Scratch-buffer widths per stage + final per-filter pooled length."""
    widths = []
    n = flat_len
    p = None
    for s in range(num_stages):
        assert n % 2 == 0, "conv chain assumes an even length at every stage"
        p = n // 2 - 1                      # per-filter pooled length
        nout = 1 << (num_stages - 1 - s)    # output streams per filter
        if s < num_stages - 1:
            lens = []
            for r in range(nout):
                r2 = (r - p) % nout
                lens.append(_stream_len(p, nout, r) + _stream_len(p, nout, r2))
            widths.append(max(lens))
        n = 2 * p
    return widths, p


_BUF_WIDTHS, P_FINAL = _conv_plan()         # [259, 517, 1034, 2066], 2065
assert 2 * P_FINAL == DENSE_IN


# --------------------------- fused Pallas kernel ------------------------------
def _fused_forward_kernel(conv_w_ref, conv_b_ref, streams_ref,
                          w1a_hbm, w1b_hbm,
                          b1_ref, w2_ref, b2_ref, w3_ref, b3_ref,
                          w4_ref, b4_ref, w5_ref, b5_ref,
                          out_ref,
                          buf1, buf2, buf3, buf4,
                          w1a_vmem, w1b_vmem, dma_sem):
    # Kick off the dense1 weight DMA (HBM -> VMEM); it overlaps the conv chain.
    cp_a = pltpu.make_async_copy(w1a_hbm, w1a_vmem, dma_sem.at[0])
    cp_b = pltpu.make_async_copy(w1b_hbm, w1b_vmem, dma_sem.at[1])
    cp_a.start()
    cp_b.start()

    stage_src = [streams_ref, buf1, buf2, buf3, buf4]
    in_lens = [_stream_len(FLAT_LEN, NUM_STREAMS0, q) for q in range(NUM_STREAMS0)]

    n = FLAT_LEN
    p0 = p1 = None
    for s in range(NUM_STAGES):
        p = n // 2 - 1                      # pooled length per filter this stage
        nin = 1 << (NUM_STAGES - s)         # input streams  (u[q::nin])
        nout = nin // 2                     # output streams per filter
        src = stage_src[s]

        w00 = conv_w_ref[4 * s + 0]         # filter 0, tap 0
        w01 = conv_w_ref[4 * s + 1]         # filter 0, tap 1
        w10 = conv_w_ref[4 * s + 2]         # filter 1, tap 0
        w11 = conv_w_ref[4 * s + 3]         # filter 1, tap 1
        cb0 = conv_b_ref[2 * s + 0]
        cb1 = conv_b_ref[2 * s + 1]

        d0 = [None] * nout
        d1 = [None] * nout
        lens = [None] * nout
        for r in range(nout):
            lr = _stream_len(p, nout, r)
            lens[r] = lr
            assert lr <= in_lens[2 * r] and lr <= in_lens[2 * r + 1]
            a = src[2 * r, :, 0:lr]                     # u[nin*t + 2r]
            c = src[2 * r + 1, :, 0:lr]                 # u[nin*t + 2r + 1]
            if 2 * r + 2 < nin:
                assert lr <= in_lens[2 * r + 2]
                a2 = src[2 * r + 2, :, 0:lr]            # u[nin*t + 2r + 2]
            else:
                assert lr + 1 <= in_lens[0]
                a2 = src[0, :, 1:lr + 1]                # wrap: u[nin*(t+1)]
            # conv (k=2) at even/odd positions, max-pool(2,2); bias added after
            # the max (max commutes with a per-filter constant).
            d0[r] = jnp.maximum(w00 * a + w01 * c, w00 * c + w01 * a2) + cb0
            d1[r] = jnp.maximum(w10 * a + w11 * c, w10 * c + w11 * a2) + cb1

        if s < NUM_STAGES - 1:
            # Assemble next stage's input streams: u'[r::nout] = [d0[r] | d1[r']]
            dst = stage_src[s + 1]
            new_lens = [None] * nout
            for r in range(nout):
                r2 = (r - p) % nout
                l0, l1 = lens[r], lens[r2]
                assert l0 + l1 <= dst.shape[2]
                dst[r, :, 0:l0] = d0[r]
                dst[r, :, l0:l0 + l1] = d1[r2]
                new_lens[r] = l0 + l1
            in_lens = new_lens
        else:
            # depth-0 output: the flattened conv result is exactly [p0 | p1]
            p0, p1 = d0[0], d1[0]            # each (B, P_FINAL)
        n = 2 * p

    # --------------- MLP: dense1..dense4 (ReLU) + output layer ---------------
    cp_a.wait()
    cp_b.wait()
    h = (jnp.dot(p0, w1a_vmem[...], preferred_element_type=jnp.float32)
         + jnp.dot(p1, w1b_vmem[...], preferred_element_type=jnp.float32)
         + b1_ref[...])
    h = jnp.maximum(h, 0.0)
    for w_r, b_r in ((w2_ref, b2_ref), (w3_ref, b3_ref), (w4_ref, b4_ref)):
        h = jnp.dot(h, w_r[...], preferred_element_type=jnp.float32) + b_r[...]
        h = jnp.maximum(h, 0.0)
    out_ref[...] = jnp.dot(h, w5_ref[...], preferred_element_type=jnp.float32) + b5_ref[...]


# --------------------------- wrapper ------------------------------------------
def model_forward(inputs, _x, y, _y, conv_params, dense_params):
    """Pallas version of Model.forward (only `inputs` is used, as in the reference)."""
    del _x, y, _y
    B = inputs.shape[0]
    u = inputs.reshape(B, -1)                              # == inputs.view(B, 1, -1)
    assert u.shape[1] == FLAT_LEN
    # TODO(synk): the conv1..conv5 chain in the reference forward is dead code
    # (its result is immediately overwritten by the conv12.. chain), so it is skipped.

    # One-time host-side layout plumbing: depth-5 de-interleave, stream q = u[q::32].
    pad = NUM_STREAMS0 * STREAM0_WIDTH - FLAT_LEN
    u_pad = jnp.pad(u, ((0, 0), (0, pad)))
    streams = u_pad.reshape(B, STREAM0_WIDTH, NUM_STREAMS0).transpose(2, 0, 1)

    conv_w = jnp.stack([w for w, _ in conv_params]).reshape(-1)   # (5*2*2,) SMEM scalars
    conv_b = jnp.stack([b for _, b in conv_params]).reshape(-1)   # (5*2,)

    (w1, b1), (w2, b2), (w3, b3), (w4, b4), (w5, b5) = dense_params
    w1a, w1b = w1[:P_FINAL], w1[P_FINAL:]                  # rows for filter-0 / filter-1 block

    kernel = pl.pallas_call(
        _fused_forward_kernel,
        out_shape=jax.ShapeDtypeStruct((B, LABEL_LEN), jnp.float32),
        in_specs=[
            pl.BlockSpec(memory_space=pltpu.MemorySpace.SMEM),   # conv weights (20,)
            pl.BlockSpec(memory_space=pltpu.MemorySpace.SMEM),   # conv biases  (10,)
            pl.BlockSpec(memory_space=pltpu.MemorySpace.VMEM),   # input streams (32,B,130)
            pl.BlockSpec(memory_space=pl.ANY),                    # dense1 weight rows [:2065] (HBM)
            pl.BlockSpec(memory_space=pl.ANY),                    # dense1 weight rows [2065:] (HBM)
        ] + [pl.BlockSpec(memory_space=pltpu.MemorySpace.VMEM)] * 9,
        out_specs=pl.BlockSpec(memory_space=pltpu.MemorySpace.VMEM),
        scratch_shapes=[
            pltpu.VMEM((1 << (NUM_STAGES - 1 - i), B, _BUF_WIDTHS[i]), jnp.float32)
            for i in range(NUM_STAGES - 1)
        ] + [
            pltpu.VMEM((P_FINAL, 128), jnp.float32),              # dense1 W (top half)
            pltpu.VMEM((DENSE_IN - P_FINAL, 128), jnp.float32),   # dense1 W (bottom half)
            pltpu.SemaphoreType.DMA((2,)),
        ],
    )
    out = kernel(conv_w, conv_b, streams, w1a, w1b,
                 b1.reshape(1, -1), w2, b2.reshape(1, -1),
                 w3, b3.reshape(1, -1), w4, b4.reshape(1, -1),
                 w5, b5.reshape(1, -1))
    return out.reshape(B, 1, LABEL_LEN)                   # matches torch (B, 1, label_len)


# --------------------------- pure-JAX reference ------------------------------
def reference_forward(inputs, conv_params, dense_params):
    B = inputs.shape[0]
    u = inputs.reshape(B, -1)
    for w, bias in conv_params:
        L = u.shape[1]
        Lc = L - KERNEL_SIZE + 1
        Lp = Lc // 2
        y = (w[:, 0][None, :, None] * u[:, None, :Lc]
             + w[:, 1][None, :, None] * u[:, None, 1:Lc + 1]
             + bias[None, :, None])                                   # (B, F, Lc)
        p = jnp.max(y[:, :, :2 * Lp].reshape(B, -1, Lp, 2), axis=-1)  # (B, F, Lp)
        u = p.reshape(B, -1)
    x = u
    for i, (w, b) in enumerate(dense_params):
        x = x @ w + b
        if i < len(dense_params) - 1:
            x = jnp.maximum(x, 0.0)
    return x.reshape(B, 1, LABEL_LEN)


# --------------------------- main ---------------------------------------------
if __name__ == "__main__":
    key = jax.random.PRNGKey(0)
    ks = jax.random.split(key, 32)
    ki = iter(ks)

    def uinit(shape, fan_in):
        bound = 1.0 / np.sqrt(fan_in)
        return jax.random.uniform(next(ki), shape, jnp.float32, -bound, bound)

    # conv12/22/32/42/52 layers: weight (F, 1, K) stored as (F, K), bias (F,)
    conv_params = []
    for _ in range(5):
        w = uinit((NUM_FILTERS, KERNEL_SIZE), KERNEL_SIZE)
        b = uinit((NUM_FILTERS,), KERNEL_SIZE)
        conv_params.append((w, b))

    # dense1..dense4 + output_layer: torch (out, in) weights pre-transposed to (in, out)
    dense_dims = [(DENSE_IN, 128), (128, 64), (64, 32), (32, 16), (16, LABEL_LEN)]
    dense_params = []
    for din, dout in dense_dims:
        w = uinit((din, dout), din)
        b = uinit((dout,), din)
        dense_params.append((w, b))

    inputs = jax.random.normal(next(ki), (BATCH, SEQ_LEN, ENC_IN), jnp.float32)
    _x = jnp.zeros((BATCH, SEQ_LEN, ENC_IN), jnp.float32)
    yy = jnp.zeros((BATCH, LABEL_LEN, ENC_IN), jnp.float32)
    _y = jnp.zeros((BATCH, LABEL_LEN, ENC_IN), jnp.float32)

    fwd = jax.jit(model_forward)
    out = jax.block_until_ready(fwd(inputs, _x, yy, _y, conv_params, dense_params))

    ref = reference_forward(inputs, conv_params, dense_params)
    assert out.shape == (BATCH, 1, LABEL_LEN), out.shape
    if not np.allclose(np.asarray(out), np.asarray(ref), rtol=1e-2, atol=1e-2):
        raise AssertionError("Pallas output mismatch vs JAX reference")
    print("KERNEL_OK")
</pallas_src>

<mosaic_0001>
module attributes {stable_mosaic.version = 11 : i64} {
  func.func @_fused_forward_kernel(%arg0: memref<20xf32, #tpu.memory_space<smem>>, %arg1: memref<10xf32, #tpu.memory_space<smem>>, %arg2: memref<32x2x130xf32, #tpu.memory_space<vmem>>, %arg3: memref<2065x128xf32, #tpu.memory_space<any>>, %arg4: memref<2065x128xf32, #tpu.memory_space<any>>, %arg5: memref<1x128xf32, #tpu.memory_space<vmem>>, %arg6: memref<128x64xf32, #tpu.memory_space<vmem>>, %arg7: memref<1x64xf32, #tpu.memory_space<vmem>>, %arg8: memref<64x32xf32, #tpu.memory_space<vmem>>, %arg9: memref<1x32xf32, #tpu.memory_space<vmem>>, %arg10: memref<32x16xf32, #tpu.memory_space<vmem>>, %arg11: memref<1x16xf32, #tpu.memory_space<vmem>>, %arg12: memref<16x8xf32, #tpu.memory_space<vmem>>, %arg13: memref<1x8xf32, #tpu.memory_space<vmem>>, %arg14: memref<2x8xf32, #tpu.memory_space<vmem>>, %arg15: memref<16x2x259xf32, #tpu.memory_space<vmem>>, %arg16: memref<8x2x517xf32, #tpu.memory_space<vmem>>, %arg17: memref<4x2x1034xf32, #tpu.memory_space<vmem>>, %arg18: memref<2x2x2066xf32, #tpu.memory_space<vmem>>, %arg19: memref<2065x128xf32, #tpu.memory_space<vmem>>, %arg20: memref<2065x128xf32, #tpu.memory_space<vmem>>, %arg21: memref<2x!tpu.dma_semaphore, #tpu.memory_space<semaphore_mem>>) attributes {dimension_semantics = [], scalar_prefetch = 0 : i64, scratch_operands = 7 : i64, tpu.core_type = #tpu.core_type<tc>} {
    %c0_i32 = arith.constant 0 : i32
    %0 = tpu.memref_slice %arg21[%c0_i32] : memref<2x!tpu.dma_semaphore, #tpu.memory_space<semaphore_mem>> -> memref<1x!tpu.dma_semaphore, #tpu.memory_space<semaphore_mem>>
    %1 = tpu.memref_squeeze %0 : memref<1x!tpu.dma_semaphore, #tpu.memory_space<semaphore_mem>> -> memref<!tpu.dma_semaphore, #tpu.memory_space<semaphore_mem>>
    tpu.enqueue_dma source(%arg3 : memref<2065x128xf32, #tpu.memory_space<any>>) target(%arg19 : memref<2065x128xf32, #tpu.memory_space<vmem>>) target_semaphore(%1 : memref<!tpu.dma_semaphore, #tpu.memory_space<semaphore_mem>>)
    %c1_i32 = arith.constant 1 : i32
    %2 = tpu.memref_slice %arg21[%c1_i32] : memref<2x!tpu.dma_semaphore, #tpu.memory_space<semaphore_mem>> -> memref<1x!tpu.dma_semaphore, #tpu.memory_space<semaphore_mem>>
    %3 = tpu.memref_squeeze %2 : memref<1x!tpu.dma_semaphore, #tpu.memory_space<semaphore_mem>> -> memref<!tpu.dma_semaphore, #tpu.memory_space<semaphore_mem>>
    tpu.enqueue_dma source(%arg4 : memref<2065x128xf32, #tpu.memory_space<any>>) target(%arg20 : memref<2065x128xf32, #tpu.memory_space<vmem>>) target_semaphore(%3 : memref<!tpu.dma_semaphore, #tpu.memory_space<semaphore_mem>>)
    %c0 = arith.constant 0 : index
    %4 = memref.load %arg0[%c0] : memref<20xf32, #tpu.memory_space<smem>>
    %c1 = arith.constant 1 : index
    %5 = memref.load %arg0[%c1] : memref<20xf32, #tpu.memory_space<smem>>
    %c2 = arith.constant 2 : index
    %6 = memref.load %arg0[%c2] : memref<20xf32, #tpu.memory_space<smem>>
    %c3 = arith.constant 3 : index
    %7 = memref.load %arg0[%c3] : memref<20xf32, #tpu.memory_space<smem>>
    %c0_0 = arith.constant 0 : index
    %8 = memref.load %arg1[%c0_0] : memref<10xf32, #tpu.memory_space<smem>>
    %c1_1 = arith.constant 1 : index
    %9 = memref.load %arg1[%c1_1] : memref<10xf32, #tpu.memory_space<smem>>
    %c0_2 = arith.constant 0 : index
    %c0_3 = arith.constant 0 : index
    %c0_4 = arith.constant 0 : index
    %10 = vector.load %arg2[%c0_2, %c0_3, %c0_4] : memref<32x2x130xf32, #tpu.memory_space<vmem>>, vector<1x2x130xf32>
    %11 = vector.shape_cast %10 : vector<1x2x130xf32> to vector<2x130xf32>
    %c1_5 = arith.constant 1 : index
    %c0_6 = arith.constant 0 : index
    %c0_7 = arith.constant 0 : index
    %12 = vector.load %arg2[%c1_5, %c0_6, %c0_7] : memref<32x2x130xf32, #tpu.memory_space<vmem>>, vector<1x2x130xf32>
    %13 = vector.shape_cast %12 : vector<1x2x130xf32> to vector<2x130xf32>
    %c2_8 = arith.constant 2 : index
    %c0_9 = arith.constant 0 : index
    %c0_10 = arith.constant 0 : index
    %14 = vector.load %arg2[%c2_8, %c0_9, %c0_10] : memref<32x2x130xf32, #tpu.memory_space<vmem>>, vector<1x2x130xf32>
    %15 = vector.shape_cast %14 : vector<1x2x130xf32> to vector<2x130xf32>
    %16 = vector.broadcast %4 : f32 to vector<2x130xf32>
    %17 = arith.mulf %16, %11 : vector<2x130xf32>
    %18 = vector.broadcast %5 : f32 to vector<2x130xf32>
    %19 = arith.mulf %18, %13 : vector<2x130xf32>
    %20 = arith.addf %17, %19 : vector<2x130xf32>
    %21 = vector.broadcast %4 : f32 to vector<2x130xf32>
    %22 = arith.mulf %21, %13 : vector<2x130xf32>
    %23 = vector.broadcast %5 : f32 to vector<2x130xf32>
    %24 = arith.mulf %23, %15 : vector<2x130xf32>
    %25 = arith.addf %22, %24 : vector<2x130xf32>
    %26 = arith.maximumf %20, %25 : vector<2x130xf32>
    %27 = vector.broadcast %8 : f32 to vector<2x130xf32>
    %28 = arith.addf %26, %27 : vector<2x130xf32>
    %29 = vector.broadcast %6 : f32 to vector<2x130xf32>
    %30 = arith.mulf %29, %11 : vector<2x130xf32>
    %31 = vector.broadcast %7 : f32 to vector<2x130xf32>
    %32 = arith.mulf %31, %13 : vector<2x130xf32>
    %33 = arith.addf %30, %32 : vector<2x130xf32>
    %34 = vector.broadcast %6 : f32 to vector<2x130xf32>
    %35 = arith.mulf %34, %13 : vector<2x130xf32>
    %36 = vector.broadcast %7 : f32 to vector<2x130xf32>
    %37 = arith.mulf %36, %15 : vector<2x130xf32>
    %38 = arith.addf %35, %37 : vector<2x130xf32>
    %39 = arith.maximumf %33, %38 : vector<2x130xf32>
    %40 = vector.broadcast %9 : f32 to vector<2x130xf32>
    %41 = arith.addf %39, %40 : vector<2x130xf32>
    %c2_11 = arith.constant 2 : index
    %c0_12 = arith.constant 0 : index
    %c0_13 = arith.constant 0 : index
    %42 = vector.load %arg2[%c2_11, %c0_12, %c0_13] : memref<32x2x130xf32, #tpu.memory_space<vmem>>, vector<1x2x130xf32>
    %43 = vector.shape_cast %42 : vector<1x2x130xf32> to vector<2x130xf32>
    %c3_14 = arith.constant 3 : index
    %c0_15 = arith.constant 0 : index
    %c0_16 = arith.constant 0 : index
    %44 = vector.load %arg2[%c3_14, %c0_15, %c0_16] : memref<32x2x130xf32, #tpu.memory_space<vmem>>, vector<1x2x130xf32>
    %45 = vector.shape_cast %44 : vector<1x2x130xf32> to vector<2x130xf32>
    %c4 = arith.constant 4 : index
    %c0_17 = arith.constant 0 : index
    %c0_18 = arith.constant 0 : index
    %46 = vector.load %arg2[%c4, %c0_17, %c0_18] : memref<32x2x130xf32, #tpu.memory_space<vmem>>, vector<1x2x130xf32>
    %47 = vector.shape_cast %46 : vector<1x2x130xf32> to vector<2x130xf32>
    %48 = vector.broadcast %4 : f32 to vector<2x130xf32>
    %49 = arith.mulf %48, %43 : vector<2x130xf32>
    %50 = vector.broadcast %5 : f32 to vector<2x130xf32>
    %51 = arith.mulf %50, %45 : vector<2x130xf32>
    %52 = arith.addf %49, %51 : vector<2x130xf32>
    %53 = vector.broadcast %4 : f32 to vector<2x130xf32>
    %54 = arith.mulf %53, %45 : vector<2x130xf32>
    %55 = vector.broadcast %5 : f32 to vector<2x130xf32>
    %56 = arith.mulf %55, %47 : vector<2x130xf32>
    %57 = arith.addf %54, %56 : vector<2x130xf32>
    %58 = arith.maximumf %52, %57 : vector<2x130xf32>
    %59 = vector.broadcast %8 : f32 to vector<2x130xf32>
    %60 = arith.addf %58, %59 : vector<2x130xf32>
    %61 = vector.broadcast %6 : f32 to vector<2x130xf32>
    %62 = arith.mulf %61, %43 : vector<2x130xf32>
    %63 = vector.broadcast %7 : f32 to vector<2x130xf32>
    %64 = arith.mulf %63, %45 : vector<2x130xf32>
    %65 = arith.addf %62, %64 : vector<2x130xf32>
    %66 = vector.broadcast %6 : f32 to vector<2x130xf32>
    %67 = arith.mulf %66, %45 : vector<2x130xf32>
    %68 = vector.broadcast %7 : f32 to vector<2x130xf32>
    %69 = arith.mulf %68, %47 : vector<2x130xf32>
    %70 = arith.addf %67, %69 : vector<2x130xf32>
    %71 = arith.maximumf %65, %70 : vector<2x130xf32>
    %72 = vector.broadcast %9 : f32 to vector<2x130xf32>
    %73 = arith.addf %71, %72 : vector<2x130xf32>
    %c4_19 = arith.constant 4 : index
    %c0_20 = arith.constant 0 : index
    %c0_21 = arith.constant 0 : index
    %74 = vector.load %arg2[%c4_19, %c0_20, %c0_21] : memref<32x2x130xf32, #tpu.memory_space<vmem>>, vector<1x2x130xf32>
    %75 = vector.shape_cast %74 : vector<1x2x130xf32> to vector<2x130xf32>
    %c5 = arith.constant 5 : index
    %c0_22 = arith.constant 0 : index
    %c0_23 = arith.constant 0 : index
    %76 = vector.load %arg2[%c5, %c0_22, %c0_23] : memref<32x2x130xf32, #tpu.memory_space<vmem>>, vector<1x2x130xf32>
    %77 = vector.shape_cast %76 : vector<1x2x130xf32> to vector<2x130xf32>
    %c6 = arith.constant 6 : index
    %c0_24 = arith.constant 0 : index
    %c0_25 = arith.constant 0 : index
    %78 = vector.load %arg2[%c6, %c0_24, %c0_25] : memref<32x2x130xf32, #tpu.memory_space<vmem>>, vector<1x2x130xf32>
    %79 = vector.shape_cast %78 : vector<1x2x130xf32> to vector<2x130xf32>
    %80 = vector.broadcast %4 : f32 to vector<2x130xf32>
    %81 = arith.mulf %80, %75 : vector<2x130xf32>
    %82 = vector.broadcast %5 : f32 to vector<2x130xf32>
    %83 = arith.mulf %82, %77 : vector<2x130xf32>
    %84 = arith.addf %81, %83 : vector<2x130xf32>
    %85 = vector.broadcast %4 : f32 to vector<2x130xf32>
    %86 = arith.mulf %85, %77 : vector<2x130xf32>
    %87 = vector.broadcast %5 : f32 to vector<2x130xf32>
    %88 = arith.mulf %87, %79 : vector<2x130xf32>
    %89 = arith.addf %86, %88 : vector<2x130xf32>
    %90 = arith.maximumf %84, %89 : vector<2x130xf32>
    %91 = vector.broadcast %8 : f32 to vector<2x130xf32>
    %92 = arith.addf %90, %91 : vector<2x130xf32>
    %93 = vector.broadcast %6 : f32 to vector<2x130xf32>
    %94 = arith.mulf %93, %75 : vector<2x130xf32>
    %95 = vector.broadcast %7 : f32 to vector<2x130xf32>
    %96 = arith.mulf %95, %77 : vector<2x130xf32>
    %97 = arith.addf %94, %96 : vector<2x130xf32>
    %98 = vector.broadcast %6 : f32 to vector<2x130xf32>
    %99 = arith.mulf %98, %77 : vector<2x130xf32>
    %100 = vector.broadcast %7 : f32 to vector<2x130xf32>
    %101 = arith.mulf %100, %79 : vector<2x130xf32>
    %102 = arith.addf %99, %101 : vector<2x130xf32>
    %103 = arith.maximumf %97, %102 : vector<2x130xf32>
    %104 = vector.broadcast %9 : f32 to vector<2x130xf32>
    %105 = arith.addf %103, %104 : vector<2x130xf32>
    %c6_26 = arith.constant 6 : index
    %c0_27 = arith.constant 0 : index
    %c0_28 = arith.constant 0 : index
    %106 = vector.load %arg2[%c6_26, %c0_27, %c0_28] : memref<32x2x130xf32, #tpu.memory_space<vmem>>, vector<1x2x130xf32>
    %107 = vector.shape_cast %106 : vector<1x2x130xf32> to vector<2x130xf32>
    %c7 = arith.constant 7 : index
    %c0_29 = arith.constant 0 : index
    %c0_30 = arith.constant 0 : index
    %108 = vector.load %arg2[%c7, %c0_29, %c0_30] : memref<32x2x130xf32, #tpu.memory_space<vmem>>, vector<1x2x130xf32>
    %109 = vector.shape_cast %108 : vector<1x2x130xf32> to vector<2x130xf32>
    %c8 = arith.constant 8 : index
    %c0_31 = arith.constant 0 : index
    %c0_32 = arith.constant 0 : index
    %110 = vector.load %arg2[%c8, %c0_31, %c0_32] : memref<32x2x130xf32, #tpu.memory_space<vmem>>, vector<1x2x130xf32>
    %111 = vector.shape_cast %110 : vector<1x2x130xf32> to vector<2x130xf32>
    %112 = vector.broadcast %4 : f32 to vector<2x130xf32>
    %113 = arith.mulf %112, %107 : vector<2x130xf32>
    %114 = vector.broadcast %5 : f32 to vector<2x130xf32>
    %115 = arith.mulf %114, %109 : vector<2x130xf32>
    %116 = arith.addf %113, %115 : vector<2x130xf32>
    %117 = vector.broadcast %4 : f32 to vector<2x130xf32>
    %118 = arith.mulf %117, %109 : vector<2x130xf32>
    %119 = vector.broadcast %5 : f32 to vector<2x130xf32>
    %120 = arith.mulf %119, %111 : vector<2x130xf32>
    %121 = arith.addf %118, %120 : vector<2x130xf32>
    %122 = arith.maximumf %116, %121 : vector<2x130xf32>
    %123 = vector.broadcast %8 : f32 to vector<2x130xf32>
    %124 = arith.addf %122, %123 : vector<2x130xf32>
    %125 = vector.broadcast %6 : f32 to vector<2x130xf32>
    %126 = arith.mulf %125, %107 : vector<2x130xf32>
    %127 = vector.broadcast %7 : f32 to vector<2x130xf32>
    %128 = arith.mulf %127, %109 : vector<2x130xf32>
    %129 = arith.addf %126, %128 : vector<2x130xf32>
    %130 = vector.broadcast %6 : f32 to vector<2x130xf32>
    %131 = arith.mulf %130, %109 : vector<2x130xf32>
    %132 = vector.broadcast %7 : f32 to vector<2x130xf32>
    %133 = arith.mulf %132, %111 : vector<2x130xf32>
    %134 = arith.addf %131, %133 : vector<2x130xf32>
    %135 = arith.maximumf %129, %134 : vector<2x130xf32>
    %136 = vector.broadcast %9 : f32 to vector<2x130xf32>
    %137 = arith.addf %135, %136 : vector<2x130xf32>
    %c8_33 = arith.constant 8 : index
    %c0_34 = arith.constant 0 : index
    %c0_35 = arith.constant 0 : index
    %138 = vector.load %arg2[%c8_33, %c0_34, %c0_35] : memref<32x2x130xf32, #tpu.memory_space<vmem>>, vector<1x2x130xf32>
    %139 = vector.shape_cast %138 : vector<1x2x130xf32> to vector<2x130xf32>
    %c9 = arith.constant 9 : index
    %c0_36 = arith.constant 0 : index
    %c0_37 = arith.constant 0 : index
    %140 = vector.load %arg2[%c9, %c0_36, %c0_37] : memref<32x2x130xf32, #tpu.memory_space<vmem>>, vector<1x2x130xf32>
    %141 = vector.shape_cast %140 : vector<1x2x130xf32> to vector<2x130xf32>
    %c10 = arith.constant 10 : index
    %c0_38 = arith.constant 0 : index
    %c0_39 = arith.constant 0 : index
    %142 = vector.load %arg2[%c10, %c0_38, %c0_39] : memref<32x2x130xf32, #tpu.memory_space<vmem>>, vector<1x2x130xf32>
    %143 = vector.shape_cast %142 : vector<1x2x130xf32> to vector<2x130xf32>
    %144 = vector.broadcast %4 : f32 to vector<2x130xf32>
    %145 = arith.mulf %144, %139 : vector<2x130xf32>
    %146 = vector.broadcast %5 : f32 to vector<2x130xf32>
    %147 = arith.mulf %146, %141 : vector<2x130xf32>
    %148 = arith.addf %145, %147 : vector<2x130xf32>
    %149 = vector.broadcast %4 : f32 to vector<2x130xf32>
    %150 = arith.mulf %149, %141 : vector<2x130xf32>
    %151 = vector.broadcast %5 : f32 to vector<2x130xf32>
    %152 = arith.mulf %151, %143 : vector<2x130xf32>
    %153 = arith.addf %150, %152 : vector<2x130xf32>
    %154 = arith.maximumf %148, %153 : vector<2x130xf32>
    %155 = vector.broadcast %8 : f32 to vector<2x130xf32>
    %156 = arith.addf %154, %155 : vector<2x130xf32>
    %157 = vector.broadcast %6 : f32 to vector<2x130xf32>
    %158 = arith.mulf %157, %139 : vector<2x130xf32>
    %159 = vector.broadcast %7 : f32 to vector<2x130xf32>
    %160 = arith.mulf %159, %141 : vector<2x130xf32>
    %161 = arith.addf %158, %160 : vector<2x130xf32>
    %162 = vector.broadcast %6 : f32 to vector<2x130xf32>
    %163 = arith.mulf %162, %141 : vector<2x130xf32>
    %164 = vector.broadcast %7 : f32 to vector<2x130xf32>
    %165 = arith.mulf %164, %143 : vector<2x130xf32>
    %166 = arith.addf %163, %165 : vector<2x130xf32>
    %167 = arith.maximumf %161, %166 : vector<2x130xf32>
    %168 = vector.broadcast %9 : f32 to vector<2x130xf32>
    %169 = arith.addf %167, %168 : vector<2x130xf32>
    %c10_40 = arith.constant 10 : index
    %c0_41 = arith.constant 0 : index
    %c0_42 = arith.constant 0 : index
    %170 = vector.load %arg2[%c10_40, %c0_41, %c0_42] : memref<32x2x130xf32, #tpu.memory_space<vmem>>, vector<1x2x129xf32>
    %171 = vector.shape_cast %170 : vector<1x2x129xf32> to vector<2x129xf32>
    %c11 = arith.constant 11 : index
    %c0_43 = arith.constant 0 : index
    %c0_44 = arith.constant 0 : index
    %172 = vector.load %arg2[%c11, %c0_43, %c0_44] : memref<32x2x130xf32, #tpu.memory_space<vmem>>, vector<1x2x129xf32>
    %173 = vector.shape_cast %172 : vector<1x2x129xf32> to vector<2x129xf32>
    %c12 = arith.constant 12 : index
    %c0_45 = arith.constant 0 : index
    %c0_46 = arith.constant 0 : index
    %174 = vector.load %arg2[%c12, %c0_45, %c0_46] : memref<32x2x130xf32, #tpu.memory_space<vmem>>, vector<1x2x129xf32>
    %175 = vector.shape_cast %174 : vector<1x2x129xf32> to vector<2x129xf32>
    %176 = vector.broadcast %4 : f32 to vector<2x129xf32>
    %177 = arith.mulf %176, %171 : vector<2x129xf32>
    %178 = vector.broadcast %5 : f32 to vector<2x129xf32>
    %179 = arith.mulf %178, %173 : vector<2x129xf32>
    %180 = arith.addf %177, %179 : vector<2x129xf32>
    %181 = vector.broadcast %4 : f32 to vector<2x129xf32>
    %182 = arith.mulf %181, %173 : vector<2x129xf32>
    %183 = vector.broadcast %5 : f32 to vector<2x129xf32>
    %184 = arith.mulf %183, %175 : vector<2x129xf32>
    %185 = arith.addf %182, %184 : vector<2x129xf32>
    %186 = arith.maximumf %180, %185 : vector<2x129xf32>
    %187 = vector.broadcast %8 : f32 to vector<2x129xf32>
    %188 = arith.addf %186, %187 : vector<2x129xf32>
    %189 = vector.broadcast %6 : f32 to vector<2x129xf32>
    %190 = arith.mulf %189, %171 : vector<2x129xf32>
    %191 = vector.broadcast %7 : f32 to vector<2x129xf32>
    %192 = arith.mulf %191, %173 : vector<2x129xf32>
    %193 = arith.addf %190, %192 : vector<2x129xf32>
    %194 = vector.broadcast %6 : f32 to vector<2x129xf32>
    %195 = arith.mulf %194, %173 : vector<2x129xf32>
    %196 = vector.broadcast %7 : f32 to vector<2x129xf32>
    %197 = arith.mulf %196, %175 : vector<2x129xf32>
    %198 = arith.addf %195, %197 : vector<2x129xf32>
    %199 = arith.maximumf %193, %198 : vector<2x129xf32>
    %200 = vector.broadcast %9 : f32 to vector<2x129xf32>
    %201 = arith.addf %199, %200 : vector<2x129xf32>
    %c12_47 = arith.constant 12 : index
    %c0_48 = arith.constant 0 : index
    %c0_49 = arith.constant 0 : index
    %202 = vector.load %arg2[%c12_47, %c0_48, %c0_49] : memref<32x2x130xf32, #tpu.memory_space<vmem>>, vector<1x2x129xf32>
    %203 = vector.shape_cast %202 : vector<1x2x129xf32> to vector<2x129xf32>
    %c13 = arith.constant 13 : index
    %c0_50 = arith.constant 0 : index
    %c0_51 = arith.constant 0 : index
    %204 = vector.load %arg2[%c13, %c0_50, %c0_51] : memref<32x2x130xf32, #tpu.memory_space<vmem>>, vector<1x2x129xf32>
    %205 = vector.shape_cast %204 : vector<1x2x129xf32> to vector<2x129xf32>
    %c14 = arith.constant 14 : index
    %c0_52 = arith.constant 0 : index
    %c0_53 = arith.constant 0 : index
    %206 = vector.load %arg2[%c14, %c0_52, %c0_53] : memref<32x2x130xf32, #tpu.memory_space<vmem>>, vector<1x2x129xf32>
    %207 = vector.shape_cast %206 : vector<1x2x129xf32> to vector<2x129xf32>
    %208 = vector.broadcast %4 : f32 to vector<2x129xf32>
    %209 = arith.mulf %208, %203 : vector<2x129xf32>
    %210 = vector.broadcast %5 : f32 to vector<2x129xf32>
    %211 = arith.mulf %210, %205 : vector<2x129xf32>
    %212 = arith.addf %209, %211 : vector<2x129xf32>
    %213 = vector.broadcast %4 : f32 to vector<2x129xf32>
    %214 = arith.mulf %213, %205 : vector<2x129xf32>
    %215 = vector.broadcast %5 : f32 to vector<2x129xf32>
    %216 = arith.mulf %215, %207 : vector<2x129xf32>
    %217 = arith.addf %214, %216 : vector<2x129xf32>
    %218 = arith.maximumf %212, %217 : vector<2x129xf32>
    %219 = vector.broadcast %8 : f32 to vector<2x129xf32>
    %220 = arith.addf %218, %219 : vector<2x129xf32>
    %221 = vector.broadcast %6 : f32 to vector<2x129xf32>
    %222 = arith.mulf %221, %203 : vector<2x129xf32>
    %223 = vector.broadcast %7 : f32 to vector<2x129xf32>
    %224 = arith.mulf %223, %205 : vector<2x129xf32>
    %225 = arith.addf %222, %224 : vector<2x129xf32>
    %226 = vector.broadcast %6 : f32 to vector<2x129xf32>
    %227 = arith.mulf %226, %205 : vector<2x129xf32>
    %228 = vector.broadcast %7 : f32 to vector<2x129xf32>
    %229 = arith.mulf %228, %207 : vector<2x129xf32>
    %230 = arith.addf %227, %229 : vector<2x129xf32>
    %231 = arith.maximumf %225, %230 : vector<2x129xf32>
    %232 = vector.broadcast %9 : f32 to vector<2x129xf32>
    %233 = arith.addf %231, %232 : vector<2x129xf32>
    %c14_54 = arith.constant 14 : index
    %c0_55 = arith.constant 0 : index
    %c0_56 = arith.constant 0 : index
    %234 = vector.load %arg2[%c14_54, %c0_55, %c0_56] : memref<32x2x130xf32, #tpu.memory_space<vmem>>, vector<1x2x129xf32>
    %235 = vector.shape_cast %234 : vector<1x2x129xf32> to vector<2x129xf32>
    %c15 = arith.constant 15 : index
    %c0_57 = arith.constant 0 : index
    %c0_58 = arith.constant 0 : index
    %236 = vector.load %arg2[%c15, %c0_57, %c0_58] : memref<32x2x130xf32, #tpu.memory_space<vmem>>, vector<1x2x129xf32>
    %237 = vector.shape_cast %236 : vector<1x2x129xf32> to vector<2x129xf32>
    %c16 = arith.constant 16 : index
    %c0_59 = arith.constant 0 : index
    %c0_60 = arith.constant 0 : index
    %238 = vector.load %arg2[%c16, %c0_59, %c0_60] : memref<32x2x130xf32, #tpu.memory_space<vmem>>, vector<1x2x129xf32>
    %239 = vector.shape_cast %238 : vector<1x2x129xf32> to vector<2x129xf32>
    %240 = vector.broadcast %4 : f32 to vector<2x129xf32>
    %241 = arith.mulf %240, %235 : vector<2x129xf32>
    %242 = vector.broadcast %5 : f32 to vector<2x129xf32>
    %243 = arith.mulf %242, %237 : vector<2x129xf32>
    %244 = arith.addf %241, %243 : vector<2x129xf32>
    %245 = vector.broadcast %4 : f32 to vector<2x129xf32>
    %246 = arith.mulf %245, %237 : vector<2x129xf32>
    %247 = vector.broadcast %5 : f32 to vector<2x129xf32>
    %248 = arith.mulf %247, %239 : vector<2x129xf32>
    %249 = arith.addf %246, %248 : vector<2x129xf32>
    %250 = arith.maximumf %244, %249 : vector<2x129xf32>
    %251 = vector.broadcast %8 : f32 to vector<2x129xf32>
    %252 = arith.addf %250, %251 : vector<2x129xf32>
    %253 = vector.broadcast %6 : f32 to vector<2x129xf32>
    %254 = arith.mulf %253, %235 : vector<2x129xf32>
    %255 = vector.broadcast %7 : f32 to vector<2x129xf32>
    %256 = arith.mulf %255, %237 : vector<2x129xf32>
    %257 = arith.addf %254, %256 : vector<2x129xf32>
    %258 = vector.broadcast %6 : f32 to vector<2x129xf32>
    %259 = arith.mulf %258, %237 : vector<2x129xf32>
    %260 = vector.broadcast %7 : f32 to vector<2x129xf32>
    %261 = arith.mulf %260, %239 : vector<2x129xf32>
    %262 = arith.addf %259, %261 : vector<2x129xf32>
    %263 = arith.maximumf %257, %262 : vector<2x129xf32>
    %264 = vector.broadcast %9 : f32 to vector<2x129xf32>
    %265 = arith.addf %263, %264 : vector<2x129xf32>
    %c16_61 = arith.constant 16 : index
    %c0_62 = arith.constant 0 : index
    %c0_63 = arith.constant 0 : index
    %266 = vector.load %arg2[%c16_61, %c0_62, %c0_63] : memref<32x2x130xf32, #tpu.memory_space<vmem>>, vector<1x2x129xf32>
    %267 = vector.shape_cast %266 : vector<1x2x129xf32> to vector<2x129xf32>
    %c17 = arith.constant 17 : index
    %c0_64 = arith.constant 0 : index
    %c0_65 = arith.constant 0 : index
    %268 = vector.load %arg2[%c17, %c0_64, %c0_65] : memref<32x2x130xf32, #tpu.memory_space<vmem>>, vector<1x2x129xf32>
    %269 = vector.shape_cast %268 : vector<1x2x129xf32> to vector<2x129xf32>
    %c18 = arith.constant 18 : index
    %c0_66 = arith.constant 0 : index
    %c0_67 = arith.constant 0 : index
    %270 = vector.load %arg2[%c18, %c0_66, %c0_67] : memref<32x2x130xf32, #tpu.memory_space<vmem>>, vector<1x2x129xf32>
    %271 = vector.shape_cast %270 : vector<1x2x129xf32> to vector<2x129xf32>
    %272 = vector.broadcast %4 : f32 to vector<2x129xf32>
    %273 = arith.mulf %272, %267 : vector<2x129xf32>
    %274 = vector.broadcast %5 : f32 to vector<2x129xf32>
    %275 = arith.mulf %274, %269 : vector<2x129xf32>
    %276 = arith.addf %273, %275 : vector<2x129xf32>
    %277 = vector.broadcast %4 : f32 to vector<2x129xf32>
    %278 = arith.mulf %277, %269 : vector<2x129xf32>
    %279 = vector.broadcast %5 : f32 to vector<2x129xf32>
    %280 = arith.mulf %279, %271 : vector<2x129xf32>
    %281 = arith.addf %278, %280 : vector<2x129xf32>
    %282 = arith.maximumf %276, %281 : vector<2x129xf32>
    %283 = vector.broadcast %8 : f32 to vector<2x129xf32>
    %284 = arith.addf %282, %283 : vector<2x129xf32>
    %285 = vector.broadcast %6 : f32 to vector<2x129xf32>
    %286 = arith.mulf %285, %267 : vector<2x129xf32>
    %287 = vector.broadcast %7 : f32 to vector<2x129xf32>
    %288 = arith.mulf %287, %269 : vector<2x129xf32>
    %289 = arith.addf %286, %288 : vector<2x129xf32>
    %290 = vector.broadcast %6 : f32 to vector<2x129xf32>
    %291 = arith.mulf %290, %269 : vector<2x129xf32>
    %292 = vector.broadcast %7 : f32 to vector<2x129xf32>
    %293 = arith.mulf %292, %271 : vector<2x129xf32>
    %294 = arith.addf %291, %293 : vector<2x129xf32>
    %295 = arith.maximumf %289, %294 : vector<2x129xf32>
    %296 = vector.broadcast %9 : f32 to vector<2x129xf32>
    %297 = arith.addf %295, %296 : vector<2x129xf32>
    %c18_68 = arith.constant 18 : index
    %c0_69 = arith.constant 0 : index
    %c0_70 = arith.constant 0 : index
    %298 = vector.load %arg2[%c18_68, %c0_69, %c0_70] : memref<32x2x130xf32, #tpu.memory_space<vmem>>, vector<1x2x129xf32>
    %299 = vector.shape_cast %298 : vector<1x2x129xf32> to vector<2x129xf32>
    %c19 = arith.constant 19 : index
    %c0_71 = arith.constant 0 : index
    %c0_72 = arith.constant 0 : index
    %300 = vector.load %arg2[%c19, %c0_71, %c0_72] : memref<32x2x130xf32, #tpu.memory_space<vmem>>, vector<1x2x129xf32>
    %301 = vector.shape_cast %300 : vector<1x2x129xf32> to vector<2x129xf32>
    %c20 = arith.constant 20 : index
    %c0_73 = arith.constant 0 : index
    %c0_74 = arith.constant 0 : index
    %302 = vector.load %arg2[%c20, %c0_73, %c0_74] : memref<32x2x130xf32, #tpu.memory_space<vmem>>, vector<1x2x129xf32>
    %303 = vector.shape_cast %302 : vector<1x2x129xf32> to vector<2x129xf32>
    %304 = vector.broadcast %4 : f32 to vector<2x129xf32>
    %305 = arith.mulf %304, %299 : vector<2x129xf32>
    %306 = vector.broadcast %5 : f32 to vector<2x129xf32>
    %307 = arith.mulf %306, %301 : vector<2x129xf32>
    %308 = arith.addf %305, %307 : vector<2x129xf32>
    %309 = vector.broadcast %4 : f32 to vector<2x129xf32>
    %310 = arith.mulf %309, %301 : vector<2x129xf32>
    %311 = vector.broadcast %5 : f32 to vector<2x129xf32>
    %312 = arith.mulf %311, %303 : vector<2x129xf32>
    %313 = arith.addf %310, %312 : vector<2x129xf32>
    %314 = arith.maximumf %308, %313 : vector<2x129xf32>
    %315 = vector.broadcast %8 : f32 to vector<2x129xf32>
    %316 = arith.addf %314, %315 : vector<2x129xf32>
    %317 = vector.broadcast %6 : f32 to vector<2x129xf32>
    %318 = arith.mulf %317, %299 : vector<2x129xf32>
    %319 = vector.broadcast %7 : f32 to vector<2x129xf32>
    %320 = arith.mulf %319, %301 : vector<2x129xf32>
    %321 = arith.addf %318, %320 : vector<2x129xf32>
    %322 = vector.broadcast %6 : f32 to vector<2x129xf32>
    %323 = arith.mulf %322, %301 : vector<2x129xf32>
    %324 = vector.broadcast %7 : f32 to vector<2x129xf32>
    %325 = arith.mulf %324, %303 : vector<2x129xf32>
    %326 = arith.addf %323, %325 : vector<2x129xf32>
    %327 = arith.maximumf %321, %326 : vector<2x129xf32>
    %328 = vector.broadcast %9 : f32 to vector<2x129xf32>
    %329 = arith.addf %327, %328 : vector<2x129xf32>
    %c20_75 = arith.constant 20 : index
    %c0_76 = arith.constant 0 : index
    %c0_77 = arith.constant 0 : index
    %330 = vector.load %arg2[%c20_75, %c0_76, %c0_77] : memref<32x2x130xf32, #tpu.memory_space<vmem>>, vector<1x2x129xf32>
    %331 = vector.shape_cast %330 : vector<1x2x129xf32> to vector<2x129xf32>
    %c21 = arith.constant 21 : index
    %c0_78 = arith.constant 0 : index
    %c0_79 = arith.constant 0 : index
    %332 = vector.load %arg2[%c21, %c0_78, %c0_79] : memref<32x2x130xf32, #tpu.memory_space<vmem>>, vector<1x2x129xf32>
    %333 = vector.shape_cast %332 : vector<1x2x129xf32> to vector<2x129xf32>
    %c22 = arith.constant 22 : index
    %c0_80 = arith.constant 0 : index
    %c0_81 = arith.constant 0 : index
    %334 = vector.load %arg2[%c22, %c0_80, %c0_81] : memref<32x2x130xf32, #tpu.memory_space<vmem>>, vector<1x2x129xf32>
    %335 = vector.shape_cast %334 : vector<1x2x129xf32> to vector<2x129xf32>
    %336 = vector.broadcast %4 : f32 to vector<2x129xf32>
    %337 = arith.mulf %336, %331 : vector<2x129xf32>
    %338 = vector.broadcast %5 : f32 to vector<2x129xf32>
    %339 = arith.mulf %338, %333 : vector<2x129xf32>
    %340 = arith.addf %337, %339 : vector<2x129xf32>
    %341 = vector.broadcast %4 : f32 to vector<2x129xf32>
    %342 = arith.mulf %341, %333 : vector<2x129xf32>
    %343 = vector.broadcast %5 : f32 to vector<2x129xf32>
    %344 = arith.mulf %343, %335 : vector<2x129xf32>
    %345 = arith.addf %342, %344 : vector<2x129xf32>
    %346 = arith.maximumf %340, %345 : vector<2x129xf32>
    %347 = vector.broadcast %8 : f32 to vector<2x129xf32>
    %348 = arith.addf %346, %347 : vector<2x129xf32>
    %349 = vector.broadcast %6 : f32 to vector<2x129xf32>
    %350 = arith.mulf %349, %331 : vector<2x129xf32>
    %351 = vector.broadcast %7 : f32 to vector<2x129xf32>
    %352 = arith.mulf %351, %333 : vector<2x129xf32>
    %353 = arith.addf %350, %352 : vector<2x129xf32>
    %354 = vector.broadcast %6 : f32 to vector<2x129xf32>
    %355 = arith.mulf %354, %333 : vector<2x129xf32>
    %356 = vector.broadcast %7 : f32 to vector<2x129xf32>
    %357 = arith.mulf %356, %335 : vector<2x129xf32>
    %358 = arith.addf %355, %357 : vector<2x129xf32>
    %359 = arith.maximumf %353, %358 : vector<2x129xf32>
    %360 = vector.broadcast %9 : f32 to vector<2x129xf32>
    %361 = arith.addf %359, %360 : vector<2x129xf32>
    %c22_82 = arith.constant 22 : index
    %c0_83 = arith.constant 0 : index
    %c0_84 = arith.constant 0 : index
    %362 = vector.load %arg2[%c22_82, %c0_83, %c0_84] : memref<32x2x130xf32, #tpu.memory_space<vmem>>, vector<1x2x129xf32>
    %363 = vector.shape_cast %362 : vector<1x2x129xf32> to vector<2x129xf32>
    %c23 = arith.constant 23 : index
    %c0_85 = arith.constant 0 : index
    %c0_86 = arith.constant 0 : index
    %364 = vector.load %arg2[%c23, %c0_85, %c0_86] : memref<32x2x130xf32, #tpu.memory_space<vmem>>, vector<1x2x129xf32>
    %365 = vector.shape_cast %364 : vector<1x2x129xf32> to vector<2x129xf32>
    %c24 = arith.constant 24 : index
    %c0_87 = arith.constant 0 : index
    %c0_88 = arith.constant 0 : index
    %366 = vector.load %arg2[%c24, %c0_87, %c0_88] : memref<32x2x130xf32, #tpu.memory_space<vmem>>, vector<1x2x129xf32>
    %367 = vector.shape_cast %366 : vector<1x2x129xf32> to vector<2x129xf32>
    %368 = vector.broadcast %4 : f32 to vector<2x129xf32>
    %369 = arith.mulf %368, %363 : vector<2x129xf32>
    %370 = vector.broadcast %5 : f32 to vector<2x129xf32>
    %371 = arith.mulf %370, %365 : vector<2x129xf32>
    %372 = arith.addf %369, %371 : vector<2x129xf32>
    %373 = vector.broadcast %4 : f32 to vector<2x129xf32>
    %374 = arith.mulf %373, %365 : vector<2x129xf32>
    %375 = vector.broadcast %5 : f32 to vector<2x129xf32>
    %376 = arith.mulf %375, %367 : vector<2x129xf32>
    %377 = arith.addf %374, %376 : vector<2x129xf32>
    %378 = arith.maximumf %372, %377 : vector<2x129xf32>
    %379 = vector.broadcast %8 : f32 to vector<2x129xf32>
    %380 = arith.addf %378, %379 : vector<2x129xf32>
    %381 = vector.broadcast %6 : f32 to vector<2x129xf32>
    %382 = arith.mulf %381, %363 : vector<2x129xf32>
    %383 = vector.broadcast %7 : f32 to vector<2x129xf32>
    %384 = arith.mulf %383, %365 : vector<2x129xf32>
    %385 = arith.addf %382, %384 : vector<2x129xf32>
    %386 = vector.broadcast %6 : f32 to vector<2x129xf32>
    %387 = arith.mulf %386, %365 : vector<2x129xf32>
    %388 = vector.broadcast %7 : f32 to vector<2x129xf32>
    %389 = arith.mulf %388, %367 : vector<2x129xf32>
    %390 = arith.addf %387, %389 : vector<2x129xf32>
    %391 = arith.maximumf %385, %390 : vector<2x129xf32>
    %392 = vector.broadcast %9 : f32 to vector<2x129xf32>
    %393 = arith.addf %391, %392 : vector<2x129xf32>
    %c24_89 = arith.constant 24 : index
    %c0_90 = arith.constant 0 : index
    %c0_91 = arith.constant 0 : index
    %394 = vector.load %arg2[%c24_89, %c0_90, %c0_91] : memref<32x2x130xf32, #tpu.memory_space<vmem>>, vector<1x2x129xf32>
    %395 = vector.shape_cast %394 : vector<1x2x129xf32> to vector<2x129xf32>
    %c25 = arith.constant 25 : index
    %c0_92 = arith.constant 0 : index
    %c0_93 = arith.constant 0 : index
    %396 = vector.load %arg2[%c25, %c0_92, %c0_93] : memref<32x2x130xf32, #tpu.memory_space<vmem>>, vector<1x2x129xf32>
    %397 = vector.shape_cast %396 : vector<1x2x129xf32> to vector<2x129xf32>
    %c26 = arith.constant 26 : index
    %c0_94 = arith.constant 0 : index
    %c0_95 = arith.constant 0 : index
    %398 = vector.load %arg2[%c26, %c0_94, %c0_95] : memref<32x2x130xf32, #tpu.memory_space<vmem>>, vector<1x2x129xf32>
    %399 = vector.shape_cast %398 : vector<1x2x129xf32> to vector<2x129xf32>
    %400 = vector.broadcast %4 : f32 to vector<2x129xf32>
    %401 = arith.mulf %400, %395 : vector<2x129xf32>
    %402 = vector.broadcast %5 : f32 to vector<2x129xf32>
    %403 = arith.mulf %402, %397 : vector<2x129xf32>
    %404 = arith.addf %401, %403 : vector<2x129xf32>
    %405 = vector.broadcast %4 : f32 to vector<2x129xf32>
    %406 = arith.mulf %405, %397 : vector<2x129xf32>
    %407 = vector.broadcast %5 : f32 to vector<2x129xf32>
    %408 = arith.mulf %407, %399 : vector<2x129xf32>
    %409 = arith.addf %406, %408 : vector<2x129xf32>
    %410 = arith.maximumf %404, %409 : vector<2x129xf32>
    %411 = vector.broadcast %8 : f32 to vector<2x129xf32>
    %412 = arith.addf %410, %411 : vector<2x129xf32>
    %413 = vector.broadcast %6 : f32 to vector<2x129xf32>
    %414 = arith.mulf %413, %395 : vector<2x129xf32>
    %415 = vector.broadcast %7 : f32 to vector<2x129xf32>
    %416 = arith.mulf %415, %397 : vector<2x129xf32>
    %417 = arith.addf %414, %416 : vector<2x129xf32>
    %418 = vector.broadcast %6 : f32 to vector<2x129xf32>
    %419 = arith.mulf %418, %397 : vector<2x129xf32>
    %420 = vector.broadcast %7 : f32 to vector<2x129xf32>
    %421 = arith.mulf %420, %399 : vector<2x129xf32>
    %422 = arith.addf %419, %421 : vector<2x129xf32>
    %423 = arith.maximumf %417, %422 : vector<2x129xf32>
    %424 = vector.broadcast %9 : f32 to vector<2x129xf32>
    %425 = arith.addf %423, %424 : vector<2x129xf32>
    %c26_96 = arith.constant 26 : index
    %c0_97 = arith.constant 0 : index
    %c0_98 = arith.constant 0 : index
    %426 = vector.load %arg2[%c26_96, %c0_97, %c0_98] : memref<32x2x130xf32, #tpu.memory_space<vmem>>, vector<1x2x129xf32>
    %427 = vector.shape_cast %426 : vector<1x2x129xf32> to vector<2x129xf32>
    %c27 = arith.constant 27 : index
    %c0_99 = arith.constant 0 : index
    %c0_100 = arith.constant 0 : index
    %428 = vector.load %arg2[%c27, %c0_99, %c0_100] : memref<32x2x130xf32, #tpu.memory_space<vmem>>, vector<1x2x129xf32>
    %429 = vector.shape_cast %428 : vector<1x2x129xf32> to vector<2x129xf32>
    %c28 = arith.constant 28 : index
    %c0_101 = arith.constant 0 : index
    %c0_102 = arith.constant 0 : index
    %430 = vector.load %arg2[%c28, %c0_101, %c0_102] : memref<32x2x130xf32, #tpu.memory_space<vmem>>, vector<1x2x129xf32>
    %431 = vector.shape_cast %430 : vector<1x2x129xf32> to vector<2x129xf32>
    %432 = vector.broadcast %4 : f32 to vector<2x129xf32>
    %433 = arith.mulf %432, %427 : vector<2x129xf32>
    %434 = vector.broadcast %5 : f32 to vector<2x129xf32>
    %435 = arith.mulf %434, %429 : vector<2x129xf32>
    %436 = arith.addf %433, %435 : vector<2x129xf32>
    %437 = vector.broadcast %4 : f32 to vector<2x129xf32>
    %438 = arith.mulf %437, %429 : vector<2x129xf32>
    %439 = vector.broadcast %5 : f32 to vector<2x129xf32>
    %440 = arith.mulf %439, %431 : vector<2x129xf32>
    %441 = arith.addf %438, %440 : vector<2x129xf32>
    %442 = arith.maximumf %436, %441 : vector<2x129xf32>
    %443 = vector.broadcast %8 : f32 to vector<2x129xf32>
    %444 = arith.addf %442, %443 : vector<2x129xf32>
    %445 = vector.broadcast %6 : f32 to vector<2x129xf32>
    %446 = arith.mulf %445, %427 : vector<2x129xf32>
    %447 = vector.broadcast %7 : f32 to vector<2x129xf32>
    %448 = arith.mulf %447, %429 : vector<2x129xf32>
    %449 = arith.addf %446, %448 : vector<2x129xf32>
    %450 = vector.broadcast %6 : f32 to vector<2x129xf32>
    %451 = arith.mulf %450, %429 : vector<2x129xf32>
    %452 = vector.broadcast %7 : f32 to vector<2x129xf32>
    %453 = arith.mulf %452, %431 : vector<2x129xf32>
    %454 = arith.addf %451, %453 : vector<2x129xf32>
    %455 = arith.maximumf %449, %454 : vector<2x129xf32>
    %456 = vector.broadcast %9 : f32 to vector<2x129xf32>
    %457 = arith.addf %455, %456 : vector<2x129xf32>
    %c28_103 = arith.constant 28 : index
    %c0_104 = arith.constant 0 : index
    %c0_105 = arith.constant 0 : index
    %458 = vector.load %arg2[%c28_103, %c0_104, %c0_105] : memref<32x2x130xf32, #tpu.memory_space<vmem>>, vector<1x2x129xf32>
    %459 = vector.shape_cast %458 : vector<1x2x129xf32> to vector<2x129xf32>
    %c29 = arith.constant 29 : index
    %c0_106 = arith.constant 0 : index
    %c0_107 = arith.constant 0 : index
    %460 = vector.load %arg2[%c29, %c0_106, %c0_107] : memref<32x2x130xf32, #tpu.memory_space<vmem>>, vector<1x2x129xf32>
    %461 = vector.shape_cast %460 : vector<1x2x129xf32> to vector<2x129xf32>
    %c30 = arith.constant 30 : index
    %c0_108 = arith.constant 0 : index
    %c0_109 = arith.constant 0 : index
    %462 = vector.load %arg2[%c30, %c0_108, %c0_109] : memref<32x2x130xf32, #tpu.memory_space<vmem>>, vector<1x2x129xf32>
    %463 = vector.shape_cast %462 : vector<1x2x129xf32> to vector<2x129xf32>
    %464 = vector.broadcast %4 : f32 to vector<2x129xf32>
    %465 = arith.mulf %464, %459 : vector<2x129xf32>
    %466 = vector.broadcast %5 : f32 to vector<2x129xf32>
    %467 = arith.mulf %466, %461 : vector<2x129xf32>
    %468 = arith.addf %465, %467 : vector<2x129xf32>
    %469 = vector.broadcast %4 : f32 to vector<2x129xf32>
    %470 = arith.mulf %469, %461 : vector<2x129xf32>
    %471 = vector.broadcast %5 : f32 to vector<2x129xf32>
    %472 = arith.mulf %471, %463 : vector<2x129xf32>
    %473 = arith.addf %470, %472 : vector<2x129xf32>
    %474 = arith.maximumf %468, %473 : vector<2x129xf32>
    %475 = vector.broadcast %8 : f32 to vector<2x129xf32>
    %476 = arith.addf %474, %475 : vector<2x129xf32>
    %477 = vector.broadcast %6 : f32 to vector<2x129xf32>
    %478 = arith.mulf %477, %459 : vector<2x129xf32>
    %479 = vector.broadcast %7 : f32 to vector<2x129xf32>
    %480 = arith.mulf %479, %461 : vector<2x129xf32>
    %481 = arith.addf %478, %480 : vector<2x129xf32>
    %482 = vector.broadcast %6 : f32 to vector<2x129xf32>
    %483 = arith.mulf %482, %461 : vector<2x129xf32>
    %484 = vector.broadcast %7 : f32 to vector<2x129xf32>
    %485 = arith.mulf %484, %463 : vector<2x129xf32>
    %486 = arith.addf %483, %485 : vector<2x129xf32>
    %487 = arith.maximumf %481, %486 : vector<2x129xf32>
    %488 = vector.broadcast %9 : f32 to vector<2x129xf32>
    %489 = arith.addf %487, %488 : vector<2x129xf32>
    %c30_110 = arith.constant 30 : index
    %c0_111 = arith.constant 0 : index
    %c0_112 = arith.constant 0 : index
    %490 = vector.load %arg2[%c30_110, %c0_111, %c0_112] : memref<32x2x130xf32, #tpu.memory_space<vmem>>, vector<1x2x129xf32>
    %491 = vector.shape_cast %490 : vector<1x2x129xf32> to vector<2x129xf32>
    %c31 = arith.constant 31 : index
    %c0_113 = arith.constant 0 : index
    %c0_114 = arith.constant 0 : index
    %492 = vector.load %arg2[%c31, %c0_113, %c0_114] : memref<32x2x130xf32, #tpu.memory_space<vmem>>, vector<1x2x129xf32>
    %493 = vector.shape_cast %492 : vector<1x2x129xf32> to vector<2x129xf32>
    %c0_115 = arith.constant 0 : index
    %c0_116 = arith.constant 0 : index
    %c1_117 = arith.constant 1 : index
    %494 = vector.load %arg2[%c0_115, %c0_116, %c1_117] : memref<32x2x130xf32, #tpu.memory_space<vmem>>, vector<1x2x129xf32>
    %495 = vector.shape_cast %494 : vector<1x2x129xf32> to vector<2x129xf32>
    %496 = vector.broadcast %4 : f32 to vector<2x129xf32>
    %497 = arith.mulf %496, %491 : vector<2x129xf32>
    %498 = vector.broadcast %5 : f32 to vector<2x129xf32>
    %499 = arith.mulf %498, %493 : vector<2x129xf32>
    %500 = arith.addf %497, %499 : vector<2x129xf32>
    %501 = vector.broadcast %4 : f32 to vector<2x129xf32>
    %502 = arith.mulf %501, %493 : vector<2x129xf32>
    %503 = vector.broadcast %5 : f32 to vector<2x129xf32>
    %504 = arith.mulf %503, %495 : vector<2x129xf32>
    %505 = arith.addf %502, %504 : vector<2x129xf32>
    %506 = arith.maximumf %500, %505 : vector<2x129xf32>
    %507 = vector.broadcast %8 : f32 to vector<2x129xf32>
    %508 = arith.addf %506, %507 : vector<2x129xf32>
    %509 = vector.broadcast %6 : f32 to vector<2x129xf32>
    %510 = arith.mulf %509, %491 : vector<2x129xf32>
    %511 = vector.broadcast %7 : f32 to vector<2x129xf32>
    %512 = arith.mulf %511, %493 : vector<2x129xf32>
    %513 = arith.addf %510, %512 : vector<2x129xf32>
    %514 = vector.broadcast %6 : f32 to vector<2x129xf32>
    %515 = arith.mulf %514, %493 : vector<2x129xf32>
    %516 = vector.broadcast %7 : f32 to vector<2x129xf32>
    %517 = arith.mulf %516, %495 : vector<2x129xf32>
    %518 = arith.addf %515, %517 : vector<2x129xf32>
    %519 = arith.maximumf %513, %518 : vector<2x129xf32>
    %520 = vector.broadcast %9 : f32 to vector<2x129xf32>
    %521 = arith.addf %519, %520 : vector<2x129xf32>
    %c0_118 = arith.constant 0 : index
    %c0_119 = arith.constant 0 : index
    %c0_120 = arith.constant 0 : index
    %522 = vector.load %arg15[%c0_118, %c0_119, %c0_120] : memref<16x2x259xf32, #tpu.memory_space<vmem>>, vector<1x2x130xf32>
    %523 = vector.shape_cast %522 : vector<1x2x130xf32> to vector<2x130xf32>
    %524 = vector.shape_cast %28 : vector<2x130xf32> to vector<1x2x130xf32>
    tpu.vector_store %arg15[%c0_118, %c0_119, %c0_120], %524 {strides = array<i32>} : memref<16x2x259xf32, #tpu.memory_space<vmem>>, vector<1x2x130xf32>,
    %c0_121 = arith.constant 0 : index
    %c0_122 = arith.constant 0 : index
    %c130 = arith.constant 130 : index
    %525 = vector.load %arg15[%c0_121, %c0_122, %c130] : memref<16x2x259xf32, #tpu.memory_space<vmem>>, vector<1x2x129xf32>
    %526 = vector.shape_cast %525 : vector<1x2x129xf32> to vector<2x129xf32>
    %527 = vector.shape_cast %393 : vector<2x129xf32> to vector<1x2x129xf32>
    tpu.vector_store %arg15[%c0_121, %c0_122, %c130], %527 {strides = array<i32>} : memref<16x2x259xf32, #tpu.memory_space<vmem>>, vector<1x2x129xf32>,
    %c1_123 = arith.constant 1 : index
    %c0_124 = arith.constant 0 : index
    %c0_125 = arith.constant 0 : index
    %528 = vector.load %arg15[%c1_123, %c0_124, %c0_125] : memref<16x2x259xf32, #tpu.memory_space<vmem>>, vector<1x2x130xf32>
    %529 = vector.shape_cast %528 : vector<1x2x130xf32> to vector<2x130xf32>
    %530 = vector.shape_cast %60 : vector<2x130xf32> to vector<1x2x130xf32>
    tpu.vector_store %arg15[%c1_123, %c0_124, %c0_125], %530 {strides = array<i32>} : memref<16x2x259xf32, #tpu.memory_space<vmem>>, vector<1x2x130xf32>,
    %c1_126 = arith.constant 1 : index
    %c0_127 = arith.constant 0 : index
    %c130_128 = arith.constant 130 : index
    %531 = vector.load %arg15[%c1_126, %c0_127, %c130_128] : memref<16x2x259xf32, #tpu.memory_space<vmem>>, vector<1x2x129xf32>
    %532 = vector.shape_cast %531 : vector<1x2x129xf32> to vector<2x129xf32>
    %533 = vector.shape_cast %425 : vector<2x129xf32> to vector<1x2x129xf32>
    tpu.vector_store %arg15[%c1_126, %c0_127, %c130_128], %533 {strides = array<i32>} : memref<16x2x259xf32, #tpu.memory_space<vmem>>, vector<1x2x129xf32>,
    %c2_129 = arith.constant 2 : index
    %c0_130 = arith.constant 0 : index
    %c0_131 = arith.constant 0 : index
    %534 = vector.load %arg15[%c2_129, %c0_130, %c0_131] : memref<16x2x259xf32, #tpu.memory_space<vmem>>, vector<1x2x130xf32>
    %535 = vector.shape_cast %534 : vector<1x2x130xf32> to vector<2x130xf32>
    %536 = vector.shape_cast %92 : vector<2x130xf32> to vector<1x2x130xf32>
    tpu.vector_store %arg15[%c2_129, %c0_130, %c0_131], %536 {strides = array<i32>} : memref<16x2x259xf32, #tpu.memory_space<vmem>>, vector<1x2x130xf32>,
    %c2_132 = arith.constant 2 : index
    %c0_133 = arith.constant 0 : index
    %c130_134 = arith.constant 130 : index
    %537 = vector.load %arg15[%c2_132, %c0_133, %c130_134] : memref<16x2x259xf32, #tpu.memory_space<vmem>>, vector<1x2x129xf32>
    %538 = vector.shape_cast %537 : vector<1x2x129xf32> to vector<2x129xf32>
    %539 = vector.shape_cast %457 : vector<2x129xf32> to vector<1x2x129xf32>
    tpu.vector_store %arg15[%c2_132, %c0_133, %c130_134], %539 {strides = array<i32>} : memref<16x2x259xf32, #tpu.memory_space<vmem>>, vector<1x2x129xf32>,
    %c3_135 = arith.constant 3 : index
    %c0_136 = arith.constant 0 : index
    %c0_137 = arith.constant 0 : index
    %540 = vector.load %arg15[%c3_135, %c0_136, %c0_137] : memref<16x2x259xf32, #tpu.memory_space<vmem>>, vector<1x2x130xf32>
    %541 = vector.shape_cast %540 : vector<1x2x130xf32> to vector<2x130xf32>
    %542 = vector.shape_cast %124 : vector<2x130xf32> to vector<1x2x130xf32>
    tpu.vector_store %arg15[%c3_135, %c0_136, %c0_137], %542 {strides = array<i32>} : memref<16x2x259xf32, #tpu.memory_space<vmem>>, vector<1x2x130xf32>,
    %c3_138 = arith.constant 3 : index
    %c0_139 = arith.constant 0 : index
    %c130_140 = arith.constant 130 : index
    %543 = vector.load %arg15[%c3_138, %c0_139, %c130_140] : memref<16x2x259xf32, #tpu.memory_space<vmem>>, vector<1x2x129xf32>
    %544 = vector.shape_cast %543 : vector<1x2x129xf32> to vector<2x129xf32>
    %545 = vector.shape_cast %489 : vector<2x129xf32> to vector<1x2x129xf32>
    tpu.vector_store %arg15[%c3_138, %c0_139, %c130_140], %545 {strides = array<i32>} : memref<16x2x259xf32, #tpu.memory_space<vmem>>, vector<1x2x129xf32>,
    %c4_141 = arith.constant 4 : index
    %c0_142 = arith.constant 0 : index
    %c0_143 = arith.constant 0 : index
    %546 = vector.load %arg15[%c4_141, %c0_142, %c0_143] : memref<16x2x259xf32, #tpu.memory_space<vmem>>, vector<1x2x130xf32>
    %547 = vector.shape_cast %546 : vector<1x2x130xf32> to vector<2x130xf32>
    %548 = vector.shape_cast %156 : vector<2x130xf32> to vector<1x2x130xf32>
    tpu.vector_store %arg15[%c4_141, %c0_142, %c0_143], %548 {strides = array<i32>} : memref<16x2x259xf32, #tpu.memory_space<vmem>>, vector<1x2x130xf32>,
    %c4_144 = arith.constant 4 : index
    %c0_145 = arith.constant 0 : index
    %c130_146 = arith.constant 130 : index
    %549 = vector.load %arg15[%c4_144, %c0_145, %c130_146] : memref<16x2x259xf32, #tpu.memory_space<vmem>>, vector<1x2x129xf32>
    %550 = vector.shape_cast %549 : vector<1x2x129xf32> to vector<2x129xf32>
    %551 = vector.shape_cast %521 : vector<2x129xf32> to vector<1x2x129xf32>
    tpu.vector_store %arg15[%c4_144, %c0_145, %c130_146], %551 {strides = array<i32>} : memref<16x2x259xf32, #tpu.memory_space<vmem>>, vector<1x2x129xf32>,
    %c5_147 = arith.constant 5 : index
    %c0_148 = arith.constant 0 : index
    %c0_149 = arith.constant 0 : index
    %552 = vector.load %arg15[%c5_147, %c0_148, %c0_149] : memref<16x2x259xf32, #tpu.memory_space<vmem>>, vector<1x2x129xf32>
    %553 = vector.shape_cast %552 : vector<1x2x129xf32> to vector<2x129xf32>
    %554 = vector.shape_cast %188 : vector<2x129xf32> to vector<1x2x129xf32>
    tpu.vector_store %arg15[%c5_147, %c0_148, %c0_149], %554 {strides = array<i32>} : memref<16x2x259xf32, #tpu.memory_space<vmem>>, vector<1x2x129xf32>,
    %c5_150 = arith.constant 5 : index
    %c0_151 = arith.constant 0 : index
    %c129 = arith.constant 129 : index
    %555 = vector.load %arg15[%c5_150, %c0_151, %c129] : memref<16x2x259xf32, #tpu.memory_space<vmem>>, vector<1x2x130xf32>
    %556 = vector.shape_cast %555 : vector<1x2x130xf32> to vector<2x130xf32>
    %557 = vector.shape_cast %41 : vector<2x130xf32> to vector<1x2x130xf32>
    tpu.vector_store %arg15[%c5_150, %c0_151, %c129], %557 {strides = array<i32>} : memref<16x2x259xf32, #tpu.memory_space<vmem>>, vector<1x2x130xf32>,
    %c6_152 = arith.constant 6 : index
    %c0_153 = arith.constant 0 : index
    %c0_154 = arith.constant 0 : index
    %558 = vector.load %arg15[%c6_152, %c0_153, %c0_154] : memref<16x2x259xf32, #tpu.memory_space<vmem>>, vector<1x2x129xf32>
    %559 = vector.shape_cast %558 : vector<1x2x129xf32> to vector<2x129xf32>
    %560 = vector.shape_cast %220 : vector<2x129xf32> to vector<1x2x129xf32>
    tpu.vector_store %arg15[%c6_152, %c0_153, %c0_154], %560 {strides = array<i32>} : memref<16x2x259xf32, #tpu.memory_space<vmem>>, vector<1x2x129xf32>,
    %c6_155 = arith.constant 6 : index
    %c0_156 = arith.constant 0 : index
    %c129_157 = arith.constant 129 : index
    %561 = vector.load %arg15[%c6_155, %c0_156, %c129_157] : memref<16x2x259xf32, #tpu.memory_space<vmem>>, vector<1x2x130xf32>
    %562 = vector.shape_cast %561 : vector<1x2x130xf32> to vector<2x130xf32>
    %563 = vector.shape_cast %73 : vector<2x130xf32> to vector<1x2x130xf32>
    tpu.vector_store %arg15[%c6_155, %c0_156, %c129_157], %563 {strides = array<i32>} : memref<16x2x259xf32, #tpu.memory_space<vmem>>, vector<1x2x130xf32>,
    %c7_158 = arith.constant 7 : index
    %c0_159 = arith.constant 0 : index
    %c0_160 = arith.constant 0 : index
    %564 = vector.load %arg15[%c7_158, %c0_159, %c0_160] : memref<16x2x259xf32, #tpu.memory_space<vmem>>, vector<1x2x129xf32>
    %565 = vector.shape_cast %564 : vector<1x2x129xf32> to vector<2x129xf32>
    %566 = vector.shape_cast %252 : vector<2x129xf32> to vector<1x2x129xf32>
    tpu.vector_store %arg15[%c7_158, %c0_159, %c0_160], %566 {strides = array<i32>} : memref<16x2x259xf32, #tpu.memory_space<vmem>>, vector<1x2x129xf32>,
    %c7_161 = arith.constant 7 : index
    %c0_162 = arith.constant 0 : index
    %c129_163 = arith.constant 129 : index
    %567 = vector.load %arg15[%c7_161, %c0_162, %c129_163] : memref<16x2x259xf32, #tpu.memory_space<vmem>>, vector<1x2x130xf32>
    %568 = vector.shape_cast %567 : vector<1x2x130xf32> to vector<2x130xf32>
    %569 = vector.shape_cast %105 : vector<2x130xf32> to vector<1x2x130xf32>
    tpu.vector_store %arg15[%c7_161, %c0_162, %c129_163], %569 {strides = array<i32>} : memref<16x2x259xf32, #tpu.memory_space<vmem>>, vector<1x2x130xf32>,
    %c8_164 = arith.constant 8 : index
    %c0_165 = arith.constant 0 : index
    %c0_166 = arith.constant 0 : index
    %570 = vector.load %arg15[%c8_164, %c0_165, %c0_166] : memref<16x2x259xf32, #tpu.memory_space<vmem>>, vector<1x2x129xf32>
    %571 = vector.shape_cast %570 : vector<1x2x129xf32> to vector<2x129xf32>
    %572 = vector.shape_cast %284 : vector<2x129xf32> to vector<1x2x129xf32>
    tpu.vector_store %arg15[%c8_164, %c0_165, %c0_166], %572 {strides = array<i32>} : memref<16x2x259xf32, #tpu.memory_space<vmem>>, vector<1x2x129xf32>,
    %c8_167 = arith.constant 8 : index
    %c0_168 = arith.constant 0 : index
    %c129_169 = arith.constant 129 : index
    %573 = vector.load %arg15[%c8_167, %c0_168, %c129_169] : memref<16x2x259xf32, #tpu.memory_space<vmem>>, vector<1x2x130xf32>
    %574 = vector.shape_cast %573 : vector<1x2x130xf32> to vector<2x130xf32>
    %575 = vector.shape_cast %137 : vector<2x130xf32> to vector<1x2x130xf32>
    tpu.vector_store %arg15[%c8_167, %c0_168, %c129_169], %575 {strides = array<i32>} : memref<16x2x259xf32, #tpu.memory_space<vmem>>, vector<1x2x130xf32>,
    %c9_170 = arith.constant 9 : index
    %c0_171 = arith.constant 0 : index
    %c0_172 = arith.constant 0 : index
    %576 = vector.load %arg15[%c9_170, %c0_171, %c0_172] : memref<16x2x259xf32, #tpu.memory_space<vmem>>, vector<1x2x129xf32>
    %577 = vector.shape_cast %576 : vector<1x2x129xf32> to vector<2x129xf32>
    %578 = vector.shape_cast %316 : vector<2x129xf32> to vector<1x2x129xf32>
    tpu.vector_store %arg15[%c9_170, %c0_171, %c0_172], %578 {strides = array<i32>} : memref<16x2x259xf32, #tpu.memory_space<vmem>>, vector<1x2x129xf32>,
    %c9_173 = arith.constant 9 : index
    %c0_174 = arith.constant 0 : index
    %c129_175 = arith.constant 129 : index
    %579 = vector.load %arg15[%c9_173, %c0_174, %c129_175] : memref<16x2x259xf32, #tpu.memory_space<vmem>>, vector<1x2x130xf32>
    %580 = vector.shape_cast %579 : vector<1x2x130xf32> to vector<2x130xf32>
    %581 = vector.shape_cast %169 : vector<2x130xf32> to vector<1x2x130xf32>
    tpu.vector_store %arg15[%c9_173, %c0_174, %c129_175], %581 {strides = array<i32>} : memref<16x2x259xf32, #tpu.memory_space<vmem>>, vector<1x2x130xf32>,
    %c10_176 = arith.constant 10 : index
    %c0_177 = arith.constant 0 : index
    %c0_178 = arith.constant 0 : index
    %582 = vector.load %arg15[%c10_176, %c0_177, %c0_178] : memref<16x2x259xf32, #tpu.memory_space<vmem>>, vector<1x2x129xf32>
    %583 = vector.shape_cast %582 : vector<1x2x129xf32> to vector<2x129xf32>
    %584 = vector.shape_cast %348 : vector<2x129xf32> to vector<1x2x129xf32>
    tpu.vector_store %arg15[%c10_176, %c0_177, %c0_178], %584 {strides = array<i32>} : memref<16x2x259xf32, #tpu.memory_space<vmem>>, vector<1x2x129xf32>,
    %c10_179 = arith.constant 10 : index
    %c0_180 = arith.constant 0 : index
    %c129_181 = arith.constant 129 : index
    %585 = vector.load %arg15[%c10_179, %c0_180, %c129_181] : memref<16x2x259xf32, #tpu.memory_space<vmem>>, vector<1x2x129xf32>
    %586 = vector.shape_cast %585 : vector<1x2x129xf32> to vector<2x129xf32>
    %587 = vector.shape_cast %201 : vector<2x129xf32> to vector<1x2x129xf32>
    tpu.vector_store %arg15[%c10_179, %c0_180, %c129_181], %587 {strides = array<i32>} : memref<16x2x259xf32, #tpu.memory_space<vmem>>, vector<1x2x129xf32>,
    %c11_182 = arith.constant 11 : index
    %c0_183 = arith.constant 0 : index
    %c0_184 = arith.constant 0 : index
    %588 = vector.load %arg15[%c11_182, %c0_183, %c0_184] : memref<16x2x259xf32, #tpu.memory_space<vmem>>, vector<1x2x129xf32>
    %589 = vector.shape_cast %588 : vector<1x2x129xf32> to vector<2x129xf32>
    %590 = vector.shape_cast %380 : vector<2x129xf32> to vector<1x2x129xf32>
    tpu.vector_store %arg15[%c11_182, %c0_183, %c0_184], %590 {strides = array<i32>} : memref<16x2x259xf32, #tpu.memory_space<vmem>>, vector<1x2x129xf32>,
    %c11_185 = arith.constant 11 : index
    %c0_186 = arith.constant 0 : index
    %c129_187 = arith.constant 129 : index
    %591 = vector.load %arg15[%c11_185, %c0_186, %c129_187] : memref<16x2x259xf32, #tpu.memory_space<vmem>>, vector<1x2x129xf32>
    %592 = vector.shape_cast %591 : vector<1x2x129xf32> to vector<2x129xf32>
    %593 = vector.shape_cast %233 : vector<2x129xf32> to vector<1x2x129xf32>
    tpu.vector_store %arg15[%c11_185, %c0_186, %c129_187], %593 {strides = array<i32>} : memref<16x2x259xf32, #tpu.memory_space<vmem>>, vector<1x2x129xf32>,
    %c12_188 = arith.constant 12 : index
    %c0_189 = arith.constant 0 : index
    %c0_190 = arith.constant 0 : index
    %594 = vector.load %arg15[%c12_188, %c0_189, %c0_190] : memref<16x2x259xf32, #tpu.memory_space<vmem>>, vector<1x2x129xf32>
    %595 = vector.shape_cast %594 : vector<1x2x129xf32> to vector<2x129xf32>
    %596 = vector.shape_cast %412 : vector<2x129xf32> to vector<1x2x129xf32>
    tpu.vector_store %arg15[%c12_188, %c0_189, %c0_190], %596 {strides = array<i32>} : memref<16x2x259xf32, #tpu.memory_space<vmem>>, vector<1x2x129xf32>,
    %c12_191 = arith.constant 12 : index
    %c0_192 = arith.constant 0 : index
    %c129_193 = arith.constant 129 : index
    %597 = vector.load %arg15[%c12_191, %c0_192, %c129_193] : memref<16x2x259xf32, #tpu.memory_space<vmem>>, vector<1x2x129xf32>
    %598 = vector.shape_cast %597 : vector<1x2x129xf32> to vector<2x129xf32>
    %599 = vector.shape_cast %265 : vector<2x129xf32> to vector<1x2x129xf32>
    tpu.vector_store %arg15[%c12_191, %c0_192, %c129_193], %599 {strides = array<i32>} : memref<16x2x259xf32, #tpu.memory_space<vmem>>, vector<1x2x129xf32>,
    %c13_194 = arith.constant 13 : index
    %c0_195 = arith.constant 0 : index
    %c0_196 = arith.constant 0 : index
    %600 = vector.load %arg15[%c13_194, %c0_195, %c0_196] : memref<16x2x259xf32, #tpu.memory_space<vmem>>, vector<1x2x129xf32>
    %601 = vector.shape_cast %600 : vector<1x2x129xf32> to vector<2x129xf32>
    %602 = vector.shape_cast %444 : vector<2x129xf32> to vector<1x2x129xf32>
    tpu.vector_store %arg15[%c13_194, %c0_195, %c0_196], %602 {strides = array<i32>} : memref<16x2x259xf32, #tpu.memory_space<vmem>>, vector<1x2x129xf32>,
    %c13_197 = arith.constant 13 : index
    %c0_198 = arith.constant 0 : index
    %c129_199 = arith.constant 129 : index
    %603 = vector.load %arg15[%c13_197, %c0_198, %c129_199] : memref<16x2x259xf32, #tpu.memory_space<vmem>>, vector<1x2x129xf32>
    %604 = vector.shape_cast %603 : vector<1x2x129xf32> to vector<2x129xf32>
    %605 = vector.shape_cast %297 : vector<2x129xf32> to vector<1x2x129xf32>
    tpu.vector_store %arg15[%c13_197, %c0_198, %c129_199], %605 {strides = array<i32>} : memref<16x2x259xf32, #tpu.memory_space<vmem>>, vector<1x2x129xf32>,
    %c14_200 = arith.constant 14 : index
    %c0_201 = arith.constant 0 : index
    %c0_202 = arith.constant 0 : index
    %606 = vector.load %arg15[%c14_200, %c0_201, %c0_202] : memref<16x2x259xf32, #tpu.memory_space<vmem>>, vector<1x2x129xf32>
    %607 = vector.shape_cast %606 : vector<1x2x129xf32> to vector<2x129xf32>
    %608 = vector.shape_cast %476 : vector<2x129xf32> to vector<1x2x129xf32>
    tpu.vector_store %arg15[%c14_200, %c0_201, %c0_202], %608 {strides = array<i32>} : memref<16x2x259xf32, #tpu.memory_space<vmem>>, vector<1x2x129xf32>,
    %c14_203 = arith.constant 14 : index
    %c0_204 = arith.constant 0 : index
    %c129_205 = arith.constant 129 : index
    %609 = vector.load %arg15[%c14_203, %c0_204, %c129_205] : memref<16x2x259xf32, #tpu.memory_space<vmem>>, vector<1x2x129xf32>
    %610 = vector.shape_cast %609 : vector<1x2x129xf32> to vector<2x129xf32>
    %611 = vector.shape_cast %329 : vector<2x129xf32> to vector<1x2x129xf32>
    tpu.vector_store %arg15[%c14_203, %c0_204, %c129_205], %611 {strides = array<i32>} : memref<16x2x259xf32, #tpu.memory_space<vmem>>, vector<1x2x129xf32>,
    %c15_206 = arith.constant 15 : index
    %c0_207 = arith.constant 0 : index
    %c0_208 = arith.constant 0 : index
    %612 = vector.load %arg15[%c15_206, %c0_207, %c0_208] : memref<16x2x259xf32, #tpu.memory_space<vmem>>, vector<1x2x129xf32>
    %613 = vector.shape_cast %612 : vector<1x2x129xf32> to vector<2x129xf32>
    %614 = vector.shape_cast %508 : vector<2x129xf32> to vector<1x2x129xf32>
    tpu.vector_store %arg15[%c15_206, %c0_207, %c0_208], %614 {strides = array<i32>} : memref<16x2x259xf32, #tpu.memory_space<vmem>>, vector<1x2x129xf32>,
    %c15_209 = arith.constant 15 : index
    %c0_210 = arith.constant 0 : index
    %c129_211 = arith.constant 129 : index
    %615 = vector.load %arg15[%c15_209, %c0_210, %c129_211] : memref<16x2x259xf32, #tpu.memory_space<vmem>>, vector<1x2x129xf32>
    %616 = vector.shape_cast %615 : vector<1x2x129xf32> to vector<2x129xf32>
    %617 = vector.shape_cast %361 : vector<2x129xf32> to vector<1x2x129xf32>
    tpu.vector_store %arg15[%c15_209, %c0_210, %c129_211], %617 {strides = array<i32>} : memref<16x2x259xf32, #tpu.memory_space<vmem>>, vector<1x2x129xf32>,
    %c4_212 = arith.constant 4 : index
    %618 = memref.load %arg0[%c4_212] : memref<20xf32, #tpu.memory_space<smem>>
    %c5_213 = arith.constant 5 : index
    %619 = memref.load %arg0[%c5_213] : memref<20xf32, #tpu.memory_space<smem>>
    %c6_214 = arith.constant 6 : index
    %620 = memref.load %arg0[%c6_214] : memref<20xf32, #tpu.memory_space<smem>>
    %c7_215 = arith.constant 7 : index
    %621 = memref.load %arg0[%c7_215] : memref<20xf32, #tpu.memory_space<smem>>
    %c2_216 = arith.constant 2 : index
    %622 = memref.load %arg1[%c2_216] : memref<10xf32, #tpu.memory_space<smem>>
    %c3_217 = arith.constant 3 : index
    %623 = memref.load %arg1[%c3_217] : memref<10xf32, #tpu.memory_space<smem>>
    %c0_218 = arith.constant 0 : index
    %c0_219 = arith.constant 0 : index
    %c0_220 = arith.constant 0 : index
    %624 = vector.load %arg15[%c0_218, %c0_219, %c0_220] : memref<16x2x259xf32, #tpu.memory_space<vmem>>, vector<1x2x259xf32>
    %625 = vector.shape_cast %624 : vector<1x2x259xf32> to vector<2x259xf32>
    %c1_221 = arith.constant 1 : index
    %c0_222 = arith.constant 0 : index
    %c0_223 = arith.constant 0 : index
    %626 = vector.load %arg15[%c1_221, %c0_222, %c0_223] : memref<16x2x259xf32, #tpu.memory_space<vmem>>, vector<1x2x259xf32>
    %627 = vector.shape_cast %626 : vector<1x2x259xf32> to vector<2x259xf32>
    %c2_224 = arith.constant 2 : index
    %c0_225 = arith.constant 0 : index
    %c0_226 = arith.constant 0 : index
    %628 = vector.load %arg15[%c2_224, %c0_225, %c0_226] : memref<16x2x259xf32, #tpu.memory_space<vmem>>, vector<1x2x259xf32>
    %629 = vector.shape_cast %628 : vector<1x2x259xf32> to vector<2x259xf32>
    %630 = vector.broadcast %618 : f32 to vector<2x259xf32>
    %631 = arith.mulf %630, %625 : vector<2x259xf32>
    %632 = vector.broadcast %619 : f32 to vector<2x259xf32>
    %633 = arith.mulf %632, %627 : vector<2x259xf32>
    %634 = arith.addf %631, %633 : vector<2x259xf32>
    %635 = vector.broadcast %618 : f32 to vector<2x259xf32>
    %636 = arith.mulf %635, %627 : vector<2x259xf32>
    %637 = vector.broadcast %619 : f32 to vector<2x259xf32>
    %638 = arith.mulf %637, %629 : vector<2x259xf32>
    %639 = arith.addf %636, %638 : vector<2x259xf32>
    %640 = arith.maximumf %634, %639 : vector<2x259xf32>
    %641 = vector.broadcast %622 : f32 to vector<2x259xf32>
    %642 = arith.addf %640, %641 : vector<2x259xf32>
    %643 = vector.broadcast %620 : f32 to vector<2x259xf32>
    %644 = arith.mulf %643, %625 : vector<2x259xf32>
    %645 = vector.broadcast %621 : f32 to vector<2x259xf32>
    %646 = arith.mulf %645, %627 : vector<2x259xf32>
    %647 = arith.addf %644, %646 : vector<2x259xf32>
    %648 = vector.broadcast %620 : f32 to vector<2x259xf32>
    %649 = arith.mulf %648, %627 : vector<2x259xf32>
    %650 = vector.broadcast %621 : f32 to vector<2x259xf32>
    %651 = arith.mulf %650, %629 : vector<2x259xf32>
    %652 = arith.addf %649, %651 : vector<2x259xf32>
    %653 = arith.maximumf %647, %652 : vector<2x259xf32>
    %654 = vector.broadcast %623 : f32 to vector<2x259xf32>
    %655 = arith.addf %653, %654 : vector<2x259xf32>
    %c2_227 = arith.constant 2 : index
    %c0_228 = arith.constant 0 : index
    %c0_229 = arith.constant 0 : index
    %656 = vector.load %arg15[%c2_227, %c0_228, %c0_229] : memref<16x2x259xf32, #tpu.memory_space<vmem>>, vector<1x2x259xf32>
    %657 = vector.shape_cast %656 : vector<1x2x259xf32> to vector<2x259xf32>
    %c3_230 = arith.constant 3 : index
    %c0_231 = arith.constant 0 : index
    %c0_232 = arith.constant 0 : index
    %658 = vector.load %arg15[%c3_230, %c0_231, %c0_232] : memref<16x2x259xf32, #tpu.memory_space<vmem>>, vector<1x2x259xf32>
    %659 = vector.shape_cast %658 : vector<1x2x259xf32> to vector<2x259xf32>
    %c4_233 = arith.constant 4 : index
    %c0_234 = arith.constant 0 : index
    %c0_235 = arith.constant 0 : index
    %660 = vector.load %arg15[%c4_233, %c0_234, %c0_235] : memref<16x2x259xf32, #tpu.memory_space<vmem>>, vector<1x2x259xf32>
    %661 = vector.shape_cast %660 : vector<1x2x259xf32> to vector<2x259xf32>
    %662 = vector.broadcast %618 : f32 to vector<2x259xf32>
    %663 = arith.mulf %662, %657 : vector<2x259xf32>
    %664 = vector.broadcast %619 : f32 to vector<2x259xf32>
    %665 = arith.mulf %664, %659 : vector<2x259xf32>
    %666 = arith.addf %663, %665 : vector<2x259xf32>
    %667 = vector.broadcast %618 : f32 to vector<2x259xf32>
    %668 = arith.mulf %667, %659 : vector<2x259xf32>
    %669 = vector.broadcast %619 : f32 to vector<2x259xf32>
    %670 = arith.mulf %669, %661 : vector<2x259xf32>
    %671 = arith.addf %668, %670 : vector<2x259xf32>
    %672 = arith.maximumf %666, %671 : vector<2x259xf32>
    %673 = vector.broadcast %622 : f32 to vector<2x259xf32>
    %674 = arith.addf %672, %673 : vector<2x259xf32>
    %675 = vector.broadcast %620 : f32 to vector<2x259xf32>
    %676 = arith.mulf %675, %657 : vector<2x259xf32>
    %677 = vector.broadcast %621 : f32 to vector<2x259xf32>
    %678 = arith.mulf %677, %659 : vector<2x259xf32>
    %679 = arith.addf %676, %678 : vector<2x259xf32>
    %680 = vector.broadcast %620 : f32 to vector<2x259xf32>
    %681 = arith.mulf %680, %659 : vector<2x259xf32>
    %682 = vector.broadcast %621 : f32 to vector<2x259xf32>
    %683 = arith.mulf %682, %661 : vector<2x259xf32>
    %684 = arith.addf %681, %683 : vector<2x259xf32>
    %685 = arith.maximumf %679, %684 : vector<2x259xf32>
    %686 = vector.broadcast %623 : f32 to vector<2x259xf32>
    %687 = arith.addf %685, %686 : vector<2x259xf32>
    %c4_236 = arith.constant 4 : index
    %c0_237 = arith.constant 0 : index
    %c0_238 = arith.constant 0 : index
    %688 = vector.load %arg15[%c4_236, %c0_237, %c0_238] : memref<16x2x259xf32, #tpu.memory_space<vmem>>, vector<1x2x259xf32>
    %689 = vector.shape_cast %688 : vector<1x2x259xf32> to vector<2x259xf32>
    %c5_239 = arith.constant 5 : index
    %c0_240 = arith.constant 0 : index
    %c0_241 = arith.constant 0 : index
    %690 = vector.load %arg15[%c5_239, %c0_240, %c0_241] : memref<16x2x259xf32, #tpu.memory_space<vmem>>, vector<1x2x259xf32>
    %691 = vector.shape_cast %690 : vector<1x2x259xf32> to vector<2x259xf32>
    %c6_242 = arith.constant 6 : index
    %c0_243 = arith.constant 0 : index
    %c0_244 = arith.constant 0 : index
    %692 = vector.load %arg15[%c6_242, %c0_243, %c0_244] : memref<16x2x259xf32, #tpu.memory_space<vmem>>, vector<1x2x259xf32>
    %693 = vector.shape_cast %692 : vector<1x2x259xf32> to vector<2x259xf32>
    %694 = vector.broadcast %618 : f32 to vector<2x259xf32>
    %695 = arith.mulf %694, %689 : vector<2x259xf32>
    %696 = vector.broadcast %619 : f32 to vector<2x259xf32>
    %697 = arith.mulf %696, %691 : vector<2x259xf32>
    %698 = arith.addf %695, %697 : vector<2x259xf32>
    %699 = vector.broadcast %618 : f32 to vector<2x259xf32>
    %700 = arith.mulf %699, %691 : vector<2x259xf32>
    %701 = vector.broadcast %619 : f32 to vector<2x259xf32>
    %702 = arith.mulf %701, %693 : vector<2x259xf32>
    %703 = arith.addf %700, %702 : vector<2x259xf32>
    %704 = arith.maximumf %698, %703 : vector<2x259xf32>
    %705 = vector.broadcast %622 : f32 to vector<2x259xf32>
    %706 = arith.addf %704, %705 : vector<2x259xf32>
    %707 = vector.broadcast %620 : f32 to vector<2x259xf32>
    %708 = arith.mulf %707, %689 : vector<2x259xf32>
    %709 = vector.broadcast %621 : f32 to vector<2x259xf32>
    %710 = arith.mulf %709, %691 : vector<2x259xf32>
    %711 = arith.addf %708, %710 : vector<2x259xf32>
    %712 = vector.broadcast %620 : f32 to vector<2x259xf32>
    %713 = arith.mulf %712, %691 : vector<2x259xf32>
    %714 = vector.broadcast %621 : f32 to vector<2x259xf32>
    %715 = arith.mulf %714, %693 : vector<2x259xf32>
    %716 = arith.addf %713, %715 : vector<2x259xf32>
    %717 = arith.maximumf %711, %716 : vector<2x259xf32>
    %718 = vector.broadcast %623 : f32 to vector<2x259xf32>
    %719 = arith.addf %717, %718 : vector<2x259xf32>
    %c6_245 = arith.constant 6 : index
    %c0_246 = arith.constant 0 : index
    %c0_247 = arith.constant 0 : index
    %720 = vector.load %arg15[%c6_245, %c0_246, %c0_247] : memref<16x2x259xf32, #tpu.memory_space<vmem>>, vector<1x2x259xf32>
    %721 = vector.shape_cast %720 : vector<1x2x259xf32> to vector<2x259xf32>
    %c7_248 = arith.constant 7 : index
    %c0_249 = arith.constant 0 : index
    %c0_250 = arith.constant 0 : index
    %722 = vector.load %arg15[%c7_248, %c0_249, %c0_250] : memref<16x2x259xf32, #tpu.memory_space<vmem>>, vector<1x2x259xf32>
    %723 = vector.shape_cast %722 : vector<1x2x259xf32> to vector<2x259xf32>
    %c8_251 = arith.constant 8 : index
    %c0_252 = arith.constant 0 : index
    %c0_253 = arith.constant 0 : index
    %724 = vector.load %arg15[%c8_251, %c0_252, %c0_253] : memref<16x2x259xf32, #tpu.memory_space<vmem>>, vector<1x2x259xf32>
    %725 = vector.shape_cast %724 : vector<1x2x259xf32> to vector<2x259xf32>
    %726 = vector.broadcast %618 : f32 to vector<2x259xf32>
    %727 = arith.mulf %726, %721 : vector<2x259xf32>
    %728 = vector.broadcast %619 : f32 to vector<2x259xf32>
    %729 = arith.mulf %728, %723 : vector<2x259xf32>
    %730 = arith.addf %727, %729 : vector<2x259xf32>
    %731 = vector.broadcast %618 : f32 to vector<2x259xf32>
    %732 = arith.mulf %731, %723 : vector<2x259xf32>
    %733 = vector.broadcast %619 : f32 to vector<2x259xf32>
    %734 = arith.mulf %733, %725 : vector<2x259xf32>
    %735 = arith.addf %732, %734 : vector<2x259xf32>
    %736 = arith.maximumf %730, %735 : vector<2x259xf32>
    %737 = vector.broadcast %622 : f32 to vector<2x259xf32>
    %738 = arith.addf %736, %737 : vector<2x259xf32>
    %739 = vector.broadcast %620 : f32 to vector<2x259xf32>
    %740 = arith.mulf %739, %721 : vector<2x259xf32>
    %741 = vector.broadcast %621 : f32 to vector<2x259xf32>
    %742 = arith.mulf %741, %723 : vector<2x259xf32>
    %743 = arith.addf %740, %742 : vector<2x259xf32>
    %744 = vector.broadcast %620 : f32 to vector<2x259xf32>
    %745 = arith.mulf %744, %723 : vector<2x259xf32>
    %746 = vector.broadcast %621 : f32 to vector<2x259xf32>
    %747 = arith.mulf %746, %725 : vector<2x259xf32>
    %748 = arith.addf %745, %747 : vector<2x259xf32>
    %749 = arith.maximumf %743, %748 : vector<2x259xf32>
    %750 = vector.broadcast %623 : f32 to vector<2x259xf32>
    %751 = arith.addf %749, %750 : vector<2x259xf32>
    %c8_254 = arith.constant 8 : index
    %c0_255 = arith.constant 0 : index
    %c0_256 = arith.constant 0 : index
    %752 = vector.load %arg15[%c8_254, %c0_255, %c0_256] : memref<16x2x259xf32, #tpu.memory_space<vmem>>, vector<1x2x258xf32>
    %753 = vector.shape_cast %752 : vector<1x2x258xf32> to vector<2x258xf32>
    %c9_257 = arith.constant 9 : index
    %c0_258 = arith.constant 0 : index
    %c0_259 = arith.constant 0 : index
    %754 = vector.load %arg15[%c9_257, %c0_258, %c0_259] : memref<16x2x259xf32, #tpu.memory_space<vmem>>, vector<1x2x258xf32>
    %755 = vector.shape_cast %754 : vector<1x2x258xf32> to vector<2x258xf32>
    %c10_260 = arith.constant 10 : index
    %c0_261 = arith.constant 0 : index
    %c0_262 = arith.constant 0 : index
    %756 = vector.load %arg15[%c10_260, %c0_261, %c0_262] : memref<16x2x259xf32, #tpu.memory_space<vmem>>, vector<1x2x258xf32>
    %757 = vector.shape_cast %756 : vector<1x2x258xf32> to vector<2x258xf32>
    %758 = vector.broadcast %618 : f32 to vector<2x258xf32>
    %759 = arith.mulf %758, %753 : vector<2x258xf32>
    %760 = vector.broadcast %619 : f32 to vector<2x258xf32>
    %761 = arith.mulf %760, %755 : vector<2x258xf32>
    %762 = arith.addf %759, %761 : vector<2x258xf32>
    %763 = vector.broadcast %618 : f32 to vector<2x258xf32>
    %764 = arith.mulf %763, %755 : vector<2x258xf32>
    %765 = vector.broadcast %619 : f32 to vector<2x258xf32>
    %766 = arith.mulf %765, %757 : vector<2x258xf32>
    %767 = arith.addf %764, %766 : vector<2x258xf32>
    %768 = arith.maximumf %762, %767 : vector<2x258xf32>
    %769 = vector.broadcast %622 : f32 to vector<2x258xf32>
    %770 = arith.addf %768, %769 : vector<2x258xf32>
    %771 = vector.broadcast %620 : f32 to vector<2x258xf32>
    %772 = arith.mulf %771, %753 : vector<2x258xf32>
    %773 = vector.broadcast %621 : f32 to vector<2x258xf32>
    %774 = arith.mulf %773, %755 : vector<2x258xf32>
    %775 = arith.addf %772, %774 : vector<2x258xf32>
    %776 = vector.broadcast %620 : f32 to vector<2x258xf32>
    %777 = arith.mulf %776, %755 : vector<2x258xf32>
    %778 = vector.broadcast %621 : f32 to vector<2x258xf32>
    %779 = arith.mulf %778, %757 : vector<2x258xf32>
    %780 = arith.addf %777, %779 : vector<2x258xf32>
    %781 = arith.maximumf %775, %780 : vector<2x258xf32>
    %782 = vector.broadcast %623 : f32 to vector<2x258xf32>
    %783 = arith.addf %781, %782 : vector<2x258xf32>
    %c10_263 = arith.constant 10 : index
    %c0_264 = arith.constant 0 : index
    %c0_265 = arith.constant 0 : index
    %784 = vector.load %arg15[%c10_263, %c0_264, %c0_265] : memref<16x2x259xf32, #tpu.memory_space<vmem>>, vector<1x2x258xf32>
    %785 = vector.shape_cast %784 : vector<1x2x258xf32> to vector<2x258xf32>
    %c11_266 = arith.constant 11 : index
    %c0_267 = arith.constant 0 : index
    %c0_268 = arith.constant 0 : index
    %786 = vector.load %arg15[%c11_266, %c0_267, %c0_268] : memref<16x2x259xf32, #tpu.memory_space<vmem>>, vector<1x2x258xf32>
    %787 = vector.shape_cast %786 : vector<1x2x258xf32> to vector<2x258xf32>
    %c12_269 = arith.constant 12 : index
    %c0_270 = arith.constant 0 : index
    %c0_271 = arith.constant 0 : index
    %788 = vector.load %arg15[%c12_269, %c0_270, %c0_271] : memref<16x2x259xf32, #tpu.memory_space<vmem>>, vector<1x2x258xf32>
    %789 = vector.shape_cast %788 : vector<1x2x258xf32> to vector<2x258xf32>
    %790 = vector.broadcast %618 : f32 to vector<2x258xf32>
    %791 = arith.mulf %790, %785 : vector<2x258xf32>
    %792 = vector.broadcast %619 : f32 to vector<2x258xf32>
    %793 = arith.mulf %792, %787 : vector<2x258xf32>
    %794 = arith.addf %791, %793 : vector<2x258xf32>
    %795 = vector.broadcast %618 : f32 to vector<2x258xf32>
    %796 = arith.mulf %795, %787 : vector<2x258xf32>
    %797 = vector.broadcast %619 : f32 to vector<2x258xf32>
    %798 = arith.mulf %797, %789 : vector<2x258xf32>
    %799 = arith.addf %796, %798 : vector<2x258xf32>
    %800 = arith.maximumf %794, %799 : vector<2x258xf32>
    %801 = vector.broadcast %622 : f32 to vector<2x258xf32>
    %802 = arith.addf %800, %801 : vector<2x258xf32>
    %803 = vector.broadcast %620 : f32 to vector<2x258xf32>
    %804 = arith.mulf %803, %785 : vector<2x258xf32>
    %805 = vector.broadcast %621 : f32 to vector<2x258xf32>
    %806 = arith.mulf %805, %787 : vector<2x258xf32>
    %807 = arith.addf %804, %806 : vector<2x258xf32>
    %808 = vector.broadcast %620 : f32 to vector<2x258xf32>
    %809 = arith.mulf %808, %787 : vector<2x258xf32>
    %810 = vector.broadcast %621 : f32 to vector<2x258xf32>
    %811 = arith.mulf %810, %789 : vector<2x258xf32>
    %812 = arith.addf %809, %811 : vector<2x258xf32>
    %813 = arith.maximumf %807, %812 : vector<2x258xf32>
    %814 = vector.broadcast %623 : f32 to vector<2x258xf32>
    %815 = arith.addf %813, %814 : vector<2x258xf32>
    %c12_272 = arith.constant 12 : index
    %c0_273 = arith.constant 0 : index
    %c0_274 = arith.constant 0 : index
    %816 = vector.load %arg15[%c12_272, %c0_273, %c0_274] : memref<16x2x259xf32, #tpu.memory_space<vmem>>, vector<1x2x258xf32>
    %817 = vector.shape_cast %816 : vector<1x2x258xf32> to vector<2x258xf32>
    %c13_275 = arith.constant 13 : index
    %c0_276 = arith.constant 0 : index
    %c0_277 = arith.constant 0 : index
    %818 = vector.load %arg15[%c13_275, %c0_276, %c0_277] : memref<16x2x259xf32, #tpu.memory_space<vmem>>, vector<1x2x258xf32>
    %819 = vector.shape_cast %818 : vector<1x2x258xf32> to vector<2x258xf32>
    %c14_278 = arith.constant 14 : index
    %c0_279 = arith.constant 0 : index
    %c0_280 = arith.constant 0 : index
    %820 = vector.load %arg15[%c14_278, %c0_279, %c0_280] : memref<16x2x259xf32, #tpu.memory_space<vmem>>, vector<1x2x258xf32>
    %821 = vector.shape_cast %820 : vector<1x2x258xf32> to vector<2x258xf32>
    %822 = vector.broadcast %618 : f32 to vector<2x258xf32>
    %823 = arith.mulf %822, %817 : vector<2x258xf32>
    %824 = vector.broadcast %619 : f32 to vector<2x258xf32>
    %825 = arith.mulf %824, %819 : vector<2x258xf32>
    %826 = arith.addf %823, %825 : vector<2x258xf32>
    %827 = vector.broadcast %618 : f32 to vector<2x258xf32>
    %828 = arith.mulf %827, %819 : vector<2x258xf32>
    %829 = vector.broadcast %619 : f32 to vector<2x258xf32>
    %830 = arith.mulf %829, %821 : vector<2x258xf32>
    %831 = arith.addf %828, %830 : vector<2x258xf32>
    %832 = arith.maximumf %826, %831 : vector<2x258xf32>
    %833 = vector.broadcast %622 : f32 to vector<2x258xf32>
    %834 = arith.addf %832, %833 : vector<2x258xf32>
    %835 = vector.broadcast %620 : f32 to vector<2x258xf32>
    %836 = arith.mulf %835, %817 : vector<2x258xf32>
    %837 = vector.broadcast %621 : f32 to vector<2x258xf32>
    %838 = arith.mulf %837, %819 : vector<2x258xf32>
    %839 = arith.addf %836, %838 : vector<2x258xf32>
    %840 = vector.broadcast %620 : f32 to vector<2x258xf32>
    %841 = arith.mulf %840, %819 : vector<2x258xf32>
    %842 = vector.broadcast %621 : f32 to vector<2x258xf32>
    %843 = arith.mulf %842, %821 : vector<2x258xf32>
    %844 = arith.addf %841, %843 : vector<2x258xf32>
    %845 = arith.maximumf %839, %844 : vector<2x258xf32>
    %846 = vector.broadcast %623 : f32 to vector<2x258xf32>
    %847 = arith.addf %845, %846 : vector<2x258xf32>
    %c14_281 = arith.constant 14 : index
    %c0_282 = arith.constant 0 : index
    %c0_283 = arith.constant 0 : index
    %848 = vector.load %arg15[%c14_281, %c0_282, %c0_283] : memref<16x2x259xf32, #tpu.memory_space<vmem>>, vector<1x2x258xf32>
    %849 = vector.shape_cast %848 : vector<1x2x258xf32> to vector<2x258xf32>
    %c15_284 = arith.constant 15 : index
    %c0_285 = arith.constant 0 : index
    %c0_286 = arith.constant 0 : index
    %850 = vector.load %arg15[%c15_284, %c0_285, %c0_286] : memref<16x2x259xf32, #tpu.memory_space<vmem>>, vector<1x2x258xf32>
    %851 = vector.shape_cast %850 : vector<1x2x258xf32> to vector<2x258xf32>
    %c0_287 = arith.constant 0 : index
    %c0_288 = arith.constant 0 : index
    %c1_289 = arith.constant 1 : index
    %852 = vector.load %arg15[%c0_287, %c0_288, %c1_289] : memref<16x2x259xf32, #tpu.memory_space<vmem>>, vector<1x2x258xf32>
    %853 = vector.shape_cast %852 : vector<1x2x258xf32> to vector<2x258xf32>
    %854 = vector.broadcast %618 : f32 to vector<2x258xf32>
    %855 = arith.mulf %854, %849 : vector<2x258xf32>
    %856 = vector.broadcast %619 : f32 to vector<2x258xf32>
    %857 = arith.mulf %856, %851 : vector<2x258xf32>
    %858 = arith.addf %855, %857 : vector<2x258xf32>
    %859 = vector.broadcast %618 : f32 to vector<2x258xf32>
    %860 = arith.mulf %859, %851 : vector<2x258xf32>
    %861 = vector.broadcast %619 : f32 to vector<2x258xf32>
    %862 = arith.mulf %861, %853 : vector<2x258xf32>
    %863 = arith.addf %860, %862 : vector<2x258xf32>
    %864 = arith.maximumf %858, %863 : vector<2x258xf32>
    %865 = vector.broadcast %622 : f32 to vector<2x258xf32>
    %866 = arith.addf %864, %865 : vector<2x258xf32>
    %867 = vector.broadcast %620 : f32 to vector<2x258xf32>
    %868 = arith.mulf %867, %849 : vector<2x258xf32>
    %869 = vector.broadcast %621 : f32 to vector<2x258xf32>
    %870 = arith.mulf %869, %851 : vector<2x258xf32>
    %871 = arith.addf %868, %870 : vector<2x258xf32>
    %872 = vector.broadcast %620 : f32 to vector<2x258xf32>
    %873 = arith.mulf %872, %851 : vector<2x258xf32>
    %874 = vector.broadcast %621 : f32 to vector<2x258xf32>
    %875 = arith.mulf %874, %853 : vector<2x258xf32>
    %876 = arith.addf %873, %875 : vector<2x258xf32>
    %877 = arith.maximumf %871, %876 : vector<2x258xf32>
    %878 = vector.broadcast %623 : f32 to vector<2x258xf32>
    %879 = arith.addf %877, %878 : vector<2x258xf32>
    %c0_290 = arith.constant 0 : index
    %c0_291 = arith.constant 0 : index
    %c0_292 = arith.constant 0 : index
    %880 = vector.load %arg16[%c0_290, %c0_291, %c0_292] : memref<8x2x517xf32, #tpu.memory_space<vmem>>, vector<1x2x259xf32>
    %881 = vector.shape_cast %880 : vector<1x2x259xf32> to vector<2x259xf32>
    %882 = vector.shape_cast %642 : vector<2x259xf32> to vector<1x2x259xf32>
    tpu.vector_store %arg16[%c0_290, %c0_291, %c0_292], %882 {strides = array<i32>} : memref<8x2x517xf32, #tpu.memory_space<vmem>>, vector<1x2x259xf32>,
    %c0_293 = arith.constant 0 : index
    %c0_294 = arith.constant 0 : index
    %c259 = arith.constant 259 : index
    %883 = vector.load %arg16[%c0_293, %c0_294, %c259] : memref<8x2x517xf32, #tpu.memory_space<vmem>>, vector<1x2x258xf32>
    %884 = vector.shape_cast %883 : vector<1x2x258xf32> to vector<2x258xf32>
    %885 = vector.shape_cast %783 : vector<2x258xf32> to vector<1x2x258xf32>
    tpu.vector_store %arg16[%c0_293, %c0_294, %c259], %885 {strides = array<i32>} : memref<8x2x517xf32, #tpu.memory_space<vmem>>, vector<1x2x258xf32>,
    %c1_295 = arith.constant 1 : index
    %c0_296 = arith.constant 0 : index
    %c0_297 = arith.constant 0 : index
    %886 = vector.load %arg16[%c1_295, %c0_296, %c0_297] : memref<8x2x517xf32, #tpu.memory_space<vmem>>, vector<1x2x259xf32>
    %887 = vector.shape_cast %886 : vector<1x2x259xf32> to vector<2x259xf32>
    %888 = vector.shape_cast %674 : vector<2x259xf32> to vector<1x2x259xf32>
    tpu.vector_store %arg16[%c1_295, %c0_296, %c0_297], %888 {strides = array<i32>} : memref<8x2x517xf32, #tpu.memory_space<vmem>>, vector<1x2x259xf32>,
    %c1_298 = arith.constant 1 : index
    %c0_299 = arith.constant 0 : index
    %c259_300 = arith.constant 259 : index
    %889 = vector.load %arg16[%c1_298, %c0_299, %c259_300] : memref<8x2x517xf32, #tpu.memory_space<vmem>>, vector<1x2x258xf32>
    %890 = vector.shape_cast %889 : vector<1x2x258xf32> to vector<2x258xf32>
    %891 = vector.shape_cast %815 : vector<2x258xf32> to vector<1x2x258xf32>
    tpu.vector_store %arg16[%c1_298, %c0_299, %c259_300], %891 {strides = array<i32>} : memref<8x2x517xf32, #tpu.memory_space<vmem>>, vector<1x2x258xf32>,
    %c2_301 = arith.constant 2 : index
    %c0_302 = arith.constant 0 : index
    %c0_303 = arith.constant 0 : index
    %892 = vector.load %arg16[%c2_301, %c0_302, %c0_303] : memref<8x2x517xf32, #tpu.memory_space<vmem>>, vector<1x2x259xf32>
    %893 = vector.shape_cast %892 : vector<1x2x259xf32> to vector<2x259xf32>
    %894 = vector.shape_cast %706 : vector<2x259xf32> to vector<1x2x259xf32>
    tpu.vector_store %arg16[%c2_301, %c0_302, %c0_303], %894 {strides = array<i32>} : memref<8x2x517xf32, #tpu.memory_space<vmem>>, vector<1x2x259xf32>,
    %c2_304 = arith.constant 2 : index
    %c0_305 = arith.constant 0 : index
    %c259_306 = arith.constant 259 : index
    %895 = vector.load %arg16[%c2_304, %c0_305, %c259_306] : memref<8x2x517xf32, #tpu.memory_space<vmem>>, vector<1x2x258xf32>
    %896 = vector.shape_cast %895 : vector<1x2x258xf32> to vector<2x258xf32>
    %897 = vector.shape_cast %847 : vector<2x258xf32> to vector<1x2x258xf32>
    tpu.vector_store %arg16[%c2_304, %c0_305, %c259_306], %897 {strides = array<i32>} : memref<8x2x517xf32, #tpu.memory_space<vmem>>, vector<1x2x258xf32>,
    %c3_307 = arith.constant 3 : index
    %c0_308 = arith.constant 0 : index
    %c0_309 = arith.constant 0 : index
    %898 = vector.load %arg16[%c3_307, %c0_308, %c0_309] : memref<8x2x517xf32, #tpu.memory_space<vmem>>, vector<1x2x259xf32>
    %899 = vector.shape_cast %898 : vector<1x2x259xf32> to vector<2x259xf32>
    %900 = vector.shape_cast %738 : vector<2x259xf32> to vector<1x2x259xf32>
    tpu.vector_store %arg16[%c3_307, %c0_308, %c0_309], %900 {strides = array<i32>} : memref<8x2x517xf32, #tpu.memory_space<vmem>>, vector<1x2x259xf32>,
    %c3_310 = arith.constant 3 : index
    %c0_311 = arith.constant 0 : index
    %c259_312 = arith.constant 259 : index
    %901 = vector.load %arg16[%c3_310, %c0_311, %c259_312] : memref<8x2x517xf32, #tpu.memory_space<vmem>>, vector<1x2x258xf32>
    %902 = vector.shape_cast %901 : vector<1x2x258xf32> to vector<2x258xf32>
    %903 = vector.shape_cast %879 : vector<2x258xf32> to vector<1x2x258xf32>
    tpu.vector_store %arg16[%c3_310, %c0_311, %c259_312], %903 {strides = array<i32>} : memref<8x2x517xf32, #tpu.memory_space<vmem>>, vector<1x2x258xf32>,
    %c4_313 = arith.constant 4 : index
    %c0_314 = arith.constant 0 : index
    %c0_315 = arith.constant 0 : index
    %904 = vector.load %arg16[%c4_313, %c0_314, %c0_315] : memref<8x2x517xf32, #tpu.memory_space<vmem>>, vector<1x2x258xf32>
    %905 = vector.shape_cast %904 : vector<1x2x258xf32> to vector<2x258xf32>
    %906 = vector.shape_cast %770 : vector<2x258xf32> to vector<1x2x258xf32>
    tpu.vector_store %arg16[%c4_313, %c0_314, %c0_315], %906 {strides = array<i32>} : memref<8x2x517xf32, #tpu.memory_space<vmem>>, vector<1x2x258xf32>,
    %c4_316 = arith.constant 4 : index
    %c0_317 = arith.constant 0 : index
    %c258 = arith.constant 258 : index
    %907 = vector.load %arg16[%c4_316, %c0_317, %c258] : memref<8x2x517xf32, #tpu.memory_space<vmem>>, vector<1x2x259xf32>
    %908 = vector.shape_cast %907 : vector<1x2x259xf32> to vector<2x259xf32>
    %909 = vector.shape_cast %655 : vector<2x259xf32> to vector<1x2x259xf32>
    tpu.vector_store %arg16[%c4_316, %c0_317, %c258], %909 {strides = array<i32>} : memref<8x2x517xf32, #tpu.memory_space<vmem>>, vector<1x2x259xf32>,
    %c5_318 = arith.constant 5 : index
    %c0_319 = arith.constant 0 : index
    %c0_320 = arith.constant 0 : index
    %910 = vector.load %arg16[%c5_318, %c0_319, %c0_320] : memref<8x2x517xf32, #tpu.memory_space<vmem>>, vector<1x2x258xf32>
    %911 = vector.shape_cast %910 : vector<1x2x258xf32> to vector<2x258xf32>
    %912 = vector.shape_cast %802 : vector<2x258xf32> to vector<1x2x258xf32>
    tpu.vector_store %arg16[%c5_318, %c0_319, %c0_320], %912 {strides = array<i32>} : memref<8x2x517xf32, #tpu.memory_space<vmem>>, vector<1x2x258xf32>,
    %c5_321 = arith.constant 5 : index
    %c0_322 = arith.constant 0 : index
    %c258_323 = arith.constant 258 : index
    %913 = vector.load %arg16[%c5_321, %c0_322, %c258_323] : memref<8x2x517xf32, #tpu.memory_space<vmem>>, vector<1x2x259xf32>
    %914 = vector.shape_cast %913 : vector<1x2x259xf32> to vector<2x259xf32>
    %915 = vector.shape_cast %687 : vector<2x259xf32> to vector<1x2x259xf32>
    tpu.vector_store %arg16[%c5_321, %c0_322, %c258_323], %915 {strides = array<i32>} : memref<8x2x517xf32, #tpu.memory_space<vmem>>, vector<1x2x259xf32>,
    %c6_324 = arith.constant 6 : index
    %c0_325 = arith.constant 0 : index
    %c0_326 = arith.constant 0 : index
    %916 = vector.load %arg16[%c6_324, %c0_325, %c0_326] : memref<8x2x517xf32, #tpu.memory_space<vmem>>, vector<1x2x258xf32>
    %917 = vector.shape_cast %916 : vector<1x2x258xf32> to vector<2x258xf32>
    %918 = vector.shape_cast %834 : vector<2x258xf32> to vector<1x2x258xf32>
    tpu.vector_store %arg16[%c6_324, %c0_325, %c0_326], %918 {strides = array<i32>} : memref<8x2x517xf32, #tpu.memory_space<vmem>>, vector<1x2x258xf32>,
    %c6_327 = arith.constant 6 : index
    %c0_328 = arith.constant 0 : index
    %c258_329 = arith.constant 258 : index
    %919 = vector.load %arg16[%c6_327, %c0_328, %c258_329] : memref<8x2x517xf32, #tpu.memory_space<vmem>>, vector<1x2x259xf32>
    %920 = vector.shape_cast %919 : vector<1x2x259xf32> to vector<2x259xf32>
    %921 = vector.shape_cast %719 : vector<2x259xf32> to vector<1x2x259xf32>
    tpu.vector_store %arg16[%c6_327, %c0_328, %c258_329], %921 {strides = array<i32>} : memref<8x2x517xf32, #tpu.memory_space<vmem>>, vector<1x2x259xf32>,
    %c7_330 = arith.constant 7 : index
    %c0_331 = arith.constant 0 : index
    %c0_332 = arith.constant 0 : index
    %922 = vector.load %arg16[%c7_330, %c0_331, %c0_332] : memref<8x2x517xf32, #tpu.memory_space<vmem>>, vector<1x2x258xf32>
    %923 = vector.shape_cast %922 : vector<1x2x258xf32> to vector<2x258xf32>
    %924 = vector.shape_cast %866 : vector<2x258xf32> to vector<1x2x258xf32>
    tpu.vector_store %arg16[%c7_330, %c0_331, %c0_332], %924 {strides = array<i32>} : memref<8x2x517xf32, #tpu.memory_space<vmem>>, vector<1x2x258xf32>,
    %c7_333 = arith.constant 7 : index
    %c0_334 = arith.constant 0 : index
    %c258_335 = arith.constant 258 : index
    %925 = vector.load %arg16[%c7_333, %c0_334, %c258_335] : memref<8x2x517xf32, #tpu.memory_space<vmem>>, vector<1x2x259xf32>
    %926 = vector.shape_cast %925 : vector<1x2x259xf32> to vector<2x259xf32>
    %927 = vector.shape_cast %751 : vector<2x259xf32> to vector<1x2x259xf32>
    tpu.vector_store %arg16[%c7_333, %c0_334, %c258_335], %927 {strides = array<i32>} : memref<8x2x517xf32, #tpu.memory_space<vmem>>, vector<1x2x259xf32>,
    %c8_336 = arith.constant 8 : index
    %928 = memref.load %arg0[%c8_336] : memref<20xf32, #tpu.memory_space<smem>>
    %c9_337 = arith.constant 9 : index
    %929 = memref.load %arg0[%c9_337] : memref<20xf32, #tpu.memory_space<smem>>
    %c10_338 = arith.constant 10 : index
    %930 = memref.load %arg0[%c10_338] : memref<20xf32, #tpu.memory_space<smem>>
    %c11_339 = arith.constant 11 : index
    %931 = memref.load %arg0[%c11_339] : memref<20xf32, #tpu.memory_space<smem>>
    %c4_340 = arith.constant 4 : index
    %932 = memref.load %arg1[%c4_340] : memref<10xf32, #tpu.memory_space<smem>>
    %c5_341 = arith.constant 5 : index
    %933 = memref.load %arg1[%c5_341] : memref<10xf32, #tpu.memory_space<smem>>
    %c0_342 = arith.constant 0 : index
    %c0_343 = arith.constant 0 : index
    %c0_344 = arith.constant 0 : index
    %934 = vector.load %arg16[%c0_342, %c0_343, %c0_344] : memref<8x2x517xf32, #tpu.memory_space<vmem>>, vector<1x2x517xf32>
    %935 = vector.shape_cast %934 : vector<1x2x517xf32> to vector<2x517xf32>
    %c1_345 = arith.constant 1 : index
    %c0_346 = arith.constant 0 : index
    %c0_347 = arith.constant 0 : index
    %936 = vector.load %arg16[%c1_345, %c0_346, %c0_347] : memref<8x2x517xf32, #tpu.memory_space<vmem>>, vector<1x2x517xf32>
    %937 = vector.shape_cast %936 : vector<1x2x517xf32> to vector<2x517xf32>
    %c2_348 = arith.constant 2 : index
    %c0_349 = arith.constant 0 : index
    %c0_350 = arith.constant 0 : index
    %938 = vector.load %arg16[%c2_348, %c0_349, %c0_350] : memref<8x2x517xf32, #tpu.memory_space<vmem>>, vector<1x2x517xf32>
    %939 = vector.shape_cast %938 : vector<1x2x517xf32> to vector<2x517xf32>
    %940 = vector.broadcast %928 : f32 to vector<2x517xf32>
    %941 = arith.mulf %940, %935 : vector<2x517xf32>
    %942 = vector.broadcast %929 : f32 to vector<2x517xf32>
    %943 = arith.mulf %942, %937 : vector<2x517xf32>
    %944 = arith.addf %941, %943 : vector<2x517xf32>
    %945 = vector.broadcast %928 : f32 to vector<2x517xf32>
    %946 = arith.mulf %945, %937 : vector<2x517xf32>
    %947 = vector.broadcast %929 : f32 to vector<2x517xf32>
    %948 = arith.mulf %947, %939 : vector<2x517xf32>
    %949 = arith.addf %946, %948 : vector<2x517xf32>
    %950 = arith.maximumf %944, %949 : vector<2x517xf32>
    %951 = vector.broadcast %932 : f32 to vector<2x517xf32>
    %952 = arith.addf %950, %951 : vector<2x517xf32>
    %953 = vector.broadcast %930 : f32 to vector<2x517xf32>
    %954 = arith.mulf %953, %935 : vector<2x517xf32>
    %955 = vector.broadcast %931 : f32 to vector<2x517xf32>
    %956 = arith.mulf %955, %937 : vector<2x517xf32>
    %957 = arith.addf %954, %956 : vector<2x517xf32>
    %958 = vector.broadcast %930 : f32 to vector<2x517xf32>
    %959 = arith.mulf %958, %937 : vector<2x517xf32>
    %960 = vector.broadcast %931 : f32 to vector<2x517xf32>
    %961 = arith.mulf %960, %939 : vector<2x517xf32>
    %962 = arith.addf %959, %961 : vector<2x517xf32>
    %963 = arith.maximumf %957, %962 : vector<2x517xf32>
    %964 = vector.broadcast %933 : f32 to vector<2x517xf32>
    %965 = arith.addf %963, %964 : vector<2x517xf32>
    %c2_351 = arith.constant 2 : index
    %c0_352 = arith.constant 0 : index
    %c0_353 = arith.constant 0 : index
    %966 = vector.load %arg16[%c2_351, %c0_352, %c0_353] : memref<8x2x517xf32, #tpu.memory_space<vmem>>, vector<1x2x517xf32>
    %967 = vector.shape_cast %966 : vector<1x2x517xf32> to vector<2x517xf32>
    %c3_354 = arith.constant 3 : index
    %c0_355 = arith.constant 0 : index
    %c0_356 = arith.constant 0 : index
    %968 = vector.load %arg16[%c3_354, %c0_355, %c0_356] : memref<8x2x517xf32, #tpu.memory_space<vmem>>, vector<1x2x517xf32>
    %969 = vector.shape_cast %968 : vector<1x2x517xf32> to vector<2x517xf32>
    %c4_357 = arith.constant 4 : index
    %c0_358 = arith.constant 0 : index
    %c0_359 = arith.constant 0 : index
    %970 = vector.load %arg16[%c4_357, %c0_358, %c0_359] : memref<8x2x517xf32, #tpu.memory_space<vmem>>, vector<1x2x517xf32>
    %971 = vector.shape_cast %970 : vector<1x2x517xf32> to vector<2x517xf32>
    %972 = vector.broadcast %928 : f32 to vector<2x517xf32>
    %973 = arith.mulf %972, %967 : vector<2x517xf32>
    %974 = vector.broadcast %929 : f32 to vector<2x517xf32>
    %975 = arith.mulf %974, %969 : vector<2x517xf32>
    %976 = arith.addf %973, %975 : vector<2x517xf32>
    %977 = vector.broadcast %928 : f32 to vector<2x517xf32>
    %978 = arith.mulf %977, %969 : vector<2x517xf32>
    %979 = vector.broadcast %929 : f32 to vector<2x517xf32>
    %980 = arith.mulf %979, %971 : vector<2x517xf32>
    %981 = arith.addf %978, %980 : vector<2x517xf32>
    %982 = arith.maximumf %976, %981 : vector<2x517xf32>
    %983 = vector.broadcast %932 : f32 to vector<2x517xf32>
    %984 = arith.addf %982, %983 : vector<2x517xf32>
    %985 = vector.broadcast %930 : f32 to vector<2x517xf32>
    %986 = arith.mulf %985, %967 : vector<2x517xf32>
    %987 = vector.broadcast %931 : f32 to vector<2x517xf32>
    %988 = arith.mulf %987, %969 : vector<2x517xf32>
    %989 = arith.addf %986, %988 : vector<2x517xf32>
    %990 = vector.broadcast %930 : f32 to vector<2x517xf32>
    %991 = arith.mulf %990, %969 : vector<2x517xf32>
    %992 = vector.broadcast %931 : f32 to vector<2x517xf32>
    %993 = arith.mulf %992, %971 : vector<2x517xf32>
    %994 = arith.addf %991, %993 : vector<2x517xf32>
    %995 = arith.maximumf %989, %994 : vector<2x517xf32>
    %996 = vector.broadcast %933 : f32 to vector<2x517xf32>
    %997 = arith.addf %995, %996 : vector<2x517xf32>
    %c4_360 = arith.constant 4 : index
    %c0_361 = arith.constant 0 : index
    %c0_362 = arith.constant 0 : index
    %998 = vector.load %arg16[%c4_360, %c0_361, %c0_362] : memref<8x2x517xf32, #tpu.memory_space<vmem>>, vector<1x2x517xf32>
    %999 = vector.shape_cast %998 : vector<1x2x517xf32> to vector<2x517xf32>
    %c5_363 = arith.constant 5 : index
    %c0_364 = arith.constant 0 : index
    %c0_365 = arith.constant 0 : index
    %1000 = vector.load %arg16[%c5_363, %c0_364, %c0_365] : memref<8x2x517xf32, #tpu.memory_space<vmem>>, vector<1x2x517xf32>
    %1001 = vector.shape_cast %1000 : vector<1x2x517xf32> to vector<2x517xf32>
    %c6_366 = arith.constant 6 : index
    %c0_367 = arith.constant 0 : index
    %c0_368 = arith.constant 0 : index
    %1002 = vector.load %arg16[%c6_366, %c0_367, %c0_368] : memref<8x2x517xf32, #tpu.memory_space<vmem>>, vector<1x2x517xf32>
    %1003 = vector.shape_cast %1002 : vector<1x2x517xf32> to vector<2x517xf32>
    %1004 = vector.broadcast %928 : f32 to vector<2x517xf32>
    %1005 = arith.mulf %1004, %999 : vector<2x517xf32>
    %1006 = vector.broadcast %929 : f32 to vector<2x517xf32>
    %1007 = arith.mulf %1006, %1001 : vector<2x517xf32>
    %1008 = arith.addf %1005, %1007 : vector<2x517xf32>
    %1009 = vector.broadcast %928 : f32 to vector<2x517xf32>
    %1010 = arith.mulf %1009, %1001 : vector<2x517xf32>
    %1011 = vector.broadcast %929 : f32 to vector<2x517xf32>
    %1012 = arith.mulf %1011, %1003 : vector<2x517xf32>
    %1013 = arith.addf %1010, %1012 : vector<2x517xf32>
    %1014 = arith.maximumf %1008, %1013 : vector<2x517xf32>
    %1015 = vector.broadcast %932 : f32 to vector<2x517xf32>
    %1016 = arith.addf %1014, %1015 : vector<2x517xf32>
    %1017 = vector.broadcast %930 : f32 to vector<2x517xf32>
    %1018 = arith.mulf %1017, %999 : vector<2x517xf32>
    %1019 = vector.broadcast %931 : f32 to vector<2x517xf32>
    %1020 = arith.mulf %1019, %1001 : vector<2x517xf32>
    %1021 = arith.addf %1018, %1020 : vector<2x517xf32>
    %1022 = vector.broadcast %930 : f32 to vector<2x517xf32>
    %1023 = arith.mulf %1022, %1001 : vector<2x517xf32>
    %1024 = vector.broadcast %931 : f32 to vector<2x517xf32>
    %1025 = arith.mulf %1024, %1003 : vector<2x517xf32>
    %1026 = arith.addf %1023, %1025 : vector<2x517xf32>
    %1027 = arith.maximumf %1021, %1026 : vector<2x517xf32>
    %1028 = vector.broadcast %933 : f32 to vector<2x517xf32>
    %1029 = arith.addf %1027, %1028 : vector<2x517xf32>
    %c6_369 = arith.constant 6 : index
    %c0_370 = arith.constant 0 : index
    %c0_371 = arith.constant 0 : index
    %1030 = vector.load %arg16[%c6_369, %c0_370, %c0_371] : memref<8x2x517xf32, #tpu.memory_space<vmem>>, vector<1x2x516xf32>
    %1031 = vector.shape_cast %1030 : vector<1x2x516xf32> to vector<2x516xf32>
    %c7_372 = arith.constant 7 : index
    %c0_373 = arith.constant 0 : index
    %c0_374 = arith.constant 0 : index
    %1032 = vector.load %arg16[%c7_372, %c0_373, %c0_374] : memref<8x2x517xf32, #tpu.memory_space<vmem>>, vector<1x2x516xf32>
    %1033 = vector.shape_cast %1032 : vector<1x2x516xf32> to vector<2x516xf32>
    %c0_375 = arith.constant 0 : index
    %c0_376 = arith.constant 0 : index
    %c1_377 = arith.constant 1 : index
    %1034 = vector.load %arg16[%c0_375, %c0_376, %c1_377] : memref<8x2x517xf32, #tpu.memory_space<vmem>>, vector<1x2x516xf32>
    %1035 = vector.shape_cast %1034 : vector<1x2x516xf32> to vector<2x516xf32>
    %1036 = vector.broadcast %928 : f32 to vector<2x516xf32>
    %1037 = arith.mulf %1036, %1031 : vector<2x516xf32>
    %1038 = vector.broadcast %929 : f32 to vector<2x516xf32>
    %1039 = arith.mulf %1038, %1033 : vector<2x516xf32>
    %1040 = arith.addf %1037, %1039 : vector<2x516xf32>
    %1041 = vector.broadcast %928 : f32 to vector<2x516xf32>
    %1042 = arith.mulf %1041, %1033 : vector<2x516xf32>
    %1043 = vector.broadcast %929 : f32 to vector<2x516xf32>
    %1044 = arith.mulf %1043, %1035 : vector<2x516xf32>
    %1045 = arith.addf %1042, %1044 : vector<2x516xf32>
    %1046 = arith.maximumf %1040, %1045 : vector<2x516xf32>
    %1047 = vector.broadcast %932 : f32 to vector<2x516xf32>
    %1048 = arith.addf %1046, %1047 : vector<2x516xf32>
    %1049 = vector.broadcast %930 : f32 to vector<2x516xf32>
    %1050 = arith.mulf %1049, %1031 : vector<2x516xf32>
    %1051 = vector.broadcast %931 : f32 to vector<2x516xf32>
    %1052 = arith.mulf %1051, %1033 : vector<2x516xf32>
    %1053 = arith.addf %1050, %1052 : vector<2x516xf32>
    %1054 = vector.broadcast %930 : f32 to vector<2x516xf32>
    %1055 = arith.mulf %1054, %1033 : vector<2x516xf32>
    %1056 = vector.broadcast %931 : f32 to vector<2x516xf32>
    %1057 = arith.mulf %1056, %1035 : vector<2x516xf32>
    %1058 = arith.addf %1055, %1057 : vector<2x516xf32>
    %1059 = arith.maximumf %1053, %1058 : vector<2x516xf32>
    %1060 = vector.broadcast %933 : f32 to vector<2x516xf32>
    %1061 = arith.addf %1059, %1060 : vector<2x516xf32>
    %c0_378 = arith.constant 0 : index
    %c0_379 = arith.constant 0 : index
    %c0_380 = arith.constant 0 : index
    %1062 = vector.load %arg17[%c0_378, %c0_379, %c0_380] : memref<4x2x1034xf32, #tpu.memory_space<vmem>>, vector<1x2x517xf32>
    %1063 = vector.shape_cast %1062 : vector<1x2x517xf32> to vector<2x517xf32>
    %1064 = vector.shape_cast %952 : vector<2x517xf32> to vector<1x2x517xf32>
    tpu.vector_store %arg17[%c0_378, %c0_379, %c0_380], %1064 {strides = array<i32>} : memref<4x2x1034xf32, #tpu.memory_space<vmem>>, vector<1x2x517xf32>,
    %c0_381 = arith.constant 0 : index
    %c0_382 = arith.constant 0 : index
    %c517 = arith.constant 517 : index
    %1065 = vector.load %arg17[%c0_381, %c0_382, %c517] : memref<4x2x1034xf32, #tpu.memory_space<vmem>>, vector<1x2x517xf32>
    %1066 = vector.shape_cast %1065 : vector<1x2x517xf32> to vector<2x517xf32>
    %1067 = vector.shape_cast %997 : vector<2x517xf32> to vector<1x2x517xf32>
    tpu.vector_store %arg17[%c0_381, %c0_382, %c517], %1067 {strides = array<i32>} : memref<4x2x1034xf32, #tpu.memory_space<vmem>>, vector<1x2x517xf32>,
    %c1_383 = arith.constant 1 : index
    %c0_384 = arith.constant 0 : index
    %c0_385 = arith.constant 0 : index
    %1068 = vector.load %arg17[%c1_383, %c0_384, %c0_385] : memref<4x2x1034xf32, #tpu.memory_space<vmem>>, vector<1x2x517xf32>
    %1069 = vector.shape_cast %1068 : vector<1x2x517xf32> to vector<2x517xf32>
    %1070 = vector.shape_cast %984 : vector<2x517xf32> to vector<1x2x517xf32>
    tpu.vector_store %arg17[%c1_383, %c0_384, %c0_385], %1070 {strides = array<i32>} : memref<4x2x1034xf32, #tpu.memory_space<vmem>>, vector<1x2x517xf32>,
    %c1_386 = arith.constant 1 : index
    %c0_387 = arith.constant 0 : index
    %c517_388 = arith.constant 517 : index
    %1071 = vector.load %arg17[%c1_386, %c0_387, %c517_388] : memref<4x2x1034xf32, #tpu.memory_space<vmem>>, vector<1x2x517xf32>
    %1072 = vector.shape_cast %1071 : vector<1x2x517xf32> to vector<2x517xf32>
    %1073 = vector.shape_cast %1029 : vector<2x517xf32> to vector<1x2x517xf32>
    tpu.vector_store %arg17[%c1_386, %c0_387, %c517_388], %1073 {strides = array<i32>} : memref<4x2x1034xf32, #tpu.memory_space<vmem>>, vector<1x2x517xf32>,
    %c2_389 = arith.constant 2 : index
    %c0_390 = arith.constant 0 : index
    %c0_391 = arith.constant 0 : index
    %1074 = vector.load %arg17[%c2_389, %c0_390, %c0_391] : memref<4x2x1034xf32, #tpu.memory_space<vmem>>, vector<1x2x517xf32>
    %1075 = vector.shape_cast %1074 : vector<1x2x517xf32> to vector<2x517xf32>
    %1076 = vector.shape_cast %1016 : vector<2x517xf32> to vector<1x2x517xf32>
    tpu.vector_store %arg17[%c2_389, %c0_390, %c0_391], %1076 {strides = array<i32>} : memref<4x2x1034xf32, #tpu.memory_space<vmem>>, vector<1x2x517xf32>,
    %c2_392 = arith.constant 2 : index
    %c0_393 = arith.constant 0 : index
    %c517_394 = arith.constant 517 : index
    %1077 = vector.load %arg17[%c2_392, %c0_393, %c517_394] : memref<4x2x1034xf32, #tpu.memory_space<vmem>>, vector<1x2x516xf32>
    %1078 = vector.shape_cast %1077 : vector<1x2x516xf32> to vector<2x516xf32>
    %1079 = vector.shape_cast %1061 : vector<2x516xf32> to vector<1x2x516xf32>
    tpu.vector_store %arg17[%c2_392, %c0_393, %c517_394], %1079 {strides = array<i32>} : memref<4x2x1034xf32, #tpu.memory_space<vmem>>, vector<1x2x516xf32>,
    %c3_395 = arith.constant 3 : index
    %c0_396 = arith.constant 0 : index
    %c0_397 = arith.constant 0 : index
    %1080 = vector.load %arg17[%c3_395, %c0_396, %c0_397] : memref<4x2x1034xf32, #tpu.memory_space<vmem>>, vector<1x2x516xf32>
    %1081 = vector.shape_cast %1080 : vector<1x2x516xf32> to vector<2x516xf32>
    %1082 = vector.shape_cast %1048 : vector<2x516xf32> to vector<1x2x516xf32>
    tpu.vector_store %arg17[%c3_395, %c0_396, %c0_397], %1082 {strides = array<i32>} : memref<4x2x1034xf32, #tpu.memory_space<vmem>>, vector<1x2x516xf32>,
    %c3_398 = arith.constant 3 : index
    %c0_399 = arith.constant 0 : index
    %c516 = arith.constant 516 : index
    %1083 = vector.load %arg17[%c3_398, %c0_399, %c516] : memref<4x2x1034xf32, #tpu.memory_space<vmem>>, vector<1x2x517xf32>
    %1084 = vector.shape_cast %1083 : vector<1x2x517xf32> to vector<2x517xf32>
    %1085 = vector.shape_cast %965 : vector<2x517xf32> to vector<1x2x517xf32>
    tpu.vector_store %arg17[%c3_398, %c0_399, %c516], %1085 {strides = array<i32>} : memref<4x2x1034xf32, #tpu.memory_space<vmem>>, vector<1x2x517xf32>,
    %c12_400 = arith.constant 12 : index
    %1086 = memref.load %arg0[%c12_400] : memref<20xf32, #tpu.memory_space<smem>>
    %c13_401 = arith.constant 13 : index
    %1087 = memref.load %arg0[%c13_401] : memref<20xf32, #tpu.memory_space<smem>>
    %c14_402 = arith.constant 14 : index
    %1088 = memref.load %arg0[%c14_402] : memref<20xf32, #tpu.memory_space<smem>>
    %c15_403 = arith.constant 15 : index
    %1089 = memref.load %arg0[%c15_403] : memref<20xf32, #tpu.memory_space<smem>>
    %c6_404 = arith.constant 6 : index
    %1090 = memref.load %arg1[%c6_404] : memref<10xf32, #tpu.memory_space<smem>>
    %c7_405 = arith.constant 7 : index
    %1091 = memref.load %arg1[%c7_405] : memref<10xf32, #tpu.memory_space<smem>>
    %c0_406 = arith.constant 0 : index
    %c0_407 = arith.constant 0 : index
    %c0_408 = arith.constant 0 : index
    %1092 = vector.load %arg17[%c0_406, %c0_407, %c0_408] : memref<4x2x1034xf32, #tpu.memory_space<vmem>>, vector<1x2x1033xf32>
    %1093 = vector.shape_cast %1092 : vector<1x2x1033xf32> to vector<2x1033xf32>
    %c1_409 = arith.constant 1 : index
    %c0_410 = arith.constant 0 : index
    %c0_411 = arith.constant 0 : index
    %1094 = vector.load %arg17[%c1_409, %c0_410, %c0_411] : memref<4x2x1034xf32, #tpu.memory_space<vmem>>, vector<1x2x1033xf32>
    %1095 = vector.shape_cast %1094 : vector<1x2x1033xf32> to vector<2x1033xf32>
    %c2_412 = arith.constant 2 : index
    %c0_413 = arith.constant 0 : index
    %c0_414 = arith.constant 0 : index
    %1096 = vector.load %arg17[%c2_412, %c0_413, %c0_414] : memref<4x2x1034xf32, #tpu.memory_space<vmem>>, vector<1x2x1033xf32>
    %1097 = vector.shape_cast %1096 : vector<1x2x1033xf32> to vector<2x1033xf32>
    %1098 = vector.broadcast %1086 : f32 to vector<2x1033xf32>
    %1099 = arith.mulf %1098, %1093 : vector<2x1033xf32>
    %1100 = vector.broadcast %1087 : f32 to vector<2x1033xf32>
    %1101 = arith.mulf %1100, %1095 : vector<2x1033xf32>
    %1102 = arith.addf %1099, %1101 : vector<2x1033xf32>
    %1103 = vector.broadcast %1086 : f32 to vector<2x1033xf32>
    %1104 = arith.mulf %1103, %1095 : vector<2x1033xf32>
    %1105 = vector.broadcast %1087 : f32 to vector<2x1033xf32>
    %1106 = arith.mulf %1105, %1097 : vector<2x1033xf32>
    %1107 = arith.addf %1104, %1106 : vector<2x1033xf32>
    %1108 = arith.maximumf %1102, %1107 : vector<2x1033xf32>
    %1109 = vector.broadcast %1090 : f32 to vector<2x1033xf32>
    %1110 = arith.addf %1108, %1109 : vector<2x1033xf32>
    %1111 = vector.broadcast %1088 : f32 to vector<2x1033xf32>
    %1112 = arith.mulf %1111, %1093 : vector<2x1033xf32>
    %1113 = vector.broadcast %1089 : f32 to vector<2x1033xf32>
    %1114 = arith.mulf %1113, %1095 : vector<2x1033xf32>
    %1115 = arith.addf %1112, %1114 : vector<2x1033xf32>
    %1116 = vector.broadcast %1088 : f32 to vector<2x1033xf32>
    %1117 = arith.mulf %1116, %1095 : vector<2x1033xf32>
    %1118 = vector.broadcast %1089 : f32 to vector<2x1033xf32>
    %1119 = arith.mulf %1118, %1097 : vector<2x1033xf32>
    %1120 = arith.addf %1117, %1119 : vector<2x1033xf32>
    %1121 = arith.maximumf %1115, %1120 : vector<2x1033xf32>
    %1122 = vector.broadcast %1091 : f32 to vector<2x1033xf32>
    %1123 = arith.addf %1121, %1122 : vector<2x1033xf32>
    %c2_415 = arith.constant 2 : index
    %c0_416 = arith.constant 0 : index
    %c0_417 = arith.constant 0 : index
    %1124 = vector.load %arg17[%c2_415, %c0_416, %c0_417] : memref<4x2x1034xf32, #tpu.memory_space<vmem>>, vector<1x2x1033xf32>
    %1125 = vector.shape_cast %1124 : vector<1x2x1033xf32> to vector<2x1033xf32>
    %c3_418 = arith.constant 3 : index
    %c0_419 = arith.constant 0 : index
    %c0_420 = arith.constant 0 : index
    %1126 = vector.load %arg17[%c3_418, %c0_419, %c0_420] : memref<4x2x1034xf32, #tpu.memory_space<vmem>>, vector<1x2x1033xf32>
    %1127 = vector.shape_cast %1126 : vector<1x2x1033xf32> to vector<2x1033xf32>
    %c0_421 = arith.constant 0 : index
    %c0_422 = arith.constant 0 : index
    %c1_423 = arith.constant 1 : index
    %1128 = vector.load %arg17[%c0_421, %c0_422, %c1_423] : memref<4x2x1034xf32, #tpu.memory_space<vmem>>, vector<1x2x1033xf32>
    %1129 = vector.shape_cast %1128 : vector<1x2x1033xf32> to vector<2x1033xf32>
    %1130 = vector.broadcast %1086 : f32 to vector<2x1033xf32>
    %1131 = arith.mulf %1130, %1125 : vector<2x1033xf32>
    %1132 = vector.broadcast %1087 : f32 to vector<2x1033xf32>
    %1133 = arith.mulf %1132, %1127 : vector<2x1033xf32>
    %1134 = arith.addf %1131, %1133 : vector<2x1033xf32>
    %1135 = vector.broadcast %1086 : f32 to vector<2x1033xf32>
    %1136 = arith.mulf %1135, %1127 : vector<2x1033xf32>
    %1137 = vector.broadcast %1087 : f32 to vector<2x1033xf32>
    %1138 = arith.mulf %1137, %1129 : vector<2x1033xf32>
    %1139 = arith.addf %1136, %1138 : vector<2x1033xf32>
    %1140 = arith.maximumf %1134, %1139 : vector<2x1033xf32>
    %1141 = vector.broadcast %1090 : f32 to vector<2x1033xf32>
    %1142 = arith.addf %1140, %1141 : vector<2x1033xf32>
    %1143 = vector.broadcast %1088 : f32 to vector<2x1033xf32>
    %1144 = arith.mulf %1143, %1125 : vector<2x1033xf32>
    %1145 = vector.broadcast %1089 : f32 to vector<2x1033xf32>
    %1146 = arith.mulf %1145, %1127 : vector<2x1033xf32>
    %1147 = arith.addf %1144, %1146 : vector<2x1033xf32>
    %1148 = vector.broadcast %1088 : f32 to vector<2x1033xf32>
    %1149 = arith.mulf %1148, %1127 : vector<2x1033xf32>
    %1150 = vector.broadcast %1089 : f32 to vector<2x1033xf32>
    %1151 = arith.mulf %1150, %1129 : vector<2x1033xf32>
    %1152 = arith.addf %1149, %1151 : vector<2x1033xf32>
    %1153 = arith.maximumf %1147, %1152 : vector<2x1033xf32>
    %1154 = vector.broadcast %1091 : f32 to vector<2x1033xf32>
    %1155 = arith.addf %1153, %1154 : vector<2x1033xf32>
    %c0_424 = arith.constant 0 : index
    %c0_425 = arith.constant 0 : index
    %c0_426 = arith.constant 0 : index
    %1156 = vector.load %arg18[%c0_424, %c0_425, %c0_426] : memref<2x2x2066xf32, #tpu.memory_space<vmem>>, vector<1x2x1033xf32>
    %1157 = vector.shape_cast %1156 : vector<1x2x1033xf32> to vector<2x1033xf32>
    %1158 = vector.shape_cast %1110 : vector<2x1033xf32> to vector<1x2x1033xf32>
    tpu.vector_store %arg18[%c0_424, %c0_425, %c0_426], %1158 {strides = array<i32>} : memref<2x2x2066xf32, #tpu.memory_space<vmem>>, vector<1x2x1033xf32>,
    %c0_427 = arith.constant 0 : index
    %c0_428 = arith.constant 0 : index
    %c1033 = arith.constant 1033 : index
    %1159 = vector.load %arg18[%c0_427, %c0_428, %c1033] : memref<2x2x2066xf32, #tpu.memory_space<vmem>>, vector<1x2x1033xf32>
    %1160 = vector.shape_cast %1159 : vector<1x2x1033xf32> to vector<2x1033xf32>
    %1161 = vector.shape_cast %1123 : vector<2x1033xf32> to vector<1x2x1033xf32>
    tpu.vector_store %arg18[%c0_427, %c0_428, %c1033], %1161 {strides = array<i32>} : memref<2x2x2066xf32, #tpu.memory_space<vmem>>, vector<1x2x1033xf32>,
    %c1_429 = arith.constant 1 : index
    %c0_430 = arith.constant 0 : index
    %c0_431 = arith.constant 0 : index
    %1162 = vector.load %arg18[%c1_429, %c0_430, %c0_431] : memref<2x2x2066xf32, #tpu.memory_space<vmem>>, vector<1x2x1033xf32>
    %1163 = vector.shape_cast %1162 : vector<1x2x1033xf32> to vector<2x1033xf32>
    %1164 = vector.shape_cast %1142 : vector<2x1033xf32> to vector<1x2x1033xf32>
    tpu.vector_store %arg18[%c1_429, %c0_430, %c0_431], %1164 {strides = array<i32>} : memref<2x2x2066xf32, #tpu.memory_space<vmem>>, vector<1x2x1033xf32>,
    %c1_432 = arith.constant 1 : index
    %c0_433 = arith.constant 0 : index
    %c1033_434 = arith.constant 1033 : index
    %1165 = vector.load %arg18[%c1_432, %c0_433, %c1033_434] : memref<2x2x2066xf32, #tpu.memory_space<vmem>>, vector<1x2x1033xf32>
    %1166 = vector.shape_cast %1165 : vector<1x2x1033xf32> to vector<2x1033xf32>
    %1167 = vector.shape_cast %1155 : vector<2x1033xf32> to vector<1x2x1033xf32>
    tpu.vector_store %arg18[%c1_432, %c0_433, %c1033_434], %1167 {strides = array<i32>} : memref<2x2x2066xf32, #tpu.memory_space<vmem>>, vector<1x2x1033xf32>,
    %c16_435 = arith.constant 16 : index
    %1168 = memref.load %arg0[%c16_435] : memref<20xf32, #tpu.memory_space<smem>>
    %c17_436 = arith.constant 17 : index
    %1169 = memref.load %arg0[%c17_436] : memref<20xf32, #tpu.memory_space<smem>>
    %c18_437 = arith.constant 18 : index
    %1170 = memref.load %arg0[%c18_437] : memref<20xf32, #tpu.memory_space<smem>>
    %c19_438 = arith.constant 19 : index
    %1171 = memref.load %arg0[%c19_438] : memref<20xf32, #tpu.memory_space<smem>>
    %c8_439 = arith.constant 8 : index
    %1172 = memref.load %arg1[%c8_439] : memref<10xf32, #tpu.memory_space<smem>>
    %c9_440 = arith.constant 9 : index
    %1173 = memref.load %arg1[%c9_440] : memref<10xf32, #tpu.memory_space<smem>>
    %c0_441 = arith.constant 0 : index
    %c0_442 = arith.constant 0 : index
    %c0_443 = arith.constant 0 : index
    %1174 = vector.load %arg18[%c0_441, %c0_442, %c0_443] : memref<2x2x2066xf32, #tpu.memory_space<vmem>>, vector<1x2x2065xf32>
    %1175 = vector.shape_cast %1174 : vector<1x2x2065xf32> to vector<2x2065xf32>
    %c1_444 = arith.constant 1 : index
    %c0_445 = arith.constant 0 : index
    %c0_446 = arith.constant 0 : index
    %1176 = vector.load %arg18[%c1_444, %c0_445, %c0_446] : memref<2x2x2066xf32, #tpu.memory_space<vmem>>, vector<1x2x2065xf32>
    %1177 = vector.shape_cast %1176 : vector<1x2x2065xf32> to vector<2x2065xf32>
    %c0_447 = arith.constant 0 : index
    %c0_448 = arith.constant 0 : index
    %c1_449 = arith.constant 1 : index
    %1178 = vector.load %arg18[%c0_447, %c0_448, %c1_449] : memref<2x2x2066xf32, #tpu.memory_space<vmem>>, vector<1x2x2065xf32>
    %1179 = vector.shape_cast %1178 : vector<1x2x2065xf32> to vector<2x2065xf32>
    %1180 = vector.broadcast %1168 : f32 to vector<2x2065xf32>
    %1181 = arith.mulf %1180, %1175 : vector<2x2065xf32>
    %1182 = vector.broadcast %1169 : f32 to vector<2x2065xf32>
    %1183 = arith.mulf %1182, %1177 : vector<2x2065xf32>
    %1184 = arith.addf %1181, %1183 : vector<2x2065xf32>
    %1185 = vector.broadcast %1168 : f32 to vector<2x2065xf32>
    %1186 = arith.mulf %1185, %1177 : vector<2x2065xf32>
    %1187 = vector.broadcast %1169 : f32 to vector<2x2065xf32>
    %1188 = arith.mulf %1187, %1179 : vector<2x2065xf32>
    %1189 = arith.addf %1186, %1188 : vector<2x2065xf32>
    %1190 = arith.maximumf %1184, %1189 : vector<2x2065xf32>
    %1191 = vector.broadcast %1172 : f32 to vector<2x2065xf32>
    %1192 = arith.addf %1190, %1191 : vector<2x2065xf32>
    %1193 = vector.broadcast %1170 : f32 to vector<2x2065xf32>
    %1194 = arith.mulf %1193, %1175 : vector<2x2065xf32>
    %1195 = vector.broadcast %1171 : f32 to vector<2x2065xf32>
    %1196 = arith.mulf %1195, %1177 : vector<2x2065xf32>
    %1197 = arith.addf %1194, %1196 : vector<2x2065xf32>
    %1198 = vector.broadcast %1170 : f32 to vector<2x2065xf32>
    %1199 = arith.mulf %1198, %1177 : vector<2x2065xf32>
    %1200 = vector.broadcast %1171 : f32 to vector<2x2065xf32>
    %1201 = arith.mulf %1200, %1179 : vector<2x2065xf32>
    %1202 = arith.addf %1199, %1201 : vector<2x2065xf32>
    %1203 = arith.maximumf %1197, %1202 : vector<2x2065xf32>
    %1204 = vector.broadcast %1173 : f32 to vector<2x2065xf32>
    %1205 = arith.addf %1203, %1204 : vector<2x2065xf32>
    %c0_i32_450 = arith.constant 0 : i32
    %1206 = tpu.memref_slice %arg21[%c0_i32_450] : memref<2x!tpu.dma_semaphore, #tpu.memory_space<semaphore_mem>> -> memref<1x!tpu.dma_semaphore, #tpu.memory_space<semaphore_mem>>
    %1207 = tpu.memref_squeeze %1206 : memref<1x!tpu.dma_semaphore, #tpu.memory_space<semaphore_mem>> -> memref<!tpu.dma_semaphore, #tpu.memory_space<semaphore_mem>>
    tpu.wait_dma2 semaphore(%1207 : memref<!tpu.dma_semaphore, #tpu.memory_space<semaphore_mem>>) src(%arg3 : memref<2065x128xf32, #tpu.memory_space<any>>) dst(%arg19 : memref<2065x128xf32, #tpu.memory_space<vmem>>)
    %c1_i32_451 = arith.constant 1 : i32
    %1208 = tpu.memref_slice %arg21[%c1_i32_451] : memref<2x!tpu.dma_semaphore, #tpu.memory_space<semaphore_mem>> -> memref<1x!tpu.dma_semaphore, #tpu.memory_space<semaphore_mem>>
    %1209 = tpu.memref_squeeze %1208 : memref<1x!tpu.dma_semaphore, #tpu.memory_space<semaphore_mem>> -> memref<!tpu.dma_semaphore, #tpu.memory_space<semaphore_mem>>
    tpu.wait_dma2 semaphore(%1209 : memref<!tpu.dma_semaphore, #tpu.memory_space<semaphore_mem>>) src(%arg4 : memref<2065x128xf32, #tpu.memory_space<any>>) dst(%arg20 : memref<2065x128xf32, #tpu.memory_space<vmem>>)
    %c0_452 = arith.constant 0 : index
    %c0_453 = arith.constant 0 : index
    %1210 = vector.load %arg19[%c0_452, %c0_453] : memref<2065x128xf32, #tpu.memory_space<vmem>>, vector<2065x128xf32>
    %cst = arith.constant dense<0.000000e+00> : vector<2x128xf32>
    %1211 = tpu.matmul %1192, %1210, %cst {dimension_numbers = #tpu.dot_dimension_numbers<[1], [0], [0], [1], [0, 0, 1, 1], [], []>} : vector<2x2065xf32>, vector<2065x128xf32>, vector<2x128xf32> -> vector<2x128xf32>
    %c0_454 = arith.constant 0 : index
    %c0_455 = arith.constant 0 : index
    %1212 = vector.load %arg20[%c0_454, %c0_455] : memref<2065x128xf32, #tpu.memory_space<vmem>>, vector<2065x128xf32>
    %cst_456 = arith.constant dense<0.000000e+00> : vector<2x128xf32>
    %1213 = tpu.matmul %1205, %1212, %cst_456 {dimension_numbers = #tpu.dot_dimension_numbers<[1], [0], [0], [1], [0, 0, 1, 1], [], []>} : vector<2x2065xf32>, vector<2065x128xf32>, vector<2x128xf32> -> vector<2x128xf32>
    %1214 = arith.addf %1211, %1213 : vector<2x128xf32>
    %c0_457 = arith.constant 0 : index
    %c0_458 = arith.constant 0 : index
    %1215 = vector.load %arg5[%c0_457, %c0_458] : memref<1x128xf32, #tpu.memory_space<vmem>>, vector<1x128xf32>
    %1216 = vector.broadcast %1215 : vector<1x128xf32> to vector<2x128xf32>
    %1217 = arith.addf %1214, %1216 : vector<2x128xf32>
    %cst_459 = arith.constant 0.000000e+00 : f32
    %1218 = vector.broadcast %cst_459 : f32 to vector<2x128xf32>
    %1219 = arith.maximumf %1217, %1218 : vector<2x128xf32>
    %c0_460 = arith.constant 0 : index
    %c0_461 = arith.constant 0 : index
    %1220 = vector.load %arg6[%c0_460, %c0_461] : memref<128x64xf32, #tpu.memory_space<vmem>>, vector<128x64xf32>
    %cst_462 = arith.constant dense<0.000000e+00> : vector<2x64xf32>
    %1221 = tpu.matmul %1219, %1220, %cst_462 {dimension_numbers = #tpu.dot_dimension_numbers<[1], [0], [0], [1], [0, 0, 1, 1], [], []>} : vector<2x128xf32>, vector<128x64xf32>, vector<2x64xf32> -> vector<2x64xf32>
    %c0_463 = arith.constant 0 : index
    %c0_464 = arith.constant 0 : index
    %1222 = vector.load %arg7[%c0_463, %c0_464] : memref<1x64xf32, #tpu.memory_space<vmem>>, vector<1x64xf32>
    %1223 = vector.broadcast %1222 : vector<1x64xf32> to vector<2x64xf32>
    %1224 = arith.addf %1221, %1223 : vector<2x64xf32>
    %cst_465 = arith.constant 0.000000e+00 : f32
    %1225 = vector.broadcast %cst_465 : f32 to vector<2x64xf32>
    %1226 = arith.maximumf %1224, %1225 : vector<2x64xf32>
    %c0_466 = arith.constant 0 : index
    %c0_467 = arith.constant 0 : index
    %1227 = vector.load %arg8[%c0_466, %c0_467] : memref<64x32xf32, #tpu.memory_space<vmem>>, vector<64x32xf32>
    %cst_468 = arith.constant dense<0.000000e+00> : vector<2x32xf32>
    %1228 = tpu.matmul %1226, %1227, %cst_468 {dimension_numbers = #tpu.dot_dimension_numbers<[1], [0], [0], [1], [0, 0, 1, 1], [], []>} : vector<2x64xf32>, vector<64x32xf32>, vector<2x32xf32> -> vector<2x32xf32>
    %c0_469 = arith.constant 0 : index
    %c0_470 = arith.constant 0 : index
    %1229 = vector.load %arg9[%c0_469, %c0_470] : memref<1x32xf32, #tpu.memory_space<vmem>>, vector<1x32xf32>
    %1230 = vector.broadcast %1229 : vector<1x32xf32> to vector<2x32xf32>
    %1231 = arith.addf %1228, %1230 : vector<2x32xf32>
    %cst_471 = arith.constant 0.000000e+00 : f32
    %1232 = vector.broadcast %cst_471 : f32 to vector<2x32xf32>
    %1233 = arith.maximumf %1231, %1232 : vector<2x32xf32>
    %c0_472 = arith.constant 0 : index
    %c0_473 = arith.constant 0 : index
    %1234 = vector.load %arg10[%c0_472, %c0_473] : memref<32x16xf32, #tpu.memory_space<vmem>>, vector<32x16xf32>
    %cst_474 = arith.constant dense<0.000000e+00> : vector<2x16xf32>
    %1235 = tpu.matmul %1233, %1234, %cst_474 {dimension_numbers = #tpu.dot_dimension_numbers<[1], [0], [0], [1], [0, 0, 1, 1], [], []>} : vector<2x32xf32>, vector<32x16xf32>, vector<2x16xf32> -> vector<2x16xf32>
    %c0_475 = arith.constant 0 : index
    %c0_476 = arith.constant 0 : index
    %1236 = vector.load %arg11[%c0_475, %c0_476] : memref<1x16xf32, #tpu.memory_space<vmem>>, vector<1x16xf32>
    %1237 = vector.broadcast %1236 : vector<1x16xf32> to vector<2x16xf32>
    %1238 = arith.addf %1235, %1237 : vector<2x16xf32>
    %cst_477 = arith.constant 0.000000e+00 : f32
    %1239 = vector.broadcast %cst_477 : f32 to vector<2x16xf32>
    %1240 = arith.maximumf %1238, %1239 : vector<2x16xf32>
    %c0_478 = arith.constant 0 : index
    %c0_479 = arith.constant 0 : index
    %1241 = vector.load %arg12[%c0_478, %c0_479] : memref<16x8xf32, #tpu.memory_space<vmem>>, vector<16x8xf32>
    %cst_480 = arith.constant dense<0.000000e+00> : vector<2x8xf32>
    %1242 = tpu.matmul %1240, %1241, %cst_480 {dimension_numbers = #tpu.dot_dimension_numbers<[1], [0], [0], [1], [0, 0, 1, 1], [], []>} : vector<2x16xf32>, vector<16x8xf32>, vector<2x8xf32> -> vector<2x8xf32>
    %c0_481 = arith.constant 0 : index
    %c0_482 = arith.constant 0 : index
    %1243 = vector.load %arg13[%c0_481, %c0_482] : memref<1x8xf32, #tpu.memory_space<vmem>>, vector<1x8xf32>
    %1244 = vector.broadcast %1243 : vector<1x8xf32> to vector<2x8xf32>
    %1245 = arith.addf %1242, %1244 : vector<2x8xf32>
    %c0_483 = arith.constant 0 : index
    %c0_484 = arith.constant 0 : index
    %1246 = vector.load %arg14[%c0_483, %c0_484] : memref<2x8xf32, #tpu.memory_space<vmem>>, vector<2x8xf32>
    tpu.vector_store %arg14[%c0_483, %c0_484], %1245 {strides = array<i32>} : memref<2x8xf32, #tpu.memory_space<vmem>>, vector<2x8xf32>,
    return
  }
}

</mosaic_0001>

<bundles_post_ra>
// kernel: model_forward.1
= control target key start
LH: loop header
LB: loop body
LE: loop exit
PB: predicated region body
PF: predicated region fallthrough
CT: control target
= control target key end

     0   :  { %19 = vsyncpa [#allocation11], 0  ;;  %s7469_s0 = inlined_call_operand.vmem [shape: f32[20], index: 0, kind: input, shape index: {}]   ;;  %s7470_s1 = inlined_call_operand.vmem [shape: f32[10], index: 1, kind: input, shape index: {}]   ;;  %s7471_s2 = inlined_call_operand.vmem [shape: f32[32,2,130], index: 2, kind: input, shape index: {}]   ;;  %s7472_s3 = inlined_call_operand.vmem [shape: f32[2065,128], index: 3, kind: input, shape index: {}]   ;;  %s7473_s4 = inlined_call_operand.vmem [shape: f32[2065,128], index: 4, kind: input, shape index: {}]   ;;  %s7474_s5 = inlined_call_operand.vmem [shape: f32[1,128], index: 5, kind: input, shape index: {}]   ;;  %s7475_s6 = inlined_call_operand.vmem [shape: f32[128,64], index: 6, kind: input, shape index: {}]   ;;  %s7476_s7 = inlined_call_operand.vmem [shape: f32[1,64], index: 7, kind: input, shape index: {}]   ;;  %s7477_s8 = inlined_call_operand.vmem [shape: f32[64,32], index: 8, kind: input, shape index: {}]   ;;  %s7478_s9 = inlined_call_operand.vmem [shape: f32[1,32], index: 9, kind: input, shape index: {}]   ;;  %s7479_s10 = inlined_call_operand.vmem [shape: f32[32,16], index: 10, kind: input, shape index: {}]   ;;  %s7480_s11 = inlined_call_operand.vmem [shape: f32[1,16], index: 11, kind: input, shape index: {}]   ;;  %s7481_s12 = inlined_call_operand.vmem [shape: f32[16,8], index: 12, kind: input, shape index: {}]   ;;  %s7482_s13 = inlined_call_operand.vmem [shape: f32[1,8], index: 13, kind: input, shape index: {}]   ;;  %s7483_s14 = inlined_call_operand.hbm [shape: f32[2,8], index: 14, kind: output, shape index: {}]  }
   0x1   :  { %20 = vsyncpa [#allocation13], 0 }
   0x2   :  { %21 = vsyncpa [#allocation10], 0  ;;  %s27_s15 = sshll.u32 %s7469_s0, 4  ;;  %s36_s18 = sshll.u32 %s7470_s1, 4  ;;  %s28_s15 = int_to_ptr.vmem [resolvable:$true] %s27_s15  ;;  %s37_s18 = int_to_ptr.vmem [resolvable:$true] %s36_s18 }
   0x3   :  { %s4193_s19 = smov [#allocation9]   ;;  %s4194_s20 = smov [#allocation12]  }
   0x4   :  { %30 = dma.vmem_to_smem %s28_s15, 16, %s4193_s19, [#allocation11]  }
   0x5   :  { %39 = dma.vmem_to_smem %s37_s18, 16, %s4194_s20, [#allocation13]  }
   0x6   :  { %4183 = dma.done.wait [#allocation11], 16  }
   0x7   :  { %4184 = vsyncadd [#allocation11], 4294967280 }
   0x8   :  { %4185 = dma.done.wait [#allocation13], 16  }
   0x9   :  { %4186 = vsyncadd [#allocation13], 4294967280 }
   0xa   :  { %68 = sfence }
   0xb   :  { %v81_v0 = vld [vmem:[%s7472_s3] sm:$0xff]  ;;  %v83_v1 = vld [vmem:[%s7472_s3 + $0x8] sm:$0xff]  ;;  %v85_v2 = vld [vmem:[%s7472_s3 + $0x10] sm:$0xff] }
   0xc   :  { %82 = vst [vmem:[#allocation6 + $0x4c8] sm:$0xff] %v81_v0  ;;  %v87_v3 = vld [vmem:[%s7472_s3 + $0x18] sm:$0xff]  ;;  %v89_v4 = vld [vmem:[%s7472_s3 + $0x20] sm:$0xff]  ;;  %v91_v5 = vld [vmem:[%s7472_s3 + $0x28] sm:$0xff] }
   0xd   :  { %84 = vst [vmem:[#allocation6 + $0x808] sm:$0xff] %v83_v1  ;;  %v93_v6 = vld [vmem:[%s7472_s3 + $0x30] sm:$0xff]  ;;  %v95_v7 = vld [vmem:[%s7472_s3 + $0x38] sm:$0xff]  ;;  %v97_v8 = vld [vmem:[%s7472_s3 + $0x40] sm:$0xff] }
   0xe   :  { %86 = vst [vmem:[#allocation6 + $0x7f8] sm:$0xff] %v85_v2  ;;  %v99_v9 = vld [vmem:[%s7472_s3 + $0x48] sm:$0xff]  ;;  %v101_v10 = vld [vmem:[%s7472_s3 + $0x50] sm:$0xff]  ;;  %v103_v11 = vld [vmem:[%s7472_s3 + $0x58] sm:$0xff] }
   0xf   :  { %88 = vst [vmem:[#allocation6 + $0x758] sm:$0xff] %v87_v3  ;;  %v105_v12 = vld [vmem:[%s7472_s3 + $0x60] sm:$0xff]  ;;  %v107_v13 = vld [vmem:[%s7472_s3 + $0x68] sm:$0xff]  ;;  %v109_v14 = vld [vmem:[%s7472_s3 + $0x70] sm:$0xff] }
  0x10   :  { %90 = vst [vmem:[#allocation6 + $0x320] sm:$0xff] %v89_v4  ;;  %v111_v15 = vld [vmem:[%s7472_s3 + $0x78] sm:$0xff]  ;;  %v113_v16 = vld [vmem:[%s7472_s3 + $0x80] sm:$0xff]  ;;  %v115_v17 = vld [vmem:[%s7472_s3 + $0x88] sm:$0xff] }
  0x11   :  { %92 = vst [vmem:[#allocation6 + $0x438] sm:$0xff] %v91_v5  ;;  %v117_v18 = vld [vmem:[%s7472_s3 + $0x90] sm:$0xff]  ;;  %v119_v19 = vld [vmem:[%s7472_s3 + $0x98] sm:$0xff]  ;;  %v121_v20 = vld [vmem:[%s7472_s3 + $0xa0] sm:$0xff] }
  0x12   :  { %94 = vst [vmem:[#allocation6 + $0x370] sm:$0xff] %v93_v6  ;;  %v123_v21 = vld [vmem:[%s7472_s3 + $0xa8] sm:$0xff]  ;;  %v125_v22 = vld [vmem:[%s7472_s3 + $0xb0] sm:$0xff]  ;;  %v127_v23 = vld [vmem:[%s7472_s3 + $0xb8] sm:$0xff] }
  0x13   :  { %96 = vst [vmem:[#allocation6 + $0x100] sm:$0xff] %v95_v7  ;;  %v129_v24 = vld [vmem:[%s7472_s3 + $0xc0] sm:$0xff]  ;;  %v131_v25 = vld [vmem:[%s7472_s3 + $0xc8] sm:$0xff]  ;;  %v133_v26 = vld [vmem:[%s7472_s3 + $0xd0] sm:$0xff] }
  0x14   :  { %98 = vst [vmem:[#allocation6 + $0x508] sm:$0xff] %v97_v8  ;;  %v135_v27 = vld [vmem:[%s7472_s3 + $0xd8] sm:$0xff]  ;;  %v137_v28 = vld [vmem:[%s7472_s3 + $0xe0] sm:$0xff]  ;;  %v139_v29 = vld [vmem:[%s7472_s3 + $0xe8] sm:$0xff] }
  0x15   :  { %100 = vst [vmem:[#allocation6 + $0x488] sm:$0xff] %v99_v9  ;;  %v141_v30 = vld [vmem:[%s7472_s3 + $0xf0] sm:$0xff]  ;;  %v143_v31 = vld [vmem:[%s7472_s3 + $0xf8] sm:$0xff]  ;;  %v145_v32 = vld [vmem:[%s7472_s3 + $0x100] sm:$0xff] }
  0x16   :  { %102 = vst [vmem:[#allocation6 + $0x310] sm:$0xff] %v101_v10  ;;  %v147_v33 = vld [vmem:[%s7472_s3 + $0x108] sm:$0xff]  ;;  %v149_v34 = vld [vmem:[%s7472_s3 + $0x110] sm:$0xff]  ;;  %v151_v35 = vld [vmem:[%s7472_s3 + $0x118] sm:$0xff] }
  0x17   :  { %104 = vst [vmem:[#allocation6 + $0x540] sm:$0xff] %v103_v11  ;;  %v153_v36 = vld [vmem:[%s7472_s3 + $0x120] sm:$0xff]  ;;  %v155_v37 = vld [vmem:[%s7472_s3 + $0x128] sm:$0xff]  ;;  %v157_v38 = vld [vmem:[%s7472_s3 + $0x130] sm:$0xff] }
  0x18   :  { %106 = vst [vmem:[#allocation6 + $0x4f8] sm:$0xff] %v105_v12  ;;  %v159_v39 = vld [vmem:[%s7472_s3 + $0x138] sm:$0xff]  ;;  %v161_v40 = vld [vmem:[%s7472_s3 + $0x140] sm:$0xff]  ;;  %v163_v41 = vld [vmem:[%s7472_s3 + $0x148] sm:$0xff] }
  0x19   :  { %108 = vst [vmem:[#allocation6 + $0x710] sm:$0xff] %v107_v13  ;;  %v165_v42 = vld [vmem:[%s7472_s3 + $0x150] sm:$0xff]  ;;  %v167_v43 = vld [vmem:[%s7472_s3 + $0x158] sm:$0xff]  ;;  %v169_v44 = vld [vmem:[%s7472_s3 + $0x160] sm:$0xff] }
  0x1a   :  { %110 = vst [vmem:[#allocation6 + $0x6d0] sm:$0xff] %v109_v14  ;;  %v171_v45 = vld [vmem:[%s7472_s3 + $0x168] sm:$0xff]  ;;  %v173_v46 = vld [vmem:[%s7472_s3 + $0x170] sm:$0xff]  ;;  %v175_v47 = vld [vmem:[%s7472_s3 + $0x178] sm:$0xff] }
  0x1b   :  { %112 = vst [vmem:[#allocation6 + $0x778] sm:$0xff] %v111_v15  ;;  %v177_v48 = vld [vmem:[%s7472_s3 + $0x180] sm:$0xff]  ;;  %v179_v49 = vld [vmem:[%s7472_s3 + $0x188] sm:$0xff]  ;;  %v181_v50 = vld [vmem:[%s7472_s3 + $0x190] sm:$0xff] }
  0x1c   :  { %114 = vst [vmem:[#allocation6 + $0x328] sm:$0xff] %v113_v16  ;;  %v183_v51 = vld [vmem:[%s7472_s3 + $0x198] sm:$0xff]  ;;  %v185_v52 = vld [vmem:[%s7472_s3 + $0x1a0] sm:$0xff]  ;;  %v187_v53 = vld [vmem:[%s7472_s3 + $0x1a8] sm:$0xff] }
  0x1d   :  { %116 = vst [vmem:[#allocation6 + $0x730] sm:$0xff] %v115_v17  ;;  %v189_v54 = vld [vmem:[%s7472_s3 + $0x1b0] sm:$0xff]  ;;  %v191_v55 = vld [vmem:[%s7472_s3 + $0x1b8] sm:$0xff]  ;;  %v193_v56 = vld [vmem:[%s7472_s3 + $0x1c0] sm:$0xff] }
  0x1e   :  { %118 = vst [vmem:[#allocation6 + $0x2d0] sm:$0xff] %v117_v18  ;;  %v195_v57 = vld [vmem:[%s7472_s3 + $0x1c8] sm:$0xff]  ;;  %v197_v58 = vld [vmem:[%s7472_s3 + $0x1d0] sm:$0xff]  ;;  %v199_v59 = vld [vmem:[%s7472_s3 + $0x1d8] sm:$0xff] }
  0x1f   :  { %120 = vst [vmem:[#allocation6 + $0x598] sm:$0xff] %v119_v19  ;;  %v201_v60 = vld [vmem:[%s7472_s3 + $0x1e0] sm:$0xff]  ;;  %v203_v61 = vld [vmem:[%s7472_s3 + $0x1e8] sm:$0xff]  ;;  %v205_v62 = vld [vmem:[%s7472_s3 + $0x1f0] sm:$0xff] }
  0x20   :  { %122 = vst [vmem:[#allocation6 + $0x5a8] sm:$0xff] %v121_v20  ;;  %v207_v63 = vld [vmem:[%s7472_s3 + $0x1f8] sm:$0xff]  ;;  %v209_v0 = vld [vmem:[%s7472_s3 + $0x200] sm:$0xff]  ;;  %v211_v1 = vld [vmem:[%s7472_s3 + $0x208] sm:$0xff] }
  0x21   :  { %124 = vst [vmem:[#allocation6 + $0x558] sm:$0xff] %v123_v21  ;;  %v213_v2 = vld [vmem:[%s7472_s3 + $0x210] sm:$0xff]  ;;  %v215_v3 = vld [vmem:[%s7472_s3 + $0x218] sm:$0xff]  ;;  %v217_v4 = vld [vmem:[%s7472_s3 + $0x220] sm:$0xff] }
  0x22   :  { %126 = vst [vmem:[#allocation6 + $0x3d8] sm:$0xff] %v125_v22  ;;  %v219_v5 = vld [vmem:[%s7472_s3 + $0x228] sm:$0xff]  ;;  %v221_v6 = vld [vmem:[%s7472_s3 + $0x230] sm:$0xff]  ;;  %v223_v7 = vld [vmem:[%s7472_s3 + $0x238] sm:$0xff] }
  0x23   :  { %128 = vst [vmem:[#allocation6 + $0x6e8] sm:$0xff] %v127_v23  ;;  %v225_v8 = vld [vmem:[%s7472_s3 + $0x240] sm:$0xff]  ;;  %v227_v9 = vld [vmem:[%s7472_s3 + $0x248] sm:$0xff]  ;;  %v229_v10 = vld [vmem:[%s7472_s3 + $0x250] sm:$0xff] }
  0x24   :  { %130 = vst [vmem:[#allocation6 + $0x680] sm:$0xff] %v129_v24  ;;  %v231_v11 = vld [vmem:[%s7472_s3 + $0x258] sm:$0xff]  ;;  %v233_v12 = vld [vmem:[%s7472_s3 + $0x260] sm:$0xff]  ;;  %v235_v13 = vld [vmem:[%s7472_s3 + $0x268] sm:$0xff] }
  0x25   :  { %132 = vst [vmem:[#allocation6 + $0x358] sm:$0xff] %v131_v25  ;;  %v237_v14 = vld [vmem:[%s7472_s3 + $0x270] sm:$0xff]  ;;  %v239_v15 = vld [vmem:[%s7472_s3 + $0x278] sm:$0xff]  ;;  %v241_v16 = vld [vmem:[%s7472_s3 + $0x280] sm:$0xff] }
  0x26   :  { %134 = vst [vmem:[#allocation6 + $0x128] sm:$0xff] %v133_v26  ;;  %v243_v17 = vld [vmem:[%s7472_s3 + $0x288] sm:$0xff]  ;;  %v245_v18 = vld [vmem:[%s7472_s3 + $0x290] sm:$0xff]  ;;  %v247_v19 = vld [vmem:[%s7472_s3 + $0x298] sm:$0xff] }
  0x27   :  { %136 = vst [vmem:[#allocation6 + $0xb0] sm:$0xff] %v135_v27  ;;  %v249_v20 = vld [vmem:[%s7472_s3 + $0x2a0] sm:$0xff]  ;;  %v251_v21 = vld [vmem:[%s7472_s3 + $0x2a8] sm:$0xff]  ;;  %v253_v22 = vld [vmem:[%s7472_s3 + $0x2b0] sm:$0xff] }
  0x28   :  { %138 = vst [vmem:[#allocation6 + $0x1b0] sm:$0xff] %v137_v28  ;;  %v255_v23 = vld [vmem:[%s7472_s3 + $0x2b8] sm:$0xff]  ;;  %v257_v24 = vld [vmem:[%s7472_s3 + $0x2c0] sm:$0xff]  ;;  %v259_v25 = vld [vmem:[%s7472_s3 + $0x2c8] sm:$0xff] }
  0x29   :  { %140 = vst [vmem:[#allocation6 + $0x270] sm:$0xff] %v139_v29  ;;  %v261_v26 = vld [vmem:[%s7472_s3 + $0x2d0] sm:$0xff]  ;;  %v263_v27 = vld [vmem:[%s7472_s3 + $0x2d8] sm:$0xff]  ;;  %v265_v28 = vld [vmem:[%s7472_s3 + $0x2e0] sm:$0xff] }
  0x2a   :  { %142 = vst [vmem:[#allocation6 + $0xf0] sm:$0xff] %v141_v30  ;;  %v267_v29 = vld [vmem:[%s7472_s3 + $0x2e8] sm:$0xff]  ;;  %v269_v30 = vld [vmem:[%s7472_s3 + $0x2f0] sm:$0xff] }
  0x2b   :  { %144 = vst [vmem:[#allocation6 + $0x3b0] sm:$0xff] %v143_v31  ;;  %v271_v31 = vld [vmem:[%s7472_s3 + $0x2f8] sm:$0xff] }
  0x2c   :  { %146 = vst [vmem:[#allocation6 + $0x548] sm:$0xff] %v145_v32  ;;  %v273_v32 = vld [vmem:[%s7472_s3 + $0x300] sm:$0xff] }
  0x2d   :  { %148 = vst [vmem:[#allocation6 + $0x3d0] sm:$0xff] %v147_v33  ;;  %v275_v33 = vld [vmem:[%s7472_s3 + $0x308] sm:$0xff] }
  0x2e   :  { %150 = vst [vmem:[#allocation6 + $0x608] sm:$0xff] %v149_v34  ;;  %v277_v34 = vld [vmem:[%s7472_s3 + $0x310] sm:$0xff] }
  0x2f   :  { %152 = vst [vmem:[#allocation6 + $0x4b0] sm:$0xff] %v151_v35  ;;  %v279_v35 = vld [vmem:[%s7472_s3 + $0x318] sm:$0xff] }
  0x30   :  { %154 = vst [vmem:[#allocation6 + $0x7f0] sm:$0xff] %v153_v36  ;;  %v281_v36 = vld [vmem:[%s7472_s3 + $0x320] sm:$0xff] }
  0x31   :  { %156 = vst [vmem:[#allocation6 + $0x500] sm:$0xff] %v155_v37  ;;  %v283_v37 = vld [vmem:[%s7472_s3 + $0x328] sm:$0xff] }
  0x32   :  { %158 = vst [vmem:[#allocation6 + $0x7b0] sm:$0xff] %v157_v38  ;;  %v285_v38 = vld [vmem:[%s7472_s3 + $0x330] sm:$0xff] }
  0x33   :  { %160 = vst [vmem:[#allocation6 + $0x3f8] sm:$0xff] %v159_v39  ;;  %v287_v39 = vld [vmem:[%s7472_s3 + $0x338] sm:$0xff] }
  0x34   :  { %162 = vst [vmem:[#allocation6 + $0x6a0] sm:$0xff] %v161_v40  ;;  %v289_v40 = vld [vmem:[%s7472_s3 + $0x340] sm:$0xff] }
  0x35   :  { %164 = vst [vmem:[#allocation6 + $0x3f0] sm:$0xff] %v163_v41  ;;  %v291_v41 = vld [vmem:[%s7472_s3 + $0x348] sm:$0xff] }
  0x36   :  { %166 = vst [vmem:[#allocation6 + $0x2e0] sm:$0xff] %v165_v42  ;;  %v293_v42 = vld [vmem:[%s7472_s3 + $0x350] sm:$0xff] }
  0x37   :  { %168 = vst [vmem:[#allocation6 + $0x6c0] sm:$0xff] %v167_v43  ;;  %v295_v43 = vld [vmem:[%s7472_s3 + $0x358] sm:$0xff] }
  0x38   :  { %170 = vst [vmem:[#allocation6 + $0x5b8] sm:$0xff] %v169_v44  ;;  %v297_v44 = vld [vmem:[%s7472_s3 + $0x360] sm:$0xff] }
  0x39   :  { %172 = vst [vmem:[#allocation6 + $0x5e0] sm:$0xff] %v171_v45  ;;  %v299_v45 = vld [vmem:[%s7472_s3 + $0x368] sm:$0xff] }
  0x3a   :  { %174 = vst [vmem:[#allocation6 + $0x5f0] sm:$0xff] %v173_v46  ;;  %v301_v46 = vld [vmem:[%s7472_s3 + $0x370] sm:$0xff] }
  0x3b   :  { %176 = vst [vmem:[#allocation6 + $0x768] sm:$0xff] %v175_v47  ;;  %v303_v47 = vld [vmem:[%s7472_s3 + $0x378] sm:$0xff] }
  0x3c   :  { %178 = vst [vmem:[#allocation6 + $0x518] sm:$0xff] %v177_v48  ;;  %v305_v48 = vld [vmem:[%s7472_s3 + $0x380] sm:$0xff] }
  0x3d   :  { %180 = vst [vmem:[#allocation6 + $0x638] sm:$0xff] %v179_v49  ;;  %v307_v49 = vld [vmem:[%s7472_s3 + $0x388] sm:$0xff] }
  0x3e   :  { %182 = vst [vmem:[#allocation6 + $0x248] sm:$0xff] %v181_v50  ;;  %v309_v50 = vld [vmem:[%s7472_s3 + $0x390] sm:$0xff] }
  0x3f   :  { %184 = vst [vmem:[#allocation6 + $0x340] sm:$0xff] %v183_v51  ;;  %v311_v51 = vld [vmem:[%s7472_s3 + $0x398] sm:$0xff] }
  0x40   :  { %186 = vst [vmem:[#allocation6 + $0x418] sm:$0xff] %v185_v52  ;;  %v313_v52 = vld [vmem:[%s7472_s3 + $0x3a0] sm:$0xff] }
  0x41   :  { %188 = vst [vmem:[#allocation6 + $0x130] sm:$0xff] %v187_v53  ;;  %v315_v53 = vld [vmem:[%s7472_s3 + $0x3a8] sm:$0xff] }
  0x42   :  { %190 = vst [vmem:[#allocation6 + $0x618] sm:$0xff] %v189_v54  ;;  %v317_v54 = vld [vmem:[%s7472_s3 + $0x3b0] sm:$0xff] }
  0x43   :  { %192 = vst [vmem:[#allocation6 + $0x140] sm:$0xff] %v191_v55  ;;  %v319_v55 = vld [vmem:[%s7472_s3 + $0x3b8] sm:$0xff] }
  0x44   :  { %194 = vst [vmem:[#allocation6 + $0x398] sm:$0xff] %v193_v56  ;;  %v321_v56 = vld [vmem:[%s7472_s3 + $0x3c0] sm:$0xff] }
  0x45   :  { %196 = vst [vmem:[#allocation6 + $0x4e0] sm:$0xff] %v195_v57  ;;  %v323_v57 = vld [vmem:[%s7472_s3 + $0x3c8] sm:$0xff] }
  0x46   :  { %198 = vst [vmem:[#allocation6 + $0x308] sm:$0xff] %v197_v58  ;;  %v325_v58 = vld [vmem:[%s7472_s3 + $0x3d0] sm:$0xff] }
  0x47   :  { %200 = vst [vmem:[#allocation6 + $0x440] sm:$0xff] %v199_v59  ;;  %v327_v59 = vld [vmem:[%s7472_s3 + $0x3d8] sm:$0xff] }
  0x48   :  { %202 = vst [vmem:[#allocation6 + $0x28] sm:$0xff] %v201_v60  ;;  %v329_v60 = vld [vmem:[%s7472_s3 + $0x3e0] sm:$0xff] }
  0x49   :  { %204 = vst [vmem:[#allocation6 + $0x510] sm:$0xff] %v203_v61  ;;  %v331_v61 = vld [vmem:[%s7472_s3 + $0x3e8] sm:$0xff] }
  0x4a   :  { %206 = vst [vmem:[#allocation6 + $0x388] sm:$0xff] %v205_v62  ;;  %v333_v62 = vld [vmem:[%s7472_s3 + $0x3f0] sm:$0xff] }
  0x4b   :  { %208 = vst [vmem:[#allocation6 + $0x530] sm:$0xff] %v207_v63  ;;  %v335_v63 = vld [vmem:[%s7472_s3 + $0x3f8] sm:$0xff] }
  0x4c   :  { %210 = vst [vmem:[#allocation6 + $0x1b8] sm:$0xff] %v209_v0  ;;  %v337_v0 = vld [vmem:[%s7472_s3 + $0x400] sm:$0xff] }
  0x4d   :  { %212 = vst [vmem:[#allocation6 + $0x788] sm:$0xff] %v211_v1  ;;  %v339_v1 = vld [vmem:[%s7472_s3 + $0x408] sm:$0xff] }
  0x4e   :  { %214 = vst [vmem:[#allocation6 + $0x678] sm:$0xff] %v213_v2  ;;  %v341_v2 = vld [vmem:[%s7472_s3 + $0x410] sm:$0xff] }
  0x4f   :  { %216 = vst [vmem:[#allocation6 + $0x560] sm:$0xff] %v215_v3  ;;  %v343_v3 = vld [vmem:[%s7472_s3 + $0x418] sm:$0xff] }
  0x50   :  { %218 = vst [vmem:[#allocation6 + $0x610] sm:$0xff] %v217_v4  ;;  %v345_v4 = vld [vmem:[%s7472_s3 + $0x420] sm:$0xff] }
  0x51   :  { %220 = vst [vmem:[#allocation6 + $0x688] sm:$0xff] %v219_v5  ;;  %v347_v5 = vld [vmem:[%s7472_s3 + $0x428] sm:$0xff] }
  0x52   :  { %222 = vst [vmem:[#allocation6 + $0x378] sm:$0xff] %v221_v6  ;;  %v349_v6 = vld [vmem:[%s7472_s3 + $0x430] sm:$0xff] }
  0x53   :  { %224 = vst [vmem:[#allocation6 + $0xb8] sm:$0xff] %v223_v7  ;;  %v351_v7 = vld [vmem:[%s7472_s3 + $0x438] sm:$0xff] }
  0x54   :  { %226 = vst [vmem:[#allocation6 + $0x2f0] sm:$0xff] %v225_v8  ;;  %v353_v8 = vld [vmem:[%s7472_s3 + $0x440] sm:$0xff] }
  0x55   :  { %228 = vst [vmem:[#allocation6 + $0x750] sm:$0xff] %v227_v9  ;;  %v355_v9 = vld [vmem:[%s7472_s3 + $0x448] sm:$0xff] }
  0x56   :  { %230 = vst [vmem:[#allocation6 + $0x170] sm:$0xff] %v229_v10  ;;  %v357_v10 = vld [vmem:[%s7472_s3 + $0x450] sm:$0xff] }
  0x57   :  { %232 = vst [vmem:[#allocation6 + $0x88] sm:$0xff] %v231_v11  ;;  %v359_v11 = vld [vmem:[%s7472_s3 + $0x458] sm:$0xff] }
  0x58   :  { %234 = vst [vmem:[#allocation6 + $0x590] sm:$0xff] %v233_v12  ;;  %v361_v12 = vld [vmem:[%s7472_s3 + $0x460] sm:$0xff] }
  0x59   :  { %236 = vst [vmem:[#allocation6 + $0x7d0] sm:$0xff] %v235_v13  ;;  %v363_v13 = vld [vmem:[%s7472_s3 + $0x468] sm:$0xff] }
  0x5a   :  { %238 = vst [vmem:[#allocation6 + $0x70] sm:$0xff] %v237_v14  ;;  %v365_v14 = vld [vmem:[%s7472_s3 + $0x470] sm:$0xff] }
  0x5b   :  { %240 = vst [vmem:[#allocation6 + $0x390] sm:$0xff] %v239_v15  ;;  %v367_v15 = vld [vmem:[%s7472_s3 + $0x478] sm:$0xff] }
  0x5c   :  { %242 = vst [vmem:[#allocation6 + $0x1a0] sm:$0xff] %v241_v16  ;;  %v369_v16 = vld [vmem:[%s7472_s3 + $0x480] sm:$0xff] }
  0x5d   :  { %244 = vst [vmem:[#allocation6 + $0x10] sm:$0xff] %v243_v17  ;;  %v371_v17 = vld [vmem:[%s7472_s3 + $0x488] sm:$0xff] }
  0x5e   :  { %246 = vst [vmem:[#allocation6 + $0x698] sm:$0xff] %v245_v18  ;;  %v373_v18 = vld [vmem:[%s7472_s3 + $0x490] sm:$0xff] }
  0x5f   :  { %248 = vst [vmem:[#allocation6 + $0x3b8] sm:$0xff] %v247_v19  ;;  %v375_v19 = vld [vmem:[%s7472_s3 + $0x498] sm:$0xff] }
  0x60   :  { %250 = vst [vmem:[#allocation6 + $0x5d8] sm:$0xff] %v249_v20  ;;  %v377_v20 = vld [vmem:[%s7472_s3 + $0x4a0] sm:$0xff] }
  0x61   :  { %252 = vst [vmem:[#allocation6 + $0x220] sm:$0xff] %v251_v21  ;;  %v379_v21 = vld [vmem:[%s7472_s3 + $0x4a8] sm:$0xff] }
  0x62   :  { %254 = vst [vmem:[#allocation6 + $0xc0] sm:$0xff] %v253_v22  ;;  %v381_v22 = vld [vmem:[%s7472_s3 + $0x4b0] sm:$0xff] }
  0x63   :  { %256 = vst [vmem:[#allocation6 + $0x50] sm:$0xff] %v255_v23  ;;  %v383_v23 = vld [vmem:[%s7472_s3 + $0x4b8] sm:$0xff] }
  0x64   :  { %258 = vst [vmem:[#allocation6 + $0x628] sm:$0xff] %v257_v24  ;;  %v385_v24 = vld [vmem:[%s7472_s3 + $0x4c0] sm:$0xff] }
  0x65   :  { %260 = vst [vmem:[#allocation6 + $0x278] sm:$0xff] %v259_v25  ;;  %v387_v25 = vld [vmem:[%s7472_s3 + $0x4c8] sm:$0xff] }
  0x66   :  { %262 = vst [vmem:[#allocation6 + $0x1f0] sm:$0xff] %v261_v26  ;;  %v389_v26 = vld [vmem:[%s7472_s3 + $0x4d0] sm:$0xff] }
  0x67   :  { %264 = vst [vmem:[#allocation6 + $0x6d8] sm:$0xff] %v263_v27  ;;  %v391_v27 = vld [vmem:[%s7472_s3 + $0x4d8] sm:$0xff] }
  0x68   :  { %266 = vst [vmem:[#allocation6 + $0x478] sm:$0xff] %v265_v28  ;;  %v393_v28 = vld [vmem:[%s7472_s3 + $0x4e0] sm:$0xff] }
  0x69   :  { %268 = vst [vmem:[#allocation6 + $0x2c0] sm:$0xff] %v267_v29  ;;  %v395_v29 = vld [vmem:[%s7472_s3 + $0x4e8] sm:$0xff] }
  0x6a   :  { %270 = vst [vmem:[#allocation6 + $0x3a0] sm:$0xff] %v269_v30  ;;  %v397_v30 = vld [vmem:[%s7472_s3 + $0x4f0] sm:$0xff] }
  0x6b   :  { %272 = vst [vmem:[#allocation6 + $0x7c0] sm:$0xff] %v271_v31  ;;  %v399_v31 = vld [vmem:[%s7472_s3 + $0x4f8] sm:$0xff] }
  0x6c   :  { %274 = vst [vmem:[#allocation6 + $0x280] sm:$0xff] %v273_v32  ;;  %v401_v32 = vld [vmem:[%s7472_s3 + $0x500] sm:$0xff] }
  0x6d   :  { %276 = vst [vmem:[#allocation6 + $0x120] sm:$0xff] %v275_v33  ;;  %v403_v33 = vld [vmem:[%s7472_s3 + $0x508] sm:$0xff] }
  0x6e   :  { %278 = vst [vmem:[#allocation6 + $0x118] sm:$0xff] %v277_v34  ;;  %v405_v34 = vld [vmem:[%s7472_s3 + $0x510] sm:$0xff] }
  0x6f   :  { %280 = vst [vmem:[#allocation6 + $0x318] sm:$0xff] %v279_v35  ;;  %v407_v35 = vld [vmem:[%s7472_s3 + $0x518] sm:$0xff] }
  0x70   :  { %282 = vst [vmem:[#allocation6 + $0x338] sm:$0xff] %v281_v36  ;;  %v409_v36 = vld [vmem:[%s7472_s3 + $0x520] sm:$0xff] }
  0x71   :  { %284 = vst [vmem:[#allocation6 + $0x58] sm:$0xff] %v283_v37  ;;  %v411_v37 = vld [vmem:[%s7472_s3 + $0x528] sm:$0xff] }
  0x72   :  { %286 = vst [vmem:[#allocation6 + $0x588] sm:$0xff] %v285_v38  ;;  %v413_v38 = vld [vmem:[%s7472_s3 + $0x530] sm:$0xff] }
  0x73   :  { %288 = vst [vmem:[#allocation6 + $0x648] sm:$0xff] %v287_v39  ;;  %v415_v39 = vld [vmem:[%s7472_s3 + $0x538] sm:$0xff] }
  0x74   :  { %290 = vst [vmem:[#allocation6 + $0x498] sm:$0xff] %v289_v40  ;;  %v417_v40 = vld [vmem:[%s7472_s3 + $0x540] sm:$0xff] }
  0x75   :  { %292 = vst [vmem:[#allocation6 + $0x18] sm:$0xff] %v291_v41  ;;  %v419_v41 = vld [vmem:[%s7472_s3 + $0x548] sm:$0xff] }
  0x76   :  { %294 = vst [vmem:[#allocation6 + $0x800] sm:$0xff] %v293_v42  ;;  %v421_v42 = vld [vmem:[%s7472_s3 + $0x550] sm:$0xff] }
  0x77   :  { %296 = vst [vmem:[#allocation6 + $0xa8] sm:$0xff] %v295_v43  ;;  %v423_v43 = vld [vmem:[%s7472_s3 + $0x558] sm:$0xff] }
  0x78   :  { %298 = vst [vmem:[#allocation6 + $0x110] sm:$0xff] %v297_v44  ;;  %v425_v44 = vld [vmem:[%s7472_s3 + $0x560] sm:$0xff] }
  0x79   :  { %300 = vst [vmem:[#allocation6 + $0xf8] sm:$0xff] %v299_v45  ;;  %v427_v45 = vld [vmem:[%s7472_s3 + $0x568] sm:$0xff] }
  0x7a   :  { %302 = vst [vmem:[#allocation6 + $0x5c0] sm:$0xff] %v301_v46  ;;  %v429_v46 = vld [vmem:[%s7472_s3 + $0x570] sm:$0xff] }
  0x7b   :  { %304 = vst [vmem:[#allocation6 + $0x810] sm:$0xff] %v303_v47  ;;  %v431_v47 = vld [vmem:[%s7472_s3 + $0x578] sm:$0xff] }
  0x7c   :  { %306 = vst [vmem:[#allocation6 + $0x640] sm:$0xff] %v305_v48  ;;  %v433_v48 = vld [vmem:[%s7472_s3 + $0x580] sm:$0xff] }
  0x7d   :  { %308 = vst [vmem:[#allocation6 + $0x188] sm:$0xff] %v307_v49  ;;  %v435_v49 = vld [vmem:[%s7472_s3 + $0x588] sm:$0xff] }
  0x7e   :  { %310 = vst [vmem:[#allocation6 + $0x380] sm:$0xff] %v309_v50  ;;  %v437_v50 = vld [vmem:[%s7472_s3 + $0x590] sm:$0xff] }
  0x7f   :  { %312 = vst [vmem:[#allocation6 + $0x458] sm:$0xff] %v311_v51  ;;  %v439_v51 = vld [vmem:[%s7472_s3 + $0x598] sm:$0xff] }
  0x80   :  { %314 = vst [vmem:[#allocation6 + $0x2f8] sm:$0xff] %v313_v52  ;;  %v441_v52 = vld [vmem:[%s7472_s3 + $0x5a0] sm:$0xff] }
  0x81   :  { %316 = vst [vmem:[#allocation6 + $0xe8] sm:$0xff] %v315_v53  ;;  %v443_v53 = vld [vmem:[%s7472_s3 + $0x5a8] sm:$0xff] }
  0x82   :  { %318 = vst [vmem:[#allocation6 + $0x5c8] sm:$0xff] %v317_v54  ;;  %v445_v54 = vld [vmem:[%s7472_s3 + $0x5b0] sm:$0xff] }
  0x83   :  { %320 = vst [vmem:[#allocation6 + $0x6c8] sm:$0xff] %v319_v55  ;;  %v447_v55 = vld [vmem:[%s7472_s3 + $0x5b8] sm:$0xff] }
  0x84   :  { %322 = vst [vmem:[#allocation6 + $0x410] sm:$0xff] %v321_v56  ;;  %v449_v56 = vld [vmem:[%s7472_s3 + $0x5c0] sm:$0xff] }
  0x85   :  { %324 = vst [vmem:[#allocation6 + $0x30] sm:$0xff] %v323_v57  ;;  %v451_v57 = vld [vmem:[%s7472_s3 + $0x5c8] sm:$0xff] }
  0x86   :  { %326 = vst [vmem:[#allocation6 + $0x98] sm:$0xff] %v325_v58  ;;  %v453_v58 = vld [vmem:[%s7472_s3 + $0x5d0] sm:$0xff] }
  0x87   :  { %328 = vst [vmem:[#allocation6 + $0x4d0] sm:$0xff] %v327_v59  ;;  %v455_v59 = vld [vmem:[%s7472_s3 + $0x5d8] sm:$0xff] }
  0x88   :  { %330 = vst [vmem:[#allocation6 + $0x178] sm:$0xff] %v329_v60  ;;  %v457_v60 = vld [vmem:[%s7472_s3 + $0x5e0] sm:$0xff] }
  0x89   :  { %332 = vst [vmem:[#allocation6 + $0x600] sm:$0xff] %v331_v61  ;;  %v459_v61 = vld [vmem:[%s7472_s3 + $0x5e8] sm:$0xff] }
  0x8a   :  { %334 = vst [vmem:[#allocation6 + $0x2b0] sm:$0xff] %v333_v62  ;;  %v461_v62 = vld [vmem:[%s7472_s3 + $0x5f0] sm:$0xff] }
  0x8b   :  { %336 = vst [vmem:[#allocation6 + $0x700] sm:$0xff] %v335_v63  ;;  %v463_v63 = vld [vmem:[%s7472_s3 + $0x5f8] sm:$0xff] }
  0x8c   :  { %338 = vst [vmem:[#allocation6 + $0x148] sm:$0xff] %v337_v0  ;;  %v465_v0 = vld [vmem:[%s7472_s3 + $0x600] sm:$0xff] }
  0x8d   :  { %340 = vst [vmem:[#allocation6 + $0xa0] sm:$0xff] %v339_v1  ;;  %v467_v1 = vld [vmem:[%s7472_s3 + $0x608] sm:$0xff] }
  0x8e   :  { %342 = vst [vmem:[#allocation6 + $0x4b8] sm:$0xff] %v341_v2  ;;  %v469_v2 = vld [vmem:[%s7472_s3 + $0x610] sm:$0xff] }
  0x8f   :  { %344 = vst [vmem:[#allocation6 + $0x2a0] sm:$0xff] %v343_v3  ;;  %v471_v3 = vld [vmem:[%s7472_s3 + $0x618] sm:$0xff] }
  0x90   :  { %346 = vst [vmem:[#allocation6 + $0x448] sm:$0xff] %v345_v4  ;;  %v473_v4 = vld [vmem:[%s7472_s3 + $0x620] sm:$0xff] }
  0x91   :  { %348 = vst [vmem:[#allocation6 + $0x218] sm:$0xff] %v347_v5  ;;  %v475_v5 = vld [vmem:[%s7472_s3 + $0x628] sm:$0xff] }
  0x92   :  { %350 = vst [vmem:[#allocation6 + $0x240] sm:$0xff] %v349_v6  ;;  %v477_v6 = vld [vmem:[%s7472_s3 + $0x630] sm:$0xff] }
  0x93   :  { %352 = vst [vmem:[#allocation6 + $0x3a8] sm:$0xff] %v351_v7  ;;  %v479_v7 = vld [vmem:[%s7472_s3 + $0x638] sm:$0xff] }
  0x94   :  { %354 = vst [vmem:[#allocation6 + $0x198] sm:$0xff] %v353_v8  ;;  %v481_v8 = vld [vmem:[%s7472_s3 + $0x640] sm:$0xff] }
  0x95   :  { %356 = vst [vmem:[#allocation6 + $0x6b0] sm:$0xff] %v355_v9  ;;  %v483_v9 = vld [vmem:[%s7472_s3 + $0x648] sm:$0xff] }
  0x96   :  { %358 = vst [vmem:[#allocation6 + $0xd8] sm:$0xff] %v357_v10  ;;  %v485_v10 = vld [vmem:[%s7472_s3 + $0x650] sm:$0xff] }
  0x97   :  { %360 = vst [vmem:[#allocation6 + $0x450] sm:$0xff] %v359_v11  ;;  %v487_v11 = vld [vmem:[%s7472_s3 + $0x658] sm:$0xff] }
  0x98   :  { %362 = vst [vmem:[#allocation6 + $0x6e0] sm:$0xff] %v361_v12  ;;  %v489_v12 = vld [vmem:[%s7472_s3 + $0x660] sm:$0xff] }
  0x99   :  { %364 = vst [vmem:[#allocation6 + $0x290] sm:$0xff] %v363_v13  ;;  %v491_v13 = vld [vmem:[%s7472_s3 + $0x668] sm:$0xff] }
  0x9a   :  { %366 = vst [vmem:[#allocation6 + $0x740] sm:$0xff] %v365_v14  ;;  %v493_v14 = vld [vmem:[%s7472_s3 + $0x670] sm:$0xff] }
  0x9b   :  { %368 = vst [vmem:[#allocation6 + $0x668] sm:$0xff] %v367_v15  ;;  %v495_v15 = vld [vmem:[%s7472_s3 + $0x678] sm:$0xff] }
  0x9c   :  { %370 = vst [vmem:[#allocation6 + $0x468] sm:$0xff] %v369_v16  ;;  %v497_v16 = vld [vmem:[%s7472_s3 + $0x680] sm:$0xff] }
  0x9d   :  { %372 = vst [vmem:[#allocation6 + $0x630] sm:$0xff] %v371_v17  ;;  %v499_v17 = vld [vmem:[%s7472_s3 + $0x688] sm:$0xff] }
  0x9e   :  { %374 = vst [vmem:[#allocation6 + $0x470] sm:$0xff] %v373_v18  ;;  %v501_v18 = vld [vmem:[%s7472_s3 + $0x690] sm:$0xff] }
  0x9f   :  { %376 = vst [vmem:[#allocation6 + $0xd0] sm:$0xff] %v375_v19  ;;  %v503_v19 = vld [vmem:[%s7472_s3 + $0x698] sm:$0xff] }
  0xa0   :  { %378 = vst [vmem:[#allocation6 + $0x538] sm:$0xff] %v377_v20  ;;  %v505_v20 = vld [vmem:[%s7472_s3 + $0x6a0] sm:$0xff] }
  0xa1   :  { %380 = vst [vmem:[#allocation6 + $0x360] sm:$0xff] %v379_v21  ;;  %v507_v21 = vld [vmem:[%s7472_s3 + $0x6a8] sm:$0xff] }
  0xa2   :  { %382 = vst [vmem:[#allocation6 + $0x230] sm:$0xff] %v381_v22  ;;  %v509_v22 = vld [vmem:[%s7472_s3 + $0x6b0] sm:$0xff] }
  0xa3   :  { %384 = vst [vmem:[#allocation6 + $0x4e8] sm:$0xff] %v383_v23  ;;  %v511_v23 = vld [vmem:[%s7472_s3 + $0x6b8] sm:$0xff] }
  0xa4   :  { %386 = vst [vmem:[#allocation6 + $0x1e8] sm:$0xff] %v385_v24  ;;  %v513_v24 = vld [vmem:[%s7472_s3 + $0x6c0] sm:$0xff] }
  0xa5   :  { %388 = vst [vmem:[#allocation6 + $0x738] sm:$0xff] %v387_v25  ;;  %v515_v25 = vld [vmem:[%s7472_s3 + $0x6c8] sm:$0xff] }
  0xa6   :  { %390 = vst [vmem:[#allocation6 + $0x250] sm:$0xff] %v389_v26  ;;  %v517_v26 = vld [vmem:[%s7472_s3 + $0x6d0] sm:$0xff] }
  0xa7   :  { %392 = vst [vmem:[#allocation6 + $0x4f0] sm:$0xff] %v391_v27  ;;  %v519_v27 = vld [vmem:[%s7472_s3 + $0x6d8] sm:$0xff] }
  0xa8   :  { %394 = vst [vmem:[#allocation6 + $0x790] sm:$0xff] %v393_v28  ;;  %v521_v28 = vld [vmem:[%s7472_s3 + $0x6e0] sm:$0xff] }
  0xa9   :  { %396 = vst [vmem:[#allocation6 + $0x430] sm:$0xff] %v395_v29  ;;  %v523_v29 = vld [vmem:[%s7472_s3 + $0x6e8] sm:$0xff] }
  0xaa   :  { %398 = vst [vmem:[#allocation6 + $0x38] sm:$0xff] %v397_v30  ;;  %v525_v30 = vld [vmem:[%s7472_s3 + $0x6f0] sm:$0xff] }
  0xab   :  { %400 = vst [vmem:[#allocation6 + $0x408] sm:$0xff] %v399_v31  ;;  %v527_v31 = vld [vmem:[%s7472_s3 + $0x6f8] sm:$0xff] }
  0xac   :  { %402 = vst [vmem:[#allocation6 + $0x210] sm:$0xff] %v401_v32  ;;  %v529_v32 = vld [vmem:[%s7472_s3 + $0x700] sm:$0xff] }
  0xad   :  { %404 = vst [vmem:[#allocation6 + $0xe0] sm:$0xff] %v403_v33  ;;  %v531_v33 = vld [vmem:[%s7472_s3 + $0x708] sm:$0xff] }
  0xae   :  { %406 = vst [vmem:[#allocation6 + $0x718] sm:$0xff] %v405_v34  ;;  %v533_v34 = vld [vmem:[%s7472_s3 + $0x710] sm:$0xff] }
  0xaf   :  { %408 = vst [vmem:[#allocation6 + $0x2a8] sm:$0xff] %v407_v35  ;;  %v535_v35 = vld [vmem:[%s7472_s3 + $0x718] sm:$0xff] }
  0xb0   :  { %410 = vst [vmem:[#allocation6 + $0x160] sm:$0xff] %v409_v36  ;;  %v537_v36 = vld [vmem:[%s7472_s3 + $0x720] sm:$0xff] }
  0xb1   :  { %412 = vst [vmem:[#allocation6 + $0x770] sm:$0xff] %v411_v37  ;;  %v539_v37 = vld [vmem:[%s7472_s3 + $0x728] sm:$0xff] }
  0xb2   :  { %414 = vst [vmem:[#allocation6 + $0x6a8] sm:$0xff] %v413_v38  ;;  %v541_v38 = vld [vmem:[%s7472_s3 + $0x730] sm:$0xff] }
  0xb3   :  { %416 = vst [vmem:[#allocation6 + $0x578] sm:$0xff] %v415_v39  ;;  %v543_v39 = vld [vmem:[%s7472_s3 + $0x738] sm:$0xff] }
  0xb4   :  { %418 = vst [vmem:[#allocation6 + $0x2b8] sm:$0xff] %v417_v40  ;;  %v545_v40 = vld [vmem:[%s7472_s3 + $0x740] sm:$0xff] }
  0xb5   :  { %420 = vst [vmem:[#allocation6 + $0x60] sm:$0xff] %v419_v41  ;;  %v547_v41 = vld [vmem:[%s7472_s3 + $0x748] sm:$0xff] }
  0xb6   :  { %422 = vst [vmem:[#allocation6 + $0x550] sm:$0xff] %v421_v42  ;;  %v549_v42 = vld [vmem:[%s7472_s3 + $0x750] sm:$0xff] }
  0xb7   :  { %424 = vst [vmem:[#allocation6 + $0x670] sm:$0xff] %v423_v43  ;;  %v551_v43 = vld [vmem:[%s7472_s3 + $0x758] sm:$0xff] }
  0xb8   :  { %426 = vst [vmem:[#allocation6 + $0x2e8] sm:$0xff] %v425_v44  ;;  %v553_v44 = vld [vmem:[%s7472_s3 + $0x760] sm:$0xff] }
  0xb9   :  { %428 = vst [vmem:[#allocation6 + $0x1d8] sm:$0xff] %v427_v45  ;;  %v555_v45 = vld [vmem:[%s7472_s3 + $0x768] sm:$0xff] }
  0xba   :  { %430 = vst [vmem:[#allocation6 + $0x528] sm:$0xff] %v429_v46  ;;  %v557_v46 = vld [vmem:[%s7472_s3 + $0x770] sm:$0xff] }
  0xbb   :  { %432 = vst [vmem:[#allocation6 + $0x3e0] sm:$0xff] %v431_v47  ;;  %v559_v47 = vld [vmem:[%s7472_s3 + $0x778] sm:$0xff] }
  0xbc   :  { %434 = vst [vmem:[#allocation6 + $0x520] sm:$0xff] %v433_v48  ;;  %v561_v48 = vld [vmem:[%s7472_s3 + $0x780] sm:$0xff] }
  0xbd   :  { %436 = vst [vmem:[#allocation6 + $0x780] sm:$0xff] %v435_v49  ;;  %v563_v49 = vld [vmem:[%s7472_s3 + $0x788] sm:$0xff] }
  0xbe   :  { %438 = vst [vmem:[#allocation6 + $0x78] sm:$0xff] %v437_v50  ;;  %v565_v50 = vld [vmem:[%s7472_s3 + $0x790] sm:$0xff] }
  0xbf   :  { %440 = vst [vmem:[#allocation6 + $0x5e8] sm:$0xff] %v439_v51  ;;  %v567_v51 = vld [vmem:[%s7472_s3 + $0x798] sm:$0xff] }
  0xc0   :  { %442 = vst [vmem:[#allocation6 + $0x48] sm:$0xff] %v441_v52  ;;  %v569_v52 = vld [vmem:[%s7472_s3 + $0x7a0] sm:$0xff] }
  0xc1   :  { %444 = vst [vmem:[#allocation6 + $0x158] sm:$0xff] %v443_v53  ;;  %v571_v53 = vld [vmem:[%s7472_s3 + $0x7a8] sm:$0xff] }
  0xc2   :  { %446 = vst [vmem:[#allocation6 + $0x420] sm:$0xff] %v445_v54  ;;  %v573_v54 = vld [vmem:[%s7472_s3 + $0x7b0] sm:$0xff] }
  0xc3   :  { %448 = vst [vmem:[#allocation6 + $0x7b8] sm:$0xff] %v447_v55  ;;  %v575_v55 = vld [vmem:[%s7472_s3 + $0x7b8] sm:$0xff] }
  0xc4   :  { %450 = vst [vmem:[#allocation6 + $0x6f8] sm:$0xff] %v449_v56  ;;  %v577_v56 = vld [vmem:[%s7472_s3 + $0x7c0] sm:$0xff] }
  0xc5   :  { %452 = vst [vmem:[#allocation6 + $0x1c8] sm:$0xff] %v451_v57  ;;  %v579_v57 = vld [vmem:[%s7472_s3 + $0x7c8] sm:$0xff] }
  0xc6   :  { %454 = vst [vmem:[#allocation6 + $0x228] sm:$0xff] %v453_v58  ;;  %v581_v58 = vld [vmem:[%s7472_s3 + $0x7d0] sm:$0xff] }
  0xc7   :  { %456 = vst [vmem:[#allocation6 + $0x1a8] sm:$0xff] %v455_v59  ;;  %v583_v59 = vld [vmem:[%s7472_s3 + $0x7d8] sm:$0xff] }
  0xc8   :  { %458 = vst [vmem:[#allocation6 + $0x2c8] sm:$0xff] %v457_v60  ;;  %v585_v60 = vld [vmem:[%s7472_s3 + $0x7e0] sm:$0xff] }
  0xc9   :  { %460 = vst [vmem:[#allocation6 + $0x460] sm:$0xff] %v459_v61  ;;  %v587_v61 = vld [vmem:[%s7472_s3 + $0x7e8] sm:$0xff] }
  0xca   :  { %462 = vst [vmem:[#allocation6 + $0x190] sm:$0xff] %v461_v62  ;;  %v589_v62 = vld [vmem:[%s7472_s3 + $0x7f0] sm:$0xff] }
  0xcb   :  { %464 = vst [vmem:[#allocation6 + $0x490] sm:$0xff] %v463_v63  ;;  %v591_v63 = vld [vmem:[%s7472_s3 + $0x7f8] sm:$0xff] }
  0xcc   :  { %466 = vst [vmem:[#allocation6 + $0x7c8] sm:$0xff] %v465_v0  ;;  %v593_v0 = vld [vmem:[%s7472_s3 + $0x800] sm:$0xff] }
  0xcd   :  { %468 = vst [vmem:[#allocation6 + $0x4a0] sm:$0xff] %v467_v1  ;;  %v595_v1 = vld [vmem:[%s7472_s3 + $0x808] sm:$0xff] }
  0xce   :  { %470 = vst [vmem:[#allocation6 + $0x168] sm:$0xff] %v469_v2  ;;  %v4050_v2 = vld [vmem:[%s7472_s3 + $0x810] sm:$0x1] }
  0xcf   :  { %472 = vst [vmem:[#allocation6 + $0x690] sm:$0xff] %v471_v3 }
  0xd0   :  { %474 = vst [vmem:[#allocation6 + $0x348] sm:$0xff] %v473_v4 }
  0xd1   :  { %476 = vst [vmem:[#allocation6 + $0x200] sm:$0xff] %v475_v5 }
  0xd2   :  { %478 = vst [vmem:[#allocation6 + $0x6b8] sm:$0xff] %v477_v6 }
  0xd3   :  { %480 = vst [vmem:[#allocation6 + $0x7d8] sm:$0xff] %v479_v7 }
  0xd4   :  { %482 = vst [vmem:[#allocation6 + $0x428] sm:$0xff] %v481_v8 }
  0xd5   :  { %484 = vst [vmem:[#allocation6 + $0x580] sm:$0xff] %v483_v9 }
  0xd6   :  { %486 = vst [vmem:[#allocation6 + $0x798] sm:$0xff] %v485_v10 }
  0xd7   :  { %488 = vst [vmem:[#allocation6 + $0x720] sm:$0xff] %v487_v11 }
  0xd8   :  { %490 = vst [vmem:[#allocation6 + $0x4c0] sm:$0xff] %v489_v12 }
  0xd9   :  { %492 = vst [vmem:[#allocation6 + $0x2d8] sm:$0xff] %v491_v13 }
  0xda   :  { %494 = vst [vmem:[#allocation6 + $0x3e8] sm:$0xff] %v493_v14 }
  0xdb   :  { %496 = vst [vmem:[#allocation6 + $0x288] sm:$0xff] %v495_v15 }
  0xdc   :  { %498 = vst [vmem:[#allocation6 + $0x238] sm:$0xff] %v497_v16 }
  0xdd   :  { %500 = vst [vmem:[#allocation6 + $0x8] sm:$0xff] %v499_v17 }
  0xde   :  { %502 = vst [vmem:[#allocation6 + $0x7a0] sm:$0xff] %v501_v18 }
  0xdf   :  { %504 = vst [vmem:[#allocation6 + $0x138] sm:$0xff] %v503_v19 }
  0xe0   :  { %506 = vst [vmem:[#allocation6 + $0x298] sm:$0xff] %v505_v20 }
  0xe1   :  { %508 = vst [vmem:[#allocation6 + $0x568] sm:$0xff] %v507_v21 }
  0xe2   :  { %510 = vst [vmem:[#allocation6 + $0x5a0] sm:$0xff] %v509_v22 }
  0xe3   :  { %512 = vst [vmem:[#allocation6 + $0x208] sm:$0xff] %v511_v23 }
  0xe4   :  { %514 = vst [vmem:[#allocation6 + $0x80] sm:$0xff] %v513_v24 }
  0xe5   :  { %516 = vst [vmem:[#allocation6 + $0x330] sm:$0xff] %v515_v25 }
  0xe6   :  { %518 = vst [vmem:[#allocation6 + $0x180] sm:$0xff] %v517_v26 }
  0xe7   :  { %520 = vst [vmem:[#allocation6 + $0x708] sm:$0xff] %v519_v27 }
  0xe8   :  { %522 = vst [vmem:[#allocation6 + $0x5d0] sm:$0xff] %v521_v28 }
  0xe9   :  { %524 = vst [vmem:[#allocation6 + $0x350] sm:$0xff] %v523_v29 }
  0xea   :  { %526 = vst [vmem:[#allocation6 + $0x1e0] sm:$0xff] %v525_v30 }
  0xeb   :  { %528 = vst [vmem:[#allocation6 + $0x660] sm:$0xff] %v527_v31 }
  0xec   :  { %530 = vst [vmem:[#allocation6 + $0x7a8] sm:$0xff] %v529_v32 }
  0xed   :  { %532 = vst [vmem:[#allocation6 + $0x3c0] sm:$0xff] %v531_v33 }
  0xee   :  { %534 = vst [vmem:[#allocation6 + $0x760] sm:$0xff] %v533_v34 }
  0xef   :  { %536 = vst [vmem:[#allocation6 + $0x300] sm:$0xff] %v535_v35 }
  0xf0   :  { %538 = vst [vmem:[#allocation6 + $0x400] sm:$0xff] %v537_v36 }
  0xf1   :  { %540 = vst [vmem:[#allocation6 + $0x1d0] sm:$0xff] %v539_v37 }
  0xf2   :  { %542 = vst [vmem:[#allocation6 + $0x6f0] sm:$0xff] %v541_v38 }
  0xf3   :  { %544 = vst [vmem:[#allocation6 + $0x68] sm:$0xff] %v543_v39 }
  0xf4   :  { %546 = vst [vmem:[#allocation6 + $0x90] sm:$0xff] %v545_v40 }
  0xf5   :  { %548 = vst [vmem:[#allocation6 + $0x570] sm:$0xff] %v547_v41 }
  0xf6   :  { %550 = vst [vmem:[#allocation6 + $0xc8] sm:$0xff] %v549_v42 }
  0xf7   :  { %552 = vst [vmem:[#allocation6 + $0x7e0] sm:$0xff] %v551_v43 }
  0xf8   :  { %554 = vst [vmem:[#allocation6 + $0x40] sm:$0xff] %v553_v44 }
  0xf9   :  { %556 = vst [vmem:[#allocation6 + $0x260] sm:$0xff] %v555_v45 }
  0xfa   :  { %558 = vst [vmem:[#allocation6 + $0x620] sm:$0xff] %v557_v46 }
  0xfb   :  { %560 = vst [vmem:[#allocation6 + $0x650] sm:$0xff] %v559_v47 }
  0xfc   :  { %562 = vst [vmem:[#allocation6 + $0x1c0] sm:$0xff] %v561_v48 }
  0xfd   :  { %564 = vst [vmem:[#allocation6 + $0x368] sm:$0xff] %v563_v49 }
  0xfe   :  { %566 = vst [vmem:[#allocation6 + $0x1f8] sm:$0xff] %v565_v50 }
  0xff   :  { %568 = vst [vmem:[#allocation6 + $0x480] sm:$0xff] %v567_v51 }
 0x100   :  { %570 = vst [vmem:[#allocation6 + $0x4d8] sm:$0xff] %v569_v52 }
 0x101   :  { %572 = vst [vmem:[#allocation6 + $0x150] sm:$0xff] %v571_v53 }
 0x102   :  { %574 = vst [vmem:[#allocation6 + $0x748] sm:$0xff] %v573_v54 }
 0x103   :  { %576 = vst [vmem:[#allocation6 + $0x4a8] sm:$0xff] %v575_v55 }
 0x104   :  { %578 = vst [vmem:[#allocation6 + $0x258] sm:$0xff] %v577_v56 }
 0x105   :  { %580 = vst [vmem:[#allocation6 + $0x7e8] sm:$0xff] %v579_v57 }
 0x106   :  { %582 = vst [vmem:[#allocation6 + $0x658] sm:$0xff] %v581_v58 }
 0x107   :  { %584 = vst [vmem:[#allocation6 + $0x728] sm:$0xff] %v583_v59 }
 0x108   :  { %586 = vst [vmem:[#allocation6 + $0x3c8] sm:$0xff] %v585_v60 }
 0x109   :  { %588 = vst [vmem:[#allocation6] sm:$0xff] %v587_v61 }
 0x10a   :  { %590 = vst [vmem:[#allocation6 + $0x20] sm:$0xff] %v589_v62 }
 0x10b   :  { %592 = vst [vmem:[#allocation6 + $0x268] sm:$0xff] %v591_v63 }
 0x10c   :  { %594 = vst [vmem:[#allocation6 + $0x5f8] sm:$0xff] %v593_v0 }
 0x10d   :  { %596 = vst [vmem:[#allocation6 + $0x108] sm:$0xff] %v595_v1 }
 0x10e   :  { %608 = vst [vmem:[#allocation6 + $0x5b0] sm:$0x1] %v4050_v2 }
 0x10f   :  { %612 = vsyncadd [#allocation8], 33040  ;;  %v626_v3 = vld [vmem:[%s7473_s4] sm:$0xff]  ;;  %v628_v4 = vld [vmem:[%s7473_s4 + $0x8] sm:$0xff]  ;;  %s4054_s22 = sld [smem:[#allocation9 + $0x3]] }
 0x110   :  { %627 = vst [vmem:[#allocation7 + $0x88] sm:$0xff] %v626_v3  ;;  %v630_v5 = vld [vmem:[%s7473_s4 + $0x10] sm:$0xff]  ;;  %v632_v6 = vld [vmem:[%s7473_s4 + $0x18] sm:$0xff]  ;;  %v634_v7 = vld [vmem:[%s7473_s4 + $0x20] sm:$0xff]  ;;  %s4053_s0 = sld [smem:[#allocation9 + $0x2]] }
 0x111   :  { %629 = vst [vmem:[#allocation7 + $0x2c0] sm:$0xff] %v628_v4  ;;  %v636_v8 = vld [vmem:[%s7473_s4 + $0x28] sm:$0xff]  ;;  %v638_v9 = vld [vmem:[%s7473_s4 + $0x30] sm:$0xff]  ;;  %v640_v10 = vld [vmem:[%s7473_s4 + $0x38] sm:$0xff]  ;;  %s5843_s24 = sld [smem:[#allocation12 + $0x1]] }
 0x112   :  { %631 = vst [vmem:[#allocation7] sm:$0xff] %v630_v5  ;;  %v642_v11 = vld [vmem:[%s7473_s4 + $0x40] sm:$0xff]  ;;  %v644_v12 = vld [vmem:[%s7473_s4 + $0x48] sm:$0xff]  ;;  %v646_v13 = vld [vmem:[%s7473_s4 + $0x50] sm:$0xff] }
 0x113   :  { %633 = vst [vmem:[#allocation7 + $0x340] sm:$0xff] %v632_v6  ;;  %v648_v14 = vld [vmem:[%s7473_s4 + $0x58] sm:$0xff]  ;;  %v650_v15 = vld [vmem:[%s7473_s4 + $0x60] sm:$0xff]  ;;  %v652_v16 = vld [vmem:[%s7473_s4 + $0x68] sm:$0xff] }
 0x114   :  { %635 = vst [vmem:[#allocation7 + $0x1d0] sm:$0xff] %v634_v7  ;;  %v654_v17 = vld [vmem:[%s7473_s4 + $0x70] sm:$0xff]  ;;  %v656_v18 = vld [vmem:[%s7473_s4 + $0x78] sm:$0xff]  ;;  %v658_v19 = vld [vmem:[%s7473_s4 + $0x80] sm:$0xff] }
 0x115   :  { %637 = vst [vmem:[#allocation7 + $0x298] sm:$0xff] %v636_v8  ;;  %v660_v20 = vld [vmem:[%s7473_s4 + $0x88] sm:$0xff]  ;;  %v662_v21 = vld [vmem:[%s7473_s4 + $0x90] sm:$0xff]  ;;  %v664_v22 = vld [vmem:[%s7473_s4 + $0x98] sm:$0xff] }
 0x116   :  { %639 = vst [vmem:[#allocation7 + $0x808] sm:$0xff] %v638_v9  ;;  %v666_v23 = vld [vmem:[%s7473_s4 + $0xa0] sm:$0xff]  ;;  %v668_v24 = vld [vmem:[%s7473_s4 + $0xa8] sm:$0xff]  ;;  %v670_v25 = vld [vmem:[%s7473_s4 + $0xb0] sm:$0xff] }
 0x117   :  { %641 = vst [vmem:[#allocation7 + $0x6f8] sm:$0xff] %v640_v10  ;;  %v672_v26 = vld [vmem:[%s7473_s4 + $0xb8] sm:$0xff]  ;;  %v674_v27 = vld [vmem:[%s7473_s4 + $0xc0] sm:$0xff]  ;;  %v676_v28 = vld [vmem:[%s7473_s4 + $0xc8] sm:$0xff] }
 0x118   :  { %643 = vst [vmem:[#allocation7 + $0x700] sm:$0xff] %v642_v11  ;;  %v678_v29 = vld [vmem:[%s7473_s4 + $0xd0] sm:$0xff]  ;;  %v680_v30 = vld [vmem:[%s7473_s4 + $0xd8] sm:$0xff]  ;;  %v682_v31 = vld [vmem:[%s7473_s4 + $0xe0] sm:$0xff] }
 0x119   :  { %645 = vst [vmem:[#allocation7 + $0x730] sm:$0xff] %v644_v12  ;;  %v684_v32 = vld [vmem:[%s7473_s4 + $0xe8] sm:$0xff]  ;;  %v686_v33 = vld [vmem:[%s7473_s4 + $0xf0] sm:$0xff]  ;;  %v688_v34 = vld [vmem:[%s7473_s4 + $0xf8] sm:$0xff] }
 0x11a   :  { %647 = vst [vmem:[#allocation7 + $0x208] sm:$0xff] %v646_v13  ;;  %v690_v35 = vld [vmem:[%s7473_s4 + $0x100] sm:$0xff]  ;;  %v692_v36 = vld [vmem:[%s7473_s4 + $0x108] sm:$0xff]  ;;  %v694_v37 = vld [vmem:[%s7473_s4 + $0x110] sm:$0xff] }
 0x11b   :  { %649 = vst [vmem:[#allocation7 + $0x230] sm:$0xff] %v648_v14  ;;  %v696_v38 = vld [vmem:[%s7473_s4 + $0x118] sm:$0xff]  ;;  %v698_v39 = vld [vmem:[%s7473_s4 + $0x120] sm:$0xff]  ;;  %v700_v40 = vld [vmem:[%s7473_s4 + $0x128] sm:$0xff] }
 0x11c   :  { %651 = vst [vmem:[#allocation7 + $0xc8] sm:$0xff] %v650_v15  ;;  %v702_v41 = vld [vmem:[%s7473_s4 + $0x130] sm:$0xff]  ;;  %v704_v42 = vld [vmem:[%s7473_s4 + $0x138] sm:$0xff]  ;;  %v706_v43 = vld [vmem:[%s7473_s4 + $0x140] sm:$0xff] }
 0x11d   :  { %653 = vst [vmem:[#allocation7 + $0x4d8] sm:$0xff] %v652_v16  ;;  %v708_v44 = vld [vmem:[%s7473_s4 + $0x148] sm:$0xff]  ;;  %v710_v45 = vld [vmem:[%s7473_s4 + $0x150] sm:$0xff]  ;;  %v712_v46 = vld [vmem:[%s7473_s4 + $0x158] sm:$0xff] }
 0x11e   :  { %655 = vst [vmem:[#allocation7 + $0x388] sm:$0xff] %v654_v17  ;;  %v714_v47 = vld [vmem:[%s7473_s4 + $0x160] sm:$0xff]  ;;  %v716_v48 = vld [vmem:[%s7473_s4 + $0x168] sm:$0xff]  ;;  %v718_v49 = vld [vmem:[%s7473_s4 + $0x170] sm:$0xff] }
 0x11f   :  { %657 = vst [vmem:[#allocation7 + $0x4d0] sm:$0xff] %v656_v18  ;;  %v720_v50 = vld [vmem:[%s7473_s4 + $0x178] sm:$0xff]  ;;  %v722_v51 = vld [vmem:[%s7473_s4 + $0x180] sm:$0xff]  ;;  %v724_v52 = vld [vmem:[%s7473_s4 + $0x188] sm:$0xff] }
 0x120   :  { %659 = vst [vmem:[#allocation7 + $0x6c0] sm:$0xff] %v658_v19  ;;  %v726_v53 = vld [vmem:[%s7473_s4 + $0x190] sm:$0xff]  ;;  %v728_v54 = vld [vmem:[%s7473_s4 + $0x198] sm:$0xff]  ;;  %v730_v55 = vld [vmem:[%s7473_s4 + $0x1a0] sm:$0xff] }
 0x121   :  { %661 = vst [vmem:[#allocation7 + $0x788] sm:$0xff] %v660_v20  ;;  %v732_v56 = vld [vmem:[%s7473_s4 + $0x1a8] sm:$0xff]  ;;  %v734_v57 = vld [vmem:[%s7473_s4 + $0x1b0] sm:$0xff]  ;;  %v736_v58 = vld [vmem:[%s7473_s4 + $0x1b8] sm:$0xff] }
 0x122   :  { %663 = vst [vmem:[#allocation7 + $0x70] sm:$0xff] %v662_v21  ;;  %v738_v59 = vld [vmem:[%s7473_s4 + $0x1c0] sm:$0xff]  ;;  %v740_v60 = vld [vmem:[%s7473_s4 + $0x1c8] sm:$0xff]  ;;  %v742_v61 = vld [vmem:[%s7473_s4 + $0x1d0] sm:$0xff] }
 0x123   :  { %665 = vst [vmem:[#allocation7 + $0x6a8] sm:$0xff] %v664_v22  ;;  %v744_v62 = vld [vmem:[%s7473_s4 + $0x1d8] sm:$0xff]  ;;  %v746_v63 = vld [vmem:[%s7473_s4 + $0x1e0] sm:$0xff]  ;;  %v748_v0 = vld [vmem:[%s7473_s4 + $0x1e8] sm:$0xff] }
 0x124   :  { %667 = vst [vmem:[#allocation7 + $0x748] sm:$0xff] %v666_v23  ;;  %v750_v1 = vld [vmem:[%s7473_s4 + $0x1f0] sm:$0xff]  ;;  %v752_v2 = vld [vmem:[%s7473_s4 + $0x1f8] sm:$0xff]  ;;  %v754_v3 = vld [vmem:[%s7473_s4 + $0x200] sm:$0xff] }
 0x125   :  { %669 = vst [vmem:[#allocation7 + $0x5f8] sm:$0xff] %v668_v24  ;;  %v756_v4 = vld [vmem:[%s7473_s4 + $0x208] sm:$0xff]  ;;  %v758_v5 = vld [vmem:[%s7473_s4 + $0x210] sm:$0xff]  ;;  %v760_v6 = vld [vmem:[%s7473_s4 + $0x218] sm:$0xff] }
 0x126   :  { %671 = vst [vmem:[#allocation7 + $0x90] sm:$0xff] %v670_v25  ;;  %v762_v7 = vld [vmem:[%s7473_s4 + $0x220] sm:$0xff]  ;;  %v764_v8 = vld [vmem:[%s7473_s4 + $0x228] sm:$0xff]  ;;  %v766_v9 = vld [vmem:[%s7473_s4 + $0x230] sm:$0xff] }
 0x127   :  { %673 = vst [vmem:[#allocation7 + $0x5c0] sm:$0xff] %v672_v26  ;;  %v768_v10 = vld [vmem:[%s7473_s4 + $0x238] sm:$0xff]  ;;  %v770_v11 = vld [vmem:[%s7473_s4 + $0x240] sm:$0xff]  ;;  %v772_v12 = vld [vmem:[%s7473_s4 + $0x248] sm:$0xff] }
 0x128   :  { %675 = vst [vmem:[#allocation7 + $0x220] sm:$0xff] %v674_v27  ;;  %v774_v13 = vld [vmem:[%s7473_s4 + $0x250] sm:$0xff]  ;;  %v776_v14 = vld [vmem:[%s7473_s4 + $0x258] sm:$0xff]  ;;  %v778_v15 = vld [vmem:[%s7473_s4 + $0x260] sm:$0xff] }
 0x129   :  { %677 = vst [vmem:[#allocation7 + $0x618] sm:$0xff] %v676_v28  ;;  %v780_v16 = vld [vmem:[%s7473_s4 + $0x268] sm:$0xff]  ;;  %v782_v17 = vld [vmem:[%s7473_s4 + $0x270] sm:$0xff]  ;;  %v784_v18 = vld [vmem:[%s7473_s4 + $0x278] sm:$0xff] }
 0x12a   :  { %679 = vst [vmem:[#allocation7 + $0x378] sm:$0xff] %v678_v29  ;;  %v786_v19 = vld [vmem:[%s7473_s4 + $0x280] sm:$0xff]  ;;  %v788_v20 = vld [vmem:[%s7473_s4 + $0x288] sm:$0xff]  ;;  %v790_v21 = vld [vmem:[%s7473_s4 + $0x290] sm:$0xff] }
 0x12b   :  { %681 = vst [vmem:[#allocation7 + $0x440] sm:$0xff] %v680_v30  ;;  %v792_v22 = vld [vmem:[%s7473_s4 + $0x298] sm:$0xff]  ;;  %v794_v23 = vld [vmem:[%s7473_s4 + $0x2a0] sm:$0xff]  ;;  %v796_v24 = vld [vmem:[%s7473_s4 + $0x2a8] sm:$0xff] }
 0x12c   :  { %683 = vst [vmem:[#allocation7 + $0x178] sm:$0xff] %v682_v31  ;;  %v798_v25 = vld [vmem:[%s7473_s4 + $0x2b0] sm:$0xff]  ;;  %v800_v26 = vld [vmem:[%s7473_s4 + $0x2b8] sm:$0xff]  ;;  %v802_v27 = vld [vmem:[%s7473_s4 + $0x2c0] sm:$0xff] }
 0x12d   :  { %685 = vst [vmem:[#allocation7 + $0x270] sm:$0xff] %v684_v32  ;;  %v804_v28 = vld [vmem:[%s7473_s4 + $0x2c8] sm:$0xff]  ;;  %v806_v29 = vld [vmem:[%s7473_s4 + $0x2d0] sm:$0xff]  ;;  %v808_v30 = vld [vmem:[%s7473_s4 + $0x2d8] sm:$0xff] }
 0x12e   :  { %687 = vst [vmem:[#allocation7 + $0x4c0] sm:$0xff] %v686_v33  ;;  %v810_v31 = vld [vmem:[%s7473_s4 + $0x2e0] sm:$0xff]  ;;  %v812_v32 = vld [vmem:[%s7473_s4 + $0x2e8] sm:$0xff]  ;;  %v814_v33 = vld [vmem:[%s7473_s4 + $0x2f0] sm:$0xff] }
 0x12f   :  { %689 = vst [vmem:[#allocation7 + $0x4f0] sm:$0xff] %v688_v34  ;;  %v816_v34 = vld [vmem:[%s7473_s4 + $0x2f8] sm:$0xff] }
 0x130   :  { %691 = vst [vmem:[#allocation7 + $0x488] sm:$0xff] %v690_v35  ;;  %v818_v35 = vld [vmem:[%s7473_s4 + $0x300] sm:$0xff] }
 0x131   :  { %693 = vst [vmem:[#allocation7 + $0x6d8] sm:$0xff] %v692_v36  ;;  %v820_v36 = vld [vmem:[%s7473_s4 + $0x308] sm:$0xff] }
 0x132   :  { %695 = vst [vmem:[#allocation7 + $0x4b0] sm:$0xff] %v694_v37  ;;  %v822_v37 = vld [vmem:[%s7473_s4 + $0x310] sm:$0xff] }
 0x133   :  { %697 = vst [vmem:[#allocation7 + $0x420] sm:$0xff] %v696_v38  ;;  %v824_v38 = vld [vmem:[%s7473_s4 + $0x318] sm:$0xff] }
 0x134   :  { %699 = vst [vmem:[#allocation7 + $0x7f0] sm:$0xff] %v698_v39  ;;  %v826_v39 = vld [vmem:[%s7473_s4 + $0x320] sm:$0xff] }
 0x135   :  { %701 = vst [vmem:[#allocation7 + $0x710] sm:$0xff] %v700_v40  ;;  %v828_v40 = vld [vmem:[%s7473_s4 + $0x328] sm:$0xff] }
 0x136   :  { %703 = vst [vmem:[#allocation7 + $0x690] sm:$0xff] %v702_v41  ;;  %v830_v41 = vld [vmem:[%s7473_s4 + $0x330] sm:$0xff] }
 0x137   :  { %705 = vst [vmem:[#allocation7 + $0x528] sm:$0xff] %v704_v42  ;;  %v832_v42 = vld [vmem:[%s7473_s4 + $0x338] sm:$0xff] }
 0x138   :  { %707 = vst [vmem:[#allocation7 + $0x588] sm:$0xff] %v706_v43  ;;  %v834_v43 = vld [vmem:[%s7473_s4 + $0x340] sm:$0xff] }
 0x139   :  { %709 = vst [vmem:[#allocation7 + $0x5c8] sm:$0xff] %v708_v44  ;;  %v836_v44 = vld [vmem:[%s7473_s4 + $0x348] sm:$0xff] }
 0x13a   :  { %711 = vst [vmem:[#allocation7 + $0x7e8] sm:$0xff] %v710_v45  ;;  %v838_v45 = vld [vmem:[%s7473_s4 + $0x350] sm:$0xff] }
 0x13b   :  { %713 = vst [vmem:[#allocation7 + $0x260] sm:$0xff] %v712_v46  ;;  %v840_v46 = vld [vmem:[%s7473_s4 + $0x358] sm:$0xff] }
 0x13c   :  { %715 = vst [vmem:[#allocation7 + $0x6d0] sm:$0xff] %v714_v47  ;;  %v842_v47 = vld [vmem:[%s7473_s4 + $0x360] sm:$0xff] }
 0x13d   :  { %717 = vst [vmem:[#allocation7 + $0x6a0] sm:$0xff] %v716_v48  ;;  %v844_v48 = vld [vmem:[%s7473_s4 + $0x368] sm:$0xff] }
 0x13e   :  { %719 = vst [vmem:[#allocation7 + $0x7b8] sm:$0xff] %v718_v49  ;;  %v846_v49 = vld [vmem:[%s7473_s4 + $0x370] sm:$0xff] }
 0x13f   :  { %721 = vst [vmem:[#allocation7 + $0x140] sm:$0xff] %v720_v50  ;;  %v848_v50 = vld [vmem:[%s7473_s4 + $0x378] sm:$0xff] }
 0x140   :  { %723 = vst [vmem:[#allocation7 + $0x758] sm:$0xff] %v722_v51  ;;  %v850_v51 = vld [vmem:[%s7473_s4 + $0x380] sm:$0xff] }
 0x141   :  { %725 = vst [vmem:[#allocation7 + $0x520] sm:$0xff] %v724_v52  ;;  %v852_v52 = vld [vmem:[%s7473_s4 + $0x388] sm:$0xff] }
 0x142   :  { %727 = vst [vmem:[#allocation7 + $0x128] sm:$0xff] %v726_v53  ;;  %v854_v53 = vld [vmem:[%s7473_s4 + $0x390] sm:$0xff] }
 0x143   :  { %729 = vst [vmem:[#allocation7 + $0x518] sm:$0xff] %v728_v54  ;;  %v856_v54 = vld [vmem:[%s7473_s4 + $0x398] sm:$0xff] }
 0x144   :  { %731 = vst [vmem:[#allocation7 + $0x4c8] sm:$0xff] %v730_v55  ;;  %v858_v55 = vld [vmem:[%s7473_s4 + $0x3a0] sm:$0xff] }
 0x145   :  { %733 = vst [vmem:[#allocation7 + $0x3e0] sm:$0xff] %v732_v56  ;;  %v860_v56 = vld [vmem:[%s7473_s4 + $0x3a8] sm:$0xff] }
 0x146   :  { %735 = vst [vmem:[#allocation7 + $0x1d8] sm:$0xff] %v734_v57  ;;  %v862_v57 = vld [vmem:[%s7473_s4 + $0x3b0] sm:$0xff] }
 0x147   :  { %737 = vst [vmem:[#allocation7 + $0x118] sm:$0xff] %v736_v58  ;;  %v864_v58 = vld [vmem:[%s7473_s4 + $0x3b8] sm:$0xff] }
 0x148   :  { %739 = vst [vmem:[#allocation7 + $0x168] sm:$0xff] %v738_v59  ;;  %v866_v59 = vld [vmem:[%s7473_s4 + $0x3c0] sm:$0xff] }
 0x149   :  { %741 = vst [vmem:[#allocation7 + $0x7b0] sm:$0xff] %v740_v60  ;;  %v868_v60 = vld [vmem:[%s7473_s4 + $0x3c8] sm:$0xff] }
 0x14a   :  { %743 = vst [vmem:[#allocation7 + $0x2e0] sm:$0xff] %v742_v61  ;;  %v870_v61 = vld [vmem:[%s7473_s4 + $0x3d0] sm:$0xff] }
 0x14b   :  { %745 = vst [vmem:[#allocation7 + $0xd0] sm:$0xff] %v744_v62  ;;  %v872_v62 = vld [vmem:[%s7473_s4 + $0x3d8] sm:$0xff] }
 0x14c   :  { %747 = vst [vmem:[#allocation7 + $0x368] sm:$0xff] %v746_v63  ;;  %v874_v63 = vld [vmem:[%s7473_s4 + $0x3e0] sm:$0xff] }
 0x14d   :  { %749 = vst [vmem:[#allocation7 + $0x430] sm:$0xff] %v748_v0  ;;  %v876_v0 = vld [vmem:[%s7473_s4 + $0x3e8] sm:$0xff] }
 0x14e   :  { %751 = vst [vmem:[#allocation7 + $0x708] sm:$0xff] %v750_v1  ;;  %v878_v1 = vld [vmem:[%s7473_s4 + $0x3f0] sm:$0xff] }
 0x14f   :  { %753 = vst [vmem:[#allocation7 + $0x418] sm:$0xff] %v752_v2  ;;  %v880_v2 = vld [vmem:[%s7473_s4 + $0x3f8] sm:$0xff] }
 0x150   :  { %755 = vst [vmem:[#allocation7 + $0x3c0] sm:$0xff] %v754_v3  ;;  %v882_v3 = vld [vmem:[%s7473_s4 + $0x400] sm:$0xff] }
 0x151   :  { %757 = vst [vmem:[#allocation7 + $0x130] sm:$0xff] %v756_v4  ;;  %v884_v4 = vld [vmem:[%s7473_s4 + $0x408] sm:$0xff] }
 0x152   :  { %759 = vst [vmem:[#allocation7 + $0x6f0] sm:$0xff] %v758_v5  ;;  %v886_v5 = vld [vmem:[%s7473_s4 + $0x410] sm:$0xff] }
 0x153   :  { %761 = vst [vmem:[#allocation7 + $0x530] sm:$0xff] %v760_v6  ;;  %v888_v6 = vld [vmem:[%s7473_s4 + $0x418] sm:$0xff] }
 0x154   :  { %763 = vst [vmem:[#allocation7 + $0xa0] sm:$0xff] %v762_v7  ;;  %v890_v7 = vld [vmem:[%s7473_s4 + $0x420] sm:$0xff] }
 0x155   :  { %765 = vst [vmem:[#allocation7 + $0x650] sm:$0xff] %v764_v8  ;;  %v892_v8 = vld [vmem:[%s7473_s4 + $0x428] sm:$0xff] }
 0x156   :  { %767 = vst [vmem:[#allocation7 + $0x608] sm:$0xff] %v766_v9  ;;  %v894_v9 = vld [vmem:[%s7473_s4 + $0x430] sm:$0xff] }
 0x157   :  { %769 = vst [vmem:[#allocation7 + $0x358] sm:$0xff] %v768_v10  ;;  %v896_v10 = vld [vmem:[%s7473_s4 + $0x438] sm:$0xff] }
 0x158   :  { %771 = vst [vmem:[#allocation7 + $0xe0] sm:$0xff] %v770_v11  ;;  %v898_v11 = vld [vmem:[%s7473_s4 + $0x440] sm:$0xff] }
 0x159   :  { %773 = vst [vmem:[#allocation7 + $0x360] sm:$0xff] %v772_v12  ;;  %v900_v12 = vld [vmem:[%s7473_s4 + $0x448] sm:$0xff] }
 0x15a   :  { %775 = vst [vmem:[#allocation7 + $0x428] sm:$0xff] %v774_v13  ;;  %v902_v13 = vld [vmem:[%s7473_s4 + $0x450] sm:$0xff] }
 0x15b   :  { %777 = vst [vmem:[#allocation7 + $0x680] sm:$0xff] %v776_v14  ;;  %v904_v14 = vld [vmem:[%s7473_s4 + $0x458] sm:$0xff] }
 0x15c   :  { %779 = vst [vmem:[#allocation7 + $0x338] sm:$0xff] %v778_v15  ;;  %v906_v15 = vld [vmem:[%s7473_s4 + $0x460] sm:$0xff] }
 0x15d   :  { %781 = vst [vmem:[#allocation7 + $0x2e8] sm:$0xff] %v780_v16  ;;  %v908_v16 = vld [vmem:[%s7473_s4 + $0x468] sm:$0xff] }
 0x15e   :  { %783 = vst [vmem:[#allocation7 + $0x810] sm:$0xff] %v782_v17  ;;  %v910_v17 = vld [vmem:[%s7473_s4 + $0x470] sm:$0xff] }
 0x15f   :  { %785 = vst [vmem:[#allocation7 + $0x148] sm:$0xff] %v784_v18  ;;  %v912_v18 = vld [vmem:[%s7473_s4 + $0x478] sm:$0xff] }
 0x160   :  { %787 = vst [vmem:[#allocation7 + $0x288] sm:$0xff] %v786_v19  ;;  %v914_v19 = vld [vmem:[%s7473_s4 + $0x480] sm:$0xff] }
 0x161   :  { %789 = vst [vmem:[#allocation7 + $0x1c8] sm:$0xff] %v788_v20  ;;  %v916_v20 = vld [vmem:[%s7473_s4 + $0x488] sm:$0xff] }
 0x162   :  { %791 = vst [vmem:[#allocation7 + $0x5b8] sm:$0xff] %v790_v21  ;;  %v918_v21 = vld [vmem:[%s7473_s4 + $0x490] sm:$0xff] }
 0x163   :  { %793 = vst [vmem:[#allocation7 + $0x280] sm:$0xff] %v792_v22  ;;  %v920_v22 = vld [vmem:[%s7473_s4 + $0x498] sm:$0xff] }
 0x164   :  { %795 = vst [vmem:[#allocation7 + $0x4e8] sm:$0xff] %v794_v23  ;;  %v922_v23 = vld [vmem:[%s7473_s4 + $0x4a0] sm:$0xff] }
 0x165   :  { %797 = vst [vmem:[#allocation7 + $0x7d8] sm:$0xff] %v796_v24  ;;  %v924_v24 = vld [vmem:[%s7473_s4 + $0x4a8] sm:$0xff] }
 0x166   :  { %799 = vst [vmem:[#allocation7 + $0x3d8] sm:$0xff] %v798_v25  ;;  %v926_v25 = vld [vmem:[%s7473_s4 + $0x4b0] sm:$0xff] }
 0x167   :  { %801 = vst [vmem:[#allocation7 + $0x1e0] sm:$0xff] %v800_v26  ;;  %v928_v26 = vld [vmem:[%s7473_s4 + $0x4b8] sm:$0xff] }
 0x168   :  { %803 = vst [vmem:[#allocation7 + $0x1b0] sm:$0xff] %v802_v27  ;;  %v930_v27 = vld [vmem:[%s7473_s4 + $0x4c0] sm:$0xff] }
 0x169   :  { %805 = vst [vmem:[#allocation7 + $0x108] sm:$0xff] %v804_v28  ;;  %v932_v28 = vld [vmem:[%s7473_s4 + $0x4c8] sm:$0xff] }
 0x16a   :  { %807 = vst [vmem:[#allocation7 + $0xd8] sm:$0xff] %v806_v29  ;;  %v934_v29 = vld [vmem:[%s7473_s4 + $0x4d0] sm:$0xff] }
 0x16b   :  { %809 = vst [vmem:[#allocation7 + $0x120] sm:$0xff] %v808_v30  ;;  %v936_v30 = vld [vmem:[%s7473_s4 + $0x4d8] sm:$0xff] }
 0x16c   :  { %811 = vst [vmem:[#allocation7 + $0x190] sm:$0xff] %v810_v31  ;;  %v938_v31 = vld [vmem:[%s7473_s4 + $0x4e0] sm:$0xff] }
 0x16d   :  { %813 = vst [vmem:[#allocation7 + $0x4b8] sm:$0xff] %v812_v32  ;;  %v940_v32 = vld [vmem:[%s7473_s4 + $0x4e8] sm:$0xff] }
 0x16e   :  { %815 = vst [vmem:[#allocation7 + $0x798] sm:$0xff] %v814_v33  ;;  %v942_v33 = vld [vmem:[%s7473_s4 + $0x4f0] sm:$0xff] }
 0x16f   :  { %817 = vst [vmem:[#allocation7 + $0x2b0] sm:$0xff] %v816_v34  ;;  %v944_v34 = vld [vmem:[%s7473_s4 + $0x4f8] sm:$0xff] }
 0x170   :  { %819 = vst [vmem:[#allocation7 + $0x370] sm:$0xff] %v818_v35  ;;  %v946_v35 = vld [vmem:[%s7473_s4 + $0x500] sm:$0xff] }
 0x171   :  { %821 = vst [vmem:[#allocation7 + $0x7a0] sm:$0xff] %v820_v36  ;;  %v948_v36 = vld [vmem:[%s7473_s4 + $0x508] sm:$0xff] }
 0x172   :  { %823 = vst [vmem:[#allocation7 + $0x490] sm:$0xff] %v822_v37  ;;  %v950_v37 = vld [vmem:[%s7473_s4 + $0x510] sm:$0xff] }
 0x173   :  { %825 = vst [vmem:[#allocation7 + $0x328] sm:$0xff] %v824_v38  ;;  %v952_v38 = vld [vmem:[%s7473_s4 + $0x518] sm:$0xff] }
 0x174   :  { %827 = vst [vmem:[#allocation7 + $0x410] sm:$0xff] %v826_v39  ;;  %v954_v39 = vld [vmem:[%s7473_s4 + $0x520] sm:$0xff] }
 0x175   :  { %829 = vst [vmem:[#allocation7 + $0x300] sm:$0xff] %v828_v40  ;;  %v956_v40 = vld [vmem:[%s7473_s4 + $0x528] sm:$0xff] }
 0x176   :  { %831 = vst [vmem:[#allocation7 + $0x228] sm:$0xff] %v830_v41  ;;  %v958_v41 = vld [vmem:[%s7473_s4 + $0x530] sm:$0xff] }
 0x177   :  { %833 = vst [vmem:[#allocation7 + $0x238] sm:$0xff] %v832_v42  ;;  %v960_v42 = vld [vmem:[%s7473_s4 + $0x538] sm:$0xff] }
 0x178   :  { %835 = vst [vmem:[#allocation7 + $0x20] sm:$0xff] %v834_v43  ;;  %v962_v43 = vld [vmem:[%s7473_s4 + $0x540] sm:$0xff] }
 0x179   :  { %837 = vst [vmem:[#allocation7 + $0x5b0] sm:$0xff] %v836_v44  ;;  %v964_v44 = vld [vmem:[%s7473_s4 + $0x548] sm:$0xff] }
 0x17a   :  { %839 = vst [vmem:[#allocation7 + $0x158] sm:$0xff] %v838_v45  ;;  %v966_v45 = vld [vmem:[%s7473_s4 + $0x550] sm:$0xff] }
 0x17b   :  { %841 = vst [vmem:[#allocation7 + $0x5e8] sm:$0xff] %v840_v46  ;;  %v968_v46 = vld [vmem:[%s7473_s4 + $0x558] sm:$0xff] }
 0x17c   :  { %843 = vst [vmem:[#allocation7 + $0xb8] sm:$0xff] %v842_v47  ;;  %v970_v47 = vld [vmem:[%s7473_s4 + $0x560] sm:$0xff] }
 0x17d   :  { %845 = vst [vmem:[#allocation7 + $0x438] sm:$0xff] %v844_v48  ;;  %v972_v48 = vld [vmem:[%s7473_s4 + $0x568] sm:$0xff] }
 0x17e   :  { %847 = vst [vmem:[#allocation7 + $0x2b8] sm:$0xff] %v846_v49  ;;  %v974_v49 = vld [vmem:[%s7473_s4 + $0x570] sm:$0xff] }
 0x17f   :  { %849 = vst [vmem:[#allocation7 + $0x5e0] sm:$0xff] %v848_v50  ;;  %v976_v50 = vld [vmem:[%s7473_s4 + $0x578] sm:$0xff] }
 0x180   :  { %851 = vst [vmem:[#allocation7 + $0x348] sm:$0xff] %v850_v51  ;;  %v978_v51 = vld [vmem:[%s7473_s4 + $0x580] sm:$0xff] }
 0x181   :  { %853 = vst [vmem:[#allocation7 + $0x8] sm:$0xff] %v852_v52  ;;  %v980_v52 = vld [vmem:[%s7473_s4 + $0x588] sm:$0xff] }
 0x182   :  { %855 = vst [vmem:[#allocation7 + $0x28] sm:$0xff] %v854_v53  ;;  %v982_v53 = vld [vmem:[%s7473_s4 + $0x590] sm:$0xff] }
 0x183   :  { %857 = vst [vmem:[#allocation7 + $0x5a8] sm:$0xff] %v856_v54  ;;  %v984_v54 = vld [vmem:[%s7473_s4 + $0x598] sm:$0xff] }
 0x184   :  { %859 = vst [vmem:[#allocation7 + $0x3f8] sm:$0xff] %v858_v55  ;;  %v986_v55 = vld [vmem:[%s7473_s4 + $0x5a0] sm:$0xff] }
 0x185   :  { %861 = vst [vmem:[#allocation7 + $0x508] sm:$0xff] %v860_v56  ;;  %v988_v56 = vld [vmem:[%s7473_s4 + $0x5a8] sm:$0xff] }
 0x186   :  { %863 = vst [vmem:[#allocation7 + $0x18] sm:$0xff] %v862_v57  ;;  %v990_v57 = vld [vmem:[%s7473_s4 + $0x5b0] sm:$0xff] }
 0x187   :  { %865 = vst [vmem:[#allocation7 + $0x7c8] sm:$0xff] %v864_v58  ;;  %v992_v58 = vld [vmem:[%s7473_s4 + $0x5b8] sm:$0xff] }
 0x188   :  { %867 = vst [vmem:[#allocation7 + $0x3e8] sm:$0xff] %v866_v59  ;;  %v994_v59 = vld [vmem:[%s7473_s4 + $0x5c0] sm:$0xff] }
 0x189   :  { %869 = vst [vmem:[#allocation7 + $0x48] sm:$0xff] %v868_v60  ;;  %v996_v60 = vld [vmem:[%s7473_s4 + $0x5c8] sm:$0xff] }
 0x18a   :  { %871 = vst [vmem:[#allocation7 + $0x668] sm:$0xff] %v870_v61  ;;  %v998_v61 = vld [vmem:[%s7473_s4 + $0x5d0] sm:$0xff] }
 0x18b   :  { %873 = vst [vmem:[#allocation7 + $0x180] sm:$0xff] %v872_v62  ;;  %v1000_v62 = vld [vmem:[%s7473_s4 + $0x5d8] sm:$0xff] }
 0x18c   :  { %875 = vst [vmem:[#allocation7 + $0x6e0] sm:$0xff] %v874_v63  ;;  %v1002_v63 = vld [vmem:[%s7473_s4 + $0x5e0] sm:$0xff] }
 0x18d   :  { %877 = vst [vmem:[#allocation7 + $0x450] sm:$0xff] %v876_v0  ;;  %v1004_v0 = vld [vmem:[%s7473_s4 + $0x5e8] sm:$0xff] }
 0x18e   :  { %879 = vst [vmem:[#allocation7 + $0x4e0] sm:$0xff] %v878_v1  ;;  %v1006_v1 = vld [vmem:[%s7473_s4 + $0x5f0] sm:$0xff] }
 0x18f   :  { %881 = vst [vmem:[#allocation7 + $0x390] sm:$0xff] %v880_v2  ;;  %v1008_v2 = vld [vmem:[%s7473_s4 + $0x5f8] sm:$0xff] }
 0x190   :  { %883 = vst [vmem:[#allocation7 + $0x780] sm:$0xff] %v882_v3  ;;  %v1010_v3 = vld [vmem:[%s7473_s4 + $0x600] sm:$0xff] }
 0x191   :  { %885 = vst [vmem:[#allocation7 + $0x10] sm:$0xff] %v884_v4  ;;  %v1012_v4 = vld [vmem:[%s7473_s4 + $0x608] sm:$0xff] }
 0x192   :  { %887 = vst [vmem:[#allocation7 + $0x1f8] sm:$0xff] %v886_v5  ;;  %v1014_v5 = vld [vmem:[%s7473_s4 + $0x610] sm:$0xff] }
 0x193   :  { %889 = vst [vmem:[#allocation7 + $0x3b0] sm:$0xff] %v888_v6  ;;  %v1016_v6 = vld [vmem:[%s7473_s4 + $0x618] sm:$0xff] }
 0x194   :  { %891 = vst [vmem:[#allocation7 + $0x670] sm:$0xff] %v890_v7  ;;  %v1018_v7 = vld [vmem:[%s7473_s4 + $0x620] sm:$0xff] }
 0x195   :  { %893 = vst [vmem:[#allocation7 + $0x2f8] sm:$0xff] %v892_v8  ;;  %v1020_v8 = vld [vmem:[%s7473_s4 + $0x628] sm:$0xff] }
 0x196   :  { %895 = vst [vmem:[#allocation7 + $0x538] sm:$0xff] %v894_v9  ;;  %v1022_v9 = vld [vmem:[%s7473_s4 + $0x630] sm:$0xff] }
 0x197   :  { %897 = vst [vmem:[#allocation7 + $0x320] sm:$0xff] %v896_v10  ;;  %v1024_v10 = vld [vmem:[%s7473_s4 + $0x638] sm:$0xff] }
 0x198   :  { %899 = vst [vmem:[#allocation7 + $0x40] sm:$0xff] %v898_v11  ;;  %v1026_v11 = vld [vmem:[%s7473_s4 + $0x640] sm:$0xff] }
 0x199   :  { %901 = vst [vmem:[#allocation7 + $0x218] sm:$0xff] %v900_v12  ;;  %v1028_v12 = vld [vmem:[%s7473_s4 + $0x648] sm:$0xff] }
 0x19a   :  { %903 = vst [vmem:[#allocation7 + $0x188] sm:$0xff] %v902_v13  ;;  %v1030_v13 = vld [vmem:[%s7473_s4 + $0x650] sm:$0xff] }
 0x19b   :  { %905 = vst [vmem:[#allocation7 + $0x510] sm:$0xff] %v904_v14  ;;  %v1032_v14 = vld [vmem:[%s7473_s4 + $0x658] sm:$0xff] }
 0x19c   :  { %907 = vst [vmem:[#allocation7 + $0x68] sm:$0xff] %v906_v15  ;;  %v1034_v15 = vld [vmem:[%s7473_s4 + $0x660] sm:$0xff] }
 0x19d   :  { %909 = vst [vmem:[#allocation7 + $0x1e8] sm:$0xff] %v908_v16  ;;  %v1036_v16 = vld [vmem:[%s7473_s4 + $0x668] sm:$0xff] }
 0x19e   :  { %911 = vst [vmem:[#allocation7 + $0x78] sm:$0xff] %v910_v17  ;;  %v1038_v17 = vld [vmem:[%s7473_s4 + $0x670] sm:$0xff] }
 0x19f   :  { %913 = vst [vmem:[#allocation7 + $0x7a8] sm:$0xff] %v912_v18  ;;  %v1040_v18 = vld [vmem:[%s7473_s4 + $0x678] sm:$0xff] }
 0x1a0   :  { %915 = vst [vmem:[#allocation7 + $0x240] sm:$0xff] %v914_v19  ;;  %v1042_v19 = vld [vmem:[%s7473_s4 + $0x680] sm:$0xff] }
 0x1a1   :  { %917 = vst [vmem:[#allocation7 + $0x30] sm:$0xff] %v916_v20  ;;  %v1044_v20 = vld [vmem:[%s7473_s4 + $0x688] sm:$0xff] }
 0x1a2   :  { %919 = vst [vmem:[#allocation7 + $0x318] sm:$0xff] %v918_v21  ;;  %v1046_v21 = vld [vmem:[%s7473_s4 + $0x690] sm:$0xff] }
 0x1a3   :  { %921 = vst [vmem:[#allocation7 + $0x4f8] sm:$0xff] %v920_v22  ;;  %v1048_v22 = vld [vmem:[%s7473_s4 + $0x698] sm:$0xff] }
 0x1a4   :  { %923 = vst [vmem:[#allocation7 + $0x660] sm:$0xff] %v922_v23  ;;  %v1050_v23 = vld [vmem:[%s7473_s4 + $0x6a0] sm:$0xff] }
 0x1a5   :  { %925 = vst [vmem:[#allocation7 + $0x3d0] sm:$0xff] %v924_v24  ;;  %v1052_v24 = vld [vmem:[%s7473_s4 + $0x6a8] sm:$0xff] }
 0x1a6   :  { %927 = vst [vmem:[#allocation7 + $0xa8] sm:$0xff] %v926_v25  ;;  %v1054_v25 = vld [vmem:[%s7473_s4 + $0x6b0] sm:$0xff] }
 0x1a7   :  { %929 = vst [vmem:[#allocation7 + $0x6c8] sm:$0xff] %v928_v26  ;;  %v1056_v26 = vld [vmem:[%s7473_s4 + $0x6b8] sm:$0xff] }
 0x1a8   :  { %931 = vst [vmem:[#allocation7 + $0x1f0] sm:$0xff] %v930_v27  ;;  %v1058_v27 = vld [vmem:[%s7473_s4 + $0x6c0] sm:$0xff] }
 0x1a9   :  { %933 = vst [vmem:[#allocation7 + $0xb0] sm:$0xff] %v932_v28  ;;  %v1060_v28 = vld [vmem:[%s7473_s4 + $0x6c8] sm:$0xff] }
 0x1aa   :  { %935 = vst [vmem:[#allocation7 + $0x5d8] sm:$0xff] %v934_v29  ;;  %v1062_v29 = vld [vmem:[%s7473_s4 + $0x6d0] sm:$0xff] }
 0x1ab   :  { %937 = vst [vmem:[#allocation7 + $0x480] sm:$0xff] %v936_v30  ;;  %v1064_v30 = vld [vmem:[%s7473_s4 + $0x6d8] sm:$0xff] }
 0x1ac   :  { %939 = vst [vmem:[#allocation7 + $0x5d0] sm:$0xff] %v938_v31  ;;  %v1066_v31 = vld [vmem:[%s7473_s4 + $0x6e0] sm:$0xff] }
 0x1ad   :  { %941 = vst [vmem:[#allocation7 + $0x550] sm:$0xff] %v940_v32  ;;  %v1068_v32 = vld [vmem:[%s7473_s4 + $0x6e8] sm:$0xff] }
 0x1ae   :  { %943 = vst [vmem:[#allocation7 + $0x278] sm:$0xff] %v942_v33  ;;  %v1070_v33 = vld [vmem:[%s7473_s4 + $0x6f0] sm:$0xff] }
 0x1af   :  { %945 = vst [vmem:[#allocation7 + $0x790] sm:$0xff] %v944_v34  ;;  %v1072_v34 = vld [vmem:[%s7473_s4 + $0x6f8] sm:$0xff] }
 0x1b0   :  { %947 = vst [vmem:[#allocation7 + $0x198] sm:$0xff] %v946_v35  ;;  %v1074_v35 = vld [vmem:[%s7473_s4 + $0x700] sm:$0xff] }
 0x1b1   :  { %949 = vst [vmem:[#allocation7 + $0x4a8] sm:$0xff] %v948_v36  ;;  %v1076_v36 = vld [vmem:[%s7473_s4 + $0x708] sm:$0xff] }
 0x1b2   :  { %951 = vst [vmem:[#allocation7 + $0x718] sm:$0xff] %v950_v37  ;;  %v1078_v37 = vld [vmem:[%s7473_s4 + $0x710] sm:$0xff] }
 0x1b3   :  { %953 = vst [vmem:[#allocation7 + $0x678] sm:$0xff] %v952_v38  ;;  %v1080_v38 = vld [vmem:[%s7473_s4 + $0x718] sm:$0xff] }
 0x1b4   :  { %955 = vst [vmem:[#allocation7 + $0x210] sm:$0xff] %v954_v39  ;;  %v1082_v39 = vld [vmem:[%s7473_s4 + $0x720] sm:$0xff] }
 0x1b5   :  { %957 = vst [vmem:[#allocation7 + $0x150] sm:$0xff] %v956_v40  ;;  %v1084_v40 = vld [vmem:[%s7473_s4 + $0x728] sm:$0xff] }
 0x1b6   :  { %959 = vst [vmem:[#allocation7 + $0x628] sm:$0xff] %v958_v41  ;;  %v1086_v41 = vld [vmem:[%s7473_s4 + $0x730] sm:$0xff] }
 0x1b7   :  { %961 = vst [vmem:[#allocation7 + $0x738] sm:$0xff] %v960_v42  ;;  %v1088_v42 = vld [vmem:[%s7473_s4 + $0x738] sm:$0xff] }
 0x1b8   :  { %963 = vst [vmem:[#allocation7 + $0xf8] sm:$0xff] %v962_v43  ;;  %v1090_v43 = vld [vmem:[%s7473_s4 + $0x740] sm:$0xff] }
 0x1b9   :  { %965 = vst [vmem:[#allocation7 + $0x760] sm:$0xff] %v964_v44  ;;  %v1092_v44 = vld [vmem:[%s7473_s4 + $0x748] sm:$0xff] }
 0x1ba   :  { %967 = vst [vmem:[#allocation7 + $0x6b0] sm:$0xff] %v966_v45  ;;  %v1094_v45 = vld [vmem:[%s7473_s4 + $0x750] sm:$0xff] }
 0x1bb   :  { %969 = vst [vmem:[#allocation7 + $0x610] sm:$0xff] %v968_v46  ;;  %v1096_v46 = vld [vmem:[%s7473_s4 + $0x758] sm:$0xff] }
 0x1bc   :  { %971 = vst [vmem:[#allocation7 + $0x3f0] sm:$0xff] %v970_v47  ;;  %v1098_v47 = vld [vmem:[%s7473_s4 + $0x760] sm:$0xff] }
 0x1bd   :  { %973 = vst [vmem:[#allocation7 + $0x100] sm:$0xff] %v972_v48  ;;  %v1100_v48 = vld [vmem:[%s7473_s4 + $0x768] sm:$0xff] }
 0x1be   :  { %975 = vst [vmem:[#allocation7 + $0x308] sm:$0xff] %v974_v49  ;;  %v1102_v49 = vld [vmem:[%s7473_s4 + $0x770] sm:$0xff] }
 0x1bf   :  { %977 = vst [vmem:[#allocation7 + $0x1a8] sm:$0xff] %v976_v50  ;;  %v1104_v50 = vld [vmem:[%s7473_s4 + $0x778] sm:$0xff] }
 0x1c0   :  { %979 = vst [vmem:[#allocation7 + $0x568] sm:$0xff] %v978_v51  ;;  %v1106_v51 = vld [vmem:[%s7473_s4 + $0x780] sm:$0xff] }
 0x1c1   :  { %981 = vst [vmem:[#allocation7 + $0x548] sm:$0xff] %v980_v52  ;;  %v1108_v52 = vld [vmem:[%s7473_s4 + $0x788] sm:$0xff] }
 0x1c2   :  { %983 = vst [vmem:[#allocation7 + $0x768] sm:$0xff] %v982_v53  ;;  %v1110_v53 = vld [vmem:[%s7473_s4 + $0x790] sm:$0xff] }
 0x1c3   :  { %985 = vst [vmem:[#allocation7 + $0x1b8] sm:$0xff] %v984_v54  ;;  %v1112_v54 = vld [vmem:[%s7473_s4 + $0x798] sm:$0xff] }
 0x1c4   :  { %987 = vst [vmem:[#allocation7 + $0x658] sm:$0xff] %v986_v55  ;;  %v1114_v55 = vld [vmem:[%s7473_s4 + $0x7a0] sm:$0xff] }
 0x1c5   :  { %989 = vst [vmem:[#allocation7 + $0x7c0] sm:$0xff] %v988_v56  ;;  %v1116_v56 = vld [vmem:[%s7473_s4 + $0x7a8] sm:$0xff] }
 0x1c6   :  { %991 = vst [vmem:[#allocation7 + $0x38] sm:$0xff] %v990_v57  ;;  %v1118_v57 = vld [vmem:[%s7473_s4 + $0x7b0] sm:$0xff] }
 0x1c7   :  { %993 = vst [vmem:[#allocation7 + $0x778] sm:$0xff] %v992_v58  ;;  %v1120_v58 = vld [vmem:[%s7473_s4 + $0x7b8] sm:$0xff] }
 0x1c8   :  { %995 = vst [vmem:[#allocation7 + $0x7e0] sm:$0xff] %v994_v59  ;;  %v1122_v59 = vld [vmem:[%s7473_s4 + $0x7c0] sm:$0xff] }
 0x1c9   :  { %997 = vst [vmem:[#allocation7 + $0x630] sm:$0xff] %v996_v60  ;;  %v1124_v60 = vld [vmem:[%s7473_s4 + $0x7c8] sm:$0xff] }
 0x1ca   :  { %999 = vst [vmem:[#allocation7 + $0x470] sm:$0xff] %v998_v61  ;;  %v1126_v61 = vld [vmem:[%s7473_s4 + $0x7d0] sm:$0xff] }
 0x1cb   :  { %1001 = vst [vmem:[#allocation7 + $0x2d8] sm:$0xff] %v1000_v62  ;;  %v1128_v62 = vld [vmem:[%s7473_s4 + $0x7d8] sm:$0xff] }
 0x1cc   :  { %1003 = vst [vmem:[#allocation7 + $0x2c8] sm:$0xff] %v1002_v63  ;;  %v1130_v63 = vld [vmem:[%s7473_s4 + $0x7e0] sm:$0xff] }
 0x1cd   :  { %1005 = vst [vmem:[#allocation7 + $0x7f8] sm:$0xff] %v1004_v0  ;;  %v1132_v0 = vld [vmem:[%s7473_s4 + $0x7e8] sm:$0xff] }
 0x1ce   :  { %1007 = vst [vmem:[#allocation7 + $0x688] sm:$0xff] %v1006_v1  ;;  %v1134_v1 = vld [vmem:[%s7473_s4 + $0x7f0] sm:$0xff] }
 0x1cf   :  { %1009 = vst [vmem:[#allocation7 + $0x2d0] sm:$0xff] %v1008_v2  ;;  %v1136_v2 = vld [vmem:[%s7473_s4 + $0x7f8] sm:$0xff] }
 0x1d0   :  { %1011 = vst [vmem:[#allocation7 + $0x600] sm:$0xff] %v1010_v3  ;;  %v1138_v3 = vld [vmem:[%s7473_s4 + $0x800] sm:$0xff] }
 0x1d1   :  { %1013 = vst [vmem:[#allocation7 + $0x380] sm:$0xff] %v1012_v4  ;;  %v1140_v4 = vld [vmem:[%s7473_s4 + $0x808] sm:$0xff] }
 0x1d2   :  { %1015 = vst [vmem:[#allocation7 + $0x728] sm:$0xff] %v1014_v5  ;;  %v4051_v5 = vld [vmem:[%s7473_s4 + $0x810] sm:$0x1] }
 0x1d3   :  { %1017 = vst [vmem:[#allocation7 + $0x560] sm:$0xff] %v1016_v6  ;;  %v5841_v6 = vld [vmem:[%s7471_s2] sm:$0xf] }
 0x1d4   :  { %1019 = vst [vmem:[#allocation7 + $0x5f0] sm:$0xff] %v1018_v7  ;;  %v5848_v7 = vld [vmem:[%s7471_s2 + $0x24] sm:$0xf] }
 0x1d5   :  { %1021 = vst [vmem:[#allocation7 + $0x398] sm:$0xff] %v1020_v8  ;;  %v5853_v8 = vld [vmem:[%s7471_s2 + $0x28] sm:$0xf] }
 0x1d6   :  { %1023 = vst [vmem:[#allocation7 + $0x2a0] sm:$0xff] %v1022_v9  ;;  %v5855_v9 = vstv %s4054_s22 }
 0x1d7   :  { %1025 = vst [vmem:[#allocation7 + $0x720] sm:$0xff] %v1024_v10  ;;  %v5860_v10 = vld [vmem:[%s7471_s2 + $0x2c] sm:$0xf] }
 0x1d8   :  { %1027 = vst [vmem:[#allocation7 + $0x620] sm:$0xff] %v1026_v11  ;;  %v5865_v11 = vld [vmem:[%s7471_s2 + $0x1c] sm:$0xf] }
 0x1d9   :  { %1029 = vst [vmem:[#allocation7 + $0x350] sm:$0xff] %v1028_v12  ;;  %v1492_v12 = vmul.f32 %v5855_v9, %v5841_v6 }
 0x1da   :  { %1031 = vst [vmem:[#allocation7 + $0x2a8] sm:$0xff] %v1030_v13  ;;  %v5872_v13 = vld [vmem:[%s7471_s2 + $0x20] sm:$0xf] }
 0x1db   :  { %1033 = vst [vmem:[#allocation7 + $0x498] sm:$0xff] %v1032_v14  ;;  %v5877_v14 = vld [vmem:[%s7471_s2 + $0x30] sm:$0xf] }
 0x1dc   :  { %1035 = vst [vmem:[#allocation7 + $0x448] sm:$0xff] %v1034_v15  ;;  %v1264_v15 = vmul.f32 %v5848_v7, %v5855_v9 }
 0x1dd   :  { %1037 = vst [vmem:[#allocation7 + $0x478] sm:$0xff] %v1036_v16  ;;  %v1267_v16 = vmul.f32 %v5853_v8, %v5855_v9 }
 0x1de   :  { %1039 = vst [vmem:[#allocation7 + $0x6b8] sm:$0xff] %v1038_v17  ;;  %v5886_v17 = vld [vmem:[%s7471_s2 + $0x18] sm:$0xf] }
 0x1df   :  { %1041 = vst [vmem:[#allocation7 + $0x3c8] sm:$0xff] %v1040_v18 }
 0x1e0   :  { %1043 = vst [vmem:[#allocation7 + $0x50] sm:$0xff] %v1042_v19 }
 0x1e1   :  { %1045 = vst [vmem:[#allocation7 + $0xc0] sm:$0xff] %v1044_v20 }
 0x1e2   :  { %1047 = vst [vmem:[#allocation7 + $0x7d0] sm:$0xff] %v1046_v21 }
 0x1e3   :  { %1049 = vst [vmem:[#allocation7 + $0x1c0] sm:$0xff] %v1048_v22 }
 0x1e4   :  { %1051 = vst [vmem:[#allocation7 + $0x58] sm:$0xff] %v1050_v23 }
 0x1e5   :  { %1053 = vst [vmem:[#allocation7 + $0x290] sm:$0xff] %v1052_v24 }
 0x1e6   :  { %1055 = vst [vmem:[#allocation7 + $0x2f0] sm:$0xff] %v1054_v25 }
 0x1e7   :  { %1057 = vst [vmem:[#allocation7 + $0x5a0] sm:$0xff] %v1056_v26 }
 0x1e8   :  { %1059 = vst [vmem:[#allocation7 + $0x570] sm:$0xff] %v1058_v27 }
 0x1e9   :  { %1061 = vst [vmem:[#allocation7 + $0x4a0] sm:$0xff] %v1060_v28 }
 0x1ea   :  { %1063 = vst [vmem:[#allocation7 + $0x460] sm:$0xff] %v1062_v29 }
 0x1eb   :  { %1065 = vst [vmem:[#allocation7 + $0x598] sm:$0xff] %v1064_v30 }
 0x1ec   :  { %1067 = vst [vmem:[#allocation7 + $0x200] sm:$0xff] %v1066_v31 }
 0x1ed   :  { %1069 = vst [vmem:[#allocation7 + $0x250] sm:$0xff] %v1068_v32 }
 0x1ee   :  { %1071 = vst [vmem:[#allocation7 + $0x578] sm:$0xff] %v1070_v33 }
 0x1ef   :  { %1073 = vst [vmem:[#allocation7 + $0x170] sm:$0xff] %v1072_v34 }
 0x1f0   :  { %1075 = vst [vmem:[#allocation7 + $0x60] sm:$0xff] %v1074_v35 }
 0x1f1   :  { %1077 = vst [vmem:[#allocation7 + $0x500] sm:$0xff] %v1076_v36 }
 0x1f2   :  { %1079 = vst [vmem:[#allocation7 + $0x268] sm:$0xff] %v1078_v37 }
 0x1f3   :  { %1081 = vst [vmem:[#allocation7 + $0x160] sm:$0xff] %v1080_v38 }
 0x1f4   :  { %1083 = vst [vmem:[#allocation7 + $0x330] sm:$0xff] %v1082_v39 }
 0x1f5   :  { %1085 = vst [vmem:[#allocation7 + $0x98] sm:$0xff] %v1084_v40 }
 0x1f6   :  { %1087 = vst [vmem:[#allocation7 + $0x750] sm:$0xff] %v1086_v41 }
 0x1f7   :  { %1089 = vst [vmem:[#allocation7 + $0x310] sm:$0xff] %v1088_v42 }
 0x1f8   :  { %1091 = vst [vmem:[#allocation7 + $0x110] sm:$0xff] %v1090_v43 }
 0x1f9   :  { %1093 = vst [vmem:[#allocation7 + $0xe8] sm:$0xff] %v1092_v44 }
 0x1fa   :  { %1095 = vst [vmem:[#allocation7 + $0x648] sm:$0xff] %v1094_v45 }
 0x1fb   :  { %1097 = vst [vmem:[#allocation7 + $0x258] sm:$0xff] %v1096_v46 }
 0x1fc   :  { %1099 = vst [vmem:[#allocation7 + $0x3a0] sm:$0xff] %v1098_v47 }
 0x1fd   :  { %1101 = vst [vmem:[#allocation7 + $0x640] sm:$0xff] %v1100_v48 }
 0x1fe   :  { %1103 = vst [vmem:[#allocation7 + $0x80] sm:$0xff] %v1102_v49 }
 0x1ff   :  { %1105 = vst [vmem:[#allocation7 + $0x1a0] sm:$0xff] %v1104_v50 }
 0x200   :  { %1107 = vst [vmem:[#allocation7 + $0x6e8] sm:$0xff] %v1106_v51 }
 0x201   :  { %1109 = vst [vmem:[#allocation7 + $0x458] sm:$0xff] %v1108_v52 }
 0x202   :  { %1111 = vst [vmem:[#allocation7 + $0x468] sm:$0xff] %v1110_v53 }
 0x203   :  { %1113 = vst [vmem:[#allocation7 + $0x3b8] sm:$0xff] %v1112_v54 }
 0x204   :  { %1115 = vst [vmem:[#allocation7 + $0x740] sm:$0xff] %v1114_v55 }
 0x205   :  { %1117 = vst [vmem:[#allocation7 + $0x800] sm:$0xff] %v1116_v56 }
 0x206   :  { %1119 = vst [vmem:[#allocation7 + $0x3a8] sm:$0xff] %v1118_v57 }
 0x207   :  { %1121 = vst [vmem:[#allocation7 + $0x138] sm:$0xff] %v1120_v58 }
 0x208   :  { %1123 = vst [vmem:[#allocation7 + $0x248] sm:$0xff] %v1122_v59 }
 0x209   :  { %1125 = vst [vmem:[#allocation7 + $0x698] sm:$0xff] %v1124_v60 }
 0x20a   :  { %1127 = vst [vmem:[#allocation7 + $0x408] sm:$0xff] %v1126_v61 }
 0x20b   :  { %1129 = vst [vmem:[#allocation7 + $0x590] sm:$0xff] %v1128_v62 }
 0x20c   :  { %1131 = vst [vmem:[#allocation7 + $0x400] sm:$0xff] %v1130_v63 }
 0x20d   :  { %1133 = vst [vmem:[#allocation7 + $0x770] sm:$0xff] %v1132_v0 }
 0x20e   :  { %1135 = vst [vmem:[#allocation7 + $0x580] sm:$0xff] %v1134_v1 }
 0x20f   :  { %1137 = vst [vmem:[#allocation7 + $0x638] sm:$0xff] %v1136_v2 }
 0x210   :  { %1139 = vst [vmem:[#allocation7 + $0xf0] sm:$0xff] %v1138_v3 }
 0x211   :  { %1141 = vst [vmem:[#allocation7 + $0x558] sm:$0xff] %v1140_v4 }
 0x212   :  { %1153 = vst [vmem:[#allocation7 + $0x540] sm:$0x1] %v4051_v5 }
 0x213   :  { %1157 = vsyncadd [#allocation8 + $0x1], 33040  ;;  %s4195_s21 = smov 127   ;;  %v5889_v18 = vstv %s4053_s0  ;;  %v1284_v19 = vmul.f32 %v5860_v10, %v5855_v9  ;;  %v1244_v20 = vmul.f32 %v5865_v11, %v5855_v9  ;;  %v1287_v23 = vmul.f32 %v5877_v14, %v5855_v9  ;;  %v5914_v31 = vld [vmem:[%s7471_s2 + $0x60] sm:$0xf]  ;;  %s4196_s16 = smov 1  }
 0x214   :  { %1494 = vrot.lane.b32.xlu0 %v1492_v12, %s4195_s21  ;;  %v1263_v21 = vmul.f32 %v5872_v13, %v5889_v18  ;;  %v1266_v22 = vmul.f32 %v5848_v7, %v5889_v18  ;;  %v1247_v24 = vmul.f32 %v5872_v13, %v5855_v9  ;;  %v1283_v25 = vmul.f32 %v5853_v8, %v5889_v18  ;;  %v5919_v32 = vld [vmem:[%s7471_s2 + $0x64] sm:$0xf]  ;;  %v5927_v39 = vld [vmem:[%s7471_s2 + $0x68] sm:$0xf]  ;;  %v5932_v40 = vld [vmem:[%s7471_s2 + $0x6c] sm:$0xf] }
 0x215   :  { %v1286_v26 = vmul.f32 %v5860_v10, %v5889_v18  ;;  %v1243_v27 = vmul.f32 %v5886_v17, %v5889_v18  ;;  %v1246_v30 = vmul.f32 %v5865_v11, %v5889_v18  ;;  %v5922_v33 = vstv %s5843_s24  ;;  %v5937_v41 = vld [vmem:[%s7471_s2 + $0x70] sm:$0xf]  ;;  %v5949_v47 = vld [vmem:[%s7471_s2 + $0x58] sm:$0xf]  ;;  %v5954_v48 = vld [vmem:[%s7471_s2 + $0x5c] sm:$0xf] }
 0x216   :  { %v1265_v28 = vadd.f32 %v1264_v15, %v1263_v21  ;;  %v1268_v29 = vadd.f32 %v1267_v16, %v1266_v22  ;;  %v1285_v36 = vadd.f32 %v1284_v19, %v1283_v25  ;;  %v1423_v42 = vmul.f32 %v5914_v31, %v5889_v18  ;;  %v5980_v62 = vld [vmem:[%s7471_s2 + $0x10] sm:$0xf]  ;;  %v5985_v63 = vld [vmem:[%s7471_s2 + $0x14] sm:$0xf]  ;;  %s4052_s22 = sld [smem:[#allocation9 + $0x1]]  ;;  %s4197_s27 = smov 2  }
 0x217   :  { %v1245_v34 = vadd.f32 %v1244_v20, %v1243_v27  ;;  %v1288_v37 = vadd.f32 %v1287_v23, %v1286_v26  ;;  %v1248_v38 = vadd.f32 %v1247_v24, %v1246_v30  ;;  %v1424_v43 = vmul.f32 %v5919_v32, %v5855_v9  ;;  %v5990_v2 = vld [vmem:[%s7471_s2 + $0x4] sm:$0xf]  ;;  %v5996_v15 = vld [vmem:[%s7471_s2 + $0x8] sm:$0xf]  ;;  %s1158_s26 = sld [smem:[#allocation9]]  ;;  %s4198_s3 = smov 3  }
 0x218   :  { %v1269_v35 = vmax.f32 %v1265_v28, %v1268_v29  ;;  %v1426_v46 = vmul.f32 %v5919_v32, %v5889_v18  ;;  %v1443_v49 = vmul.f32 %v5927_v39, %v5889_v18  ;;  %v1444_v50 = vmul.f32 %v5932_v40, %v5855_v9  ;;  %s1162_s4 = sld [smem:[#allocation12]]  ;;  %s4199_s30 = smov 5  }
 0x219   :  { %v1249_v45 = vmax.f32 %v1245_v34, %v1248_v38  ;;  %v1425_v51 = vadd.f32 %v1424_v43, %v1423_v42  ;;  %v1427_v52 = vmul.f32 %v5927_v39, %v5855_v9  ;;  %v1289_v53 = vmax.f32 %v1285_v36, %v1288_v37  ;;  %v6027_v36 = vld [vmem:[%s7471_s2 + $0x78] sm:$0xf]  ;;  %s4090_s20 = sld [smem:[#allocation9 + $0x7]]  ;;  %s4200_s19 = smov 4  }
 0x21a   :  { %v1270_v44 = vadd.f32 %v1269_v35, %v5922_v33  ;;  %v1446_v55 = vmul.f32 %v5932_v40, %v5889_v18  ;;  %v1447_v56 = vmul.f32 %v5937_v41, %v5855_v9  ;;  %v1403_v58 = vmul.f32 %v5949_v47, %v5889_v18  ;;  %v6020_v35 = vld [vmem:[%s7471_s2 + $0x74] sm:$0xf]  ;;  %s6314_s0 = sld [smem:[#allocation9 + $0x4]] }
 0x21b   :  { %v1250_v54 = vadd.f32 %v1249_v45, %v5922_v33  ;;  %v1428_v57 = vadd.f32 %v1427_v52, %v1426_v46  ;;  %v1404_v59 = vmul.f32 %v5954_v48, %v5855_v9  ;;  %v1406_v60 = vmul.f32 %v5954_v48, %v5889_v18  ;;  %v6037_v46 = vld [vmem:[%s7471_s2 + $0x38] sm:$0xf]  ;;  %v6051_v52 = vld [vmem:[%s7471_s2 + $0x40] sm:$0xf]  ;;  %s4091_s23 = sld [smem:[#allocation12 + $0x2]] }
 0x21c   :  { %1597 = vrot.lane.b32.xlu1 %v1270_v44, %s4196_s16  ;;  %v1407_v61 = vmul.f32 %v5914_v31, %v5855_v9  ;;  %v1290_v3 = vadd.f32 %v1289_v53, %v5922_v33  ;;  %v1445_v4 = vadd.f32 %v1444_v50, %v1443_v49  ;;  %v1448_v5 = vadd.f32 %v1447_v56, %v1446_v55  ;;  %s4096_s1 = sld [smem:[#allocation9 + $0xb]] }
 0x21d   :  { %1588 = vrot.lane.b32.xlu0 %v1250_v54, %s4196_s16  ;;  %v1429_v0 = vmax.f32 %v1425_v51, %v1428_v57  ;;  %v1405_v1 = vadd.f32 %v1404_v59, %v1403_v58  ;;  %v1223_v16 = vmul.f32 %v5980_v62, %v5889_v18  ;;  %v1224_v19 = vmul.f32 %v5985_v63, %v5855_v9  ;;  %v6046_v51 = vld [vmem:[%s7471_s2 + $0x3c] sm:$0xf]  ;;  %s4094_s25 = sld [smem:[#allocation9 + $0x9]] }
 0x21e   :  { %v1408_v12 = vadd.f32 %v1407_v61, %v1406_v60  ;;  %v1226_v22 = vmul.f32 %v5985_v63, %v5889_v18  ;;  %v1181_v23 = vmul.f32 %v5889_v18, %v5841_v6  ;;  %v1183_v24 = vmul.f32 %v5990_v2, %v5855_v9  ;;  %s6699_s28 = sld [smem:[#allocation12 + $0x5]] }
 0x21f   :  { %v1430_v20 = vadd.f32 %v1429_v0, %v5922_v33  ;;  %v1225_v25 = vadd.f32 %v1224_v19, %v1223_v16  ;;  %v1227_v26 = vmul.f32 %v5886_v17, %v5855_v9  ;;  %v1449_v27 = vmax.f32 %v1445_v4, %v1448_v5  ;;  %s6761_s24 = sld [smem:[#allocation9 + $0xd]] }
 0x220   :  { %v1409_v21 = vmax.f32 %v1405_v1, %v1408_v12  ;;  %v1185_v28 = vmul.f32 %v5990_v2, %v5889_v18  ;;  %v1186_v29 = vmul.f32 %v5996_v15, %v5855_v9  ;;  %v6029_v37 = vstv %s4052_s22  ;;  %v6070_v1 = vld [vmem:[%s7471_s2 + $0xc] sm:$0xf]  ;;  %s6310_s22 = sld [smem:[#allocation9 + $0x6]] }
 0x221   :  { %v1228_v34 = vadd.f32 %v1227_v26, %v1226_v22  ;;  %v1184_v38 = vadd.f32 %v1183_v24, %v1181_v23  ;;  %v1463_v43 = vmul.f32 %v5937_v41, %v5889_v18  ;;  %v1450_v44 = vadd.f32 %v1449_v27, %v5922_v33  ;;  %v6086_v22 = vld [vmem:[%s7471_s2 + $0x50] sm:$0xf]  ;;  %v4076_v23 = vld [vmem:[%s7471_s2 + $0x54] sm:$0xf]  ;;  %s6770_s29 = sld [smem:[#allocation9 + $0xc]] }
 0x222   :  { %v1410_v30 = vadd.f32 %v1409_v21, %v5922_v33  ;;  %v1187_v45 = vadd.f32 %v1186_v29, %v1185_v28  ;;  %v1464_v49 = vmul.f32 %v6020_v35, %v5855_v9  ;;  %v1466_v50 = vmul.f32 %v6020_v35, %v5889_v18  ;;  %s6803_s15 = sld [smem:[#allocation12 + $0x6]] }
 0x223   :  { %v1229_v42 = vmax.f32 %v1225_v25, %v1228_v34  ;;  %v1467_v53 = vmul.f32 %v6027_v36, %v5855_v9  ;;  %v1477_v55 = vmul.f32 %v6029_v37, %v5841_v6  ;;  %v1323_v57 = vmul.f32 %v6037_v46, %v5889_v18  ;;  %s4102_s17 = sld [smem:[#allocation9 + $0xf]] }
 0x224   :  { %1606 = vrot.lane.b32.xlu1 %v1290_v3, %s4196_s16  ;;  %1507 = vrot.lane.b32.xlu2 %v1410_v30, %s4197_s27  ;;  %v1465_v56 = vadd.f32 %v1464_v49, %v1463_v43  ;;  %v1188_v59 = vmax.f32 %v1184_v38, %v1187_v45  ;;  %v1324_v60 = vmul.f32 %v6046_v51, %v5855_v9  ;;  %v6104_v45 = vld [vmem:[%s7471_s2 + $0x34] sm:$0xf]  ;;  %vm1502_vm0 = vcmask 1041408   ;;  %s4101_s18 = sld [smem:[#allocation9 + $0xe]] }
 0x225   :  { %1520 = vrot.lane.b32.xlu0 %v1430_v20, %s4197_s27  ;;  %v1230_v54 = vadd.f32 %v1229_v42, %v5922_v33  ;;  %v1468_v58 = vadd.f32 %v1467_v53, %v1466_v50  ;;  %v1326_v61 = vmul.f32 %v6046_v51, %v5889_v18  ;;  %v1327_v0 = vmul.f32 %v6051_v52, %v5855_v9 }
 0x226   :  { %v1203_v3 = vmul.f32 %v5996_v15, %v5889_v18  ;;  %v1207_v4 = vmul.f32 %v5980_v62, %v5855_v9  ;;  %v1204_v12 = vmul.f32 %v6070_v1, %v5855_v9  ;;  %v1206_v16 = vmul.f32 %v6070_v1, %v5889_v18 }
 0x227   :  { %v1469_v5 = vmax.f32 %v1465_v56, %v1468_v58  ;;  %v1190_v19 = vadd.f32 %v5922_v33, %v1188_v59  ;;  %v1325_v20 = vadd.f32 %v1324_v60, %v1323_v57  ;;  %v1328_v21 = vadd.f32 %v1327_v0, %v1326_v61 }
 0x228   :  { %v1205_v25 = vadd.f32 %v1204_v12, %v1203_v3  ;;  %v1208_v26 = vadd.f32 %v1207_v4, %v1206_v16  ;;  %v1383_v27 = vmul.f32 %v6086_v22, %v5889_v18  ;;  %v1384_v29 = vmul.f32 %v4076_v23, %v5855_v9  ;;  %v6135_v12 = vld [vmem:[%s7471_s2 + $0x4c] sm:$0xf] }
 0x229   :  { %v1470_v24 = vadd.f32 %v1469_v5, %v5922_v33  ;;  %v1329_v28 = vmax.f32 %v1325_v20, %v1328_v21  ;;  %v1386_v30 = vmul.f32 %v4076_v23, %v5889_v18  ;;  %v1387_v34 = vmul.f32 %v5949_v47, %v5855_v9  ;;  %v6130_v5 = vld [vmem:[%s7471_s2 + $0x48] sm:$0xf] }
 0x22a   :  { %v1209_v38 = vmax.f32 %v1205_v25, %v1208_v26  ;;  %v1385_v43 = vadd.f32 %v1384_v29, %v1383_v27  ;;  %v1303_v50 = vmul.f32 %v5877_v14, %v5889_v18  ;;  %v1307_v56 = vmul.f32 %v6037_v46, %v5855_v9 }
 0x22b   :  { %v1330_v42 = vadd.f32 %v1329_v28, %v5922_v33  ;;  %v6121_v0 = vstv %s1158_s26  ;;  %v1172_v4 = vmul.f32 %v5990_v2, %v6029_v37  ;;  %v1359_v26 = vmul.f32 %v6086_v22, %v6029_v37  ;;  %s4095_s26 = sld [smem:[#allocation9 + $0xa]] }
 0x22c   :  { %1529 = vrot.lane.b32.xlu1 %v1450_v44, %s4197_s27  ;;  %1479 = vrot.lane.b32.xlu2 %v1477_v55, %s4195_s21  ;;  %v1388_v44 = vadd.f32 %v1387_v34, %v1386_v30  ;;  %v1210_v49 = vadd.f32 %v1209_v38, %v5922_v33  ;;  %v1306_v55 = vmul.f32 %v6104_v45, %v5889_v18  ;;  %vm1503_vm1 = vcmask 11266  }
 0x22d   :  { %1579 = vrot.lane.b32.xlu0 %v1230_v54, %s4196_s16  ;;  %v1304_v54 = vmul.f32 %v6104_v45, %v5855_v9  ;;  %v1170_v3 = vmul.f32 %v6121_v0, %v5841_v6  ;;  %v1174_v20 = vmul.f32 %v5990_v2, %v6121_v0  ;;  %v1175_v6 = vmul.f32 %v5996_v15, %v6029_v37  ;;  %v4072_v2 = vld [vmem:[%s7471_s2 + $0x44] sm:$0xf]  ;;  %vm6163_vm3 = vmor %vm1503_vm1, %vm1502_vm0 }
 0x22e   :  { %v1389_v53 = vmax.f32 %v1385_v43, %v1388_v44  ;;  %v1308_v59 = vadd.f32 %v1307_v56, %v1306_v55  ;;  %v1355_v21 = vmul.f32 %v6130_v5, %v6121_v0  ;;  %v1358_v25 = vmul.f32 %v6135_v12, %v6121_v0 }
 0x22f   :  { %v1305_v58 = vadd.f32 %v1304_v54, %v1303_v50  ;;  %v1173_v16 = vadd.f32 %v1172_v4, %v1170_v3  ;;  %vm1554_vm2 = vcmask 3074   ;;  %v1176_v27 = vadd.f32 %v1175_v6, %v1174_v20 }
 0x230   :  { %v1390_v57 = vadd.f32 %v1389_v53, %v5922_v33  ;;  %v1360_v29 = vadd.f32 %v1359_v26, %v1358_v25  ;;  %v1343_v30 = vmul.f32 %v6051_v52, %v5889_v18  ;;  %v1344_v34 = vmul.f32 %v4072_v2, %v5855_v9  ;;  %vm6170_vm4 = vmor %vm1554_vm2, %vm1502_vm0 }
 0x231   :  { %v1309_v60 = vmax.f32 %v1305_v58, %v1308_v59  ;;  %v1177_v38 = vmax.f32 %v1173_v16, %v1176_v27  ;;  %v1376_v43 = vmul.f32 %v4076_v23, %v6029_v37  ;;  %v1378_v44 = vmul.f32 %v4076_v23, %v6121_v0 }
 0x232   :  { %v1379_v53 = vmul.f32 %v5949_v47, %v6029_v37  ;;  %v1335_v23 = vmul.f32 %v6051_v52, %v6121_v0  ;;  %v1345_v4 = vadd.f32 %v1344_v34, %v1343_v30  ;;  %v1346_v16 = vmul.f32 %v4072_v2, %v5889_v18 }
 0x233   :  { %v1310_v61 = vadd.f32 %v1309_v60, %v5922_v33  ;;  %v1338_v60 = vmul.f32 %v4072_v2, %v6121_v0  ;;  %v1347_v20 = vmul.f32 %v6130_v5, %v5855_v9  ;;  %v1218_v30 = vmul.f32 %v5985_v63, %v6121_v0 }
 0x234   :  { %1558 = vrot.lane.b32.xlu1 %v1190_v19, %s4196_s16  ;;  %1538 = vrot.lane.b32.xlu2 %v1470_v24, %s4197_s27  ;;  %v6137_v19 = vstv %s1162_s4  ;;  %v1356_v24 = vmul.f32 %v6135_v12, %v6029_v37  ;;  %v1380_v59 = vadd.f32 %v1379_v53, %v1378_v44  ;;  %v1219_v34 = vmul.f32 %v5886_v17, %v6029_v37  ;;  %s6651_s4 = sld [smem:[#allocation12 + $0x4]] }
 0x235   :  { %v1179_v55 = vadd.f32 %v6137_v19, %v1177_v38  ;;  %v1195_v38 = vmul.f32 %v5996_v15, %v6121_v0  ;;  %v1196_v44 = vmul.f32 %v6070_v1, %v6029_v37  ;;  %v1198_v53 = vmul.f32 %v6070_v1, %v6121_v0  ;;  %v4086_v15 = vld [vmem:[%s7471_s2 + $0x7c] sm:$0xf]  ;;  %s6234_s2 = sld [smem:[#allocation9 + $0x5]] }
 0x236   :  { %v1357_v28 = vadd.f32 %v1356_v24, %v1355_v21  ;;  %v1348_v24 = vadd.f32 %v1347_v20, %v1346_v16  ;;  %vm1514_vm5 = vcmask 19458   ;;  %vm1513_vm6 = vcmask 1041424  }
 0x237   :  { %1505 = vst.msk [vmem:[#allocation2] sm:$0xf] %vm6163_vm3, %v1179_v55  ;;  %v1197_v55 = vadd.f32 %v1196_v44, %v1195_v38  ;;  %v1364_v1 = vmul.f32 %v6135_v12, %v5855_v9  ;;  %vm1510_vm7 = vcmask 15360   ;;  %vm6230_vm8 = vmor %vm1514_vm5, %vm1513_vm6  ;;  %vm1482_vm9 = vcmask 1039360  }
 0x238   :  { %v1349_v27 = vmax.f32 %v1345_v4, %v1348_v24  ;;  %vm1561_vm10 = vcmask 7168   ;;  %vm1564_vm11 = vcmask 1041416   ;;  %v1476_v44 = vmul.f32 %v4086_v15, %v6121_v0 }
 0x239   :  { %vm6292_vm12 = vmor %vm1514_vm5, %vm1564_vm11  ;;  %vm1826_vm14 = vcmask 1043458   ;;  %vm1828_vm5 = vcmask 21508  }
 0x23a   :  { %vm6339_vm13 = vmor %vm1503_vm1, %vm1564_vm11  ;;  %vm1871_vm1 = vcmask 13316  }
 0x23b   :  { %vm6408_vm15 = vmor %vm1826_vm14, %vm1502_vm0 }
 0x23c   :  { %1625 = vrot.lane.b32.xlu1 %v1330_v42, %s4196_s16  ;;  %1570 = vrot.lane.b32.xlu2 %v1210_v49, %s4196_s16  ;;  %v1375_v42 = vmul.f32 %v6086_v22, %v6121_v0  ;;  %v1361_v49 = vmax.f32 %v1357_v28, %v1360_v29  ;;  %v1215_v28 = vmul.f32 %v5980_v62, %v6121_v0  ;;  %vm6422_vm2 = vmor %vm1871_vm1, %vm6408_vm15  ;;  %vm2106_vm1 = vcmask 1041448  }
 0x23d   :  { %v1216_v29 = vmul.f32 %v5985_v63, %v6029_v37  ;;  %v1199_v63 = vmul.f32 %v5980_v62, %v6029_v37  ;;  %v1366_v62 = vmul.f32 %v6135_v12, %v5889_v18  ;;  %vm6454_vm11 = vmor %vm1828_vm5, %vm6408_vm15  ;;  %vm2092_vm15 = vcmask 33792  }
 0x23e   :  { %v1377_v56 = vadd.f32 %v1376_v43, %v1375_v42  ;;  %v1362_v58 = vadd.f32 %v1361_v49, %v6137_v19  ;;  %v1350_v42 = vadd.f32 %v1349_v27, %v5922_v33  ;;  %v1220_v49 = vadd.f32 %v1219_v34, %v1218_v30 }
 0x23f   :  { %v1217_v43 = vadd.f32 %v1216_v29, %v1215_v28  ;;  %v1275_v28 = vmul.f32 %v5853_v8, %v6121_v0  ;;  %v1276_v29 = vmul.f32 %v5860_v10, %v6029_v37  ;;  %v6254_v34 = vstv %s4090_s20  ;;  %s4104_s20 = sld [smem:[#allocation12 + $0x7]] }
 0x240   :  { %1595 = vst.msk [vmem:[#allocation2 + $0x36] sm:$0xf] %vm6170_vm4, %v1362_v58  ;;  %v1381_v6 = vmax.f32 %v1377_v56, %v1380_v59  ;;  %v1367_v58 = vmul.f32 %v6086_v22, %v5855_v9  ;;  %vm2108_vm5 = vcmask 1045508  }
 0x241   :  { %v1221_v56 = vmax.f32 %v1217_v43, %v1220_v49  ;;  %v1277_v49 = vadd.f32 %v1276_v29, %v1275_v28  ;;  %v1316_v28 = vmul.f32 %v6046_v51, %v6029_v37 }
 0x242   :  { %v1382_v25 = vadd.f32 %v1381_v6, %v6137_v19  ;;  %v1368_v6 = vadd.f32 %v1367_v58, %v1366_v62 }
 0x244   :  { %1652 = vrot.lane.b32.xlu1 %v1390_v57, %s4196_s16  ;;  %v1336_v57 = vmul.f32 %v4072_v2, %v6029_v37  ;;  %1604 = vst.msk [vmem:[#allocation2 + $0x3c] sm:$0xf] %vm6170_vm4, %v1382_v25  ;;  %1634 = vrot.lane.b32.xlu2 %v1350_v42, %s4196_s16 }
 0x246   :  { %v1337_v3 = vadd.f32 %v1336_v57, %v1335_v23  ;;  %v1200_v23 = vadd.f32 %v1199_v63, %v1198_v53  ;;  %v1363_v57 = vmul.f32 %v6130_v5, %v5889_v18 }
 0x248   :  { %v1365_v20 = vadd.f32 %v1364_v1, %v1363_v57  ;;  %v1238_v57 = vmul.f32 %v5865_v11, %v6121_v0  ;;  %v1239_v1 = vmul.f32 %v5872_v13, %v6029_v37 }
 0x24a   :  { %v1369_v30 = vmax.f32 %v1365_v20, %v1368_v6 }
 0x24c   :  { %1616 = vrot.lane.b32.xlu1 %v1310_v61, %s4196_s16  ;;  %v1339_v61 = vmul.f32 %v6130_v5, %v6029_v37  ;;  %v1489_v5 = vmul.f32 %v4086_v15, %v5855_v9  ;;  %v1473_v9 = vmul.f32 %v6027_v36, %v6121_v0 }
 0x24e   :  { %v1340_v21 = vadd.f32 %v1339_v61, %v1338_v60  ;;  %v1222_v60 = vadd.f32 %v1221_v56, %v6137_v19  ;;  %v1201_v61 = vmax.f32 %v1197_v55, %v1200_v23  ;;  %v6261_v56 = vstv %s6234_s2  ;;  %s4201_s2 = smov 9  }
 0x24f   :  { %v1236_v23 = vmul.f32 %v5865_v11, %v6029_v37 }
 0x250   :  { %v1341_v26 = vmax.f32 %v1337_v3, %v1340_v21  ;;  %v1488_v3 = vmul.f32 %v6027_v36, %v5889_v18  ;;  %1527 = vst.msk [vmem:[#allocation2 + $0xc] sm:$0xf] %vm6163_vm3, %v1222_v60  ;;  %v1202_v22 = vadd.f32 %v1201_v61, %v6137_v19  ;;  %v1474_v21 = vmul.f32 %v4086_v15, %v6029_v37 }
 0x252   :  { %v1342_v2 = vadd.f32 %v1341_v26, %v6137_v19  ;;  %v1490_v25 = vadd.f32 %v1489_v5, %v1488_v3  ;;  %v1491_v26 = vmul.f32 %v4086_v15, %v5889_v18  ;;  %1518 = vst.msk [vmem:[#allocation2 + $0x6] sm:$0xf] %vm6163_vm3, %v1202_v22  ;;  %v1279_v18 = vmul.f32 %v5877_v14, %v6029_v37 }
 0x253   :  { %v1475_v43 = vadd.f32 %v1474_v21, %v1473_v9  ;;  %v1370_v15 = vadd.f32 %v1369_v30, %v5922_v33  ;;  %v1315_v5 = vmul.f32 %v6037_v46, %v6121_v0  ;;  %v1240_v22 = vadd.f32 %v1239_v1, %v1238_v57 }
 0x254   :  { %1586 = vst.msk [vmem:[#allocation2 + $0x30] sm:$0xf] %vm6170_vm4, %v1342_v2  ;;  %v1278_v2 = vmul.f32 %v5860_v10, %v6121_v0  ;;  %v1235_v10 = vmul.f32 %v5886_v17, %v6121_v0  ;;  %v1415_v9 = vmul.f32 %v5914_v31, %v6121_v0  ;;  %v1416_v21 = vmul.f32 %v5919_v32, %v6029_v37 }
 0x255   :  { %v1298_v57 = vmul.f32 %v6104_v45, %v6121_v0 }
 0x256   :  { %v1280_v55 = vadd.f32 %v1279_v18, %v1278_v2  ;;  %v1237_v3 = vadd.f32 %v1236_v23, %v1235_v10  ;;  %v1417_v30 = vadd.f32 %v1416_v21, %v1415_v9  ;;  %v1318_v18 = vmul.f32 %v6046_v51, %v6121_v0 }
 0x257   :  { %v1295_v51 = vmul.f32 %v5877_v14, %v6121_v0  ;;  %v1296_v23 = vmul.f32 %v6104_v45, %v6029_v37  ;;  %v1299_v14 = vmul.f32 %v6037_v46, %v6029_v37  ;;  %v6357_v9 = vstv %s6310_s22  ;;  %s4106_s22 = sld [smem:[#allocation9 + $0x11]] }
 0x258   :  { %v1281_v60 = vmax.f32 %v1277_v49, %v1280_v55 }
 0x27e   :  { %v1508_v59 = vpop.permute.xlu2 %1507 }
 0x27f   :  { %v1509_v12 = vrot.slane %v1508_v59, 6 }
 0x281   :  { %v1511_v16 = vsel %vm1510_vm7, %v1509_v12, %v1508_v59  ;;  %v1282_v12 = vadd.f32 %v1281_v60, %v6137_v19 }
 0x282   :  { %1516 = vst.msk [vmem:[#allocation2 + $0x2] sm:$0xf] %vm6230_vm8, %v1511_v16 }
 0x283   :  { %1556 = vst.msk [vmem:[#allocation2 + $0x1e] sm:$0xf] %vm6170_vm4, %v1282_v12 }
 0x286   :  { %v1495_v24 = vpop.permute.xlu0 %1494  ;;  %v1480_v42 = vpop.permute.xlu2 %1479 }
 0x287   :  { %v1496_v27 = vrot.slane %v1495_v24, 2  ;;  %v1481_v63 = vrot.slane %v1480_v42, 2 }
 0x289   :  { %v1497_v38 = vsel %vm1482_vm9, %v1495_v24, %v1496_v27  ;;  %v1483_v58 = vsel %vm1482_vm9, %v1480_v42, %v1481_v63  ;;  %v6273_v59 = vld [vmem:[#allocation2] sm:$0x3f]  ;;  %v1418_v24 = vmul.f32 %v5919_v32, %v6121_v0  ;;  %v1419_v27 = vmul.f32 %v5927_v39, %v6029_v37 }
 0x28a   :  { %v1499_v53 = vadd.f32 %v1497_v38, %v1491_v26  ;;  %v1485_v61 = vadd.f32 %v1483_v58, %v1476_v44  ;;  %v1816_v17 = vmul.f32 %v6254_v34, %v6273_v59  ;;  %v1802_v16 = vmul.f32 %v6261_v56, %v6273_v59 }
 0x28b   :  { %v1241_v26 = vmax.f32 %v1237_v3, %v1240_v22  ;;  %v1319_v38 = vmul.f32 %v6051_v52, %v6029_v37  ;;  %v1317_v63 = vadd.f32 %v1316_v28, %v1315_v5  ;;  %v1297_v58 = vadd.f32 %v1296_v23, %v1295_v51 }
 0x28c   :  { %v1500_v62 = vmax.f32 %v1490_v25, %v1499_v53  ;;  %v1486_v6 = vmax.f32 %v1475_v43, %v1485_v61  ;;  %1818 = vrot.lane.b32.xlu2 %v1816_v17, %s4195_s21  ;;  %v1420_v53 = vadd.f32 %v1419_v27, %v1418_v24  ;;  %v1300_v17 = vadd.f32 %v1299_v14, %v1298_v57 }
 0x28d   :  { %v1242_v44 = vadd.f32 %v1241_v26, %v6137_v19  ;;  %v1320_v55 = vadd.f32 %v1319_v38, %v1318_v18 }
 0x28e   :  { %v1501_v11 = vadd.f32 %v1500_v62, %v5922_v33  ;;  %v1598_v20 = vpop.permute.xlu1 %1597  ;;  %v1487_v29 = vadd.f32 %v1486_v6, %v6137_v19  ;;  %v1539_v2 = vpop.permute.xlu2 %1538  ;;  %v1421_v1 = vmax.f32 %v1417_v30, %v1420_v53  ;;  %v1301_v12 = vmax.f32 %v1297_v58, %v1300_v17 }
 0x28f   :  { %v1599_v25 = vrot.slane %v1598_v20, 6  ;;  %v1589_v32 = vpop.permute.xlu0 %1588  ;;  %v1540_v49 = vrot.slane %v1539_v2, 6  ;;  %v1321_v62 = vmax.f32 %v1317_v63, %v1320_v55  ;;  %1536 = vst.msk [vmem:[#allocation2 + $0x12] sm:$0xf] %vm6163_vm3, %v1242_v44  ;;  %v1395_v6 = vmul.f32 %v5949_v47, %v6121_v0 }
 0x290   :  { %1547 = vrot.lane.b32.xlu0 %v1501_v11, %s4197_s27  ;;  %v1590_v43 = vrot.slane %v1589_v32, 6  ;;  %1650 = vst.msk [vmem:[#allocation2 + $0x5a] sm:$0xf] %vm6170_vm4, %v1487_v29  ;;  %v1422_v45 = vadd.f32 %v1421_v1, %v6137_v19  ;;  %v1302_v24 = vadd.f32 %v1301_v12, %v6137_v19  ;;  %v1398_v47 = vmul.f32 %v5954_v48, %v6121_v0 }
 0x291   :  { %v1600_v42 = vsel %vm1561_vm10, %v1599_v25, %v1598_v20  ;;  %v1541_v10 = vsel %vm1510_vm7, %v1540_v49, %v1539_v2  ;;  %v1322_v61 = vadd.f32 %v1321_v62, %v6137_v19  ;;  %v1396_v25 = vmul.f32 %v5954_v48, %v6029_v37 }
 0x292   :  { %1602 = vst.msk [vmem:[#allocation2 + $0x38] sm:$0xf] %vm6292_vm12, %v1600_v42  ;;  %v1591_v52 = vsel %vm1561_vm10, %v1590_v43, %v1589_v32  ;;  %v1399_v32 = vmul.f32 %v5914_v31, %v6029_v37 }
 0x293   :  { %1593 = vst.msk [vmem:[#allocation2 + $0x32] sm:$0xf] %vm6292_vm12, %v1591_v52  ;;  %v1397_v29 = vadd.f32 %v1396_v25, %v1395_v6 }
 0x294   :  { %1543 = vst.msk [vmem:[#allocation2 + $0x14] sm:$0xf] %vm6230_vm8, %v1541_v10  ;;  %1804 = vrot.lane.b32.xlu2 %v1802_v16, %s4195_s21  ;;  %v1400_v18 = vadd.f32 %v1399_v32, %v1398_v47 }
 0x295   :  { %1623 = vst.msk [vmem:[#allocation2 + $0x48] sm:$0xf] %vm6170_vm4, %v1422_v45 }
 0x296   :  { %v1607_v60 = vpop.permute.xlu1 %1606  ;;  %v1571_v11 = vpop.permute.xlu2 %1570  ;;  %1577 = vst.msk [vmem:[#allocation2 + $0x2a] sm:$0xf] %vm6170_vm4, %v1322_v61  ;;  %v1401_v43 = vmax.f32 %v1397_v29, %v1400_v18  ;;  %v1679_v61 = vmul.f32 %v6357_v9, %v6273_v59 }
 0x297   :  { %v1608_v3 = vrot.slane %v1607_v60, 6  ;;  %v1521_v5 = vpop.permute.xlu0 %1520  ;;  %v1572_v20 = vrot.slane %v1571_v11, 6  ;;  %1568 = vst.msk [vmem:[#allocation2 + $0x24] sm:$0xf] %vm6170_vm4, %v1302_v24 }
 0x298   :  { %1643 = vrot.lane.b32.xlu0 %v1370_v15, %s4196_s16  ;;  %v1522_v16 = vrot.slane %v1521_v5, 6  ;;  %v6354_v15 = vstv %s6314_s0  ;;  %s4092_s16 = sld [smem:[#allocation12 + $0x3]]  ;;  %v1402_v10 = vadd.f32 %v1401_v43, %v6137_v19 }
 0x299   :  { %v1609_v22 = vsel %vm1561_vm10, %v1608_v3, %v1607_v60  ;;  %v1743_v21 = vld [vmem:[#allocation2 + $0x36] sm:$0x3f]  ;;  %v1573_v28 = vsel %vm1561_vm10, %v1572_v20, %v1571_v11  ;;  %v6404_v3 = vstv %s4091_s23  ;;  %v1668_v11 = vmul.f32 %v6354_v15, %v6273_v59  ;;  %s6969_s0 = sld [smem:[#allocation9 + $0x13]] }
 0x29a   :  { %1612 = vst.msk [vmem:[#allocation2 + $0x3e] sm:$0xf] %vm6339_vm13, %v1609_v22  ;;  %v1523_v26 = vsel %vm1510_vm7, %v1522_v16, %v1521_v5  ;;  %v6363_v27 = vld [vmem:[#allocation2 + $0x30] sm:$0x3f]  ;;  %v1754_v30 = vmul.f32 %v1743_v21, %v6254_v34  ;;  %v1746_v48 = vmul.f32 %v1743_v21, %v6261_v56  ;;  %v1756_v44 = vmul.f32 %v1743_v21, %v6357_v9  ;;  %s4107_s23 = sld [smem:[#allocation9 + $0x12]] }
 0x29b   :  { %1525 = vst.msk [vmem:[#allocation2 + $0x8] sm:$0xf] %vm6230_vm8, %v1523_v26  ;;  %v1753_v2 = vmul.f32 %v6363_v27, %v6357_v9  ;;  %v1745_v31 = vmul.f32 %v6363_v27, %v6354_v15  ;;  %v1748_v53 = vmul.f32 %v1743_v21, %v6354_v15  ;;  %v1731_v33 = vmul.f32 %v6363_v27, %v6261_v56 }
 0x29c   :  { %1575 = vst.msk [vmem:[#allocation2 + $0x26] sm:$0xf] %vm6292_vm12, %v1573_v28 }
 0x29d   :  { %v1755_v51 = vadd.f32 %v1754_v30, %v1753_v2  ;;  %v1747_v57 = vadd.f32 %v1746_v48, %v1745_v31  ;;  %1614 = vst.msk [vmem:[#allocation2 + $0x42] sm:$0xf] %vm6170_vm4, %v1402_v10  ;;  %v1739_v30 = vmul.f32 %v6363_v27, %v6254_v34 }
 0x29e   :  { %v1530_v38 = vpop.permute.xlu1 %1529  ;;  %v6397_v58 = vstv %s4092_s16  ;;  %s4105_s16 = sld [smem:[#allocation9 + $0x10]] }
 0x29f   :  { %v1531_v42 = vrot.slane %v1530_v38, 6  ;;  %v1580_v49 = vpop.permute.xlu0 %1579 }
 0x2a0   :  { %v1581_v52 = vrot.slane %v1580_v49, 6 }
 0x2a1   :  { %v1532_v63 = vsel %vm1510_vm7, %v1531_v42, %v1530_v38  ;;  %v6385_v55 = vld [vmem:[#allocation2 + $0x3c] sm:$0x3f] }
 0x2a2   :  { %1534 = vst.msk [vmem:[#allocation2 + $0xe] sm:$0xf] %vm6230_vm8, %v1532_v63  ;;  %v1757_v23 = vmul.f32 %v6385_v55, %v6254_v34  ;;  %v1749_v1 = vmul.f32 %v6385_v55, %v6261_v56  ;;  %v1582_v62 = vsel %vm1561_vm10, %v1581_v52, %v1580_v49  ;;  %v1665_v14 = vld [vmem:[#allocation2 + $0x6] sm:$0x3f] }
 0x2a3   :  { %1584 = vst.msk [vmem:[#allocation2 + $0x2c] sm:$0xf] %vm6292_vm12, %v1582_v62  ;;  %v1681_v17 = vmul.f32 %v6254_v34, %v1665_v14  ;;  %v6414_v16 = vld [vmem:[#allocation2 + $0x24] sm:$0x3f]  ;;  %v1670_v6 = vmul.f32 %v6261_v56, %v1665_v14  ;;  %v1683_v25 = vmul.f32 %v6357_v9, %v1665_v14  ;;  %v1672_v59 = vmul.f32 %v6354_v15, %v1665_v14 }
 0x2a4   :  { %v1758_v60 = vadd.f32 %v1757_v23, %v1756_v44  ;;  %v1750_v45 = vadd.f32 %v1749_v1, %v1748_v53  ;;  %v1735_v2 = vmul.f32 %v6414_v16, %v6357_v9  ;;  %v1727_v42 = vmul.f32 %v6414_v16, %v6354_v15 }
 0x2a5   :  { %v1682_v29 = vadd.f32 %v1681_v17, %v1679_v61  ;;  %v1671_v38 = vadd.f32 %v1670_v6, %v1668_v11 }
 0x2a6   :  { %v1559_v12 = vpop.permute.xlu1 %1558  ;;  %v1759_v22 = vmax.f32 %v1755_v51, %v1758_v60  ;;  %v1751_v20 = vmax.f32 %v1747_v57, %v1750_v45 }
 0x2a7   :  { %v1560_v21 = vrot.slane %v1559_v12, 6 }
 0x2a8   :  { %v1760_v24 = vadd.f32 %v1759_v22, %v6397_v58  ;;  %v1752_v26 = vadd.f32 %v1751_v20, %v6404_v3 }
 0x2a9   :  { %v1562_v47 = vsel %vm1561_vm10, %v1560_v21, %v1559_v12  ;;  %v6428_v32 = vld [vmem:[#allocation2 + $0xc] sm:$0x3f]  ;;  %v1435_v21 = vmul.f32 %v5927_v39, %v6121_v0 }
 0x2aa   :  { %1566 = vst.msk [vmem:[#allocation2 + $0x20] sm:$0xf] %vm6292_vm12, %v1562_v47  ;;  %1832 = vrot.lane.b32.xlu0 %v1760_v24, %s4198_s3  ;;  %v1684_v18 = vmul.f32 %v6254_v34, %v6428_v32  ;;  %v1673_v31 = vmul.f32 %v6261_v56, %v6428_v32  ;;  %v1725_v48 = vld [vmem:[#allocation2 + $0x2a] sm:$0x3f]  ;;  %v1436_v24 = vmul.f32 %v5932_v40, %v6029_v37  ;;  %vm1880_vm12 = vmor %vm1826_vm14, %vm1513_vm6  ;;  %vm1838_vm6 = vcmask 1041432  }
 0x2ab   :  { %1873 = vst.msk [vmem:[#allocation3 + $0x28] sm:$0x3f] %vm6422_vm2, %v1752_v26  ;;  %v1736_v44 = vmul.f32 %v1725_v48, %v6254_v34  ;;  %v1738_v49 = vmul.f32 %v1725_v48, %v6357_v9  ;;  %v1728_v63 = vmul.f32 %v1725_v48, %v6261_v56  ;;  %v1730_v51 = vmul.f32 %v1725_v48, %v6354_v15 }
 0x2ac   :  { %v1685_v43 = vadd.f32 %v1684_v18, %v1683_v25  ;;  %v1674_v53 = vadd.f32 %v1673_v31, %v1672_v59  ;;  %v1438_v25 = vmul.f32 %v5932_v40, %v6121_v0  ;;  %v1439_v26 = vmul.f32 %v5937_v41, %v6029_v37 }
 0x2ad   :  { %v1737_v23 = vadd.f32 %v1736_v44, %v1735_v2  ;;  %v1740_v57 = vadd.f32 %v1739_v30, %v1738_v49  ;;  %v1729_v14 = vadd.f32 %v1728_v63, %v1727_v42  ;;  %v1732_v60 = vadd.f32 %v1731_v33, %v1730_v51 }
 0x2ae   :  { %v1626_v52 = vpop.permute.xlu1 %1625  ;;  %v1686_v10 = vmax.f32 %v1682_v29, %v1685_v43  ;;  %v1675_v1 = vmax.f32 %v1671_v38, %v1674_v53  ;;  %v1437_v47 = vadd.f32 %v1436_v24, %v1435_v21  ;;  %v1440_v29 = vadd.f32 %v1439_v26, %v1438_v25 }
 0x2af   :  { %v1627_v62 = vrot.slane %v1626_v52, 6  ;;  %v1733_v11 = vmax.f32 %v1729_v14, %v1732_v60  ;;  %v1741_v12 = vmax.f32 %v1737_v23, %v1740_v57  ;;  %v1771_v42 = vmul.f32 %v6385_v55, %v6357_v9  ;;  %v1635_v14 = vpop.permute.xlu2 %1634 }
 0x2b0   :  { %v1688_v27 = vadd.f32 %v6397_v58, %v1686_v10  ;;  %v1677_v61 = vadd.f32 %v6404_v3, %v1675_v1  ;;  %v1441_v2 = vmax.f32 %v1437_v47, %v1440_v29  ;;  %v1763_v33 = vmul.f32 %v6385_v55, %v6354_v15 }
 0x2b1   :  { %v1628_v17 = vsel %vm1561_vm10, %v1627_v62, %v1626_v52  ;;  %v1734_v5 = vadd.f32 %v1733_v11, %v6404_v3  ;;  %v1742_v20 = vadd.f32 %v1741_v12, %v6397_v58  ;;  %v1636_v60 = vrot.slane %v1635_v14, 6 }
 0x2b2   :  { %1630 = vst.msk [vmem:[#allocation2 + $0x4a] sm:$0xf] %vm6339_vm13, %v1628_v17  ;;  %1875 = vrot.lane.b32.xlu2 %v1688_v27, %s4197_s27  ;;  %v1442_v30 = vadd.f32 %v1441_v2, %v6137_v19  ;;  %v1256_v17 = vmul.f32 %v5848_v7, %v6029_v37  ;;  %v1258_v11 = vmul.f32 %v5848_v7, %v6121_v0 }
 0x2b3   :  { %1830 = vst.msk [vmem:[#allocation3] sm:$0x3f] %vm6454_vm11, %v1677_v61  ;;  %v1637_v27 = vsel %vm1561_vm10, %v1636_v60, %v1635_v14  ;;  %v1255_v61 = vmul.f32 %v5872_v13, %v6121_v0  ;;  %v1259_v12 = vmul.f32 %v5853_v8, %v6029_v37  ;;  %v1455_v13 = vmul.f32 %v5937_v41, %v6121_v0 }
 0x2b4   :  { %1862 = vst.msk [vmem:[#allocation3 + $0x1e] sm:$0x3f] %vm6454_vm11, %v1734_v5  ;;  %v1456_v21 = vmul.f32 %v6020_v35, %v6029_v37  ;;  %v1458_v7 = vmul.f32 %v6020_v35, %v6121_v0  ;;  %v1459_v8 = vmul.f32 %v6027_v36, %v6029_v37  ;;  %v1689_v35 = vld [vmem:[#allocation2 + $0x12] sm:$0x3f]  ;;  %v6534_v36 = vld [vmem:[#allocation2 + $0x1e] sm:$0x3f] }
 0x2b5   :  { %1632 = vst.msk [vmem:[#allocation2 + $0x4e] sm:$0xf] %vm6170_vm4, %v1442_v30  ;;  %v1257_v5 = vadd.f32 %v1256_v17, %v1255_v61  ;;  %v1692_v30 = vmul.f32 %v1689_v35, %v6261_v56  ;;  %v1710_v46 = vmul.f32 %v6534_v36, %v6261_v56  ;;  %v1699_v17 = vmul.f32 %v6357_v9, %v6428_v32 }
 0x2b6   :  { %v1653_v22 = vpop.permute.xlu1 %1652  ;;  %1639 = vst.msk [vmem:[#allocation2 + $0x50] sm:$0xf] %vm6339_vm13, %v1637_v27  ;;  %v1457_v24 = vadd.f32 %v1456_v21, %v1455_v13  ;;  %v1460_v25 = vadd.f32 %v1459_v8, %v1458_v7 }
 0x2b7   :  { %v1654_v6 = vrot.slane %v1653_v22, 6 }
 0x2b8   :  { %v1461_v26 = vmax.f32 %v1457_v24, %v1460_v25 }
 0x2b9   :  { %v1655_v59 = vsel %vm1561_vm10, %v1654_v6, %v1653_v22  ;;  %v6487_v38 = vld [vmem:[#allocation2 + $0x48] sm:$0x3f]  ;;  %v1260_v22 = vadd.f32 %v1259_v12, %v1258_v11 }
 0x2ba   :  { %1657 = vst.msk [vmem:[#allocation2 + $0x5c] sm:$0xf] %vm6339_vm13, %v1655_v59  ;;  %1904 = vrot.lane.b32.xlu2 %v1742_v20, %s4197_s27  ;;  %v1775_v31 = vmul.f32 %v6487_v38, %v6254_v34  ;;  %v1767_v43 = vmul.f32 %v6487_v38, %v6261_v56  ;;  %v1462_v59 = vadd.f32 %v1461_v26, %v6137_v19 }
 0x2bb   :  { %v1261_v20 = vmax.f32 %v1257_v5, %v1260_v22  ;;  %v1700_v5 = vmul.f32 %v1689_v35, %v6254_v34  ;;  %v1702_v22 = vmul.f32 %v1689_v35, %v6357_v9  ;;  %v1781_v21 = vmul.f32 %v6487_v38, %v6354_v15 }
 0x2bc   :  { %1641 = vst.msk [vmem:[#allocation2 + $0x54] sm:$0xf] %vm6170_vm4, %v1462_v59 }
 0x2bd   :  { %v1262_v6 = vadd.f32 %v1261_v20, %v6137_v19 }
 0x2be   :  { %v1617_v39 = vpop.permute.xlu1 %1616 }
 0x2bf   :  { %v1618_v18 = vrot.slane %v1617_v39, 6  ;;  %1545 = vst.msk [vmem:[#allocation2 + $0x18] sm:$0xf] %vm6163_vm3, %v1262_v6  ;;  %vm1840_vm3 = vcmask 37892  }
 0x2c0   :  { %vm6549_vm4 = vmor %vm1840_vm3, %vm1880_vm12  ;;  %vm2101_vm12 = vcmask 39936  }
 0x2c1   :  { %v1619_v40 = vsel %vm1561_vm10, %v1618_v18, %v1617_v39  ;;  %v1797_v19 = vld [vmem:[#allocation2 + $0x5a] sm:$0x3f]  ;;  %v1691_v39 = vmul.f32 %v6354_v15, %v6428_v32 }
 0x2c2   :  { %1621 = vst.msk [vmem:[#allocation2 + $0x44] sm:$0xf] %vm6339_vm13, %v1619_v40  ;;  %v1799_v27 = vmul.f32 %v1797_v19, %v6261_v56  ;;  %v1813_v12 = vmul.f32 %v1797_v19, %v6254_v34 }
 0x2c9   :  { %v1761_v48 = vld [vmem:[#allocation2 + $0x42] sm:$0x3f] }
 0x2ca   :  { %v1772_v44 = vmul.f32 %v1761_v48, %v6254_v34  ;;  %v1774_v49 = vmul.f32 %v1761_v48, %v6357_v9  ;;  %v1764_v53 = vmul.f32 %v1761_v48, %v6261_v56  ;;  %v1766_v63 = vmul.f32 %v1761_v48, %v6354_v15 }
 0x2cb   :  { %v1713_v48 = vmul.f32 %v6414_v16, %v6261_v56 }
 0x2cc   :  { %v1773_v51 = vadd.f32 %v1772_v44, %v1771_v42  ;;  %v1776_v52 = vadd.f32 %v1775_v31, %v1774_v49  ;;  %v1765_v10 = vadd.f32 %v1764_v53, %v1763_v33  ;;  %v1768_v23 = vadd.f32 %v1767_v43, %v1766_v63  ;;  %v1779_v44 = vld [vmem:[#allocation2 + $0x4e] sm:$0x3f] }
 0x2cd   :  { %v1712_v31 = vmul.f32 %v6534_v36, %v6354_v15  ;;  %v1694_v49 = vmul.f32 %v1689_v35, %v6354_v15  ;;  %v1815_v63 = vmul.f32 %v1797_v19, %v6357_v9  ;;  %v1782_v7 = vmul.f32 %v1779_v44, %v6261_v56 }
 0x2ce   :  { %v1777_v57 = vmax.f32 %v1773_v51, %v1776_v52  ;;  %v1769_v1 = vmax.f32 %v1765_v10, %v1768_v23  ;;  %v1801_v51 = vmul.f32 %v1797_v19, %v6354_v15 }
 0x2cf   :  { %v1714_v60 = vadd.f32 %v1713_v48, %v1712_v31 }
 0x2d0   :  { %v1778_v62 = vadd.f32 %v1777_v57, %v6397_v58  ;;  %v1770_v55 = vadd.f32 %v1769_v1, %v6404_v3  ;;  %v1693_v57 = vadd.f32 %v1692_v30, %v1691_v39  ;;  %v1718_v39 = vmul.f32 %v6534_v36, %v6254_v34 }
 0x2d1   :  { %v1720_v30 = vmul.f32 %v6534_v36, %v6357_v9 }
 0x2d2   :  { %1846 = vrot.lane.b32.xlu2 %v1778_v62, %s4198_s3  ;;  %1884 = vst.msk [vmem:[#allocation3 + $0x32] sm:$0x3f] %vm6422_vm2, %v1770_v55  ;;  %v1789_v62 = vmul.f32 %v6487_v38, %v6357_v9  ;;  %v1790_v55 = vmul.f32 %v1779_v44, %v6254_v34 }
 0x2d4   :  { %v1791_v25 = vadd.f32 %v1790_v55, %v1789_v62 }
 0x2e6   :  { %v1819_v50 = vpop.permute.xlu2 %1818 }
 0x2e7   :  { %v1820_v54 = vrot.slane %v1819_v50, 2 }
 0x2e9   :  { %v1821_v10 = vsel %vm1482_vm9, %v1819_v50, %v1820_v54  ;;  %v1792_v50 = vmul.f32 %v1779_v44, %v6357_v9 }
 0x2ea   :  { %v1823_v6 = vadd.f32 %v1821_v10, %v1815_v63  ;;  %v1701_v63 = vadd.f32 %v1700_v5, %v1699_v17  ;;  %v6641_v5 = vstv %s4094_s25 }
 0x2ee   :  { %v1805_v29 = vpop.permute.xlu2 %1804 }
 0x2ef   :  { %v1806_v42 = vrot.slane %v1805_v29, 2 }
 0x2f1   :  { %v1807_v61 = vsel %vm1482_vm9, %v1805_v29, %v1806_v42 }
 0x2f2   :  { %v1809_v8 = vadd.f32 %v1807_v61, %v1801_v51 }
 0x302   :  { %v1548_v47 = vpop.permute.xlu0 %1547 }
 0x303   :  { %v1549_v41 = vrot.slane %v1548_v47, 6 }
 0x305   :  { %v1550_v2 = vsel %vm1510_vm7, %v1549_v41, %v1548_v47 }
 0x306   :  { %1552 = vst.msk [vmem:[#allocation2 + $0x1a] sm:$0xf] %vm6230_vm8, %v1550_v2  ;;  %v1784_v2 = vmul.f32 %v1779_v44, %v6354_v15  ;;  %vm1839_vm8 = vmor %vm1826_vm14, %vm1838_vm6  ;;  %vm2146_vm6 = vcmask 66560  }
 0x30a   :  { %v1644_v0 = vpop.permute.xlu0 %1643 }
 0x30b   :  { %v1645_v37 = vrot.slane %v1644_v0, 6 }
 0x30c   :  { %v1876_v4 = vpop.permute.xlu2 %1875 }
 0x30d   :  { %v1646_v18 = vsel %vm1561_vm10, %v1645_v37, %v1644_v0  ;;  %v1690_v40 = vld [vmem:[#allocation2 + $0x18] sm:$0x3f]  ;;  %v1877_v43 = vrot.slane %v1876_v4, 6  ;;  %vm1835_vm10 = vcmask 23552  }
 0x30e   :  { %1648 = vst.msk [vmem:[#allocation2 + $0x56] sm:$0xf] %vm6339_vm13, %v1646_v18  ;;  %v1695_v53 = vmul.f32 %v1690_v40, %v6261_v56  ;;  %v1709_v52 = vmul.f32 %v1690_v40, %v6354_v15  ;;  %v1703_v38 = vmul.f32 %v1690_v40, %v6254_v34  ;;  %v1717_v29 = vmul.f32 %v1690_v40, %v6357_v9  ;;  %vm6605_vm13 = vmor %vm1840_vm3, %vm1839_vm8 }
 0x30f   :  { %v1878_v23 = vsel %vm1510_vm7, %v1877_v43, %v1876_v4  ;;  %v1783_v18 = vadd.f32 %v1782_v7, %v1781_v21  ;;  %vm2110_vm3 = vcmask 1047558   ;;  %vm2113_vm8 = vcmask 74752  }
 0x310   :  { %v1696_v1 = vadd.f32 %v1695_v53, %v1694_v49  ;;  %1882 = vst.msk [vmem:[#allocation3 + $0x2c] sm:$0x3f] %vm6549_vm4, %v1878_v23  ;;  %v1711_v14 = vadd.f32 %v1710_v46, %v1709_v52  ;;  %v1719_v48 = vadd.f32 %v1718_v39, %v1717_v29 }
 0x312   :  { %v1697_v11 = vmax.f32 %v1693_v57, %v1696_v1  ;;  %v1715_v20 = vmax.f32 %v1711_v14, %v1714_v60  ;;  %v6626_v1 = vstv %s4096_s1  ;;  %s4110_s1 = sld [smem:[#allocation12 + $0x9]] }
 0x314   :  { %v1698_v13 = vadd.f32 %v1697_v11, %v6404_v3  ;;  %v1905_v32 = vpop.permute.xlu2 %1904  ;;  %v1716_v26 = vadd.f32 %v1715_v20, %v6404_v3 }
 0x315   :  { %v1780_v24 = vld [vmem:[#allocation2 + $0x54] sm:$0x3f]  ;;  %v1906_v37 = vrot.slane %v1905_v32, 6 }
 0x316   :  { %v1798_v59 = vmul.f32 %v1780_v24, %v6354_v15  ;;  %v1793_v47 = vmul.f32 %v1780_v24, %v6254_v34  ;;  %v1812_v41 = vmul.f32 %v1780_v24, %v6357_v9  ;;  %1844 = vst.msk [vmem:[#allocation3 + $0xa] sm:$0x3f] %vm6454_vm11, %v1698_v13  ;;  %v1785_v35 = vmul.f32 %v1780_v24, %v6261_v56 }
 0x317   :  { %1853 = vst.msk [vmem:[#allocation3 + $0x14] sm:$0x3f] %vm6454_vm11, %v1716_v26  ;;  %v1721_v15 = vmul.f32 %v6414_v16, %v6254_v34  ;;  %v1704_v56 = vadd.f32 %v1703_v38, %v1702_v22  ;;  %v1907_v44 = vsel %vm1510_vm7, %v1906_v37, %v1905_v32  ;;  %v1962_v13 = vld [vmem:[#allocation3 + $0x28] sm:$0xff]  ;;  %v1963_v21 = vld [vmem:[#allocation3 + $0x30] sm:$0x3] }
 0x318   :  { %v1800_v0 = vadd.f32 %v1799_v27, %v1798_v59  ;;  %v1794_v19 = vadd.f32 %v1793_v47, %v1792_v50  ;;  %v1814_v54 = vadd.f32 %v1813_v12, %v1812_v41  ;;  %v1786_v4 = vadd.f32 %v1785_v35, %v1784_v2 }
 0x319   :  { %v1722_v51 = vadd.f32 %v1721_v15, %v1720_v30  ;;  %v1705_v52 = vmax.f32 %v1701_v63, %v1704_v56  ;;  %v1972_v32 = vmul.f32 %v1962_v13, %v6641_v5  ;;  %v6670_v47 = vmul.f32 %v1963_v21, %v6626_v1 }
 0x31a   :  { %v1810_v40 = vmax.f32 %v1800_v0, %v1809_v8  ;;  %v1795_v31 = vmax.f32 %v1791_v25, %v1794_v19  ;;  %v1824_v45 = vmax.f32 %v1814_v54, %v1823_v6  ;;  %v1787_v42 = vmax.f32 %v1783_v18, %v1786_v4 }
 0x31b   :  { %v1723_v46 = vmax.f32 %v1719_v48, %v1722_v51  ;;  %v1706_v10 = vadd.f32 %v1705_v52, %v6397_v58  ;;  %v6645_v6 = vstv %s4095_s26  ;;  %v1988_v25 = vmul.f32 %v1962_v13, %v6626_v1 }
 0x31c   :  { %v1811_v43 = vadd.f32 %v1810_v40, %v6404_v3  ;;  %v1796_v9 = vadd.f32 %v1795_v31, %v6397_v58  ;;  %v1825_v36 = vadd.f32 %v1824_v45, %v6397_v58  ;;  %v1833_v49 = vpop.permute.xlu0 %1832  ;;  %v1788_v53 = vadd.f32 %v1787_v42, %v6404_v3 }
 0x31d   :  { %v1834_v16 = vrot.slane %v1833_v49, 6  ;;  %v1724_v23 = vadd.f32 %v1723_v46, %v6397_v58  ;;  %v6665_v59 = vmul.f32 %v1962_v13, %v6645_v6  ;;  %v6673_v41 = vmul.f32 %v1963_v21, %v6645_v6 }
 0x31e   :  { %1902 = vst.msk [vmem:[#allocation3 + $0x46] sm:$0x3f] %vm6422_vm2, %v1811_v43  ;;  %1855 = vrot.lane.b32.xlu0 %v1796_v9, %s4198_s3  ;;  %1864 = vrot.lane.b32.xlu1 %v1825_v36, %s4198_s3  ;;  %v6691_v19 = vmul.f32 %v1963_v21, %v6641_v5  ;;  %v6728_v36 = vstv %s6651_s4  ;;  %s4109_s3 = sld [smem:[#allocation12 + $0x8]] }
 0x31f   :  { %1909 = vst.msk [vmem:[#allocation3 + $0x4a] sm:$0x3f] %vm6549_vm4, %v1907_v44  ;;  %v1836_v3 = vsel %vm1835_vm10, %v1834_v16, %v1833_v49 }
 0x320   :  { %1893 = vst.msk [vmem:[#allocation3 + $0x3c] sm:$0x3f] %vm6422_vm2, %v1788_v53  ;;  %vm2107_vm2 = vmor %vm1826_vm14, %vm2106_vm1 }
 0x321   :  { %1842 = vst.msk [vmem:[#allocation3 + $0x4] sm:$0x3f] %vm6605_vm13, %v1836_v3  ;;  %vm2109_vm11 = vmor %vm2108_vm5, %vm2107_vm2  ;;  %vm2150_vm2 = vcmask 25600  }
 0x326   :  { %1886 = vrot.lane.b32.xlu0 %v1706_v10, %s4197_s27  ;;  %1895 = vrot.lane.b32.xlu1 %v1724_v23, %s4197_s27  ;;  %s4093_s27 = sld [smem:[#allocation9 + $0x8]]  ;;  %v6655_v8 = vld [vmem:[#allocation3 + $0x4e] sm:$0x3]  ;;  %v6657_v24 = vld [vmem:[#allocation3 + $0x46] sm:$0xff] }
 0x327   :  { %v6680_v35 = vmul.f32 %v6655_v8, %v6626_v1  ;;  %v6684_v0 = vmul.f32 %v6655_v8, %v6645_v6  ;;  %v6688_v37 = vmul.f32 %v6657_v24, %v6641_v5  ;;  %v6697_v18 = vmul.f32 %v6657_v24, %v6626_v1 }
 0x328   :  { %v6624_v57 = vld [vmem:[#allocation3 + $0x8] sm:$0x3]  ;;  %v6628_v62 = vld [vmem:[#allocation3] sm:$0xff]  ;;  %v2069_v40 = vmul.f32 %v6657_v24, %v6645_v6 }
 0x329   :  { %v2072_v28 = vmul.f32 %v6626_v1, %v6624_v57  ;;  %v2071_v55 = vmul.f32 %v6626_v1, %v6628_v62  ;;  %v6709_v31 = vmul.f32 %v6641_v5, %v6628_v62  ;;  %v6713_v45 = vmul.f32 %v6645_v6, %v6624_v57 }
 0x32c   :  { %v1847_v14 = vpop.permute.xlu2 %1846  ;;  %v6639_v12 = vstv %s4093_s27 }
 0x32d   :  { %v1848_v60 = vrot.slane %v1847_v14, 6  ;;  %v6662_v26 = vmul.f32 %v1962_v13, %v6639_v12  ;;  %v6676_v38 = vmul.f32 %v1963_v21, %v6639_v12  ;;  %v1923_v54 = vmul.f32 %v6639_v12, %v6628_v62 }
 0x32e   :  { %2077 = vrot.lane.b32.xlu1 %v2072_v28, %s4195_s21  ;;  %2075 = vrot.lane.b32.xlu0 %v2071_v55, %s4195_s21  ;;  %v6703_v4 = vmul.f32 %v6639_v12, %v6624_v57  ;;  %v6759_v21 = vstv %s6699_s28 }
 0x32f   :  { %v1849_v58 = vsel %vm1835_vm10, %v1848_v60, %v1847_v14 }
 0x330   :  { %1851 = vst.msk [vmem:[#allocation3 + $0xe] sm:$0x3f] %vm6605_vm13, %v1849_v58 }
 0x337   :  { %v6647_v7 = vld [vmem:[#allocation3 + $0xa] sm:$0xff]  ;;  %v6742_v46 = vld [vmem:[#allocation3 + $0x12] sm:$0x3] }
 0x338   :  { %v1926_v50 = vmul.f32 %v6641_v5, %v6647_v7  ;;  %v1930_v43 = vmul.f32 %v6639_v12, %v6647_v7 }
 0x33a   :  { %v1928_v15 = vadd.f32 %v1926_v50, %v1923_v54 }
 0x390   :  { %v1856_v27 = vpop.permute.xlu0 %1855  ;;  %v1865_v61 = vpop.permute.xlu1 %1864 }
 0x391   :  { %v1857_v17 = vrot.slane %v1856_v27, 6  ;;  %v1866_v11 = vrot.slane %v1865_v61, 6 }
 0x393   :  { %v1858_v22 = vsel %vm1835_vm10, %v1857_v17, %v1856_v27  ;;  %v1867_v20 = vsel %vm1835_vm10, %v1866_v11, %v1865_v61  ;;  %v6752_v11 = vmul.f32 %v6626_v1, %v6742_v46  ;;  %vm2164_vm10 = vcmask 1041440  }
 0x394   :  { %1860 = vst.msk [vmem:[#allocation3 + $0x18] sm:$0x3f] %vm6605_vm13, %v1858_v22  ;;  %v6756_v22 = vmul.f32 %v6645_v6, %v6628_v62 }
 0x395   :  { %1869 = vst.msk [vmem:[#allocation3 + $0x22] sm:$0x3f] %vm6605_vm13, %v1867_v20  ;;  %vm6973_vm13 = vmor %vm1826_vm14, %vm2164_vm10  ;;  %vm2342_vm10 = vcmask 72704  }
 0x396   :  { %vm6989_vm1 = vmor %vm2108_vm5, %vm6973_vm13 }
 0x398   :  { %v1887_v29 = vpop.permute.xlu0 %1886  ;;  %v1896_v2 = vpop.permute.xlu1 %1895 }
 0x399   :  { %v1888_v39 = vrot.slane %v1887_v29, 6  ;;  %v1897_v30 = vrot.slane %v1896_v2, 6 }
 0x39b   :  { %v1889_v56 = vsel %vm1510_vm7, %v1888_v39, %v1887_v29  ;;  %v1898_v48 = vsel %vm1510_vm7, %v1897_v30, %v1896_v2  ;;  %v6717_v42 = vld [vmem:[#allocation3 + $0x14] sm:$0xff]  ;;  %v6721_v44 = vld [vmem:[#allocation3 + $0x1c] sm:$0x3]  ;;  %vm2052_vm7 = vcmask 1045504   ;;  %v1950_v29 = vmul.f32 %v6645_v6, %v6742_v46 }
 0x39c   :  { %1891 = vst.msk [vmem:[#allocation3 + $0x36] sm:$0x3f] %vm6549_vm4, %v1889_v56  ;;  %v1932_v9 = vmul.f32 %v6641_v5, %v6717_v42  ;;  %v1960_v49 = vld [vmem:[#allocation3 + $0x1e] sm:$0xff]  ;;  %v1964_v53 = vmul.f32 %v6639_v12, %v6717_v42  ;;  %v1980_v34 = vmul.f32 %v6645_v6, %v6717_v42  ;;  %v6734_v16 = vld [vmem:[#allocation3 + $0x26] sm:$0x3]  ;;  %v1981_v23 = vmul.f32 %v6645_v6, %v6721_v44 }
 0x39d   :  { %1900 = vst.msk [vmem:[#allocation3 + $0x40] sm:$0x3f] %vm6549_vm4, %v1898_v48  ;;  %v1966_v63 = vmul.f32 %v1960_v49, %v6641_v5  ;;  %v1970_v51 = vmul.f32 %v1960_v49, %v6639_v12  ;;  %v1982_v3 = vmul.f32 %v1960_v49, %v6626_v1  ;;  %v1986_v52 = vmul.f32 %v1960_v49, %v6645_v6  ;;  %vm6920_vm4 = vmor %vm2110_vm3, %vm2109_vm11 }
 0x39e   :  { %v1934_v10 = vadd.f32 %v1932_v9, %v1930_v43  ;;  %v1983_v28 = vmul.f32 %v6734_v16, %v6626_v1  ;;  %v1987_v33 = vmul.f32 %v6734_v16, %v6645_v6  ;;  %v1945_v2 = vmul.f32 %v6626_v1, %v6647_v7  ;;  %vm2167_vm11 = vmor %vm2110_vm3, %vm6989_vm1 }
 0x39f   :  { %v1968_v55 = vadd.f32 %v1966_v63, %v1964_v53  ;;  %v1974_v14 = vadd.f32 %v1972_v32, %v1970_v51  ;;  %v1984_v60 = vadd.f32 %v1982_v3, %v1980_v34  ;;  %v1990_v58 = vadd.f32 %v1988_v25, %v1986_v52 }
 0x3a0   :  { %v2078_v27 = vpop.permute.xlu1 %2077  ;;  %v2076_v61 = vpop.permute.xlu0 %2075  ;;  %v1936_v17 = vmax.f32 %v1928_v15, %v1934_v10  ;;  %v1985_v30 = vadd.f32 %v1983_v28, %v1981_v23  ;;  %v1991_v15 = vadd.f32 %v6670_v47, %v1987_v33 }
 0x3a1   :  { %v2080_v20 = vrot.slane %v2078_v27, 2  ;;  %v2079_v13 = vrot.slane %v2076_v61, 2  ;;  %v1976_v50 = vmax.f32 %v1968_v55, %v1974_v14  ;;  %v1992_v32 = vmax.f32 %v1984_v60, %v1990_v58 }
 0x3a2   :  { %v6764_v25 = vadd.f32 %v6728_v36, %v1936_v17  ;;  %v1993_v14 = vmax.f32 %v1985_v30, %v1991_v15 }
 0x3a3   :  { %v2081_v62 = vsel %vm2052_vm7, %v2079_v13, %v2080_v20  ;;  %v6774_v54 = vadd.f32 %v1976_v50, %v6728_v36  ;;  %v1996_v39 = vld [vmem:[#allocation3 + $0x32] sm:$0xff]  ;;  %v1994_v9 = vadd.f32 %v1992_v32, %v6759_v21  ;;  %v1997_v3 = vld [vmem:[#allocation3 + $0x3a] sm:$0x3]  ;;  %v6808_v13 = vstv %s6761_s24 }
 0x3a4   :  { %v6777_v56 = vld [vmem:[#allocation3 + $0x44] sm:$0x3]  ;;  %v6779_v48 = vld [vmem:[#allocation3 + $0x3c] sm:$0xff]  ;;  %v2082_v43 = vsel %vm1482_vm9, %v2076_v61, %v2081_v62  ;;  %v2002_v49 = vmul.f32 %v1996_v39, %v6641_v5  ;;  %v2006_v53 = vmul.f32 %v1996_v39, %v6639_v12  ;;  %v2018_v10 = vmul.f32 %v1996_v39, %v6626_v1 }
 0x3a5   :  { %v2064_v34 = vmul.f32 %v6777_v56, %v6645_v6  ;;  %v2008_v63 = vmul.f32 %v6779_v48, %v6641_v5  ;;  %v2063_v47 = vmul.f32 %v6779_v48, %v6645_v6  ;;  %v2085_v51 = vadd.f32 %v2082_v43, %v2069_v40  ;;  %2096 = vrot.lane.b32.xlu0 %v1994_v9, %s4199_s30 }
 0x3a6   :  { %v2004_v52 = vadd.f32 %v2002_v49, %v6662_v26  ;;  %v2022_v23 = vmul.f32 %v1996_v39, %v6645_v6  ;;  %v2024_v28 = vmul.f32 %v6779_v48, %v6626_v1  ;;  %v1927_v40 = vmul.f32 %v6641_v5, %v6742_v46 }
 0x3a7   :  { %v2067_v33 = vadd.f32 %v6697_v18, %v2063_v47  ;;  %v2010_v55 = vadd.f32 %v2008_v63, %v2006_v53  ;;  %v2020_v60 = vadd.f32 %v2018_v10, %v6665_v59  ;;  %v2019_v26 = vmul.f32 %v1997_v3, %v6626_v1 }
 0x3a8   :  { %v2026_v58 = vadd.f32 %v2024_v28, %v2022_v23  ;;  %v2023_v61 = vmul.f32 %v1997_v3, %v6645_v6  ;;  %v2025_v18 = vmul.f32 %v6777_v56, %v6626_v1  ;;  %v2068_v50 = vadd.f32 %v6680_v35, %v2064_v34 }
 0x3a9   :  { %v2087_v17 = vmax.f32 %v2067_v33, %v2085_v51  ;;  %v2012_v20 = vmax.f32 %v2004_v52, %v2010_v55  ;;  %v1952_v59 = vmul.f32 %v6626_v1, %v6721_v44  ;;  %v6814_v62 = vstv %s6770_s29 }
 0x3aa   :  { %v2028_v32 = vmax.f32 %v2020_v60, %v2026_v58  ;;  %v2086_v39 = vadd.f32 %v2078_v27, %v6684_v0  ;;  %v1995_v15 = vadd.f32 %v1993_v14, %v6759_v21  ;;  %v2021_v49 = vadd.f32 %v2019_v26, %v6673_v41 }
 0x3ab   :  { %v6818_v30 = vadd.f32 %v2012_v20, %v6728_v36  ;;  %v2089_v43 = vadd.f32 %v2087_v17, %v6759_v21  ;;  %v2027_v35 = vadd.f32 %v2025_v18, %v2023_v61  ;;  %v2190_v53 = vmul.f32 %v6808_v13, %v6774_v54 }
 0x3ac   :  { %v2030_v9 = vadd.f32 %v2028_v32, %v6759_v21  ;;  %v1949_v0 = vmul.f32 %v6645_v6, %v6647_v7  ;;  %v1951_v27 = vmul.f32 %v6626_v1, %v6717_v42  ;;  %v2186_v34 = vmul.f32 %v6814_v62, %v6764_v25 }
 0x3ad   :  { %2136 = vrot.lane.b32.xlu2 %v2089_v43, %s4199_s30  ;;  %v2088_v63 = vmax.f32 %v2068_v50, %v2086_v39  ;;  %2098 = vrot.lane.b32.xlu0 %v1995_v15, %s4199_s30  ;;  %v2196_v41 = vmul.f32 %v6814_v62, %v6774_v54  ;;  %v2199_v47 = vmul.f32 %v6808_v13, %v6818_v30  ;;  %v6844_v23 = vstv %s6803_s15 }
 0x3ae   :  { %2120 = vrot.lane.b32.xlu1 %v2030_v9, %s4199_s30  ;;  %v1954_v51 = vadd.f32 %v1952_v59, %v1950_v29  ;;  %v1947_v6 = vadd.f32 %v1945_v2, %v6756_v22  ;;  %v1929_v7 = vadd.f32 %v1927_v40, %v6703_v4  ;;  %v1931_v1 = vmul.f32 %v6639_v12, %v6742_v46 }
 0x3af   :  { %v2029_v42 = vmax.f32 %v2021_v49, %v2027_v35  ;;  %v2193_v52 = vadd.f32 %v2190_v53, %v2186_v34  ;;  %v2202_v10 = vadd.f32 %v2199_v47, %v2196_v41  ;;  %v1953_v28 = vadd.f32 %v1951_v27, %v1949_v0 }
 0x3b0   :  { %v2003_v33 = vmul.f32 %v1997_v3, %v6641_v5  ;;  %v2007_v55 = vmul.f32 %v1997_v3, %v6639_v12  ;;  %v2009_v29 = vmul.f32 %v6777_v56, %v6641_v5  ;;  %v2090_v22 = vadd.f32 %v2088_v63, %v6759_v21 }
 0x3b1   :  { %v2205_v2 = vmax.f32 %v2193_v52, %v2202_v10  ;;  %v1933_v4 = vmul.f32 %v6641_v5, %v6721_v44  ;;  %v1965_v46 = vmul.f32 %v6639_v12, %v6721_v44  ;;  %v1967_v60 = vmul.f32 %v6734_v16, %v6641_v5 }
 0x3b2   :  { %v2005_v14 = vadd.f32 %v2003_v33, %v6676_v38  ;;  %v2011_v40 = vadd.f32 %v2009_v29, %v2007_v55  ;;  %v1971_v3 = vmul.f32 %v6734_v16, %v6639_v12  ;;  %v2031_v58 = vadd.f32 %v2029_v42, %v6759_v21 }
 0x3b3   :  { %v6862_v26 = vadd.f32 %v6844_v23, %v2205_v2  ;;  %v1935_v61 = vadd.f32 %v1933_v4, %v1931_v1  ;;  %v2034_v17 = vmul.f32 %v6779_v48, %v6639_v12  ;;  %v1969_v38 = vadd.f32 %v1967_v60, %v1965_v46 }
 0x3b4   :  { %v2013_v44 = vmax.f32 %v2005_v14, %v2011_v40  ;;  %v1975_v20 = vadd.f32 %v6691_v19, %v1971_v3  ;;  %v2035_v18 = vmul.f32 %v6777_v56, %v6639_v12  ;;  %v1948_v16 = vadd.f32 %v6752_v11, %v6713_v45 }
 0x3b5   :  { %2138 = vrot.lane.b32.xlu2 %v2090_v22, %s4199_s30  ;;  %2046 = vrot.lane.b32.xlu0 %v6709_v31, %s4195_s21  ;;  %v1955_v50 = vmax.f32 %v1947_v6, %v1953_v28  ;;  %v2037_v48 = vmul.f32 %v6655_v8, %v6641_v5  ;;  %v1937_v19 = vmax.f32 %v1929_v7, %v1935_v61  ;;  %v6892_v49 = vstv %s4101_s18 }
 0x3b6   :  { %2122 = vrot.lane.b32.xlu1 %v2031_v58, %s4199_s30  ;;  %v2015_v32 = vadd.f32 %v2013_v44, %v6728_v36  ;;  %v1977_v59 = vmax.f32 %v1969_v38, %v1975_v20  ;;  %v6879_v56 = vadd.f32 %v6688_v37, %v2034_v17  ;;  %v1956_v39 = vmax.f32 %v1948_v16, %v1954_v51 }
 0x3b7   :  { %v6881_v15 = vadd.f32 %v2037_v48, %v2035_v18  ;;  %v1940_v31 = vadd.f32 %v6728_v36, %v1937_v19  ;;  %v1958_v11 = vadd.f32 %v6759_v21, %v1955_v50  ;;  %v2043_v43 = vmul.f32 %v6641_v5, %v6624_v57 }
 0x3b8   :  { %2133 = vst.msk [vmem:[#allocation4 + $0x2c] sm:$0x3] %vm2092_vm15, %v2015_v32  ;;  %v1979_v45 = vadd.f32 %v1977_v59, %v6728_v36  ;;  %v1959_v9 = vadd.f32 %v6759_v21, %v1956_v39  ;;  %v6890_v37 = vstv %s4102_s17  ;;  %v2213_v53 = vmul.f32 %v6892_v49, %v6764_v25 }
 0x3b9   :  { %2093 = vst.msk [vmem:[#allocation4 + $0x8] sm:$0x3] %vm2092_vm15, %v1940_v31  ;;  %v2226_v35 = vmul.f32 %v6890_v37, %v6818_v30  ;;  %v2217_v57 = vmul.f32 %v6890_v37, %v6774_v54  ;;  %v2223_v5 = vmul.f32 %v6892_v49, %v6774_v54  ;;  %v2297_v21 = vmul.f32 %v6890_v37, %v6764_v25 }
 0x3ba   :  { %2117 = vst.msk [vmem:[#allocation4 + $0x1a] sm:$0x3] %vm2092_vm15, %v1979_v45  ;;  %v6905_v63 = vstv %s4104_s20  ;;  %v2254_v47 = vmul.f32 %v6808_v13, %v6764_v25  ;;  %v6912_v54 = vstv %s4106_s22  ;;  %v2040_v31 = vmul.f32 %v6657_v24, %v6639_v12 }
 0x3bb   :  { %v2229_v0 = vadd.f32 %v2226_v35, %v2223_v5  ;;  %v2220_v27 = vadd.f32 %v2217_v57, %v2213_v53  ;;  %v2421_v51 = vmul.f32 %v6912_v54, %v6862_v26  ;;  %v2041_v45 = vmul.f32 %v6655_v8, %v6639_v12 }
 0x3bc   :  { %vm2159_vm15 = vcmask 31744  }
 0x3bd   :  { %2154 = vrot.lane.b32.xlu2 %v1958_v11, %s4200_s19  ;;  %2156 = vrot.lane.b32.xlu0 %v1959_v9, %s4200_s19  ;;  %v2232_v34 = vmax.f32 %v2220_v27, %v2229_v0 }
 0x3be   :  { %2048 = vrot.lane.b32.xlu1 %v2043_v43, %s4195_s21 }
 0x3bf   :  { %v2236_v41 = vadd.f32 %v6905_v63, %v2232_v34 }
 0x3c6   :  { %2303 = vrot.lane.b32.xlu1 %v2297_v21, %s4195_s21 }
 0x3ce   :  { %2334 = vrot.lane.b32.xlu1 %v2236_v41, %s4201_s2 }
 0x3d6   :  { %2260 = vrot.lane.b32.xlu1 %v2254_v47, %s4195_s21 }
 0x3de   :  { %2431 = vrot.lane.b32.xlu1 %v2421_v51, %s4195_s21 }
 0x407   :  { %v2137_v6 = vpop.permute.xlu2 %2136 }
 0x408   :  { %v2140_v7 = vrot.slane %v2137_v6, 6 }
 0x40a   :  { %v2141_v1 = vsel %vm2101_vm12, %v2140_v7, %v2137_v6 }
 0x40b   :  { %2145 = vst.msk [vmem:[#allocation4 + $0x2c] sm:$0xff] %vm6920_vm4, %v2141_v1 }
 0x40f   :  { %v2139_v42 = vpop.permute.xlu2 %2138 }
 0x410   :  { %v2142_v52 = vsel %vm2101_vm12, %v2140_v7, %v2139_v42 }
 0x411   :  { %2147 = vst.msk [vmem:[#allocation4 + $0x34] sm:$0x3] %vm2146_vm6, %v2142_v52 }
 0x412   :  { %v6942_v3 = vld [vmem:[#allocation4 + $0x2c] sm:$0xff] }
 0x413   :  { %v2200_v20 = vmul.f32 %v6808_v13, %v6942_v3  ;;  %v2227_v16 = vmul.f32 %v6890_v37, %v6942_v3 }
 0x417   :  { %v2097_v10 = vpop.permute.xlu0 %2096  ;;  %v2155_v50 = vpop.permute.xlu2 %2154 }
 0x418   :  { %v2100_v28 = vrot.slane %v2097_v10, 6  ;;  %v6963_v39 = vld [vmem:[#allocation4 + $0x34] sm:$0x3]  ;;  %v2158_v57 = vrot.slane %v2155_v50, 6 }
 0x419   :  { %v2228_v24 = vmul.f32 %v6890_v37, %v6963_v39  ;;  %v2201_v12 = vmul.f32 %v6808_v13, %v6963_v39 }
 0x41a   :  { %v2102_v33 = vsel %vm2101_vm12, %v2100_v28, %v2097_v10 }
 0x41b   :  { %2112 = vst.msk [vmem:[#allocation4 + $0x8] sm:$0xff] %vm6920_vm4, %v2102_v33 }
 0x41f   :  { %v2099_v29 = vpop.permute.xlu0 %2098 }
 0x420   :  { %v2121_v55 = vpop.permute.xlu1 %2120  ;;  %v2103_v2 = vsel %vm2101_vm12, %v2100_v28, %v2099_v29 }
 0x421   :  { %v2124_v22 = vrot.slane %v2121_v55, 6  ;;  %2114 = vst.msk [vmem:[#allocation4 + $0x10] sm:$0x3] %vm2113_vm8, %v2103_v2 }
 0x422   :  { %v6935_v46 = vld [vmem:[#allocation4 + $0x8] sm:$0xff] }
 0x423   :  { %v2125_v4 = vsel %vm2101_vm12, %v2124_v22, %v2121_v55  ;;  %v2298_v14 = vmul.f32 %v6890_v37, %v6935_v46  ;;  %v2187_v38 = vmul.f32 %v6814_v62, %v6935_v46  ;;  %v2214_v18 = vmul.f32 %v6892_v49, %v6935_v46 }
 0x424   :  { %2129 = vst.msk [vmem:[#allocation4 + $0x1a] sm:$0xff] %vm6920_vm4, %v2125_v4 }
 0x425   :  { %2305 = vrot.lane.b32.xlu2 %v2298_v14, %s4195_s21 }
 0x427   :  { %v2047_v60 = vpop.permute.xlu0 %2046 }
 0x428   :  { %v2123_v40 = vpop.permute.xlu1 %2122  ;;  %v6945_v61 = vld [vmem:[#allocation4 + $0x10] sm:$0x3]  ;;  %v2050_v8 = vrot.slane %v2047_v60, 2 }
 0x429   :  { %v2126_v58 = vsel %vm2101_vm12, %v2124_v22, %v2123_v40  ;;  %v2299_v17 = vmul.f32 %v6890_v37, %v6945_v61  ;;  %v2188_v5 = vmul.f32 %v6814_v62, %v6945_v61  ;;  %v2215_v25 = vmul.f32 %v6892_v49, %v6945_v61 }
 0x42a   :  { %2130 = vst.msk [vmem:[#allocation4 + $0x22] sm:$0x3] %vm2113_vm8, %v2126_v58  ;;  %v7011_v58 = vstv %s6969_s0  ;;  %vm2350_vm12 = vcmask 1041480  }
 0x42b   :  { %v2180_v44 = vld [vmem:[#allocation4 + $0x1a] sm:$0xff]  ;;  %2307 = vrot.lane.b32.xlu0 %v2299_v17, %s4195_s21  ;;  %vm2351_vm4 = vmor %vm1826_vm14, %vm2350_vm12 }
 0x42c   :  { %v2191_v48 = vmul.f32 %v6808_v13, %v2180_v44  ;;  %v2197_v32 = vmul.f32 %v6814_v62, %v2180_v44  ;;  %v2218_v19 = vmul.f32 %v6890_v37, %v2180_v44  ;;  %v2224_v59 = vmul.f32 %v6892_v49, %v2180_v44  ;;  %vm2352_vm8 = vmor %vm2108_vm5, %vm2351_vm4 }
 0x42d   :  { %vm7037_vm14 = vmor %vm2110_vm3, %vm2352_vm8  ;;  %vm2356_vm5 = vcmask 140288  }
 0x42e   :  { %v2194_v11 = vadd.f32 %v2191_v48, %v2187_v38  ;;  %v2203_v43 = vadd.f32 %v2200_v20, %v2197_v32  ;;  %v2221_v9 = vadd.f32 %v2218_v19, %v2214_v18  ;;  %v2230_v35 = vadd.f32 %v2227_v16, %v2224_v59 }
 0x42f   :  { %v2157_v0 = vpop.permute.xlu0 %2156  ;;  %v2255_v19 = vmul.f32 %v6808_v13, %v6935_v46 }
 0x430   :  { %v2049_v21 = vpop.permute.xlu1 %2048  ;;  %v2206_v27 = vmax.f32 %v2194_v11, %v2203_v43  ;;  %v2233_v34 = vmax.f32 %v2221_v9, %v2230_v35  ;;  %v2161_v51 = vsel %vm2159_vm15, %v2158_v57, %v2157_v0  ;;  %v2256_v43 = vmul.f32 %v6808_v13, %v6945_v61 }
 0x431   :  { %v2051_v41 = vrot.slane %v2049_v21, 2  ;;  %v2058_v47 = vadd.f32 %v2049_v21, %v2041_v45  ;;  %v2181_v6 = vld [vmem:[#allocation4 + $0x22] sm:$0x3]  ;;  %2169 = vst.msk [vmem:[#allocation4 + $0x46] sm:$0x3] %vm2146_vm6, %v2161_v51  ;;  %v2497_v61 = vmul.f32 %v7011_v58, %v6862_v26 }
 0x432   :  { %v6995_v1 = vadd.f32 %v6844_v23, %v2206_v27  ;;  %v2237_v42 = vadd.f32 %v6905_v63, %v2233_v34  ;;  %v2219_v52 = vmul.f32 %v6890_v37, %v2181_v6  ;;  %v2225_v10 = vmul.f32 %v6892_v49, %v2181_v6 }
 0x433   :  { %v2053_v28 = vsel %vm2052_vm7, %v2050_v8, %v2051_v41  ;;  %v2060_v33 = vmax.f32 %v6881_v15, %v2058_v47  ;;  %v2192_v55 = vmul.f32 %v6808_v13, %v2181_v6  ;;  %v2198_v29 = vmul.f32 %v6814_v62, %v2181_v6 }
 0x434   :  { %v2054_v22 = vsel %vm1482_vm9, %v2047_v60, %v2053_v28  ;;  %2336 = vrot.lane.b32.xlu2 %v2237_v42, %s4201_s2  ;;  %v2222_v2 = vadd.f32 %v2219_v52, %v2215_v25  ;;  %v2231_v4 = vadd.f32 %v2228_v24, %v2225_v10  ;;  %v2498_v17 = vmul.f32 %v7011_v58, %v6995_v1 }
 0x435   :  { %v2057_v14 = vadd.f32 %v2054_v22, %v2040_v31  ;;  %v2062_v40 = vadd.f32 %v2060_v33, %v6728_v36  ;;  %v2195_v44 = vadd.f32 %v2192_v55, %v2188_v5  ;;  %v2204_v38 = vadd.f32 %v2201_v12, %v2198_v29 }
 0x436   :  { %v2234_v15 = vmax.f32 %v2222_v2, %v2231_v4  ;;  %v2160_v60 = vsel %vm2159_vm15, %v2158_v57, %v2155_v50  ;;  %2509 = vrot.lane.b32.xlu1 %v2498_v17, %s4195_s21  ;;  %v2242_v31 = vmul.f32 %v6814_v62, %v6818_v30  ;;  %v2422_v35 = vmul.f32 %v6912_v54, %v6995_v1 }
 0x437   :  { %v2059_v20 = vmax.f32 %v6879_v56, %v2057_v14  ;;  %2151 = vst.msk [vmem:[#allocation4 + $0x3e] sm:$0x3] %vm2150_vm2, %v2062_v40  ;;  %v2207_v48 = vmax.f32 %v2195_v44, %v2204_v38  ;;  %v2285_v56 = vmul.f32 %v6892_v49, %v6818_v30  ;;  %v2287_v17 = vmul.f32 %v6892_v49, %v6963_v39 }
 0x438   :  { %2168 = vst.msk [vmem:[#allocation4 + $0x3e] sm:$0xff] %vm2167_vm11, %v2160_v60  ;;  %v2304_v18 = vpop.permute.xlu1 %2303  ;;  %v2238_v16 = vadd.f32 %v6905_v63, %v2234_v15  ;;  %v2241_v55 = vld [vmem:[#allocation4 + $0x46] sm:$0x3]  ;;  %v7085_v44 = vstv %s4105_s16  ;;  %v7087_v38 = vstv %s4107_s23 }
 0x439   :  { %v2061_v32 = vadd.f32 %v2059_v20, %v6728_v36  ;;  %v2211_v50 = vadd.f32 %v6844_v23, %v2207_v48  ;;  %v2309_v8 = vrot.slane %v2304_v18, 2  ;;  %v2290_v4 = vmul.f32 %v2241_v55, %v6890_v37 }
 0x43a   :  { %2338 = vrot.lane.b32.xlu0 %v2238_v16, %s4201_s2  ;;  %v2296_v20 = vmul.f32 %v2241_v55, %v6892_v49 }
 0x43b   :  { %v2288_v59 = vmul.f32 %v6890_v37, %v2061_v32  ;;  %v2245_v45 = vmul.f32 %v6808_v13, %v2061_v32  ;;  %2330 = vst.msk [vmem:[#allocation5 + $0x10] sm:$0x3] %vm2146_vm6, %v2211_v50  ;;  %v2294_v0 = vmul.f32 %v6892_v49, %v2061_v32  ;;  %v2251_v29 = vmul.f32 %v6814_v62, %v2061_v32 }
 0x43c   :  { %2262 = vrot.lane.b32.xlu2 %v2255_v19, %s4195_s21  ;;  %v2293_v48 = vadd.f32 %v2290_v4, %v2287_v17 }
 0x43d   :  { %v2291_v36 = vadd.f32 %v2288_v59, %v2285_v56  ;;  %v2248_v46 = vadd.f32 %v2245_v45, %v2242_v31  ;;  %v2400_v45 = vmul.f32 %v7085_v44, %v6862_v26 }
 0x43f   :  { %v2240_v15 = vld [vmem:[#allocation4 + $0x3e] sm:$0xff] }
 0x440   :  { %v2335_v11 = vpop.permute.xlu1 %2334  ;;  %v2289_v19 = vmul.f32 %v2240_v15, %v6890_v37  ;;  %v2246_v4 = vmul.f32 %v2240_v15, %v6808_v13 }
 0x441   :  { %v2340_v30 = vrot.slane %v2335_v11, 6 }
 0x442   :  { %2264 = vrot.lane.b32.xlu0 %v2256_v43, %s4195_s21 }
 0x443   :  { %v2343_v53 = vsel %vm2342_vm10, %v2340_v30, %v2335_v11  ;;  %v2476_v11 = vmul.f32 %v7087_v38, %v6862_v26 }
 0x444   :  { %2354 = vst.msk [vmem:[#allocation5 + $0x10] sm:$0xff] %vm7037_vm14, %v2343_v53  ;;  %2433 = vrot.lane.b32.xlu2 %v2422_v35, %s4195_s21 }
 0x448   :  { %v2261_v25 = vpop.permute.xlu1 %2260 }
 0x449   :  { %v2266_v28 = vrot.slane %v2261_v25, 2 }
 0x44a   :  { %2507 = vrot.lane.b32.xlu0 %v2497_v61, %s4195_s21 }
 0x44b   :  { %v7051_v57 = vld [vmem:[#allocation5 + $0x10] sm:$0xff] }
 0x44c   :  { %v2423_v24 = vmul.f32 %v6912_v54, %v7051_v57 }
 0x450   :  { %v2432_v14 = vpop.permute.xlu1 %2431 }
 0x452   :  { %2435 = vrot.lane.b32.xlu0 %v2423_v24, %s4195_s21 }
 0x47f   :  { %v2306_v12 = vpop.permute.xlu2 %2305 }
 0x480   :  { %v2310_v5 = vrot.slane %v2306_v12, 2 }
 0x482   :  { %v2312_v21 = vsel %vm2052_vm7, %v2309_v8, %v2310_v5 }
 0x483   :  { %v2313_v27 = vsel %vm1482_vm9, %v2304_v18, %v2312_v21  ;;  %v2441_v18 = vrot.slane %v2432_v14, 2 }
 0x484   :  { %v2319_v34 = vadd.f32 %v2313_v27, %v2294_v0 }
 0x486   :  { %v2322_v41 = vmax.f32 %v2291_v36, %v2319_v34  ;;  %v2286_v36 = vmul.f32 %v6892_v49, %v6942_v3 }
 0x488   :  { %v2325_v47 = vadd.f32 %v2322_v41, %v6905_v63  ;;  %v2292_v8 = vadd.f32 %v2289_v19, %v2286_v36  ;;  %v7118_v41 = vstv %s4109_s3  ;;  %v2499_v36 = vmul.f32 %v7011_v58, %v7051_v57 }
 0x48a   :  { %2365 = vrot.lane.b32.xlu1 %v2325_v47, %s4201_s2 }
 0x48e   :  { %v7061_v51 = vpop.permute.xlu2 %2336 }
 0x48f   :  { %v2341_v6 = vrot.slane %v7061_v51, 6 }
 0x491   :  { %v2344_v7 = vsel %vm1502_vm0, %v2340_v30, %v2341_v6 }
 0x492   :  { %v7069_v42 = vsel %vm2342_vm10, %v2344_v7, %v7061_v51 }
 0x493   :  { %v2424_v52 = vmul.f32 %v6912_v54, %v7069_v42  ;;  %v2500_v7 = vmul.f32 %v7011_v58, %v7069_v42 }
 0x495   :  { %2437 = vrot.lane.b32.xlu1 %v2424_v52, %s4195_s21 }
 0x496   :  { %v7074_v10 = vpop.permute.xlu2 %2262 }
 0x497   :  { %v2267_v33 = vrot.slane %v7074_v10, 2 }
 0x499   :  { %v2269_v22 = vsel %vm2052_vm7, %v2266_v28, %v2267_v33 }
 0x49a   :  { %v2270_v2 = vsel %vm1482_vm9, %v2261_v25, %v2269_v22  ;;  %v2253_v22 = vmul.f32 %v2241_v55, %v6814_v62 }
 0x49b   :  { %v2276_v40 = vadd.f32 %v2270_v2, %v2251_v29  ;;  %v2244_v29 = vmul.f32 %v6814_v62, %v6963_v39  ;;  %v2252_v39 = vmul.f32 %v2240_v15, %v6814_v62 }
 0x49d   :  { %v2279_v60 = vmax.f32 %v2248_v46, %v2276_v40  ;;  %v2308_v16 = vpop.permute.xlu0 %2307  ;;  %v2295_v46 = vmul.f32 %v2240_v15, %v6892_v49 }
 0x49e   :  { %v7090_v32 = vpop.permute.xlu2 %2433  ;;  %v2311_v56 = vrot.slane %v2308_v16, 2  ;;  %v2321_v59 = vadd.f32 %v2308_v16, %v2296_v20  ;;  %v2243_v20 = vmul.f32 %v6814_v62, %v6942_v3 }
 0x49f   :  { %v7094_v50 = vadd.f32 %v2279_v60, %v6844_v23  ;;  %v2442_v31 = vrot.slane %v7090_v32, 2 }
 0x4a0   :  { %v2314_v37 = vsel %vm2052_vm7, %v2310_v5, %v2311_v56  ;;  %v2324_v43 = vmax.f32 %v2293_v48, %v2321_v59  ;;  %v2249_v16 = vadd.f32 %v2246_v4, %v2243_v20  ;;  %v2401_v59 = vmul.f32 %v7085_v44, %v6995_v1 }
 0x4a1   :  { %v2446_v30 = vsel %vm2052_vm7, %v2441_v18, %v2442_v31  ;;  %v2406_v35 = vmul.f32 %v6912_v54, %v7094_v50  ;;  %v2315_v53 = vsel %vm1482_vm9, %v2306_v12, %v2314_v37  ;;  %v2416_v49 = vmul.f32 %v7085_v44, %v7094_v50 }
 0x4a2   :  { %v2447_v61 = vsel %vm1482_vm9, %v2432_v14, %v2446_v30  ;;  %v2482_v26 = vmul.f32 %v7011_v58, %v7094_v50  ;;  %v2327_v24 = vadd.f32 %v2324_v43, %v6905_v63  ;;  %v2320_v5 = vadd.f32 %v2315_v53, %v2295_v46 }
 0x4a3   :  { %v2411_v21 = vadd.f32 %v2406_v35, %v2400_v45  ;;  %v2459_v0 = vadd.f32 %v2447_v61, %v2416_v49  ;;  %v2477_v45 = vmul.f32 %v7087_v38, %v6995_v1  ;;  %v2492_v46 = vmul.f32 %v7087_v38, %v7094_v50 }
 0x4a4   :  { %v2487_v27 = vadd.f32 %v2482_v26, %v2476_v11  ;;  %2369 = vrot.lane.b32.xlu0 %v2327_v24, %s4201_s2  ;;  %v2323_v34 = vmax.f32 %v2292_v8, %v2320_v5  ;;  %v7176_v53 = vstv %s4110_s1 }
 0x4a5   :  { %v2464_v12 = vmax.f32 %v2411_v21, %v2459_v0 }
 0x4a6   :  { %v2326_v47 = vadd.f32 %v2323_v34, %v6905_v63  ;;  %v2247_v63 = vmul.f32 %v2241_v55, %v6808_v13 }
 0x4a7   :  { %v7122_v25 = vadd.f32 %v7118_v41, %v2464_v12 }
 0x4a8   :  { %2367 = vrot.lane.b32.xlu2 %v2326_v47, %s4201_s2  ;;  %v2250_v14 = vadd.f32 %v2247_v63, %v2244_v29  ;;  %v7154_v56 = vpop.permute.xlu1 %2509 }
 0x4ac   :  { %v2339_v52 = vpop.permute.xlu0 %2338  ;;  %2513 = vrot.lane.b32.xlu0 %v2500_v7, %s4195_s21 }
 0x4ad   :  { %v2346_v28 = vsel %vm2342_vm10, %v2341_v6, %v2339_v52 }
 0x4ae   :  { %2357 = vst.msk [vmem:[#allocation5 + $0x20] sm:$0x3] %vm2356_vm5, %v2346_v28 }
 0x4b4   :  { %v2265_v2 = vpop.permute.xlu0 %2264 }
 0x4b5   :  { %v2268_v40 = vrot.slane %v2265_v2, 2  ;;  %v2278_v17 = vadd.f32 %v2265_v2, %v2253_v22  ;;  %v7137_v51 = vld [vmem:[#allocation5 + $0x20] sm:$0x3]  ;;  %v2402_v22 = vmul.f32 %v7085_v44, %v7051_v57 }
 0x4b6   :  { %v2425_v6 = vmul.f32 %v6912_v54, %v7137_v51  ;;  %v2501_v60 = vmul.f32 %v7011_v58, %v7137_v51 }
 0x4b7   :  { %v2271_v13 = vsel %vm2052_vm7, %v2267_v33, %v2268_v40  ;;  %v2281_v55 = vmax.f32 %v2250_v14, %v2278_v17  ;;  %v2518_v33 = vrot.slane %v7154_v56, 2 }
 0x4b8   :  { %v2272_v18 = vsel %vm1482_vm9, %v7074_v10, %v2271_v13  ;;  %2439 = vrot.lane.b32.xlu2 %v2425_v6, %s4195_s21  ;;  %2515 = vrot.lane.b32.xlu1 %v2501_v60, %s4195_s21 }
 0x4b9   :  { %v2277_v48 = vadd.f32 %v2272_v18, %v2252_v39  ;;  %v2284_v19 = vadd.f32 %v2281_v55, %v6844_v23  ;;  %v2403_v55 = vmul.f32 %v7085_v44, %v7069_v42 }
 0x4bb   :  { %v2280_v62 = vmax.f32 %v2249_v16, %v2277_v48  ;;  %2361 = vst.msk [vmem:[#allocation5 + $0x32] sm:$0x3] %vm2146_vm6, %v2284_v19 }
 0x4bc   :  { %v2508_v3 = vpop.permute.xlu0 %2507 }
 0x4bd   :  { %v2283_v15 = vadd.f32 %v2280_v62, %v6844_v23  ;;  %v2517_v10 = vrot.slane %v2508_v3, 2 }
 0x4bf   :  { %v2522_v11 = vsel %vm2052_vm7, %v2517_v10, %v2518_v33  ;;  %v2407_v37 = vmul.f32 %v6912_v54, %v2283_v15  ;;  %v2483_v23 = vmul.f32 %v7011_v58, %v2283_v15  ;;  %v2417_v24 = vmul.f32 %v7085_v44, %v2283_v15 }
 0x4c0   :  { %v2523_v43 = vsel %vm1482_vm9, %v2508_v3, %v2522_v11  ;;  %2511 = vrot.lane.b32.xlu2 %v2499_v36, %s4195_s21  ;;  %v2493_v11 = vmul.f32 %v7087_v38, %v2283_v15 }
 0x4c1   :  { %v2535_v30 = vadd.f32 %v2523_v43, %v2492_v46  ;;  %v2412_v1 = vadd.f32 %v2407_v37, %v2401_v59  ;;  %v7174_v35 = vadd.f32 %v2483_v23, %v2477_v45 }
 0x4c3   :  { %v2540_v61 = vmax.f32 %v2487_v27, %v2535_v30 }
 0x4c4   :  { %v2436_v50 = vpop.permute.xlu0 %2435 }
 0x4c5   :  { %v7179_v49 = vadd.f32 %v7176_v53, %v2540_v61  ;;  %v2443_v26 = vrot.slane %v2436_v50, 2 }
 0x4c7   :  { %v2448_v8 = vsel %vm2052_vm7, %v2442_v31, %v2443_v26 }
 0x4c8   :  { %v2449_v5 = vsel %vm1482_vm9, %v7090_v32, %v2448_v8 }
 0x4c9   :  { %v2460_v21 = vadd.f32 %v2449_v5, %v2417_v24 }
 0x4cb   :  { %v2465_v0 = vmax.f32 %v2412_v1, %v2460_v21 }
 0x4cd   :  { %v7188_v34 = vadd.f32 %v7118_v41, %v2465_v0 }
 0x4fc   :  { %v2366_v27 = vpop.permute.xlu1 %2365 }
 0x4fd   :  { %v2371_v12 = vrot.slane %v2366_v27, 6 }
 0x4ff   :  { %v2373_v47 = vsel %vm2342_vm10, %v2371_v12, %v2366_v27 }
 0x500   :  { %2380 = vst.msk [vmem:[#allocation5 + $0x32] sm:$0xff] %vm7037_vm14, %v2373_v47 }
 0x502   :  { %v2368_v7 = vpop.permute.xlu2 %2367 }
 0x503   :  { %v2372_v52 = vrot.slane %v2368_v7, 6 }
 0x505   :  { %v2374_v28 = vsel %vm1502_vm0, %v2371_v12, %v2372_v52 }
 0x506   :  { %v7195_v31 = vsel %vm2342_vm10, %v2374_v28, %v2368_v7  ;;  %v2480_v28 = vmul.f32 %v7087_v38, %v7137_v51 }
 0x507   :  { %v2438_v32 = vpop.permute.xlu1 %2437  ;;  %v2396_v63 = vld [vmem:[#allocation5 + $0x32] sm:$0xff]  ;;  %v2409_v39 = vmul.f32 %v6912_v54, %v7195_v31  ;;  %v2419_v18 = vmul.f32 %v7085_v44, %v7195_v31 }
 0x508   :  { %v2444_v29 = vrot.slane %v2438_v32, 2  ;;  %v2408_v2 = vmul.f32 %v6912_v54, %v2396_v63  ;;  %v2418_v4 = vmul.f32 %v7085_v44, %v2396_v63  ;;  %v2484_v1 = vmul.f32 %v7011_v58, %v2396_v63 }
 0x509   :  { %v2414_v19 = vadd.f32 %v2409_v39, %v2403_v55 }
 0x50a   :  { %v2450_v9 = vsel %vm2052_vm7, %v2443_v26, %v2444_v29  ;;  %v2413_v14 = vadd.f32 %v2408_v2, %v2402_v22  ;;  %v2404_v26 = vmul.f32 %v7085_v44, %v7137_v51 }
 0x50b   :  { %v2451_v40 = vsel %vm1482_vm9, %v2436_v50, %v2450_v9  ;;  %v2495_v9 = vmul.f32 %v7087_v38, %v7195_v31 }
 0x50c   :  { %v2461_v17 = vadd.f32 %v2451_v40, %v2418_v4 }
 0x50e   :  { %v2466_v6 = vmax.f32 %v2413_v14, %v2461_v17 }
 0x510   :  { %v7204_v60 = vadd.f32 %v7118_v41, %v2466_v6 }
 0x512   :  { %v2440_v20 = vpop.permute.xlu2 %2439 }
 0x513   :  { %v2445_v13 = vrot.slane %v2440_v20, 2 }
 0x515   :  { %v2452_v16 = vsel %vm2052_vm7, %v2444_v29, %v2445_v13  ;;  %v2485_v29 = vmul.f32 %v7011_v58, %v7195_v31 }
 0x516   :  { %v2453_v48 = vsel %vm1482_vm9, %v2438_v32, %v2452_v16  ;;  %v2370_v3 = vpop.permute.xlu0 %2369 }
 0x517   :  { %v2462_v62 = vadd.f32 %v2453_v48, %v2419_v18  ;;  %v2376_v10 = vsel %vm2342_vm10, %v2372_v52, %v2370_v3 }
 0x518   :  { %2382 = vst.msk [vmem:[#allocation5 + $0x42] sm:$0x3] %vm2356_vm5, %v2376_v10 }
 0x519   :  { %v2467_v59 = vmax.f32 %v2414_v19, %v2462_v62 }
 0x51a   :  { %v2512_v45 = vpop.permute.xlu2 %2511 }
 0x51b   :  { %v7217_v36 = vadd.f32 %v7118_v41, %v2467_v59  ;;  %v2519_v46 = vrot.slane %v2512_v45, 2 }
 0x51d   :  { %v2524_v37 = vsel %vm2052_vm7, %v2518_v33, %v2519_v46  ;;  %v2478_v33 = vmul.f32 %v7087_v38, %v7051_v57 }
 0x51e   :  { %v2525_v23 = vsel %vm1482_vm9, %v7154_v56, %v2524_v37  ;;  %v2514_v30 = vpop.permute.xlu0 %2513  ;;  %v2494_v56 = vmul.f32 %v7087_v38, %v2396_v63 }
 0x51f   :  { %v2536_v43 = vadd.f32 %v2525_v23, %v2493_v11  ;;  %v2520_v61 = vrot.slane %v2514_v30, 2  ;;  %v2398_v50 = vld [vmem:[#allocation5 + $0x42] sm:$0x3]  ;;  %v2489_v47 = vadd.f32 %v2484_v1, %v2478_v33 }
 0x520   :  { %v2410_v15 = vmul.f32 %v6912_v54, %v2398_v50  ;;  %v2420_v8 = vmul.f32 %v7085_v44, %v2398_v50  ;;  %v2486_v44 = vmul.f32 %v7011_v58, %v2398_v50  ;;  %v2496_v32 = vmul.f32 %v7087_v38, %v2398_v50 }
 0x521   :  { %v2541_v24 = vmax.f32 %v7174_v35, %v2536_v43  ;;  %v2526_v5 = vsel %vm2052_vm7, %v2519_v46, %v2520_v61 }
 0x522   :  { %v2527_v0 = vsel %vm1482_vm9, %v2512_v45, %v2526_v5  ;;  %v2415_v27 = vadd.f32 %v2410_v15, %v2404_v26  ;;  %v2463_v12 = vadd.f32 %v2440_v20, %v2420_v8  ;;  %v2491_v22 = vadd.f32 %v2486_v44, %v2480_v28 }
 0x523   :  { %v2547_v21 = vadd.f32 %v7176_v53, %v2541_v24  ;;  %v2537_v7 = vadd.f32 %v2527_v0, %v2494_v56 }
 0x524   :  { %v2468_v35 = vmax.f32 %v2415_v27, %v2463_v12 }
 0x525   :  { %v2542_v52 = vmax.f32 %v2489_v47, %v2537_v7 }
 0x526   :  { %v7238_v54 = vadd.f32 %v7118_v41, %v2468_v35  ;;  %v2479_v41 = vmul.f32 %v7087_v38, %v7069_v42 }
 0x527   :  { %v7242_v57 = vadd.f32 %v7176_v53, %v2542_v52 }
 0x528   :  { %v2490_v17 = vadd.f32 %v2485_v29, %v2479_v41 }
 0x52a   :  { %v2516_v63 = vpop.permute.xlu1 %2515 }
 0x52b   :  { %v2521_v2 = vrot.slane %v2516_v63, 2  ;;  %v2539_v4 = vadd.f32 %v2516_v63, %v2496_v32 }
 0x52d   :  { %v2528_v14 = vsel %vm2052_vm7, %v2520_v61, %v2521_v2  ;;  %v2544_v40 = vmax.f32 %v2491_v22, %v2539_v4 }
 0x52e   :  { %v2529_v51 = vsel %vm1482_vm9, %v2514_v30, %v2528_v14 }
 0x52f   :  { %v2538_v6 = vadd.f32 %v2529_v51, %v2495_v9  ;;  %v7256_v20 = vadd.f32 %v7176_v53, %v2544_v40 }
 0x531   :  { %v2543_v58 = vmax.f32 %v2490_v17, %v2538_v6 }
 0x533   :  { %v7259_v39 = vadd.f32 %v7176_v53, %v2543_v58 }
 0x534   :  { %4187 = dma.done.wait [#allocation8], 33040 }
 0x535   :  { %4188 = vsyncadd [#allocation8], 4294934256 }
 0x536   :  { %4189 = dma.done.wait [#allocation8 + $0x1], 33040 }
 0x537   :  { %4190 = vsyncadd [#allocation8 + $0x1], 4294934256  ;;  %3079 = vst [vmem:[#allocation1] ss:$4 sm:$0xff] %v7179_v49  ;;  %v2830_v42 = vld [vmem:[#allocation7 + $0x4d0] sm:$0xff]  ;;  %v2862_v31 = vld [vmem:[#allocation7 + $0x140] sm:$0xff] }
 0x538   :  { %3081 = vst [vmem:[#allocation1 + $0x20] ss:$4 sm:$0xff] %v2547_v21  ;;  %v2846_v38 = vld [vmem:[#allocation7 + $0x4f0] sm:$0xff]  ;;  %3125 = vmatpush.msra.mxu0 %v2830_v42  ;;  %v2829_v13 = vld [vmem:[#allocation7 + $0x388] sm:$0xff]  ;;  %v2845_v55 = vld [vmem:[#allocation7 + $0x4c0] sm:$0xff]  ;;  %3165 = vmatpush.msra.mxu2 %v2862_v31  ;;  %vm3121_vm0 = vcmask 1040384  }
 0x539   :  { %3145 = vmatpush.msra.mxu1 %v2846_v38  ;;  %v2861_v18 = vld [vmem:[#allocation7 + $0x7b8] sm:$0xff]  ;;  %v2844_v53 = vld [vmem:[#allocation7 + $0x270] sm:$0xff]  ;;  %v2860_v19 = vld [vmem:[#allocation7 + $0x6a0] sm:$0xff]  ;;  %vm3118_vm9 = vcmask 138240   ;;  %vm3913_vm7 = vcmask 523264   ;;  %vm3946_vm3 = vcmask 261120  }
 0x53a   :  { %v2878_v16 = vld [vmem:[#allocation7 + $0x418] sm:$0xff]  ;;  %3126 = vmatpush.msra.mxu0 %v2829_v13  ;;  %v2877_v62 = vld [vmem:[#allocation7 + $0x708] sm:$0xff]  ;;  %3166 = vmatpush.msra.mxu2 %v2861_v18  ;;  %v2859_v10 = vld [vmem:[#allocation7 + $0x6d0] sm:$0xff]  ;;  %vm3977_vm6 = vcmask 130048   ;;  %s4202_s21 = smov [#allocation14]   ;;  %vm4001_vm13 = vcmask 58368  }
 0x53b   :  { %v2828_v48 = vld [vmem:[#allocation7 + $0x4d8] sm:$0xff]  ;;  %3146 = vmatpush.msra.mxu1 %v2845_v55  ;;  %3185 = vmatpush.msra.mxu3 %v2878_v16  ;;  %v2827_v49 = vld [vmem:[#allocation7 + $0xc8] sm:$0xff]  ;;  %v2876_v59 = vld [vmem:[#allocation7 + $0x430] sm:$0xff]  ;;  %s4008_s27 = sshll.u32 %s4202_s21, 4  ;;  %s4009_s27 = int_to_ptr.vmem [resolvable:$true] %s4008_s27 }
 0x53c   :  { %v2843_v3 = vld [vmem:[#allocation7 + $0x178] sm:$0xff]  ;;  %3127 = vmatpush.msra.mxu0 %v2828_v48  ;;  %3167 = vmatpush.msra.mxu2 %v2860_v19  ;;  %v2826_v45 = vld [vmem:[#allocation7 + $0x230] sm:$0xff]  ;;  %v2842_v46 = vld [vmem:[#allocation7 + $0x440] sm:$0xff] }
 0x53d   :  { %3147 = vmatpush.msra.mxu1 %v2844_v53  ;;  %3186 = vmatpush.msra.mxu3 %v2877_v62  ;;  %v2858_v11 = vld [vmem:[#allocation7 + $0x260] sm:$0xff]  ;;  %v2875_v37 = vld [vmem:[#allocation7 + $0x368] sm:$0xff]  ;;  %v2841_v43 = vld [vmem:[#allocation7 + $0x378] sm:$0xff] }
 0x53e   :  { %3128 = vmatpush.msra.mxu0 %v2827_v49  ;;  %3168 = vmatpush.msra.mxu2 %v2859_v10  ;;  %v2825_v23 = vld [vmem:[#allocation7 + $0x208] sm:$0xff]  ;;  %v2874_v1 = vld [vmem:[#allocation7 + $0xd0] sm:$0xff]  ;;  %v2840_v50 = vld [vmem:[#allocation7 + $0x618] sm:$0xff] }
 0x53f   :  { %3148 = vmatpush.msra.mxu1 %v2843_v3  ;;  %3187 = vmatpush.msra.mxu3 %v2876_v59  ;;  %v2857_v30 = vld [vmem:[#allocation7 + $0x7e8] sm:$0xff]  ;;  %v2824_v61 = vld [vmem:[#allocation7 + $0x730] sm:$0xff]  ;;  %v2873_v24 = vld [vmem:[#allocation7 + $0x2e0] sm:$0xff] }
 0x540   :  { %3129 = vmatpush.msra.mxu0 %v2826_v45  ;;  %3169 = vmatpush.msra.mxu2 %v2858_v11  ;;  %v2856_v26 = vld [vmem:[#allocation7 + $0x5c8] sm:$0xff]  ;;  %v2823_v15 = vld [vmem:[#allocation7 + $0x700] sm:$0xff]  ;;  %v2872_v56 = vld [vmem:[#allocation7 + $0x7b0] sm:$0xff] }
 0x541   :  { %3149 = vmatpush.msra.mxu1 %v2842_v46  ;;  %3188 = vmatpush.msra.mxu3 %v2875_v37  ;;  %v2839_v8 = vld [vmem:[#allocation7 + $0x220] sm:$0xff]  ;;  %v2855_v33 = vld [vmem:[#allocation7 + $0x588] sm:$0xff]  ;;  %v2822_v5 = vld [vmem:[#allocation7 + $0x6f8] sm:$0xff] }
 0x542   :  { %3130 = vmatpush.msra.mxu0 %v2825_v23  ;;  %3170 = vmatpush.msra.mxu2 %v2857_v30  ;;  %v2838_v21 = vld [vmem:[#allocation7 + $0x5c0] sm:$0xff]  ;;  %v2854_v0 = vld [vmem:[#allocation7 + $0x528] sm:$0xff]  ;;  %v2837_v47 = vld [vmem:[#allocation7 + $0x90] sm:$0xff] }
 0x543   :  { %3150 = vmatpush.msra.mxu1 %v2841_v43  ;;  %3189 = vmatpush.msra.mxu3 %v2874_v1  ;;  %v2871_v27 = vld [vmem:[#allocation7 + $0x168] sm:$0xff]  ;;  %v2853_v7 = vld [vmem:[#allocation7 + $0x690] sm:$0xff]  ;;  %v2870_v35 = vld [vmem:[#allocation7 + $0x118] sm:$0xff] }
 0x544   :  { %3131 = vmatpush.msra.mxu0 %v2824_v61  ;;  %3171 = vmatpush.msra.mxu2 %v2856_v26  ;;  %v2821_v12 = vld [vmem:[#allocation7 + $0x808] sm:$0xff]  ;;  %v2820_v52 = vld [vmem:[#allocation7 + $0x298] sm:$0xff]  ;;  %v2852_v28 = vld [vmem:[#allocation7 + $0x710] sm:$0xff] }
 0x545   :  { %3151 = vmatpush.msra.mxu1 %v2840_v50  ;;  %3190 = vmatpush.msra.mxu3 %v2873_v24  ;;  %v2836_v44 = vld [vmem:[#allocation7 + $0x5f8] sm:$0xff]  ;;  %v2819_v63 = vld [vmem:[#allocation7 + $0x1d0] sm:$0xff]  ;;  %v2835_v29 = vld [vmem:[#allocation7 + $0x748] sm:$0xff] }
 0x546   :  { %3132 = vmatpush.msra.mxu0 %v2823_v15  ;;  %3172 = vmatpush.msra.mxu2 %v2855_v33  ;;  %v2869_v32 = vld [vmem:[#allocation7 + $0x1d8] sm:$0xff]  ;;  %v2851_v22 = vld [vmem:[#allocation7 + $0x7f0] sm:$0xff]  ;;  %v2868_v2 = vld [vmem:[#allocation7 + $0x3e0] sm:$0xff] }
 0x547   :  { %3152 = vmatpush.msra.mxu1 %v2839_v8  ;;  %3191 = vmatpush.msra.mxu3 %v2872_v56  ;;  %v2818_v4 = vld [vmem:[#allocation7 + $0x340] sm:$0xff]  ;;  %v2834_v41 = vld [vmem:[#allocation7 + $0x6a8] sm:$0xff]  ;;  %v2833_v51 = vld [vmem:[#allocation7 + $0x70] sm:$0xff] }
 0x548   :  { %3133 = vmatpush.msra.mxu0 %v2822_v5  ;;  %3173 = vmatpush.msra.mxu2 %v2854_v0  ;;  %v2850_v9 = vld [vmem:[#allocation7 + $0x420] sm:$0xff]  ;;  %v2867_v14 = vld [vmem:[#allocation7 + $0x4c8] sm:$0xff]  ;;  %v2849_v17 = vld [vmem:[#allocation7 + $0x4b0] sm:$0xff] }
 0x549   :  { %3153 = vmatpush.msra.mxu1 %v2838_v21  ;;  %3192 = vmatpush.msra.mxu3 %v2871_v27  ;;  %v2817_v40 = vld [vmem:[#allocation7] sm:$0xff]  ;;  %v2866_v6 = vld [vmem:[#allocation7 + $0x518] sm:$0xff]  ;;  %v2832_v42 = vld [vmem:[#allocation7 + $0x788] sm:$0xff] }
 0x54a   :  { %3134 = vmatpush.msra.mxu0 %v2821_v12  ;;  %3174 = vmatpush.msra.mxu2 %v2853_v7  ;;  %v2816_v58 = vld [vmem:[#allocation7 + $0x2c0] sm:$0xff]  ;;  %v2848_v38 = vld [vmem:[#allocation7 + $0x6d8] sm:$0xff]  ;;  %v2865_v31 = vld [vmem:[#allocation7 + $0x128] sm:$0xff] }
 0x54b   :  { %3154 = vmatpush.msra.mxu1 %v2837_v47  ;;  %3193 = vmatpush.msra.mxu3 %v2870_v35  ;;  %v2815_v13 = vld [vmem:[#allocation7 + $0x88] sm:$0xff]  ;;  %v2831_v55 = vld [vmem:[#allocation7 + $0x6c0] sm:$0xff]  ;;  %v2910_v53 = vld [vmem:[#allocation7 + $0x2b0] sm:$0xff] }
 0x54c   :  { %3135 = vmatpush.msra.mxu0 %v2820_v52  ;;  %3175 = vmatpush.msra.mxu2 %v2852_v28  ;;  %v2847_v18 = vld [vmem:[#allocation7 + $0x488] sm:$0xff]  ;;  %v2864_v16 = vld [vmem:[#allocation7 + $0x520] sm:$0xff]  ;;  %v2863_v62 = vld [vmem:[#allocation7 + $0x758] sm:$0xff] }
 0x54d   :  { %3155 = vmatpush.msra.mxu1 %v2836_v44  ;;  %3194 = vmatpush.msra.mxu3 %v2869_v32  ;;  %v2894_v48 = vld [vmem:[#allocation7 + $0x148] sm:$0xff]  ;;  %v2926_v19 = vld [vmem:[#allocation7 + $0x5e0] sm:$0xff]  ;;  %v2893_v49 = vld [vmem:[#allocation7 + $0x810] sm:$0xff] }
 0x54e   :  { %3136 = vmatpush.msra.mxu0 %v2819_v63  ;;  %3176 = vmatpush.msra.mxu2 %v2851_v22  ;;  %v2909_v3 = vld [vmem:[#allocation7 + $0x798] sm:$0xff]  ;;  %v2942_v59 = vld [vmem:[#allocation7 + $0x390] sm:$0xff]  ;;  %v2892_v45 = vld [vmem:[#allocation7 + $0x2e8] sm:$0xff] }
 0x54f   :  { %3156 = vmatpush.msra.mxu1 %v2835_v29  ;;  %3195 = vmatpush.msra.mxu3 %v2868_v2  ;;  %v2925_v10 = vld [vmem:[#allocation7 + $0x2b8] sm:$0xff]  ;;  %v2941_v37 = vld [vmem:[#allocation7 + $0x4e0] sm:$0xff]  ;;  %v2907_v43 = vld [vmem:[#allocation7 + $0x190] sm:$0xff] }
 0x550   :  { %3137 = vmatpush.msra.mxu0 %v2818_v4  ;;  %3177 = vmatpush.msra.mxu2 %v2850_v9  ;;  %v2908_v46 = vld [vmem:[#allocation7 + $0x4b8] sm:$0xff]  ;;  %v2940_v1 = vld [vmem:[#allocation7 + $0x450] sm:$0xff]  ;;  %v2890_v61 = vld [vmem:[#allocation7 + $0x680] sm:$0xff] }
 0x551   :  { %3157 = vmatpush.msra.mxu1 %v2834_v41  ;;  %3196 = vmatpush.msra.mxu3 %v2867_v14  ;;  %v2924_v11 = vld [vmem:[#allocation7 + $0x438] sm:$0xff]  ;;  %v2906_v50 = vld [vmem:[#allocation7 + $0x120] sm:$0xff]  ;;  %v2922_v26 = vld [vmem:[#allocation7 + $0x5e8] sm:$0xff] }
 0x552   :  { %3138 = vmatpush.msra.mxu0 %v2817_v40  ;;  %3178 = vmatpush.msra.mxu2 %v2849_v17  ;;  %v2891_v23 = vld [vmem:[#allocation7 + $0x338] sm:$0xff]  ;;  %v2939_v24 = vld [vmem:[#allocation7 + $0x6e0] sm:$0xff]  ;;  %v2889_v15 = vld [vmem:[#allocation7 + $0x428] sm:$0xff] }
 0x553   :  { %3158 = vmatpush.msra.mxu1 %v2833_v51  ;;  %3197 = vmatpush.msra.mxu3 %v2866_v6  ;;  %v2923_v30 = vld [vmem:[#allocation7 + $0xb8] sm:$0xff]  ;;  %v2938_v56 = vld [vmem:[#allocation7 + $0x180] sm:$0xff]  ;;  %v2904_v21 = vld [vmem:[#allocation7 + $0x108] sm:$0xff] }
 0x554   :  { %3139 = vmatpush.msra.mxu0 %v2816_v58  ;;  %3179 = vmatpush.msra.mxu2 %v2848_v38  ;;  %v2905_v8 = vld [vmem:[#allocation7 + $0xd8] sm:$0xff]  ;;  %v2888_v5 = vld [vmem:[#allocation7 + $0x360] sm:$0xff]  ;;  %v2920_v0 = vld [vmem:[#allocation7 + $0x5b0] sm:$0xff] }
 0x555   :  { %3159 = vmatpush.msra.mxu1 %v2832_v42  ;;  %3198 = vmatpush.msra.mxu3 %v2865_v31  ;;  %v2921_v33 = vld [vmem:[#allocation7 + $0x158] sm:$0xff]  ;;  %v2937_v27 = vld [vmem:[#allocation7 + $0x668] sm:$0xff]  ;;  %v2887_v12 = vld [vmem:[#allocation7 + $0xe0] sm:$0xff] }
 0x556   :  { %3140 = vmatpush.msra.mxu0 %v2815_v13  ;;  %3180 = vmatpush.msra.mxu2 %v2847_v18  ;;  %v2903_v47 = vld [vmem:[#allocation7 + $0x1b0] sm:$0xff]  ;;  %v2919_v7 = vld [vmem:[#allocation7 + $0x20] sm:$0xff]  ;;  %v2936_v35 = vld [vmem:[#allocation7 + $0x48] sm:$0xff] }
 0x557   :  { %3160 = vmatpush.msra.mxu1 %v2831_v55  ;;  %3199 = vmatpush.msra.mxu3 %v2864_v16  ;;  %v7262_v52 = vld.sshfl [vmem:[#allocation1] sm:$0xff pattern:$0x73625140]  ;;  %v7264_v44 = vld.sshfl [vmem:[#allocation1 + $0x8] sm:$0xff pattern:$0x73625140] }
 0x558   :  { %3205 = vmatpush.msrb.mxu0 %v2894_v48  ;;  %3245 = vmatpush.msrb.mxu2 %v2926_v19  ;;  %v7266_v28 = vld.sshfl [vmem:[#allocation1 + $0x10] sm:$0xff pattern:$0x73625140]  ;;  %v7268_v32 = vld.sshfl [vmem:[#allocation1 + $0x18] sm:$0xff pattern:$0x73625140] }
 0x559   :  { %3225 = vmatpush.msrb.mxu1 %v2910_v53  ;;  %3200 = vmatpush.msra.mxu3 %v2863_v62  ;;  %v2886_v63 = vld [vmem:[#allocation7 + $0x358] sm:$0xff]  ;;  %v2902_v29 = vld [vmem:[#allocation7 + $0x1e0] sm:$0xff]  ;;  %3090 = vst [vmem:[#allocation1] ss:$4 sm:$0xff] %v7242_v57  ;;  %v2935_v2 = vld [vmem:[#allocation7 + $0x3e8] sm:$0xff] }
 0x55a   :  { %3206 = vmatpush.msrb.mxu0 %v2893_v49  ;;  %3246 = vmatpush.msrb.mxu2 %v2925_v10  ;;  %v2918_v22 = vld [vmem:[#allocation7 + $0x238] sm:$0xff]  ;;  %v2885_v4 = vld [vmem:[#allocation7 + $0x608] sm:$0xff]  ;;  %v2884_v40 = vld [vmem:[#allocation7 + $0x650] sm:$0xff] }
 0x55b   :  { %3226 = vmatpush.msrb.mxu1 %v2909_v3  ;;  %3265 = vmatpush.msrb.mxu3 %v2942_v59  ;;  %v2901_v41 = vld [vmem:[#allocation7 + $0x3d8] sm:$0xff]  ;;  %v2917_v9 = vld [vmem:[#allocation7 + $0x228] sm:$0xff]  ;;  %v2916_v17 = vld [vmem:[#allocation7 + $0x300] sm:$0xff] }
 0x55c   :  { %3207 = vmatpush.msrb.mxu0 %v2892_v45  ;;  %3247 = vmatpush.msrb.mxu2 %v2924_v11  ;;  %v2934_v14 = vld [vmem:[#allocation7 + $0x7c8] sm:$0xff]  ;;  %v2900_v51 = vld [vmem:[#allocation7 + $0x7d8] sm:$0xff]  ;;  %v2883_v58 = vld [vmem:[#allocation7 + $0xa0] sm:$0xff] }
 0x55d   :  { %3227 = vmatpush.msrb.mxu1 %v2908_v46  ;;  %3266 = vmatpush.msrb.mxu3 %v2941_v37  ;;  %v2933_v6 = vld [vmem:[#allocation7 + $0x18] sm:$0xff]  ;;  %v2899_v57 = vld [vmem:[#allocation7 + $0x4e8] sm:$0xff]  ;;  %v2915_v42 = vld [vmem:[#allocation7 + $0x410] sm:$0xff] }
 0x55e   :  { %3208 = vmatpush.msrb.mxu0 %v2891_v23  ;;  %3248 = vmatpush.msrb.mxu2 %v2923_v30  ;;  %v2932_v38 = vld [vmem:[#allocation7 + $0x508] sm:$0xff]  ;;  %v7271_v31 = vld.sshfl [vmem:[#allocation1 + $0x30] sm:$0xff pattern:$0x73625140]  ;;  %v2898_v48 = vld [vmem:[#allocation7 + $0x280] sm:$0xff] }
 0x55f   :  { %3228 = vmatpush.msrb.mxu1 %v2907_v43  ;;  %3267 = vmatpush.msrb.mxu3 %v2940_v1  ;;  %v7273_v13 = vld.sshfl [vmem:[#allocation1 + $0x20] sm:$0xff pattern:$0x73625140]  ;;  %v7275_v55 = vld.sshfl [vmem:[#allocation1 + $0x38] sm:$0xff pattern:$0x73625140] }
 0x560   :  { %3209 = vmatpush.msrb.mxu0 %v2890_v61  ;;  %3249 = vmatpush.msrb.mxu2 %v2922_v26  ;;  %v7277_v18 = vld.sshfl [vmem:[#allocation1 + $0x28] sm:$0xff pattern:$0x73625140]  ;;  %v2931_v19 = vld [vmem:[#allocation7 + $0x3f8] sm:$0xff]  ;;  %v2912_v46 = vld [vmem:[#allocation7 + $0x7a0] sm:$0xff] }
 0x561   :  { %3229 = vmatpush.msrb.mxu1 %v2906_v50  ;;  %3268 = vmatpush.msrb.mxu3 %v2939_v24  ;;  %v2882_v16 = vld [vmem:[#allocation7 + $0x530] sm:$0xff]  ;;  %3091 = vst [vmem:[#allocation1 + $0x20] ss:$4 sm:$0xff] %v7259_v39  ;;  %v2914_v53 = vld [vmem:[#allocation7 + $0x328] sm:$0xff]  ;;  %v2897_v49 = vld [vmem:[#allocation7 + $0x5b8] sm:$0xff] }
 0x562   :  { %3210 = vmatpush.msrb.mxu0 %v2889_v15  ;;  %3250 = vmatpush.msrb.mxu2 %v2921_v33  ;;  %v2881_v62 = vld [vmem:[#allocation7 + $0x6f0] sm:$0xff]  ;;  %v2930_v10 = vld [vmem:[#allocation7 + $0x5a8] sm:$0xff]  ;;  %v2879_v11 = vld [vmem:[#allocation7 + $0x3c0] sm:$0xff] }
 0x563   :  { %3230 = vmatpush.msrb.mxu1 %v2905_v8  ;;  %3269 = vmatpush.msrb.mxu3 %v2938_v56  ;;  %v2913_v3 = vld [vmem:[#allocation7 + $0x490] sm:$0xff]  ;;  %v2896_v45 = vld [vmem:[#allocation7 + $0x1c8] sm:$0xff]  ;;  %v2957_v26 = vld [vmem:[#allocation7 + $0x78] sm:$0xff] }
 0x564   :  { %3211 = vmatpush.msrb.mxu0 %v2888_v5  ;;  %3251 = vmatpush.msrb.mxu2 %v2920_v0  ;;  %v2880_v59 = vld [vmem:[#allocation7 + $0x130] sm:$0xff]  ;;  %v2929_v39 = vld [vmem:[#allocation7 + $0x28] sm:$0xff]  ;;  %v2973_v24 = vld [vmem:[#allocation7 + $0x278] sm:$0xff] }
 0x565   :  { %3231 = vmatpush.msrb.mxu1 %v2904_v21  ;;  %3270 = vmatpush.msrb.mxu3 %v2937_v27  ;;  %v2895_v37 = vld [vmem:[#allocation7 + $0x288] sm:$0xff]  ;;  %v2911_v23 = vld [vmem:[#allocation7 + $0x370] sm:$0xff]  ;;  %v2988_v5 = vld [vmem:[#allocation7 + $0x100] sm:$0xff] }
 0x566   :  { %3212 = vmatpush.msrb.mxu0 %v2887_v12  ;;  %3252 = vmatpush.msrb.mxu2 %v2919_v7  ;;  %v2928_v43 = vld [vmem:[#allocation7 + $0x8] sm:$0xff]  ;;  %v2974_v1 = vld [vmem:[#allocation7 + $0x790] sm:$0xff] }
 0x567   :  { %3232 = vmatpush.msrb.mxu1 %v2903_v47  ;;  %3271 = vmatpush.msrb.mxu3 %v2936_v35  ;;  %v2958_v30 = vld [vmem:[#allocation7 + $0x7a8] sm:$0xff]  ;;  %v3006_v8 = vld [vmem:[#allocation7 + $0x2d0] sm:$0xff]  ;;  %v3004_v47 = vld [vmem:[#allocation7 + $0x7f8] sm:$0xff] }
 0x568   :  { %3213 = vmatpush.msrb.mxu0 %v2886_v63  ;;  %3253 = vmatpush.msrb.mxu2 %v2918_v22  ;;  %v2990_v61 = vld [vmem:[#allocation7 + $0x1a8] sm:$0xff]  ;;  %v2972_v56 = vld [vmem:[#allocation7 + $0x550] sm:$0xff] }
 0x569   :  { %3233 = vmatpush.msrb.mxu1 %v2902_v29  ;;  %3272 = vmatpush.msrb.mxu3 %v2935_v2  ;;  %v2927_v50 = vld [vmem:[#allocation7 + $0x348] sm:$0xff]  ;;  %v2971_v27 = vld [vmem:[#allocation7 + $0x5d0] sm:$0xff]  ;;  %v2969_v2 = vld [vmem:[#allocation7 + $0x5d8] sm:$0xff] }
 0x56a   :  { %3214 = vmatpush.msrb.mxu0 %v2885_v4  ;;  %3254 = vmatpush.msrb.mxu2 %v2917_v9  ;;  %v2989_v15 = vld [vmem:[#allocation7 + $0x308] sm:$0xff]  ;;  %v2987_v12 = vld [vmem:[#allocation7 + $0x3f0] sm:$0xff]  ;;  %v2952_v9 = vld [vmem:[#allocation7 + $0x218] sm:$0xff] }
 0x56b   :  { %3234 = vmatpush.msrb.mxu1 %v2901_v41  ;;  %3273 = vmatpush.msrb.mxu3 %v2934_v14  ;;  %v2956_v33 = vld [vmem:[#allocation7 + $0x1e8] sm:$0xff]  ;;  %v2954_v7 = vld [vmem:[#allocation7 + $0x510] sm:$0xff]  ;;  %v3002_v41 = vld [vmem:[#allocation7 + $0x2d8] sm:$0xff] }
 0x56c   :  { %3215 = vmatpush.msrb.mxu0 %v2884_v40  ;;  %3255 = vmatpush.msrb.mxu2 %v2916_v17  ;;  %v3005_v21 = vld [vmem:[#allocation7 + $0x688] sm:$0xff]  ;;  %v2986_v63 = vld [vmem:[#allocation7 + $0x610] sm:$0xff]  ;;  %v2984_v14 = vld [vmem:[#allocation7 + $0x760] sm:$0xff] }
 0x56d   :  { %3235 = vmatpush.msrb.mxu1 %v2900_v51  ;;  %3274 = vmatpush.msrb.mxu3 %v2933_v6  ;;  %v2955_v0 = vld [vmem:[#allocation7 + $0x68] sm:$0xff]  ;;  %v2985_v4 = vld [vmem:[#allocation7 + $0x6b0] sm:$0xff]  ;;  %v2951_v51 = vld [vmem:[#allocation7 + $0x40] sm:$0xff] }
 0x56e   :  { %3216 = vmatpush.msrb.mxu0 %v2883_v58  ;;  %3256 = vmatpush.msrb.mxu2 %v2915_v42  ;;  %v7284_v35 = vld.sshfl [vmem:[#allocation1] sm:$0xff pattern:$0x73625140]  ;;  %v3001_v40 = vld [vmem:[#allocation7 + $0x470] sm:$0xff]  ;;  %v2983_v6 = vld [vmem:[#allocation7 + $0xf8] sm:$0xff] }
 0x56f   :  { %3236 = vmatpush.msrb.mxu1 %v2899_v57  ;;  %3275 = vmatpush.msrb.mxu3 %v2932_v38  ;;  %v3003_v29 = vld [vmem:[#allocation7 + $0x2c8] sm:$0xff]  ;;  %v2967_v17 = vld [vmem:[#allocation7 + $0x1f0] sm:$0xff]  ;;  %v2950_v57 = vld [vmem:[#allocation7 + $0x320] sm:$0xff] }
 0x570   :  { %3217 = vmatpush.msrb.mxu0 %v2882_v16  ;;  %3257 = vmatpush.msrb.mxu2 %v2914_v53  ;;  %v2953_v22 = vld [vmem:[#allocation7 + $0x188] sm:$0xff]  ;;  %v3000_v58 = vld [vmem:[#allocation7 + $0x630] sm:$0xff]  ;;  %v2982_v38 = vld [vmem:[#allocation7 + $0x738] sm:$0xff] }
 0x571   :  { %3237 = vmatpush.msrb.mxu1 %v2898_v48  ;;  %3276 = vmatpush.msrb.mxu3 %v2931_v19  ;;  %v2966_v42 = vld [vmem:[#allocation7 + $0x6c8] sm:$0xff]  ;;  %v2998_v16 = vld [vmem:[#allocation7 + $0x778] sm:$0xff]  ;;  %v2964_v53 = vld [vmem:[#allocation7 + $0x3d0] sm:$0xff] }
 0x572   :  { %3218 = vmatpush.msrb.mxu0 %v2881_v62  ;;  %3258 = vmatpush.msrb.mxu2 %v2913_v3  ;;  %v2948_v48 = vld [vmem:[#allocation7 + $0x2f8] sm:$0xff]  ;;  %v2980_v19 = vld [vmem:[#allocation7 + $0x150] sm:$0xff]  ;;  %v2963_v3 = vld [vmem:[#allocation7 + $0x660] sm:$0xff] }
 0x573   :  { %3238 = vmatpush.msrb.mxu1 %v2897_v49  ;;  %3277 = vmatpush.msrb.mxu3 %v2930_v10  ;;  %v2997_v62 = vld [vmem:[#allocation7 + $0x38] sm:$0xff]  ;;  %v2947_v49 = vld [vmem:[#allocation7 + $0x670] sm:$0xff] }
 0x574   :  { %3219 = vmatpush.msrb.mxu0 %v2880_v59  ;;  %3259 = vmatpush.msrb.mxu2 %v2912_v46  ;;  %v2979_v10 = vld [vmem:[#allocation7 + $0x210] sm:$0xff]  ;;  %v2996_v59 = vld [vmem:[#allocation7 + $0x7c0] sm:$0xff]  ;;  %v2962_v46 = vld [vmem:[#allocation7 + $0x4f8] sm:$0xff] }
 0x575   :  { %3239 = vmatpush.msrb.mxu1 %v2896_v45  ;;  %3278 = vmatpush.msrb.mxu3 %v2929_v39  ;;  %v2946_v45 = vld [vmem:[#allocation7 + $0x3b0] sm:$0xff]  ;;  %v2978_v39 = vld [vmem:[#allocation7 + $0x678] sm:$0xff] }
 0x576   :  { %3220 = vmatpush.msrb.mxu0 %v2879_v11  ;;  %3260 = vmatpush.msrb.mxu2 %v2911_v23  ;;  %v2995_v11 = vld [vmem:[#allocation7 + $0x658] sm:$0xff] }
 0x577   :  { %3240 = vmatpush.msrb.mxu1 %v2895_v37  ;;  %3279 = vmatpush.msrb.mxu3 %v2928_v43  ;;  %v2945_v37 = vld [vmem:[#allocation7 + $0x1f8] sm:$0xff] }
 0x578   :  { %3141 = vmatmul.f32.vlgmr.msra.gmra.mxu0 %v7262_v52  ;;  %3161 = vmatmul.f32.vlgmr.msra.gmra.mxu1 %v7264_v44  ;;  %v7286_v52 = vld.sshfl [vmem:[#allocation1 + $0x10] sm:$0xff pattern:$0x73625140]  ;;  %v7288_v44 = vld.sshfl [vmem:[#allocation1 + $0x8] sm:$0xff pattern:$0x73625140] }
 0x579   :  { %3181 = vmatmul.f32.vlgmr.msra.gmra.mxu2 %v7266_v28  ;;  %3285 = vmatpush.msra.mxu0 %v2958_v30  ;;  %v7290_v28 = vld.sshfl [vmem:[#allocation1 + $0x18] sm:$0xff pattern:$0x73625140] }
 0x57a   :  { %3305 = vmatpush.msra.mxu1 %v2974_v1  ;;  %3325 = vmatpush.msra.mxu2 %v2990_v61  ;;  %3100 = vst [vmem:[#allocation1] ss:$4 sm:$0xff] %v7256_v20  ;;  %v2968_v20 = vld [vmem:[#allocation7 + $0xb0] sm:$0xff]  ;;  %v2961_v23 = vld [vmem:[#allocation7 + $0x318] sm:$0xff] }
 0x57b   :  { %3280 = vmatpush.msrb.mxu3 %v2927_v50  ;;  %3286 = vmatpush.msra.mxu0 %v2957_v26  ;;  %v2977_v43 = vld [vmem:[#allocation7 + $0x718] sm:$0xff]  ;;  %v2944_v1 = vld [vmem:[#allocation7 + $0x10] sm:$0xff]  ;;  %v2976_v50 = vld [vmem:[#allocation7 + $0x4a8] sm:$0xff] }
 0x57c   :  { %3201 = vmatmul.f32.vlgmr.msra.gmra.mxu3 %v7268_v32  ;;  %3306 = vmatpush.msra.mxu1 %v2973_v24  ;;  %v2970_v32 = vld [vmem:[#allocation7 + $0x480] sm:$0xff]  ;;  %v2994_v30 = vld [vmem:[#allocation7 + $0x1b8] sm:$0xff]  ;;  %v2960_v61 = vld [vmem:[#allocation7 + $0x30] sm:$0xff] }
 0x57d   :  { %3326 = vmatpush.msra.mxu2 %v2989_v15  ;;  %3345 = vmatpush.msra.mxu3 %v3006_v8  ;;  %v2993_v26 = vld [vmem:[#allocation7 + $0x768] sm:$0xff]  ;;  %v2943_v24 = vld [vmem:[#allocation7 + $0x780] sm:$0xff]  ;;  %v2975_v8 = vld [vmem:[#allocation7 + $0x198] sm:$0xff] }
 0x57e   :  { %3287 = vmatpush.msra.mxu0 %v2956_v33  ;;  %3307 = vmatpush.msra.mxu1 %v2972_v56  ;;  %v2959_v15 = vld [vmem:[#allocation7 + $0x240] sm:$0xff]  ;;  %v2992_v33 = vld [vmem:[#allocation7 + $0x548] sm:$0xff] }
 0x57f   :  { %3327 = vmatpush.msra.mxu2 %v2988_v5  ;;  %3346 = vmatpush.msra.mxu3 %v3005_v21  ;;  %v3022_v56 = vld [vmem:[#allocation7 + $0x3c8] sm:$0xff]  ;;  %v3038_v5 = vld [vmem:[#allocation7 + $0x170] sm:$0xff]  ;;  %v3054_v21 = vld [vmem:[#allocation7 + $0x1a0] sm:$0xff] }
 0x580   :  { %3288 = vmatpush.msra.mxu0 %v2955_v0  ;;  %3308 = vmatpush.msra.mxu1 %v2971_v27  ;;  %v2991_v0 = vld [vmem:[#allocation7 + $0x568] sm:$0xff]  ;;  %v3021_v27 = vld [vmem:[#allocation7 + $0x6b8] sm:$0xff] }
 0x581   :  { %3328 = vmatpush.msra.mxu2 %v2987_v12  ;;  %3347 = vmatpush.msra.mxu3 %v3004_v47  ;;  %v3037_v12 = vld [vmem:[#allocation7 + $0x578] sm:$0xff]  ;;  %v3053_v47 = vld [vmem:[#allocation7 + $0x80] sm:$0xff] }
 0x582   :  { %3261 = vmatmul.f32.vlgmr.msrb.gmra.mxu2 %v7271_v31  ;;  %3289 = vmatpush.msra.mxu0 %v2954_v7  ;;  %v2999_v31 = vld [vmem:[#allocation7 + $0x7e0] sm:$0xff]  ;;  %v3070_v7 = vld [vmem:[#allocation7 + $0x638] sm:$0xff] }
 0x583   :  { %3309 = vmatpush.msra.mxu1 %v2970_v32  ;;  %3329 = vmatpush.msra.mxu2 %v2986_v63  ;;  %v3020_v32 = vld [vmem:[#allocation7 + $0x478] sm:$0xff]  ;;  %v3036_v63 = vld [vmem:[#allocation7 + $0x250] sm:$0xff] }
 0x584   :  { %3348 = vmatpush.msra.mxu3 %v3003_v29  ;;  %3221 = vmatmul.f32.vlgmr.msrb.gmra.mxu0 %v7273_v13  ;;  %v2949_v13 = vld [vmem:[#allocation7 + $0x538] sm:$0xff]  ;;  %v3052_v29 = vld [vmem:[#allocation7 + $0x640] sm:$0xff] }
 0x585   :  { %3281 = vmatmul.f32.vlgmr.msrb.gmra.mxu3 %v7275_v55  ;;  %3290 = vmatpush.msra.mxu0 %v2953_v22  ;;  %v2965_v55 = vld [vmem:[#allocation7 + $0xa8] sm:$0xff]  ;;  %v3069_v22 = vld [vmem:[#allocation7 + $0x580] sm:$0xff] }
 0x586   :  { %3310 = vmatpush.msra.mxu1 %v2969_v2  ;;  %3330 = vmatpush.msra.mxu2 %v2985_v4  ;;  %v7301_v2 = vld.sshfl [vmem:[#allocation1 + $0x20] sm:$0xff pattern:$0x73625140]  ;;  %v7307_v4 = vld.sshfl [vmem:[#allocation1 + $0x38] sm:$0xff pattern:$0x73625140] }
 0x587   :  { %3349 = vmatpush.msra.mxu3 %v3002_v41  ;;  %3241 = vmatmul.f32.vlgmr.msrb.gmra.mxu1 %v7277_v18  ;;  %v2981_v18 = vld [vmem:[#allocation7 + $0x628] sm:$0xff] }
 0x588   :  { %3291 = vmatpush.msra.mxu0 %v2952_v9  ;;  %3311 = vmatpush.msra.mxu1 %v2968_v20  ;;  %v3019_v41 = vld [vmem:[#allocation7 + $0x448] sm:$0xff]  ;;  %v3035_v9 = vld [vmem:[#allocation7 + $0x200] sm:$0xff]  ;;  %v3018_v20 = vld [vmem:[#allocation7 + $0x498] sm:$0xff] }
 0x589   :  { %3331 = vmatpush.msra.mxu2 %v2984_v14  ;;  %3350 = vmatpush.msra.mxu3 %v3001_v40  ;;  %v3034_v14 = vld [vmem:[#allocation7 + $0x598] sm:$0xff] }
 0x58a   :  { %3292 = vmatpush.msra.mxu0 %v2951_v51  ;;  %3312 = vmatpush.msra.mxu1 %v2967_v17  ;;  %v3050_v40 = vld [vmem:[#allocation7 + $0x258] sm:$0xff]  ;;  %v3067_v51 = vld [vmem:[#allocation7 + $0x400] sm:$0xff]  ;;  %v3017_v17 = vld [vmem:[#allocation7 + $0x2a8] sm:$0xff] }
 0x58b   :  { %3332 = vmatpush.msra.mxu2 %v2983_v6  ;;  %3351 = vmatpush.msra.mxu3 %v3000_v58  ;;  %v3033_v6 = vld [vmem:[#allocation7 + $0x460] sm:$0xff]  ;;  %v3049_v58 = vld [vmem:[#allocation7 + $0x648] sm:$0xff] }
 0x58c   :  { %3293 = vmatpush.msra.mxu0 %v2950_v57  ;;  %3313 = vmatpush.msra.mxu1 %v2966_v42  ;;  %v3016_v57 = vld [vmem:[#allocation7 + $0x350] sm:$0xff]  ;;  %v3032_v42 = vld [vmem:[#allocation7 + $0x4a0] sm:$0xff] }
 0x58d   :  { %3333 = vmatpush.msra.mxu2 %v2982_v38  ;;  %3352 = vmatpush.msra.mxu3 %v2999_v31  ;;  %v3048_v38 = vld [vmem:[#allocation7 + $0xe8] sm:$0xff] }
 0x58e   :  { %3294 = vmatpush.msra.mxu0 %v2949_v13  ;;  %3314 = vmatpush.msra.mxu1 %v2965_v55  ;;  %v3065_v31 = vld [vmem:[#allocation7 + $0x408] sm:$0xff]  ;;  %v3015_v55 = vld [vmem:[#allocation7 + $0x620] sm:$0xff] }
 0x58f   :  { %3334 = vmatpush.msra.mxu2 %v2981_v18  ;;  %3353 = vmatpush.msra.mxu3 %v2998_v16  ;;  %v7310_v13 = vld.sshfl [vmem:[#allocation1] sm:$0xff pattern:$0x73625140]  ;;  %v3031_v18 = vld [vmem:[#allocation7 + $0x570] sm:$0xff] }
 0x590   :  { %3295 = vmatpush.msra.mxu0 %v2948_v48  ;;  %3315 = vmatpush.msra.mxu1 %v2964_v53  ;;  %3470 = vst [vmem:[#allocation1] ss:$4 sm:$0xff] %v7122_v25  ;;  %v3047_v16 = vld [vmem:[#allocation7 + $0x110] sm:$0xff]  ;;  %v3064_v48 = vld [vmem:[#allocation7 + $0x698] sm:$0xff]  ;;  %v3014_v53 = vld [vmem:[#allocation7 + $0x720] sm:$0xff] }
 0x591   :  { %3335 = vmatpush.msra.mxu2 %v2980_v19  ;;  %3354 = vmatpush.msra.mxu3 %v2997_v62  ;;  %v3030_v19 = vld [vmem:[#allocation7 + $0x5a0] sm:$0xff]  ;;  %v3046_v62 = vld [vmem:[#allocation7 + $0x310] sm:$0xff]  ;;  %v3062_v25 = vld [vmem:[#allocation7 + $0x138] sm:$0xff] }
 0x592   :  { %3296 = vmatpush.msra.mxu0 %v2947_v49  ;;  %3316 = vmatpush.msra.mxu1 %v2963_v3  ;;  %v3063_v49 = vld [vmem:[#allocation7 + $0x248] sm:$0xff]  ;;  %v3013_v3 = vld [vmem:[#allocation7 + $0x2a0] sm:$0xff] }
 0x593   :  { %3336 = vmatpush.msra.mxu2 %v2979_v10  ;;  %3355 = vmatpush.msra.mxu3 %v2996_v59  ;;  %v3029_v10 = vld [vmem:[#allocation7 + $0x2f0] sm:$0xff] }
 0x594   :  { %3297 = vmatpush.msra.mxu0 %v2946_v45  ;;  %3317 = vmatpush.msra.mxu1 %v2962_v46  ;;  %v3045_v59 = vld [vmem:[#allocation7 + $0x750] sm:$0xff]  ;;  %v3012_v45 = vld [vmem:[#allocation7 + $0x398] sm:$0xff] }
 0x595   :  { %3337 = vmatpush.msra.mxu2 %v2978_v39  ;;  %3356 = vmatpush.msra.mxu3 %v2995_v11  ;;  %v3028_v46 = vld [vmem:[#allocation7 + $0x290] sm:$0xff]  ;;  %v3044_v39 = vld [vmem:[#allocation7 + $0x98] sm:$0xff]  ;;  %v3061_v11 = vld [vmem:[#allocation7 + $0x3a8] sm:$0xff] }
 0x596   :  { %3298 = vmatpush.msra.mxu0 %v2945_v37  ;;  %3318 = vmatpush.msra.mxu1 %v2961_v23  ;;  %v3011_v37 = vld [vmem:[#allocation7 + $0x5f0] sm:$0xff]  ;;  %v3027_v23 = vld [vmem:[#allocation7 + $0x58] sm:$0xff] }
 0x597   :  { %3338 = vmatpush.msra.mxu2 %v2977_v43  ;;  %3357 = vmatpush.msra.mxu3 %v2994_v30  ;;  %v3043_v43 = vld [vmem:[#allocation7 + $0x330] sm:$0xff]  ;;  %v3060_v30 = vld [vmem:[#allocation7 + $0x800] sm:$0xff] }
 0x598   :  { %3299 = vmatpush.msra.mxu0 %v2944_v1  ;;  %3319 = vmatpush.msra.mxu1 %v2960_v61  ;;  %v3010_v1 = vld [vmem:[#allocation7 + $0x560] sm:$0xff] }
 0x599   :  { %3339 = vmatpush.msra.mxu2 %v2976_v50  ;;  %3358 = vmatpush.msra.mxu3 %v2993_v26  ;;  %v3026_v61 = vld [vmem:[#allocation7 + $0x1c0] sm:$0xff] }
 0x59a   :  { %3300 = vmatpush.msra.mxu0 %v2943_v24  ;;  %3320 = vmatpush.msra.mxu1 %v2959_v15  ;;  %v3042_v50 = vld [vmem:[#allocation7 + $0x160] sm:$0xff]  ;;  %v3009_v24 = vld [vmem:[#allocation7 + $0x728] sm:$0xff]  ;;  %v3025_v15 = vld [vmem:[#allocation7 + $0x7d0] sm:$0xff] }
 0x59b   :  { %3340 = vmatpush.msra.mxu2 %v2975_v8  ;;  %3359 = vmatpush.msra.mxu3 %v2992_v33  ;;  %v3059_v26 = vld [vmem:[#allocation7 + $0x740] sm:$0xff]  ;;  %v3041_v8 = vld [vmem:[#allocation7 + $0x268] sm:$0xff]  ;;  %v3058_v33 = vld [vmem:[#allocation7 + $0x3b8] sm:$0xff] }
 0x59c   :  { %3301 = vmatmul.f32.vlgmr.msra.gmra.mxu0 %v7284_v35  ;;  %3341 = vmatmul.f32.vlgmr.msra.gmra.mxu2 %v7286_v52  ;;  %v7303_v35 = vld.sshfl [vmem:[#allocation1 + $0x30] sm:$0xff pattern:$0x73625140]  ;;  %v7305_v52 = vld.sshfl [vmem:[#allocation1 + $0x28] sm:$0xff pattern:$0x73625140] }
 0x59d   :  { %3365 = vmatpush.msrb.mxu0 %v3022_v56  ;;  %3385 = vmatpush.msrb.mxu1 %v3038_v5  ;;  %3472 = vst [vmem:[#allocation1 + $0x20] ss:$4 sm:$0xff] %v7188_v34  ;;  %v3066_v34 = vld [vmem:[#allocation7 + $0x590] sm:$0xff]  ;;  %v3008_v56 = vld [vmem:[#allocation7 + $0x380] sm:$0xff] }
 0x59e   :  { %3405 = vmatpush.msrb.mxu2 %v3054_v21  ;;  %3360 = vmatpush.msra.mxu3 %v2991_v0  ;;  %v3024_v5 = vld [vmem:[#allocation7 + $0xc0] sm:$0xff]  ;;  %v3057_v0 = vld [vmem:[#allocation7 + $0x468] sm:$0xff] }
 0x59f   :  { %3321 = vmatmul.f32.vlgmr.msra.gmra.mxu1 %v7288_v44  ;;  %3361 = vmatmul.f32.vlgmr.msra.gmra.mxu3 %v7290_v28  ;;  %v3051_v44 = vld [vmem:[#allocation7 + $0x3a0] sm:$0xff]  ;;  %v3068_v28 = vld [vmem:[#allocation7 + $0x770] sm:$0xff] }
 0x5a0   :  { %3366 = vmatpush.msrb.mxu0 %v3021_v27  ;;  %3386 = vmatpush.msrb.mxu1 %v3037_v12  ;;  %v3040_v21 = vld [vmem:[#allocation7 + $0x500] sm:$0xff]  ;;  %v3023_v12 = vld [vmem:[#allocation7 + $0x50] sm:$0xff] }
 0x5a1   :  { %3406 = vmatpush.msrb.mxu2 %v3053_v47  ;;  %3425 = vmatpush.msrb.mxu3 %v3070_v7  ;;  %v3007_v27 = vld [vmem:[#allocation7 + $0x600] sm:$0xff]  ;;  %v3056_v7 = vld [vmem:[#allocation7 + $0x458] sm:$0xff] }
 0x5a2   :  { %3367 = vmatpush.msrb.mxu0 %v3020_v32  ;;  %3387 = vmatpush.msrb.mxu1 %v3036_v63  ;;  %v3039_v47 = vld [vmem:[#allocation7 + $0x60] sm:$0xff]  ;;  %v2587_v63 = vld [vmem:[#allocation6 + $0x3b0] sm:$0xff] }
 0x5a3   :  { %3407 = vmatpush.msrb.mxu2 %v3052_v29  ;;  %3426 = vmatpush.msrb.mxu3 %v3069_v22  ;;  %v2571_v32 = vld [vmem:[#allocation6 + $0x778] sm:$0xff]  ;;  %v3055_v29 = vld [vmem:[#allocation7 + $0x6e8] sm:$0xff]  ;;  %v2570_v22 = vld [vmem:[#allocation6 + $0x6d0] sm:$0xff] }
 0x5a4   :  { %3368 = vmatpush.msrb.mxu0 %v3019_v41  ;;  %3388 = vmatpush.msrb.mxu1 %v3035_v9  ;;  %v2586_v41 = vld [vmem:[#allocation6 + $0xf0] sm:$0xff]  ;;  %v2603_v9 = vld [vmem:[#allocation6 + $0x768] sm:$0xff] }
 0x5a5   :  { %3408 = vmatpush.msrb.mxu2 %v3051_v44  ;;  %3427 = vmatpush.msrb.mxu3 %v3068_v28  ;;  %v2569_v44 = vld [vmem:[#allocation6 + $0x710] sm:$0xff]  ;;  %v3073_v28 = vld [vmem:[#allocation7 + $0x540] sm:$0x1] }
 0x5a6   :  { %3369 = vmatpush.msrb.mxu0 %v3018_v20  ;;  %3389 = vmatpush.msrb.mxu1 %v3034_v14  ;;  %v2585_v20 = vld [vmem:[#allocation6 + $0x270] sm:$0xff] }
 0x5a7   :  { %3409 = vmatpush.msrb.mxu2 %v3050_v40  ;;  %3428 = vmatpush.msrb.mxu3 %v3067_v51  ;;  %v2602_v14 = vld [vmem:[#allocation6 + $0x5f0] sm:$0xff]  ;;  %v2601_v51 = vld [vmem:[#allocation6 + $0x5e0] sm:$0xff] }
 0x5a8   :  { %3370 = vmatpush.msrb.mxu0 %v3017_v17  ;;  %3390 = vmatpush.msrb.mxu1 %v3033_v6  ;;  %v2584_v40 = vld [vmem:[#allocation6 + $0x1b0] sm:$0xff]  ;;  %v3071_v17 = vld [vmem:[#allocation7 + $0xf0] sm:$0xff] }
 0x5a9   :  { %3410 = vmatpush.msrb.mxu2 %v3049_v58  ;;  %3429 = vmatpush.msrb.mxu3 %v3066_v34  ;;  %v2583_v6 = vld [vmem:[#allocation6 + $0xb0] sm:$0xff]  ;;  %v2582_v34 = vld [vmem:[#allocation6 + $0x128] sm:$0xff] }
 0x5aa   :  { %3371 = vmatpush.msrb.mxu0 %v3016_v57  ;;  %3391 = vmatpush.msrb.mxu1 %v3032_v42  ;;  %v2566_v58 = vld [vmem:[#allocation6 + $0x310] sm:$0xff]  ;;  %v2599_v57 = vld [vmem:[#allocation6 + $0x6c0] sm:$0xff] }
 0x5ab   :  { %3411 = vmatpush.msrb.mxu2 %v3048_v38  ;;  %3430 = vmatpush.msrb.mxu3 %v3065_v31  ;;  %v2619_v42 = vld [vmem:[#allocation6 + $0x530] sm:$0xff]  ;;  %v2565_v38 = vld [vmem:[#allocation6 + $0x488] sm:$0xff]  ;;  %v2581_v31 = vld [vmem:[#allocation6 + $0x358] sm:$0xff] }
 0x5ac   :  { %3372 = vmatpush.msrb.mxu0 %v3015_v55  ;;  %3392 = vmatpush.msrb.mxu1 %v3031_v18  ;;  %v2598_v55 = vld [vmem:[#allocation6 + $0x2e0] sm:$0xff]  ;;  %v2618_v18 = vld [vmem:[#allocation6 + $0x388] sm:$0xff] }
 0x5ad   :  { %3412 = vmatpush.msrb.mxu2 %v3047_v16  ;;  %3431 = vmatpush.msrb.mxu3 %v3064_v48  ;;  %v2564_v16 = vld [vmem:[#allocation6 + $0x508] sm:$0xff]  ;;  %v7320_v48 = vld.sshfl [vmem:[#allocation1] sm:$0xff pattern:$0x73625140] }
 0x5ae   :  { %3373 = vmatpush.msrb.mxu0 %v3014_v53  ;;  %3393 = vmatpush.msrb.mxu1 %v3030_v19  ;;  %v7322_v53 = vld.sshfl [vmem:[#allocation1 + $0x8] sm:$0xff pattern:$0x73625140]  ;;  %v7324_v19 = vld.sshfl [vmem:[#allocation1 + $0x10] sm:$0xff pattern:$0x73625140] }
 0x5af   :  { %3413 = vmatpush.msrb.mxu2 %v3046_v62  ;;  %3432 = vmatpush.msrb.mxu3 %v3063_v49  ;;  %v7326_v62 = vld.sshfl [vmem:[#allocation1 + $0x18] sm:$0xff pattern:$0x73625140]  ;;  %v2580_v49 = vld [vmem:[#allocation6 + $0x680] sm:$0xff] }
 0x5b0   :  { %3374 = vmatpush.msrb.mxu0 %v3013_v3  ;;  %3394 = vmatpush.msrb.mxu1 %v3029_v10  ;;  %v2597_v3 = vld [vmem:[#allocation6 + $0x3f0] sm:$0xff]  ;;  %3481 = vst [vmem:[#allocation1] ss:$4 sm:$0xff] %v7204_v60  ;;  %v2563_v10 = vld [vmem:[#allocation6 + $0x100] sm:$0xff]  ;;  %v2561_v60 = vld [vmem:[#allocation6 + $0x438] sm:$0xff] }
 0x5b1   :  { %3414 = vmatpush.msrb.mxu2 %v3045_v59  ;;  %3433 = vmatpush.msrb.mxu3 %v3062_v25  ;;  %v2579_v59 = vld [vmem:[#allocation6 + $0x6e8] sm:$0xff]  ;;  %v2596_v25 = vld [vmem:[#allocation6 + $0x6a0] sm:$0xff] }
 0x5b2   :  { %3375 = vmatpush.msrb.mxu0 %v3012_v45  ;;  %3395 = vmatpush.msrb.mxu1 %v3028_v46  ;;  %v2616_v45 = vld [vmem:[#allocation6 + $0x28] sm:$0xff]  ;;  %v2562_v46 = vld [vmem:[#allocation6 + $0x370] sm:$0xff] }
 0x5b3   :  { %3415 = vmatpush.msrb.mxu2 %v3044_v39  ;;  %3434 = vmatpush.msrb.mxu3 %v3061_v11  ;;  %v2578_v39 = vld [vmem:[#allocation6 + $0x3d8] sm:$0xff] }
 0x5b4   :  { %3376 = vmatpush.msrb.mxu0 %v3011_v37  ;;  %3396 = vmatpush.msrb.mxu1 %v3027_v23  ;;  %v2595_v11 = vld [vmem:[#allocation6 + $0x3f8] sm:$0xff]  ;;  %v2615_v37 = vld [vmem:[#allocation6 + $0x440] sm:$0xff] }
 0x5b5   :  { %3416 = vmatpush.msrb.mxu2 %v3043_v43  ;;  %3435 = vmatpush.msrb.mxu3 %v3060_v30  ;;  %v2577_v23 = vld [vmem:[#allocation6 + $0x558] sm:$0xff]  ;;  %v2594_v43 = vld [vmem:[#allocation6 + $0x7b0] sm:$0xff]  ;;  %v2614_v30 = vld [vmem:[#allocation6 + $0x308] sm:$0xff] }
 0x5b6   :  { %3377 = vmatpush.msrb.mxu0 %v3010_v1  ;;  %3397 = vmatpush.msrb.mxu1 %v3026_v61  ;;  %v2560_v1 = vld [vmem:[#allocation6 + $0x320] sm:$0xff]  ;;  %v2576_v61 = vld [vmem:[#allocation6 + $0x5a8] sm:$0xff] }
 0x5b7   :  { %3417 = vmatpush.msrb.mxu2 %v3042_v50  ;;  %3436 = vmatpush.msrb.mxu3 %v3059_v26  ;;  %v2593_v50 = vld [vmem:[#allocation6 + $0x500] sm:$0xff] }
 0x5b8   :  { %3378 = vmatpush.msrb.mxu0 %v3009_v24  ;;  %3398 = vmatpush.msrb.mxu1 %v3025_v15  ;;  %v2613_v26 = vld [vmem:[#allocation6 + $0x4e0] sm:$0xff]  ;;  %v2559_v24 = vld [vmem:[#allocation6 + $0x758] sm:$0xff] }
 0x5b9   :  { %3418 = vmatpush.msrb.mxu2 %v3041_v8  ;;  %3437 = vmatpush.msrb.mxu3 %v3058_v33  ;;  %v2575_v15 = vld [vmem:[#allocation6 + $0x598] sm:$0xff]  ;;  %v2592_v8 = vld [vmem:[#allocation6 + $0x7f0] sm:$0xff] }
 0x5ba   :  { %3379 = vmatpush.msrb.mxu0 %v3008_v56  ;;  %3399 = vmatpush.msrb.mxu1 %v3024_v5  ;;  %v2612_v33 = vld [vmem:[#allocation6 + $0x398] sm:$0xff]  ;;  %v2574_v5 = vld [vmem:[#allocation6 + $0x2d0] sm:$0xff] }
 0x5bb   :  { %3419 = vmatpush.msrb.mxu2 %v3040_v21  ;;  %3438 = vmatpush.msrb.mxu3 %v3057_v0  ;;  %v2558_v56 = vld [vmem:[#allocation6 + $0x7f8] sm:$0xff]  ;;  %v2591_v21 = vld [vmem:[#allocation6 + $0x4b0] sm:$0xff]  ;;  %v2611_v0 = vld [vmem:[#allocation6 + $0x140] sm:$0xff] }
 0x5bc   :  { %3380 = vmatpush.msrb.mxu0 %v3007_v27  ;;  %3400 = vmatpush.msrb.mxu1 %v3023_v12  ;;  %v2557_v27 = vld [vmem:[#allocation6 + $0x808] sm:$0xff]  ;;  %v2573_v12 = vld [vmem:[#allocation6 + $0x730] sm:$0xff] }
 0x5bd   :  { %3420 = vmatpush.msrb.mxu2 %v3039_v47  ;;  %3439 = vmatpush.msrb.mxu3 %v3056_v7  ;;  %v2590_v47 = vld [vmem:[#allocation6 + $0x608] sm:$0xff]  ;;  %v2610_v7 = vld [vmem:[#allocation6 + $0x618] sm:$0xff] }
 0x5be   :  { %3381 = vmatmul.f32.vlgmr.msrb.gmra.mxu0 %v7301_v2  ;;  %3421 = vmatmul.f32.vlgmr.msrb.gmra.mxu2 %v7303_v35  ;;  %v2568_v2 = vld [vmem:[#allocation6 + $0x4f8] sm:$0xff]  ;;  %v3072_v35 = vld [vmem:[#allocation7 + $0x558] sm:$0xff] }
 0x5bf   :  { %3514 = vmatpush.msra.mxu1 %v2571_v32  ;;  %3534 = vmatpush.msra.mxu2 %v2587_v63  ;;  %v2556_v32 = vld [vmem:[#allocation6 + $0x4c8] sm:$0xff] }
 0x5c0   :  { %3440 = vmatpush.msrb.mxu3 %v3055_v29  ;;  %3401 = vmatmul.f32.vlgmr.msrb.gmra.mxu1 %v7305_v52  ;;  %v2567_v52 = vld [vmem:[#allocation6 + $0x540] sm:$0xff]  ;;  %v2572_v63 = vld [vmem:[#allocation6 + $0x328] sm:$0xff]  ;;  %v2589_v29 = vld [vmem:[#allocation6 + $0x3d0] sm:$0xff] }
 0x5c1   :  { %3441 = vmatmul.f32.vlgmr.msrb.gmra.mxu3 %v7307_v4  ;;  %3515 = vmatpush.msra.mxu1 %v2570_v22  ;;  %v2600_v4 = vld [vmem:[#allocation6 + $0x5b8] sm:$0xff]  ;;  %v2609_v22 = vld [vmem:[#allocation6 + $0x130] sm:$0xff] }
 0x5c2   :  { %3535 = vmatpush.msra.mxu2 %v2586_v41  ;;  %3554 = vmatpush.msra.mxu3 %v2603_v9  ;;  %v2635_v41 = vld [vmem:[#allocation6 + $0x390] sm:$0xff]  ;;  %v2651_v9 = vld [vmem:[#allocation6 + $0x7c0] sm:$0xff] }
 0x5c3   :  { %3516 = vmatpush.msra.mxu1 %v2569_v44  ;;  %4111 = vmatpush.msk.msra.mxu0 %vm3121_vm0, %v3073_v28  ;;  %v2588_v44 = vld [vmem:[#allocation6 + $0x548] sm:$0xff]  ;;  %v2608_v28 = vld [vmem:[#allocation6 + $0x418] sm:$0xff] }
 0x5c4   :  { %3536 = vmatpush.msra.mxu2 %v2585_v20  ;;  %3555 = vmatpush.msra.mxu3 %v2602_v14  ;;  %v2634_v20 = vld [vmem:[#allocation6 + $0x70] sm:$0xff]  ;;  %v2650_v14 = vld [vmem:[#allocation6 + $0x3a0] sm:$0xff] }
 0x5c5   :  { %3517 = vmatpush.msra.mxu1 %v2568_v2  ;;  %3459 = vmatpush.msra.mxu0 %v3072_v35  ;;  %v2667_v2 = vld [vmem:[#allocation6 + $0x810] sm:$0xff]  ;;  %v2607_v35 = vld [vmem:[#allocation6 + $0x340] sm:$0xff] }
 0x5c6   :  { %3537 = vmatpush.msra.mxu2 %v2584_v40  ;;  %3556 = vmatpush.msra.mxu3 %v2601_v51  ;;  %v2633_v40 = vld [vmem:[#allocation6 + $0x7d0] sm:$0xff]  ;;  %v2649_v51 = vld [vmem:[#allocation6 + $0x2c0] sm:$0xff] }
 0x5c7   :  { %3518 = vmatpush.msra.mxu1 %v2567_v52  ;;  %3460 = vmatpush.msra.mxu0 %v3071_v17  ;;  %v2666_v52 = vld [vmem:[#allocation6 + $0x5c0] sm:$0xff]  ;;  %v2606_v17 = vld [vmem:[#allocation6 + $0x248] sm:$0xff] }
 0x5c8   :  { %3538 = vmatpush.msra.mxu2 %v2583_v6  ;;  %3557 = vmatpush.msra.mxu3 %v2600_v4  ;;  %v2632_v6 = vld [vmem:[#allocation6 + $0x590] sm:$0xff]  ;;  %v2648_v4 = vld [vmem:[#allocation6 + $0x478] sm:$0xff] }
 0x5c9   :  { %4112 = vmatmul.msk.f32.vlgmr.msra.gmra.mxu0 %vm3118_vm9, %v7310_v13  ;;  %3519 = vmatpush.msra.mxu1 %v2566_v58  ;;  %v2617_v13 = vld [vmem:[#allocation6 + $0x510] sm:$0xff]  ;;  %v2665_v58 = vld [vmem:[#allocation6 + $0xf8] sm:$0xff] }
 0x5ca   :  { %3539 = vmatpush.msra.mxu2 %v2582_v34  ;;  %3558 = vmatpush.msra.mxu3 %v2599_v57  ;;  %v2605_v34 = vld [vmem:[#allocation6 + $0x638] sm:$0xff]  ;;  %v2631_v57 = vld [vmem:[#allocation6 + $0x88] sm:$0xff] }
 0x5cb   :  { %3574 = vmatpush.msrb.mxu0 %v2619_v42  ;;  %3520 = vmatpush.msra.mxu1 %v2565_v38  ;;  %v2647_v42 = vld [vmem:[#allocation6 + $0x6d8] sm:$0xff]  ;;  %v2664_v38 = vld [vmem:[#allocation6 + $0x110] sm:$0xff] }
 0x5cc   :  { %3540 = vmatpush.msra.mxu2 %v2581_v31  ;;  %3559 = vmatpush.msra.mxu3 %v2598_v55  ;;  %v2604_v31 = vld [vmem:[#allocation6 + $0x518] sm:$0xff]  ;;  %v2630_v55 = vld [vmem:[#allocation6 + $0x170] sm:$0xff] }
 0x5cd   :  { %3575 = vmatpush.msrb.mxu0 %v2618_v18  ;;  %3521 = vmatpush.msra.mxu1 %v2564_v16  ;;  %v2646_v18 = vld [vmem:[#allocation6 + $0x1f0] sm:$0xff]  ;;  %v2663_v16 = vld [vmem:[#allocation6 + $0xa8] sm:$0xff] }
 0x5ce   :  { %3541 = vmatpush.msra.mxu2 %v2580_v49  ;;  %3560 = vmatpush.msra.mxu3 %v2597_v3  ;;  %v2662_v49 = vld [vmem:[#allocation6 + $0x800] sm:$0xff]  ;;  %v2682_v3 = vld [vmem:[#allocation6 + $0x2b0] sm:$0xff] }
 0x5cf   :  { %3576 = vmatpush.msrb.mxu0 %v2617_v13  ;;  %3522 = vmatpush.msra.mxu1 %v2563_v10  ;;  %v2628_v13 = vld [vmem:[#allocation6 + $0x2f0] sm:$0xff]  ;;  %v7333_v10 = vld.sshfl [vmem:[#allocation1 + $0x20] sm:$0xff pattern:$0x73625140] }
 0x5d0   :  { %3542 = vmatpush.msra.mxu2 %v2579_v59  ;;  %3561 = vmatpush.msra.mxu3 %v2596_v25  ;;  %v7335_v59 = vld.sshfl [vmem:[#allocation1 + $0x28] sm:$0xff pattern:$0x73625140]  ;;  %v7337_v25 = vld.sshfl [vmem:[#allocation1 + $0x30] sm:$0xff pattern:$0x73625140] }
 0x5d1   :  { %3577 = vmatpush.msrb.mxu0 %v2616_v45  ;;  %3523 = vmatpush.msra.mxu1 %v2562_v46  ;;  %v7339_v45 = vld.sshfl [vmem:[#allocation1 + $0x38] sm:$0xff pattern:$0x73625140]  ;;  %v2644_v46 = vld [vmem:[#allocation6 + $0x628] sm:$0xff] }
 0x5d2   :  { %3543 = vmatpush.msra.mxu2 %v2578_v39  ;;  %3562 = vmatpush.msra.mxu3 %v2595_v11  ;;  %v2661_v39 = vld [vmem:[#allocation6 + $0x18] sm:$0xff]  ;;  %3482 = vst [vmem:[#allocation1 + $0x20] ss:$4 sm:$0xff] %v7217_v36  ;;  %v2625_v36 = vld [vmem:[#allocation6 + $0x688] sm:$0xff] }
 0x5d3   :  { %3578 = vmatpush.msrb.mxu0 %v2615_v37  ;;  %3524 = vmatpush.msra.mxu1 %v2561_v60  ;;  %v2627_v11 = vld [vmem:[#allocation6 + $0xb8] sm:$0xff]  ;;  %v2643_v37 = vld [vmem:[#allocation6 + $0x50] sm:$0xff] }
 0x5d4   :  { %3544 = vmatpush.msra.mxu2 %v2577_v23  ;;  %3563 = vmatpush.msra.mxu3 %v2594_v43  ;;  %v2660_v60 = vld [vmem:[#allocation6 + $0x498] sm:$0xff] }
 0x5d5   :  { %3579 = vmatpush.msrb.mxu0 %v2614_v30  ;;  %3525 = vmatpush.msra.mxu1 %v2560_v1  ;;  %v2680_v23 = vld [vmem:[#allocation6 + $0x178] sm:$0xff]  ;;  %v2642_v30 = vld [vmem:[#allocation6 + $0xc0] sm:$0xff]  ;;  %v2659_v1 = vld [vmem:[#allocation6 + $0x648] sm:$0xff] }
 0x5d6   :  { %3545 = vmatpush.msra.mxu2 %v2576_v61  ;;  %3564 = vmatpush.msra.mxu3 %v2593_v50  ;;  %v2626_v43 = vld [vmem:[#allocation6 + $0x378] sm:$0xff]  ;;  %v2679_v61 = vld [vmem:[#allocation6 + $0x4d0] sm:$0xff]  ;;  %v2641_v50 = vld [vmem:[#allocation6 + $0x220] sm:$0xff] }
 0x5d7   :  { %3580 = vmatpush.msrb.mxu0 %v2613_v26  ;;  %3526 = vmatpush.msra.mxu1 %v2559_v24  ;;  %v2658_v26 = vld [vmem:[#allocation6 + $0x588] sm:$0xff]  ;;  %v2678_v24 = vld [vmem:[#allocation6 + $0x98] sm:$0xff] }
 0x5d8   :  { %3546 = vmatpush.msra.mxu2 %v2575_v15  ;;  %3565 = vmatpush.msra.mxu3 %v2592_v8  ;;  %v2624_v15 = vld [vmem:[#allocation6 + $0x610] sm:$0xff]  ;;  %v2640_v8 = vld [vmem:[#allocation6 + $0x5d8] sm:$0xff] }
 0x5d9   :  { %3581 = vmatpush.msrb.mxu0 %v2612_v33  ;;  %3527 = vmatpush.msra.mxu1 %v2558_v56  ;;  %v2657_v33 = vld [vmem:[#allocation6 + $0x58] sm:$0xff]  ;;  %v2677_v56 = vld [vmem:[#allocation6 + $0x30] sm:$0xff] }
 0x5da   :  { %3547 = vmatpush.msra.mxu2 %v2574_v5  ;;  %3566 = vmatpush.msra.mxu3 %v2591_v21  ;;  %v2623_v5 = vld [vmem:[#allocation6 + $0x560] sm:$0xff]  ;;  %v2639_v21 = vld [vmem:[#allocation6 + $0x3b8] sm:$0xff] }
 0x5db   :  { %3582 = vmatpush.msrb.mxu0 %v2611_v0  ;;  %3528 = vmatpush.msra.mxu1 %v2557_v27  ;;  %v2656_v0 = vld [vmem:[#allocation6 + $0x338] sm:$0xff]  ;;  %v2676_v27 = vld [vmem:[#allocation6 + $0x410] sm:$0xff] }
 0x5dc   :  { %3548 = vmatpush.msra.mxu2 %v2573_v12  ;;  %3567 = vmatpush.msra.mxu3 %v2590_v47  ;;  %v2622_v12 = vld [vmem:[#allocation6 + $0x678] sm:$0xff] }
 0x5dd   :  { %3583 = vmatpush.msrb.mxu0 %v2610_v7  ;;  %3529 = vmatpush.msra.mxu1 %v2556_v32  ;;  %v2638_v47 = vld [vmem:[#allocation6 + $0x698] sm:$0xff]  ;;  %v2675_v32 = vld [vmem:[#allocation6 + $0x6c8] sm:$0xff] }
 0x5de   :  { %3549 = vmatpush.msra.mxu2 %v2572_v63  ;;  %3568 = vmatpush.msra.mxu3 %v2589_v29  ;;  %v2655_v7 = vld [vmem:[#allocation6 + $0x318] sm:$0xff]  ;;  %v2621_v63 = vld [vmem:[#allocation6 + $0x788] sm:$0xff]  ;;  %v2637_v29 = vld [vmem:[#allocation6 + $0x10] sm:$0xff] }
 0x5df   :  { %3584 = vmatpush.msrb.mxu0 %v2609_v22  ;;  %3530 = vmatmul.f32.vlgmr.msra.gmra.mxu1 %v7320_v48  ;;  %v2683_v48 = vld [vmem:[#allocation6 + $0x700] sm:$0xff]  ;;  %v2654_v22 = vld [vmem:[#allocation6 + $0x118] sm:$0xff] }
 0x5e0   :  { %3550 = vmatmul.f32.vlgmr.msra.gmra.mxu2 %v7322_v53  ;;  %3594 = vmatpush.msrb.mxu1 %v2635_v41  ;;  %v2629_v53 = vld [vmem:[#allocation6 + $0x750] sm:$0xff]  ;;  %v2674_v41 = vld [vmem:[#allocation6 + $0x5c8] sm:$0xff] }
 0x5e1   :  { %3614 = vmatpush.msrb.mxu2 %v2651_v9  ;;  %3569 = vmatpush.msra.mxu3 %v2588_v44  ;;  %v2620_v9 = vld [vmem:[#allocation6 + $0x1b8] sm:$0xff]  ;;  %v2636_v44 = vld [vmem:[#allocation6 + $0x1a0] sm:$0xff] }
 0x5e2   :  { %3585 = vmatpush.msrb.mxu0 %v2608_v28  ;;  %3570 = vmatmul.f32.vlgmr.msra.gmra.mxu3 %v7324_v19  ;;  %v2645_v19 = vld [vmem:[#allocation6 + $0x278] sm:$0xff]  ;;  %v2653_v28 = vld [vmem:[#allocation6 + $0x120] sm:$0xff] }
 0x5e3   :  { %3595 = vmatpush.msrb.mxu1 %v2634_v20  ;;  %3615 = vmatpush.msrb.mxu2 %v2650_v14  ;;  %v2673_v20 = vld [vmem:[#allocation6 + $0xe8] sm:$0xff] }
 0x5e4   :  { %3634 = vmatpush.msrb.mxu3 %v2667_v2  ;;  %3586 = vmatpush.msrb.mxu0 %v2607_v35  ;;  %v2699_v14 = vld [vmem:[#allocation6 + $0x668] sm:$0xff]  ;;  %v2652_v35 = vld [vmem:[#allocation6 + $0x280] sm:$0xff] }
 0x5e5   :  { %3596 = vmatpush.msrb.mxu1 %v2633_v40  ;;  %3616 = vmatpush.msrb.mxu2 %v2649_v51  ;;  %v2715_v2 = vld [vmem:[#allocation6 + $0x408] sm:$0xff]  ;;  %v2672_v40 = vld [vmem:[#allocation6 + $0x2f8] sm:$0xff]  ;;  %v2698_v51 = vld [vmem:[#allocation6 + $0x740] sm:$0xff] }
 0x5e6   :  { %3635 = vmatpush.msrb.mxu3 %v2666_v52  ;;  %3587 = vmatpush.msrb.mxu0 %v2606_v17  ;;  %v2714_v52 = vld [vmem:[#allocation6 + $0x38] sm:$0xff]  ;;  %v2731_v17 = vld [vmem:[#allocation6 + $0x3e0] sm:$0xff] }
 0x5e7   :  { %3597 = vmatpush.msrb.mxu1 %v2632_v6  ;;  %3617 = vmatpush.msrb.mxu2 %v2648_v4  ;;  %v2671_v6 = vld [vmem:[#allocation6 + $0x458] sm:$0xff]  ;;  %v2697_v4 = vld [vmem:[#allocation6 + $0x290] sm:$0xff] }
 0x5e8   :  { %3636 = vmatpush.msrb.mxu3 %v2665_v58  ;;  %3588 = vmatpush.msrb.mxu0 %v2605_v34  ;;  %v2713_v58 = vld [vmem:[#allocation6 + $0x430] sm:$0xff]  ;;  %v2730_v34 = vld [vmem:[#allocation6 + $0x528] sm:$0xff] }
 0x5e9   :  { %3598 = vmatpush.msrb.mxu1 %v2631_v57  ;;  %3618 = vmatpush.msrb.mxu2 %v2647_v42  ;;  %v2670_v57 = vld [vmem:[#allocation6 + $0x380] sm:$0xff] }
 0x5ea   :  { %3637 = vmatpush.msrb.mxu3 %v2664_v38  ;;  %3589 = vmatpush.msrb.mxu0 %v2604_v31  ;;  %v2696_v42 = vld [vmem:[#allocation6 + $0x6e0] sm:$0xff]  ;;  %v2712_v38 = vld [vmem:[#allocation6 + $0x790] sm:$0xff]  ;;  %v2729_v31 = vld [vmem:[#allocation6 + $0x1d8] sm:$0xff] }
 0x5eb   :  { %3590 = vmatmul.f32.vlgmr.msrb.gmra.mxu0 %v7326_v62  ;;  %3599 = vmatpush.msrb.mxu1 %v2630_v55  ;;  %v2681_v62 = vld [vmem:[#allocation6 + $0x600] sm:$0xff]  ;;  %v2669_v55 = vld [vmem:[#allocation6 + $0x188] sm:$0xff] }
 0x5ec   :  { %3619 = vmatpush.msrb.mxu2 %v2646_v18  ;;  %3638 = vmatpush.msrb.mxu3 %v2663_v16  ;;  %v2695_v18 = vld [vmem:[#allocation6 + $0x450] sm:$0xff] }
 0x5ed   :  { %3654 = vmatpush.msra.mxu0 %v2683_v48  ;;  %3600 = vmatpush.msrb.mxu1 %v2629_v53  ;;  %v2711_v16 = vld [vmem:[#allocation6 + $0x4f0] sm:$0xff]  ;;  %v2728_v48 = vld [vmem:[#allocation6 + $0x2e8] sm:$0xff]  ;;  %v2668_v53 = vld [vmem:[#allocation6 + $0x640] sm:$0xff] }
 0x5ee   :  { %3620 = vmatpush.msrb.mxu2 %v2645_v19  ;;  %3639 = vmatpush.msrb.mxu3 %v2662_v49  ;;  %v2694_v19 = vld [vmem:[#allocation6 + $0xd8] sm:$0xff]  ;;  %v2710_v49 = vld [vmem:[#allocation6 + $0x250] sm:$0xff] }
 0x5ef   :  { %3655 = vmatpush.msra.mxu0 %v2682_v3  ;;  %3601 = vmatpush.msrb.mxu1 %v2628_v13  ;;  %v2727_v3 = vld [vmem:[#allocation6 + $0x670] sm:$0xff] }
 0x5f0   :  { %3621 = vmatpush.msrb.mxu2 %v2644_v46  ;;  %3640 = vmatpush.msrb.mxu3 %v2661_v39  ;;  %v2747_v13 = vld [vmem:[#allocation6 + $0x490] sm:$0xff]  ;;  %v2692_v39 = vld [vmem:[#allocation6 + $0x198] sm:$0xff] }
 0x5f1   :  { %3656 = vmatpush.msra.mxu0 %v2681_v62  ;;  %3602 = vmatpush.msrb.mxu1 %v2627_v11  ;;  %v2746_v46 = vld [vmem:[#allocation6 + $0x190] sm:$0xff]  ;;  %v7346_v62 = vld.sshfl [vmem:[#allocation1] sm:$0xff pattern:$0x73625140] }
 0x5f2   :  { %3622 = vmatpush.msrb.mxu2 %v2643_v37  ;;  %3641 = vmatpush.msrb.mxu3 %v2660_v60  ;;  %v7348_v11 = vld.sshfl [vmem:[#allocation1 + $0x8] sm:$0xff pattern:$0x73625140]  ;;  %v7350_v37 = vld.sshfl [vmem:[#allocation1 + $0x10] sm:$0xff pattern:$0x73625140] }
 0x5f3   :  { %3657 = vmatpush.msra.mxu0 %v2680_v23  ;;  %3603 = vmatpush.msrb.mxu1 %v2626_v43  ;;  %v7352_v60 = vld.sshfl [vmem:[#allocation1 + $0x18] sm:$0xff pattern:$0x73625140]  ;;  %v2708_v23 = vld [vmem:[#allocation6 + $0x1e8] sm:$0xff]  ;;  %v2725_v43 = vld [vmem:[#allocation6 + $0x60] sm:$0xff] }
 0x5f4   :  { %3623 = vmatpush.msrb.mxu2 %v2642_v30  ;;  %3642 = vmatpush.msrb.mxu3 %v2659_v1  ;;  %3491 = vst [vmem:[#allocation1] ss:$4 sm:$0xff] %v7238_v54  ;;  %v2691_v30 = vld [vmem:[#allocation6 + $0x3a8] sm:$0xff]  ;;  %v2689_v54 = vld [vmem:[#allocation6 + $0x218] sm:$0xff] }
 0x5f5   :  { %3658 = vmatpush.msra.mxu0 %v2679_v61  ;;  %3604 = vmatpush.msrb.mxu1 %v2625_v36  ;;  %v2707_v1 = vld [vmem:[#allocation6 + $0x4e8] sm:$0xff]  ;;  %v2724_v61 = vld [vmem:[#allocation6 + $0x2b8] sm:$0xff] }
 0x5f6   :  { %3624 = vmatpush.msrb.mxu2 %v2641_v50  ;;  %3643 = vmatpush.msrb.mxu3 %v2658_v26  ;;  %v2744_v36 = vld [vmem:[#allocation6 + $0x2c8] sm:$0xff]  ;;  %v2690_v50 = vld [vmem:[#allocation6 + $0x240] sm:$0xff]  ;;  %v2706_v26 = vld [vmem:[#allocation6 + $0x230] sm:$0xff] }
 0x5f7   :  { %3659 = vmatpush.msra.mxu0 %v2678_v24  ;;  %3605 = vmatpush.msrb.mxu1 %v2624_v15  ;;  %v2723_v24 = vld [vmem:[#allocation6 + $0x578] sm:$0xff]  ;;  %v2743_v15 = vld [vmem:[#allocation6 + $0x1a8] sm:$0xff] }
 0x5f8   :  { %3625 = vmatpush.msrb.mxu2 %v2640_v8  ;;  %3644 = vmatpush.msrb.mxu3 %v2657_v33  ;;  %v2705_v8 = vld [vmem:[#allocation6 + $0x360] sm:$0xff]  ;;  %v2722_v33 = vld [vmem:[#allocation6 + $0x6a8] sm:$0xff] }
 0x5f9   :  { %3660 = vmatpush.msra.mxu0 %v2677_v56  ;;  %3606 = vmatpush.msrb.mxu1 %v2623_v5  ;;  %v2742_v56 = vld [vmem:[#allocation6 + $0x228] sm:$0xff] }
 0x5fa   :  { %3626 = vmatpush.msrb.mxu2 %v2639_v21  ;;  %3645 = vmatpush.msrb.mxu3 %v2656_v0  ;;  %v2688_v5 = vld [vmem:[#allocation6 + $0x448] sm:$0xff]  ;;  %v2704_v21 = vld [vmem:[#allocation6 + $0x538] sm:$0xff]  ;;  %v2721_v0 = vld [vmem:[#allocation6 + $0x770] sm:$0xff] }
 0x5fb   :  { %3661 = vmatpush.msra.mxu0 %v2676_v27  ;;  %3607 = vmatpush.msrb.mxu1 %v2622_v12  ;;  %v2741_v27 = vld [vmem:[#allocation6 + $0x1c8] sm:$0xff]  ;;  %v2687_v12 = vld [vmem:[#allocation6 + $0x2a0] sm:$0xff] }
 0x5fc   :  { %3627 = vmatpush.msrb.mxu2 %v2638_v47  ;;  %3646 = vmatpush.msrb.mxu3 %v2655_v7  ;;  %v2703_v47 = vld [vmem:[#allocation6 + $0xd0] sm:$0xff]  ;;  %v2720_v7 = vld [vmem:[#allocation6 + $0x160] sm:$0xff] }
 0x5fd   :  { %3662 = vmatpush.msra.mxu0 %v2675_v32  ;;  %3608 = vmatpush.msrb.mxu1 %v2621_v63  ;;  %v2740_v32 = vld [vmem:[#allocation6 + $0x6f8] sm:$0xff] }
 0x5fe   :  { %3628 = vmatpush.msrb.mxu2 %v2637_v29  ;;  %3647 = vmatpush.msrb.mxu3 %v2654_v22  ;;  %v2686_v63 = vld [vmem:[#allocation6 + $0x4b8] sm:$0xff]  ;;  %v2702_v29 = vld [vmem:[#allocation6 + $0x470] sm:$0xff]  ;;  %v2719_v22 = vld [vmem:[#allocation6 + $0x2a8] sm:$0xff] }
 0x5ff   :  { %3663 = vmatpush.msra.mxu0 %v2674_v41  ;;  %3609 = vmatpush.msrb.mxu1 %v2620_v9  ;;  %v2739_v41 = vld [vmem:[#allocation6 + $0x7b8] sm:$0xff]  ;;  %v2685_v9 = vld [vmem:[#allocation6 + $0xa0] sm:$0xff] }
 0x600   :  { %3629 = vmatpush.msrb.mxu2 %v2636_v44  ;;  %3648 = vmatpush.msrb.mxu3 %v2653_v28  ;;  %v2701_v44 = vld [vmem:[#allocation6 + $0x630] sm:$0xff]  ;;  %v2718_v28 = vld [vmem:[#allocation6 + $0x718] sm:$0xff] }
 0x601   :  { %3664 = vmatpush.msra.mxu0 %v2673_v20  ;;  %3610 = vmatmul.f32.vlgmr.msrb.gmra.mxu1 %v7333_v10  ;;  %v2693_v10 = vld [vmem:[#allocation6 + $0x6b0] sm:$0xff]  ;;  %v2738_v20 = vld [vmem:[#allocation6 + $0x420] sm:$0xff] }
 0x602   :  { %3630 = vmatmul.f32.vlgmr.msrb.gmra.mxu2 %v7335_v59  ;;  %3674 = vmatpush.msra.mxu1 %v2699_v14  ;;  %v2709_v59 = vld [vmem:[#allocation6 + $0x738] sm:$0xff]  ;;  %v2684_v14 = vld [vmem:[#allocation6 + $0x148] sm:$0xff] }
 0x603   :  { %3694 = vmatpush.msra.mxu2 %v2715_v2  ;;  %3649 = vmatpush.msrb.mxu3 %v2652_v35  ;;  %v2700_v2 = vld [vmem:[#allocation6 + $0x468] sm:$0xff]  ;;  %v2717_v35 = vld [vmem:[#allocation6 + $0xe0] sm:$0xff] }
 0x604   :  { %3665 = vmatpush.msra.mxu0 %v2672_v40  ;;  %3650 = vmatmul.f32.vlgmr.msrb.gmra.mxu3 %v7337_v25  ;;  %v2726_v25 = vld [vmem:[#allocation6 + $0x550] sm:$0xff]  ;;  %v2737_v40 = vld [vmem:[#allocation6 + $0x158] sm:$0xff] }
 0x605   :  { %3675 = vmatpush.msra.mxu1 %v2698_v51  ;;  %3695 = vmatpush.msra.mxu2 %v2714_v52  ;;  %v2763_v51 = vld [vmem:[#allocation6 + $0x288] sm:$0xff]  ;;  %v2779_v52 = vld [vmem:[#allocation6 + $0x660] sm:$0xff] }
 0x606   :  { %3714 = vmatpush.msra.mxu3 %v2731_v17  ;;  %3666 = vmatpush.msra.mxu0 %v2671_v6  ;;  %v2716_v17 = vld [vmem:[#allocation6 + $0x210] sm:$0xff]  ;;  %v2736_v6 = vld [vmem:[#allocation6 + $0x48] sm:$0xff] }
 0x607   :  { %3676 = vmatpush.msra.mxu1 %v2697_v4  ;;  %3696 = vmatpush.msra.mxu2 %v2713_v58  ;;  %v2762_v4 = vld [vmem:[#allocation6 + $0x3e8] sm:$0xff]  ;;  %v2778_v58 = vld [vmem:[#allocation6 + $0x1e0] sm:$0xff] }
 0x608   :  { %3715 = vmatpush.msra.mxu3 %v2730_v34  ;;  %3667 = vmatpush.msra.mxu0 %v2670_v57  ;;  %v2795_v34 = vld [vmem:[#allocation6 + $0x650] sm:$0xff]  ;;  %v2735_v57 = vld [vmem:[#allocation6 + $0x5e8] sm:$0xff] }
 0x609   :  { %3677 = vmatpush.msra.mxu1 %v2696_v42  ;;  %3697 = vmatpush.msra.mxu2 %v2712_v38  ;;  %v2761_v42 = vld [vmem:[#allocation6 + $0x2d8] sm:$0xff]  ;;  %v2777_v38 = vld [vmem:[#allocation6 + $0x350] sm:$0xff] }
 0x60a   :  { %3716 = vmatpush.msra.mxu3 %v2729_v31  ;;  %3668 = vmatpush.msra.mxu0 %v2669_v55  ;;  %v2794_v31 = vld [vmem:[#allocation6 + $0x620] sm:$0xff]  ;;  %v2734_v55 = vld [vmem:[#allocation6 + $0x78] sm:$0xff] }
 0x60b   :  { %3678 = vmatpush.msra.mxu1 %v2695_v18  ;;  %3698 = vmatpush.msra.mxu2 %v2711_v16  ;;  %v2760_v18 = vld [vmem:[#allocation6 + $0x4c0] sm:$0xff]  ;;  %v2776_v16 = vld [vmem:[#allocation6 + $0x5d0] sm:$0xff] }
 0x60c   :  { %3717 = vmatpush.msra.mxu3 %v2728_v48  ;;  %3669 = vmatpush.msra.mxu0 %v2668_v53  ;;  %v2793_v48 = vld [vmem:[#allocation6 + $0x260] sm:$0xff] }
 0x60d   :  { %3670 = vmatmul.f32.vlgmr.msra.gmra.mxu0 %v7339_v45  ;;  %3679 = vmatpush.msra.mxu1 %v2694_v19  ;;  %v2745_v45 = vld [vmem:[#allocation6 + $0x460] sm:$0xff] }
 0x60e   :  { %3699 = vmatpush.msra.mxu2 %v2710_v49  ;;  %3718 = vmatpush.msra.mxu3 %v2727_v3  ;;  %v2733_v53 = vld [vmem:[#allocation6 + $0x780] sm:$0xff]  ;;  %v2775_v49 = vld [vmem:[#allocation6 + $0x708] sm:$0xff] }
 0x60f   :  { %3734 = vmatpush.msrb.mxu0 %v2747_v13  ;;  %3680 = vmatpush.msra.mxu1 %v2693_v10  ;;  %v2759_v19 = vld [vmem:[#allocation6 + $0x720] sm:$0xff]  ;;  %v2758_v10 = vld [vmem:[#allocation6 + $0x798] sm:$0xff] }
 0x610   :  { %3700 = vmatpush.msra.mxu2 %v2709_v59  ;;  %3719 = vmatpush.msra.mxu3 %v2726_v25  ;;  %v2792_v3 = vld [vmem:[#allocation6 + $0x40] sm:$0xff] }
 0x611   :  { %3735 = vmatpush.msrb.mxu0 %v2746_v46  ;;  %3681 = vmatpush.msra.mxu1 %v2692_v39  ;;  %v2732_v13 = vld [vmem:[#allocation6 + $0x520] sm:$0xff]  ;;  %v2811_v46 = vld [vmem:[#allocation6 + $0x268] sm:$0xff] }
 0x612   :  { %3701 = vmatpush.msra.mxu2 %v2708_v23  ;;  %3720 = vmatpush.msra.mxu3 %v2725_v43  ;;  %v2774_v59 = vld [vmem:[#allocation6 + $0x180] sm:$0xff]  ;;  %v2756_v23 = vld [vmem:[#allocation6 + $0x428] sm:$0xff] }
 0x613   :  { %3736 = vmatpush.msrb.mxu0 %v2745_v45  ;;  %3682 = vmatpush.msra.mxu1 %v2691_v30  ;;  %v2791_v25 = vld [vmem:[#allocation6 + $0x7e0] sm:$0xff]  ;;  %v2789_v45 = vld [vmem:[#allocation6 + $0x570] sm:$0xff] }
 0x614   :  { %3702 = vmatpush.msra.mxu2 %v2707_v1  ;;  %3721 = vmatpush.msra.mxu3 %v2724_v61  ;;  %v2757_v39 = vld [vmem:[#allocation6 + $0x580] sm:$0xff]  ;;  %v2755_v1 = vld [vmem:[#allocation6 + $0x7d8] sm:$0xff]  ;;  %v2771_v61 = vld [vmem:[#allocation6 + $0x208] sm:$0xff] }
 0x615   :  { %3737 = vmatpush.msrb.mxu0 %v2744_v36  ;;  %3683 = vmatpush.msra.mxu1 %v2690_v50  ;;  %v2772_v43 = vld [vmem:[#allocation6 + $0x80] sm:$0xff]  ;;  %v2788_v36 = vld [vmem:[#allocation6 + $0x90] sm:$0xff]  ;;  %v2754_v50 = vld [vmem:[#allocation6 + $0x6b8] sm:$0xff] }
 0x616   :  { %3703 = vmatpush.msra.mxu2 %v2706_v26  ;;  %3722 = vmatpush.msra.mxu3 %v2723_v24  ;;  %v2809_v30 = vld [vmem:[#allocation6] sm:$0xff]  ;;  %v2787_v24 = vld [vmem:[#allocation6 + $0x68] sm:$0xff] }
 0x617   :  { %3738 = vmatpush.msrb.mxu0 %v2743_v15  ;;  %3684 = vmatpush.msra.mxu1 %v2689_v54  ;;  %v2770_v26 = vld [vmem:[#allocation6 + $0x5a0] sm:$0xff]  ;;  %v2807_v15 = vld [vmem:[#allocation6 + $0x728] sm:$0xff] }
 0x618   :  { %3704 = vmatpush.msra.mxu2 %v2705_v8  ;;  %3723 = vmatpush.msra.mxu3 %v2722_v33  ;;  %v2753_v54 = vld [vmem:[#allocation6 + $0x200] sm:$0xff]  ;;  %v2769_v8 = vld [vmem:[#allocation6 + $0x568] sm:$0xff]  ;;  %v2786_v33 = vld [vmem:[#allocation6 + $0x6f0] sm:$0xff] }
 0x619   :  { %3739 = vmatpush.msrb.mxu0 %v2742_v56  ;;  %3685 = vmatpush.msra.mxu1 %v2688_v5  ;;  %v2806_v56 = vld [vmem:[#allocation6 + $0x658] sm:$0xff]  ;;  %v2752_v5 = vld [vmem:[#allocation6 + $0x348] sm:$0xff] }
 0x61a   :  { %3705 = vmatpush.msra.mxu2 %v2704_v21  ;;  %3724 = vmatpush.msra.mxu3 %v2721_v0  ;;  %v2768_v21 = vld [vmem:[#allocation6 + $0x298] sm:$0xff]  ;;  %v2785_v0 = vld [vmem:[#allocation6 + $0x1d0] sm:$0xff] }
 0x61b   :  { %3740 = vmatpush.msrb.mxu0 %v2741_v27  ;;  %3686 = vmatpush.msra.mxu1 %v2687_v12  ;;  %v2805_v27 = vld [vmem:[#allocation6 + $0x7e8] sm:$0xff]  ;;  %v2751_v12 = vld [vmem:[#allocation6 + $0x690] sm:$0xff] }
 0x61c   :  { %3706 = vmatpush.msra.mxu2 %v2703_v47  ;;  %3725 = vmatpush.msra.mxu3 %v2720_v7  ;;  %v2767_v47 = vld [vmem:[#allocation6 + $0x138] sm:$0xff]  ;;  %v2784_v7 = vld [vmem:[#allocation6 + $0x400] sm:$0xff] }
 0x61d   :  { %3741 = vmatpush.msrb.mxu0 %v2740_v32  ;;  %3687 = vmatpush.msra.mxu1 %v2686_v63  ;;  %v2804_v32 = vld [vmem:[#allocation6 + $0x258] sm:$0xff]  ;;  %v2750_v63 = vld [vmem:[#allocation6 + $0x168] sm:$0xff] }
 0x61e   :  { %3707 = vmatpush.msra.mxu2 %v2702_v29  ;;  %3726 = vmatpush.msra.mxu3 %v2719_v22  ;;  %v2766_v29 = vld [vmem:[#allocation6 + $0x7a0] sm:$0xff] }
 0x61f   :  { %3742 = vmatpush.msrb.mxu0 %v2739_v41  ;;  %3688 = vmatpush.msra.mxu1 %v2685_v9  ;;  %v2783_v22 = vld [vmem:[#allocation6 + $0x300] sm:$0xff]  ;;  %v2803_v41 = vld [vmem:[#allocation6 + $0x4a8] sm:$0xff] }
 0x620   :  { %3708 = vmatpush.msra.mxu2 %v2701_v44  ;;  %3727 = vmatpush.msra.mxu3 %v2718_v28  ;;  %v2749_v9 = vld [vmem:[#allocation6 + $0x4a0] sm:$0xff]  ;;  %v2765_v44 = vld [vmem:[#allocation6 + $0x8] sm:$0xff] }
 0x621   :  { %3743 = vmatpush.msrb.mxu0 %v2738_v20  ;;  %3689 = vmatpush.msra.mxu1 %v2684_v14  ;;  %v2782_v28 = vld [vmem:[#allocation6 + $0x760] sm:$0xff]  ;;  %v2802_v20 = vld [vmem:[#allocation6 + $0x748] sm:$0xff] }
 0x622   :  { %3709 = vmatpush.msra.mxu2 %v2700_v2  ;;  %3728 = vmatpush.msra.mxu3 %v2717_v35  ;;  %v2748_v14 = vld [vmem:[#allocation6 + $0x7c8] sm:$0xff]  ;;  %v2764_v2 = vld [vmem:[#allocation6 + $0x238] sm:$0xff]  ;;  %v2781_v35 = vld [vmem:[#allocation6 + $0x3c0] sm:$0xff] }
 0x623   :  { %3744 = vmatpush.msrb.mxu0 %v2737_v40  ;;  %3690 = vmatmul.f32.vlgmr.msra.gmra.mxu1 %v7346_v62  ;;  %v2773_v62 = vld [vmem:[#allocation6 + $0x330] sm:$0xff] }
 0x624   :  { %3710 = vmatmul.f32.vlgmr.msra.gmra.mxu2 %v7348_v11  ;;  %3754 = vmatpush.msrb.mxu1 %v2763_v51  ;;  %v2790_v11 = vld [vmem:[#allocation6 + $0xc8] sm:$0xff]  ;;  %v2801_v40 = vld [vmem:[#allocation6 + $0x150] sm:$0xff]  ;;  %v3487_v51 = vld.sshfl [vmem:[#allocation1 + $0x20] sm:$0xff pattern:$0x73625140] }
 0x625   :  { %3774 = vmatpush.msrb.mxu2 %v2779_v52  ;;  %3729 = vmatpush.msra.mxu3 %v2716_v17  ;;  %v3488_v52 = vld.sshfl [vmem:[#allocation1 + $0x28] sm:$0xff pattern:$0x73625140] }
 0x626   :  { %3745 = vmatpush.msrb.mxu0 %v2736_v6  ;;  %3730 = vmatmul.f32.vlgmr.msra.gmra.mxu3 %v7350_v37  ;;  %v2810_v37 = vld [vmem:[#allocation6 + $0x20] sm:$0xff]  ;;  %v2780_v17 = vld [vmem:[#allocation6 + $0x7a8] sm:$0xff]  ;;  %v2800_v6 = vld [vmem:[#allocation6 + $0x4d8] sm:$0xff] }
 0x627   :  { %3755 = vmatpush.msrb.mxu1 %v2762_v4  ;;  %3775 = vmatpush.msrb.mxu2 %v2778_v58  ;;  %v3489_v4 = vld.sshfl [vmem:[#allocation1 + $0x30] sm:$0xff pattern:$0x73625140] }
 0x628   :  { %3794 = vmatpush.msrb.mxu3 %v2795_v34  ;;  %3746 = vmatpush.msrb.mxu0 %v2735_v57  ;;  %v2814_v58 = vld [vmem:[#allocation6 + $0x5b0] sm:$0x1]  ;;  %v2799_v34 = vld [vmem:[#allocation6 + $0x480] sm:$0xff]  ;;  %v2813_v57 = vld [vmem:[#allocation6 + $0x108] sm:$0xff] }
 0x629   :  { %3756 = vmatpush.msrb.mxu1 %v2761_v42  ;;  %3776 = vmatpush.msrb.mxu2 %v2777_v38  ;;  %v2798_v42 = vld [vmem:[#allocation6 + $0x1f8] sm:$0xff] }
 0x62a   :  { %3795 = vmatpush.msrb.mxu3 %v2794_v31  ;;  %3747 = vmatpush.msrb.mxu0 %v2734_v55  ;;  %v2812_v38 = vld [vmem:[#allocation6 + $0x5f8] sm:$0xff]  ;;  %v2797_v31 = vld [vmem:[#allocation6 + $0x368] sm:$0xff] }
 0x62b   :  { %3757 = vmatpush.msrb.mxu1 %v2760_v18  ;;  %3777 = vmatpush.msrb.mxu2 %v2776_v16  ;;  %v3492_v55 = vld.sshfl [vmem:[#allocation1] sm:$0xff pattern:$0x73625140]  ;;  %v3490_v16 = vld.sshfl [vmem:[#allocation1 + $0x38] sm:$0xff pattern:$0x73625140] }
 0x62c   :  { %3796 = vmatpush.msrb.mxu3 %v2793_v48  ;;  %3748 = vmatpush.msrb.mxu0 %v2733_v53  ;;  %v2796_v18 = vld [vmem:[#allocation6 + $0x1c0] sm:$0xff]  ;;  %v3162_v48 = vpop.f32.mrf.mxu1  ;;  %v3142_v53 = vpop.f32.mrf.mxu0 }
 0x62d   :  { %3758 = vmatpush.msrb.mxu1 %v2759_v19  ;;  %3778 = vmatpush.msrb.mxu2 %v2775_v49  ;;  %v3163_v19 = vadd.f32 %v3162_v48, %v3142_v53  ;;  %v3182_v49 = vpop.f32.mrf.mxu2  ;;  %v3907_v48 = vld [vmem:[%s7477_s8 + $0x30] sm:$0xff] }
 0x62e   :  { %3797 = vmatpush.msrb.mxu3 %v2792_v3  ;;  %3749 = vmatpush.msrb.mxu0 %v2732_v13  ;;  %v3202_v13 = vpop.f32.mrf.mxu3 }
 0x62f   :  { %3750 = vmatmul.f32.vlgmr.msrb.gmra.mxu0 %v7352_v60  ;;  %3759 = vmatpush.msrb.mxu1 %v2758_v10  ;;  %v2808_v60 = vld [vmem:[#allocation6 + $0x3c8] sm:$0xff]  ;;  %v3183_v3 = vadd.f32 %v3182_v49, %v3163_v19 }
 0x630   :  { %3779 = vmatpush.msrb.mxu2 %v2774_v59  ;;  %3798 = vmatpush.msrb.mxu3 %v2791_v25  ;;  %v3906_v19 = vld [vmem:[%s7477_s8 + $0x28] sm:$0xff] }
 0x631   :  { %3814 = vmatpush.msra.mxu0 %v2811_v46  ;;  %3760 = vmatpush.msrb.mxu1 %v2757_v39  ;;  %v3203_v10 = vadd.f32 %v3202_v13, %v3183_v3  ;;  %v3905_v13 = vld [vmem:[%s7477_s8 + $0x20] sm:$0xff] }
 0x632   :  { %3780 = vmatpush.msrb.mxu2 %v2773_v62  ;;  %3799 = vmatpush.msrb.mxu3 %v2790_v11 }
 0x633   :  { %3815 = vmatpush.msra.mxu0 %v2810_v37  ;;  %3761 = vmatpush.msrb.mxu1 %v2756_v23 }
 0x634   :  { %3781 = vmatpush.msrb.mxu2 %v2772_v43  ;;  %3800 = vmatpush.msrb.mxu3 %v2789_v45  ;;  %v3222_v59 = vpop.f32.mrf.mxu0  ;;  %v3242_v46 = vpop.f32.mrf.mxu1 }
 0x635   :  { %3816 = vmatpush.msra.mxu0 %v2809_v30  ;;  %3762 = vmatpush.msrb.mxu1 %v2755_v1  ;;  %v3223_v25 = vadd.f32 %v3222_v59, %v3203_v10  ;;  %v3262_v62 = vpop.f32.mrf.mxu2 }
 0x636   :  { %3782 = vmatpush.msrb.mxu2 %v2771_v61  ;;  %3801 = vmatpush.msrb.mxu3 %v2788_v36  ;;  %v3282_v37 = vpop.f32.mrf.mxu3  ;;  %v3875_v36 = vld [vmem:[%s7475_s6 + $0x78] sm:$0xff] }
 0x637   :  { %3817 = vmatpush.msra.mxu0 %v2808_v60  ;;  %3763 = vmatpush.msrb.mxu1 %v2754_v50  ;;  %v3243_v39 = vadd.f32 %v3242_v46, %v3223_v25  ;;  %v3874_v60 = vld [vmem:[%s7475_s6 + $0x70] sm:$0xff]  ;;  %v3904_v25 = vld [vmem:[%s7477_s8 + $0x18] sm:$0xff] }
 0x638   :  { %3783 = vmatpush.msrb.mxu2 %v2770_v26  ;;  %3802 = vmatpush.msrb.mxu3 %v2787_v24  ;;  %v3873_v24 = vld [vmem:[%s7475_s6 + $0x68] sm:$0xff] }
 0x639   :  { %3818 = vmatpush.msra.mxu0 %v2807_v15  ;;  %3764 = vmatpush.msrb.mxu1 %v2753_v54  ;;  %v3263_v11 = vadd.f32 %v3262_v62, %v3243_v39  ;;  %v3872_v54 = vld [vmem:[%s7475_s6 + $0x60] sm:$0xff] }
 0x63a   :  { %3784 = vmatpush.msrb.mxu2 %v2769_v8  ;;  %3803 = vmatpush.msrb.mxu3 %v2786_v33  ;;  %v3871_v33 = vld [vmem:[%s7475_s6 + $0x58] sm:$0xff] }
 0x63b   :  { %3819 = vmatpush.msra.mxu0 %v2806_v56  ;;  %3765 = vmatpush.msrb.mxu1 %v2752_v5  ;;  %v3283_v43 = vadd.f32 %v3282_v37, %v3263_v11 }
 0x63c   :  { %3785 = vmatpush.msrb.mxu2 %v2768_v21  ;;  %3804 = vmatpush.msrb.mxu3 %v2785_v0  ;;  %v3302_v23 = vpop.f32.mrf.mxu0  ;;  %v3322_v30 = vpop.f32.mrf.mxu1  ;;  %v3870_v21 = vld [vmem:[%s7475_s6 + $0x50] sm:$0xff] }
 0x63d   :  { %3820 = vmatpush.msra.mxu0 %v2805_v27  ;;  %3766 = vmatpush.msrb.mxu1 %v2751_v12  ;;  %v3303_v45 = vadd.f32 %v3302_v23, %v3283_v43  ;;  %v3342_v1 = vpop.f32.mrf.mxu2 }
 0x63e   :  { %3786 = vmatpush.msrb.mxu2 %v2767_v47  ;;  %3805 = vmatpush.msrb.mxu3 %v2784_v7  ;;  %v3362_v26 = vpop.f32.mrf.mxu3 }
 0x63f   :  { %3821 = vmatpush.msra.mxu0 %v2804_v32  ;;  %3767 = vmatpush.msrb.mxu1 %v2750_v63  ;;  %v3323_v61 = vadd.f32 %v3322_v30, %v3303_v45 }
 0x640   :  { %3787 = vmatpush.msrb.mxu2 %v2766_v29  ;;  %3806 = vmatpush.msrb.mxu3 %v2783_v22  ;;  %v3869_v22 = vld [vmem:[%s7475_s6 + $0x48] sm:$0xff] }
 0x641   :  { %3822 = vmatpush.msra.mxu0 %v2803_v41  ;;  %3768 = vmatpush.msrb.mxu1 %v2749_v9  ;;  %v3343_v50 = vadd.f32 %v3342_v1, %v3323_v61  ;;  %v3868_v9 = vld [vmem:[%s7475_s6 + $0x40] sm:$0xff] }
 0x642   :  { %3788 = vmatpush.msrb.mxu2 %v2765_v44  ;;  %3807 = vmatpush.msrb.mxu3 %v2782_v28  ;;  %v3867_v28 = vld [vmem:[%s7475_s6 + $0x38] sm:$0xff] }
 0x643   :  { %3823 = vmatpush.msra.mxu0 %v2802_v20  ;;  %3769 = vmatpush.msrb.mxu1 %v2748_v14  ;;  %v3363_v8 = vadd.f32 %v3362_v26, %v3343_v50  ;;  %v4130_v26 = vld [vmem:[%s7474_s5] ss:$0 sm:$0xff] }
 0x644   :  { %3789 = vmatpush.msrb.mxu2 %v2764_v2  ;;  %3808 = vmatpush.msrb.mxu3 %v2781_v35  ;;  %v3382_v15 = vpop.f32.mrf.mxu0  ;;  %v3402_v5 = vpop.f32.mrf.mxu1  ;;  %v3866_v2 = vld [vmem:[%s7475_s6 + $0x30] sm:$0xff] }
 0x645   :  { %3824 = vmatpush.msra.mxu0 %v2801_v40  ;;  %3770 = vmatmul.f32.vlgmr.msrb.gmra.mxu1 %v3487_v51  ;;  %v3383_v56 = vadd.f32 %v3382_v15, %v3363_v8  ;;  %v3422_v0 = vpop.f32.mrf.mxu2  ;;  %v3865_v40 = vld [vmem:[%s7475_s6 + $0x28] sm:$0xff]  ;;  %v3903_v8 = vld [vmem:[%s7477_s8 + $0x10] sm:$0xff] }
 0x646   :  { %3790 = vmatmul.f32.vlgmr.msrb.gmra.mxu2 %v3488_v52  ;;  %3809 = vmatpush.msrb.mxu3 %v2780_v17  ;;  %v3442_v47 = vpop.f32.mrf.mxu3  ;;  %v3864_v52 = vld [vmem:[%s7475_s6 + $0x20] sm:$0xff] }
 0x647   :  { %3825 = vmatpush.msra.mxu0 %v2800_v6  ;;  %3810 = vmatmul.f32.vlgmr.msrb.gmra.mxu3 %v3489_v4  ;;  %v3403_v27 = vadd.f32 %v3402_v5, %v3383_v56  ;;  %v3863_v4 = vld [vmem:[%s7475_s6 + $0x18] sm:$0xff]  ;;  %v3901_v56 = vld [vmem:[%s7477_s8] sm:$0xff] }
 0x648   :  { %4113 = vmatpush.msk.msra.mxu1 %vm3121_vm0, %v2814_v58  ;;  %3880 = vmatpush.msra.mxu2 %v3875_v36  ;;  %v3941_v5 = vld [vmem:[%s7479_s10 + $0x18] sm:$0xff] }
 0x649   :  { %3826 = vmatpush.msra.mxu0 %v2799_v34  ;;  %v3423_v12 = vadd.f32 %v3422_v0, %v3403_v27  ;;  %v4131_v0 = vld [vmem:[%s7476_s7] ss:$0 sm:$0xff] }
 0x64a   :  { %3848 = vmatpush.msra.mxu1 %v2813_v57  ;;  %3881 = vmatpush.msra.mxu2 %v3874_v60  ;;  %v3862_v57 = vld [vmem:[%s7475_s6 + $0x10] sm:$0xff] }
 0x64b   :  { %3827 = vmatpush.msra.mxu0 %v2798_v42  ;;  %v3443_v7 = vadd.f32 %v3442_v47, %v3423_v12 }
 0x64c   :  { %3849 = vmatpush.msra.mxu1 %v2812_v38  ;;  %3882 = vmatpush.msra.mxu2 %v3873_v24  ;;  %v3462_v32 = vpop.f32.mrf.mxu0  ;;  %v3861_v38 = vld [vmem:[%s7475_s6 + $0x8] sm:$0xff] }
 0x64d   :  { %3828 = vmatpush.msra.mxu0 %v2797_v31  ;;  %4114 = vmatmul.msk.f32.vlgmr.msra.gmra.mxu1 %vm3118_vm9, %v3492_v55  ;;  %v3463_v29 = vadd.f32 %v3462_v32, %v3443_v7  ;;  %v3860_v55 = vld [vmem:[%s7475_s6] sm:$0xff]  ;;  %v3939_v7 = vld [vmem:[%s7479_s10 + $0x8] sm:$0xff] }
 0x64e   :  { %3883 = vmatpush.msra.mxu2 %v3872_v54  ;;  %v3938_v32 = vld [vmem:[%s7479_s10] sm:$0xff] }
 0x64f   :  { %3829 = vmatpush.msra.mxu0 %v2796_v18 }
 0x650   :  { %3830 = vmatmul.f32.vlgmr.msra.gmra.mxu0 %v3490_v16  ;;  %3884 = vmatpush.msra.mxu2 %v3871_v33  ;;  %v3908_v16 = vld [vmem:[%s7477_s8 + $0x38] sm:$0xff]  ;;  %v3902_v33 = vld [vmem:[%s7477_s8 + $0x8] sm:$0xff] }
 0x651   :  { %3925 = vmatpush.msra.mxu3 %v3908_v16  ;;  %3962 = vmatpush.msrb.mxu0 %v3941_v5 }
 0x652   :  { %3885 = vmatpush.msra.mxu2 %v3870_v21  ;;  %v3940_v21 = vld [vmem:[%s7479_s10 + $0x10] sm:$0xff] }
 0x653   :  { %3926 = vmatpush.msra.mxu3 %v3907_v48  ;;  %3963 = vmatpush.msrb.mxu0 %v3940_v21 }
 0x654   :  { %3886 = vmatpush.msra.mxu2 %v3869_v22 }
 0x655   :  { %3927 = vmatpush.msra.mxu3 %v3906_v19  ;;  %3964 = vmatpush.msrb.mxu0 %v3939_v7 }
 0x656   :  { %3887 = vmatpush.msra.mxu2 %v3868_v9 }
 0x657   :  { %3928 = vmatpush.msra.mxu3 %v3905_v13  ;;  %3965 = vmatpush.msrb.mxu0 %v3938_v32 }
 0x658   :  { %3888 = vmatpush.msra.mxu2 %v3867_v28  ;;  %v4133_v28 = vld [vmem:[%s7480_s11] ss:$0 sm:$0xff] }
 0x659   :  { %3929 = vmatpush.msra.mxu3 %v3904_v25 }
 0x65a   :  { %3889 = vmatpush.msra.mxu2 %v3866_v2 }
 0x65b   :  { %3930 = vmatpush.msra.mxu3 %v3903_v8 }
 0x65c   :  { %v3531_v63 = vpop.f32.mrf.mxu1  ;;  %3890 = vmatpush.msra.mxu2 %v3865_v40 }
 0x65d   :  { %v3532_v44 = vadd.f32 %v3531_v63, %v3463_v29  ;;  %3931 = vmatpush.msra.mxu3 %v3902_v33  ;;  %v3972_v63 = vld [vmem:[%s7481_s12 + $0x8] sm:$0xff]  ;;  %v4132_v29 = vld [vmem:[%s7478_s9] ss:$0 sm:$0xff] }
 0x65e   :  { %3891 = vmatpush.msra.mxu2 %v3864_v52  ;;  %3995 = vmatpush.msrb.mxu1 %v3972_v63 }
 0x65f   :  { %3932 = vmatpush.msra.mxu3 %v3901_v56 }
 0x660   :  { %3892 = vmatpush.msra.mxu2 %v3863_v4 }
 0x662   :  { %3893 = vmatpush.msra.mxu2 %v3862_v57 }
 0x663   :  { %v3551_v41 = vpop.f32.mrf.mxu2 }
 0x664   :  { %v3552_v20 = vadd.f32 %v3551_v41, %v3532_v44  ;;  %3894 = vmatpush.msra.mxu2 %v3861_v38  ;;  %v3971_v44 = vld [vmem:[%s7481_s12] sm:$0xff]  ;;  %s4010_s12 = sshll.u32 %s7483_s14, 4  ;;  %s4011_s12 = int_to_ptr.hbm [resolvable:$true] %s4010_s12 }
 0x665   :  { %v3571_v14 = vpop.f32.mrf.mxu3  ;;  %3996 = vmatpush.msrb.mxu1 %v3971_v44 }
 0x666   :  { %v3572_v35 = vadd.f32 %v3571_v14, %v3552_v20  ;;  %3895 = vmatpush.msra.mxu2 %v3860_v55 }
 0x668   :  { %v3591_v51 = vpop.f32.mrf.mxu0 }
 0x669   :  { %v3592_v6 = vadd.f32 %v3591_v51, %v3572_v35  ;;  %v4134_v35 = vld [vmem:[%s7482_s13] ss:$0 sm:$0xff] }
 0x67e   :  { %v3611_v17 = vpop.f32.mrf.mxu1 }
 0x67f   :  { %v3612_v34 = vadd.f32 %v3611_v17, %v3592_v6 }
 0x685   :  { %v3631_v58 = vpop.f32.mrf.mxu2 }
 0x686   :  { %v3632_v42 = vadd.f32 %v3631_v58, %v3612_v34 }
 0x687   :  { %v3651_v31 = vpop.f32.mrf.mxu3 }
 0x688   :  { %v3652_v18 = vadd.f32 %v3651_v31, %v3632_v42 }
 0x68a   :  { %v3671_v53 = vpop.f32.mrf.mxu0 }
 0x68b   :  { %v3672_v3 = vadd.f32 %v3671_v53, %v3652_v18 }
 0x6a0   :  { %v3691_v49 = vpop.f32.mrf.mxu1 }
 0x6a1   :  { %v3692_v59 = vadd.f32 %v3691_v49, %v3672_v3 }
 0x6a7   :  { %v3711_v10 = vpop.f32.mrf.mxu2 }
 0x6a8   :  { %v3712_v46 = vadd.f32 %v3711_v10, %v3692_v59 }
 0x6a9   :  { %v3731_v39 = vpop.f32.mrf.mxu3 }
 0x6aa   :  { %v3732_v62 = vadd.f32 %v3731_v39, %v3712_v46 }
 0x6ac   :  { %v3751_v11 = vpop.f32.mrf.mxu0 }
 0x6ad   :  { %v3752_v23 = vadd.f32 %v3751_v11, %v3732_v62 }
 0x6c2   :  { %v3771_v37 = vpop.f32.mrf.mxu1 }
 0x6c3   :  { %v3772_v43 = vadd.f32 %v3771_v37, %v3752_v23 }
 0x6c9   :  { %v3791_v45 = vpop.f32.mrf.mxu2 }
 0x6ca   :  { %v3792_v30 = vadd.f32 %v3791_v45, %v3772_v43  ;;  %v3811_v1 = vpop.f32.mrf.mxu3  ;;  %v3851_v60 = vpop.f32.mrf.mxu1 }
 0x6cc   :  { %v3812_v61 = vadd.f32 %v3811_v1, %v3792_v30 }
 0x6cd   :  { %v3831_v36 = vpop.f32.mrf.mxu0 }
 0x6ce   :  { %v3832_v50 = vadd.f32 %v3831_v36, %v3812_v61 }
 0x6d0   :  { %v3852_v24 = vadd.f32 %v3851_v60, %v3832_v50 }
 0x6d2   :  { %v3858_v15 = vadd.f32 %v4130_v26, %v3852_v24 }
 0x6d4   :  { %v3859_v54 = vmax.f32 %v3858_v15, 0.0 }
 0x6d6   :  { %3896 = vmatmul.f32.vlgmr.msra.gmra.mxu2 %v3859_v54 }
 0x759   :  { %v3897_v27 = vpop.f32.mrf.mxu2 }
 0x75a   :  { %v3898_v12 = vadd.f32 %v4131_v0, %v3897_v27 }
 0x75c   :  { %v3900_v47 = vmax.f32 %v3898_v12, 0.0 }
 0x75e   :  { %4115 = vmatmul.msk.f32.vlgmr.msra.gmra.mxu3 %vm3913_vm7, %v3900_v47 }
 0x7e1   :  { %v3934_v22 = vpop.f32.mrf.mxu3 }
 0x7e2   :  { %v3935_v41 = vadd.f32 %v4132_v29, %v3934_v22 }
 0x7e4   :  { %v3937_v9 = vmax.f32 %v3935_v41, 0.0 }
 0x7e6   :  { %4116 = vmatmul.msk.f32.vlgmr.msrb.gmra.mxu0 %vm3946_vm3, %v3937_v9 }
 0x863   :  { %v3967_v20 = vpop.f32.mrf.mxu0 }
 0x864   :  { %v3968_v14 = vadd.f32 %v4133_v28, %v3967_v20 }
 0x866   :  { %v3970_v2 = vmax.f32 %v3968_v14, 0.0 }
 0x868   :  { %4117 = vmatmul.msk.f32.vlgmr.msrb.gmra.mxu1 %vm3977_vm6, %v3970_v2 }
 0x8e5   :  { %v3998_v40 = vpop.f32.mrf.mxu1 }
 0x8e6   :  { %v3999_v51 = vadd.f32 %v4134_v35, %v3998_v40 }
 0x8e8   :  { %4002 = vst.msk [vmem:[#allocation14] sm:$0x3] %vm4001_vm13, %v3999_v51 }
 0x8e9   :  { %4013 = dma.vmem_to_hbm [thread:$0]  %s4009_s27, 32, %s4011_s12, [#allocation10]  }
 0x8ea   :  { %4191 = dma.done.wait [#allocation10], 32  }
 0x8eb   :  { %4192 = vsyncadd [#allocation10], 4294967264 }
 0x8ec   :  { %4018 = vsyncpa [#allocation10], 1 }
 0x8ed   :  { %4019 = vsyncpa [#allocation11], 1 }
 0x8ee   :  { %4020 = vsyncpa [#allocation13], 1 }
 0x8ef   :  { %4021 = vsyncmov [#allocation8] }
 0x8f2   :  { %s4022_s11 = vpop.sfrf %4021 }
 0x8f3   :  { %p4118_p0 = scmp.ne.s32.totalorder %s4022_s11, 0 }
 0x8f5   :  { %4026 = shalt.err (%p4118_p0)  }
 0x8f6   :  { %4028 = vsyncmov [#allocation8 + $0x1] }
 0x8f9   :  { %s4029_s13 = vpop.sfrf %4028 }
 0x8fa   :  { %p4119_p1 = scmp.ne.s32.totalorder %s4029_s13, 0 }
 0x8fc   :  { %4033 = shalt.err (%p4119_p1)  }

</bundles_post_ra>
